<compile_context>
chip_gen: v6e
topology: v6e:2x2x1
jax: 0.10.0
libtpu: 0.0.40
codegen_flags: <defaults>
</compile_context>

<pallas_src>
import functools

import jax
import jax.numpy as jnp
from jax.experimental import pallas as pl
from jax.experimental.pallas import tpu as pltpu


_VMEM_LIMIT = 32 * 1024 * 1024  # lifts v5e's 16 MiB scoped default; == v7x default


def _elu(y):
    # ELU(alpha=1).  exp(min(y,0))-1 == expm1(y) for y<=0 up to ~1e-7 abs error
    # (negligible vs bf16 weights); exp lowers reliably on all Mosaic versions.
    return jnp.where(y > 0, y, jnp.exp(jnp.minimum(y, 0.0)) - 1.0)


# ----------------------------------------------------------------------------
# One fused streaming kernel over all layers' weight tiles.
#   grid step s:
#     s in [0, n1)          : h1[s]      = ELU(x  @ w1_tile + b1_tile)
#     s in [n1, n1+n2)      : h2[s-n1]   = ELU(h1 @ w2_tile + b2_tile)
#     s in [n1+n2, total)   : acc       += ELU(h2 @ w3_tile + b3_tile) @ w4_tile
#     last step             : out        = acc + b4
# ----------------------------------------------------------------------------
def _fused_kernel(x_ref, w1_ref, b1_ref, w2_ref, b2_ref, w3_ref, b3_ref,
                  w4_ref, b4_ref, o_ref, h1_ref, h2_ref, acc_ref,
                  *, nt1, nt2, nt3, n1, n2, n3):
    s = pl.program_id(0)
    bp = x_ref.shape[0]

    # ---- phase 1: fc1 (480 -> 4096) + ELU, one N tile per step -------------
    @pl.when(s < n1)
    def _():
        y = jnp.dot(x_ref[...], w1_ref[...], preferred_element_type=jnp.float32)
        y = _elu(y + b1_ref[...])
        h1_ref[s] = y.astype(h1_ref.dtype)

    # ---- phase 2: fc2 (4096 -> 2048) + ELU, one N tile per step ------------
    @pl.when((s >= n1) & (s < n1 + n2))
    def _():
        y = jnp.zeros((bp, nt2), jnp.float32)
        for t in range(n1):  # static unroll over the K chunks held in h1 scratch
            y += jnp.dot(h1_ref[t], w2_ref[pl.ds(t * nt1, nt1), :],
                         preferred_element_type=jnp.float32)
        y = _elu(y + b2_ref[...])
        h2_ref[s - n1] = y.astype(h2_ref.dtype)

    # ---- phase 3: fused heads, tiled reduction over fc3 columns ------------
    @pl.when(s >= n1 + n2)
    def _():
        k = s - (n1 + n2)

        @pl.when(k == 0)
        def _():
            acc_ref[...] = jnp.zeros_like(acc_ref)

        h3 = jnp.zeros((bp, nt3), jnp.float32)
        for t in range(n2):  # static unroll over the K chunks held in h2 scratch
            h3 += jnp.dot(h2_ref[t], w3_ref[pl.ds(t * nt2, nt2), :],
                          preferred_element_type=jnp.float32)
        h3 = _elu(h3 + b3_ref[...])
        acc_ref[...] += jnp.dot(h3.astype(jnp.bfloat16), w4_ref[...],
                                preferred_element_type=jnp.float32)

        @pl.when(s == n1 + n2 + n3 - 1)
        def _():
            o_ref[...] = acc_ref[...] + b4_ref[...]


def fused_forward(xf, p, *, nt1=2048, nt2=512, nt3=512):
    """xf: (Bp, 480) bf16.  Returns (Bp, 128) f32: col 0 = value, 1:13 = policy."""
    Bp, K1 = xf.shape
    N1 = p["w1"].shape[1]    # 4096
    N2 = p["w2"].shape[1]    # 2048
    N3 = p["w3c"].shape[1]   # 1024 (value|policy fused)
    N4 = p["w4c"].shape[1]   # 128  (block-diagonal fc4, lane-dense)
    assert N1 % nt1 == 0 and N2 % nt2 == 0 and N3 % nt3 == 0
    n1, n2, n3 = N1 // nt1, N2 // nt2, N3 // nt3
    total = n1 + n2 + n3

    kernel = functools.partial(_fused_kernel, nt1=nt1, nt2=nt2, nt3=nt3,
                               n1=n1, n2=n2, n3=n3)

    # Weight/bias tile schedules: clamp so a block is fetched once and then
    # stays resident (no re-DMA) outside its layer's phase.
    i1 = lambda s: (0, jnp.minimum(s, n1 - 1))
    i2 = lambda s: (0, jnp.clip(s - n1, 0, n2 - 1))
    i3 = lambda s: (0, jnp.clip(s - n1 - n2, 0, n3 - 1))
    i4 = lambda s: (jnp.clip(s - n1 - n2, 0, n3 - 1), 0)
    const = lambda s: (0, 0)

    return pl.pallas_call(
        kernel,
        out_shape=jax.ShapeDtypeStruct((Bp, N4), jnp.float32),
        grid_spec=pltpu.PrefetchScalarGridSpec(
            num_scalar_prefetch=0,
            grid=(total,),
            in_specs=[
                pl.BlockSpec((Bp, K1), const),    # activations resident in VMEM
                pl.BlockSpec((K1, nt1), i1),      # fc1 weight tile (~1.9 MB bf16)
                pl.BlockSpec((1, nt1), i1),
                pl.BlockSpec((N1, nt2), i2),      # fc2 weight tile (4 MB bf16)
                pl.BlockSpec((1, nt2), i2),
                pl.BlockSpec((N2, nt3), i3),      # fused fc3 weight tile (2 MB bf16)
                pl.BlockSpec((1, nt3), i3),
                pl.BlockSpec((nt3, N4), i4),      # block-diag fc4 row tile
                pl.BlockSpec((1, N4), const),
            ],
            out_specs=pl.BlockSpec((Bp, N4), const),
            scratch_shapes=[
                pltpu.VMEM((n1, Bp, nt1), jnp.bfloat16),  # h1 (post-fc1 act)
                pltpu.VMEM((n2, Bp, nt2), jnp.bfloat16),  # h2 (post-fc2 act)
                pltpu.VMEM((Bp, N4), jnp.float32),        # heads accumulator
            ],
        ),
        compiler_params=pltpu.CompilerParams(
            dimension_semantics=("arbitrary",),  # sequential layer dependency
            vmem_limit_bytes=_VMEM_LIMIT,
        ),
    )(xf, p["w1"], p["b1"], p["w2"], p["b2"], p["w3c"], p["b3c"],
      p["w4c"], p["b4c"])


# ----------------------------------------------------------------------------
# Parameter initialization (mimics the PyTorch module __init__)
# ----------------------------------------------------------------------------
def init_params(key):
    def xavier_normal(k, fan_in, fan_out):
        std = (2.0 / (fan_in + fan_out)) ** 0.5
        w = std * jax.random.normal(k, (fan_in, fan_out), dtype=jnp.float32)
        return w.astype(jnp.bfloat16)  # weights stored bf16 (f32 accumulate)

    def bias_uniform(k, fan_in, fan_out):
        bound = 1.0 / (fan_in ** 0.5)
        return jax.random.uniform(
            k, (1, fan_out), minval=-bound, maxval=bound, dtype=jnp.float32
        )

    dims = {
        "1": (20 * 24, 4096),
        "2": (4096, 2048),
        "3v": (2048, 512),
        "4v": (512, 1),
        "3p": (2048, 512),
        "4p": (512, 12),
    }
    params = {}
    keys = jax.random.split(key, 2 * len(dims))
    for i, (name, (fi, fo)) in enumerate(dims.items()):
        params["w" + name] = xavier_normal(keys[2 * i], fi, fo)
        params["b" + name] = bias_uniform(keys[2 * i + 1], fi, fo)
    return params


def prepare_params(params):
    """Build the fused head weights once (outside the hot path)."""
    p = dict(params)
    # fc3_value | fc3_policy fused along N.
    p["w3c"] = jnp.concatenate([params["w3v"], params["w3p"]], axis=1)  # (2048,1024) bf16
    p["b3c"] = jnp.concatenate([params["b3v"], params["b3p"]], axis=1)  # (1,1024) f32
    # fc4_value / fc4_policy embedded block-diagonally into a lane-dense (1024,128).
    w4 = jnp.zeros((1024, 128), jnp.float32)
    w4 = w4.at[:512, 0:1].set(params["w4v"].astype(jnp.float32))
    w4 = w4.at[512:, 1:13].set(params["w4p"].astype(jnp.float32))
    p["w4c"] = w4.astype(jnp.bfloat16)
    b4 = jnp.zeros((1, 128), jnp.float32)
    b4 = b4.at[:, 0:1].set(params["b4v"])
    b4 = b4.at[:, 1:13].set(params["b4p"])
    p["b4c"] = b4
    return p


# ----------------------------------------------------------------------------
# Forward pass
# ----------------------------------------------------------------------------
def value_policy_net(x, params):
    B = x.shape[0]
    xf = jnp.reshape(x, (B, -1)).astype(jnp.bfloat16)  # flatten(start_dim=1)

    # Pad batch to a multiple of 16 (bf16 sublane packing). Padded rows compute
    # ELU(bias) garbage (no cross-row mixing) and are sliced off below.
    Bp = ((B + 15) // 16) * 16
    if Bp != B:
        xf = jnp.pad(xf, ((0, Bp - B), (0, 0)))

    out = fused_forward(xf, params)
    value = out[:B, 0:1]
    policy = out[:B, 1:13]
    return value, policy


# Pure-JAX f32 reference for correctness checking.
def value_policy_net_ref(x, params):
    def elu(z):
        return jnp.where(z > 0, z, jnp.expm1(z))

    f32 = lambda a: a.astype(jnp.float32)
    B = x.shape[0]
    h = jnp.reshape(x, (B, -1)).astype(jnp.float32)
    h = elu(h @ f32(params["w1"]) + params["b1"])
    h = elu(h @ f32(params["w2"]) + params["b2"])
    v = elu(h @ f32(params["w3v"]) + params["b3v"]) @ f32(params["w4v"]) + params["b4v"]
    p = elu(h @ f32(params["w3p"]) + params["b3p"]) @ f32(params["w4p"]) + params["b4p"]
    return v, p


if __name__ == "__main__":
    key = jax.random.PRNGKey(0)
    pkey, xkey = jax.random.split(key)

    params = prepare_params(init_params(pkey))

    # Rubik's-cube style input: (B, 20, 24), flattened to (B, 480).
    B = 2
    x = jax.random.normal(xkey, (B, 20, 24), dtype=jnp.float32)

    value, policy = jax.jit(value_policy_net)(x, params)
    jax.block_until_ready((value, policy))

    v_ref, p_ref = value_policy_net_ref(x, params)
    assert value.shape == (B, 1) and policy.shape == (B, 12)
    # bf16 weights/activations vs f32 reference -> loosened tolerance.
    assert jnp.allclose(value, v_ref, atol=3e-2, rtol=3e-2)
    assert jnp.allclose(policy, p_ref, atol=3e-2, rtol=3e-2)

    print("KERNEL_OK")
</pallas_src>

<mosaic_0001>
module attributes {stable_mosaic.version = 11 : i64} {
  func.func @_fused_kernel(%arg0: i32, %arg1: memref<16x480xbf16, #tpu.memory_space<vmem>>, %arg2: memref<480x2048xbf16, #tpu.memory_space<vmem>>, %arg3: memref<1x2048xf32, #tpu.memory_space<vmem>>, %arg4: memref<4096x512xbf16, #tpu.memory_space<vmem>>, %arg5: memref<1x512xf32, #tpu.memory_space<vmem>>, %arg6: memref<2048x512xbf16, #tpu.memory_space<vmem>>, %arg7: memref<1x512xf32, #tpu.memory_space<vmem>>, %arg8: memref<512x128xbf16, #tpu.memory_space<vmem>>, %arg9: memref<1x128xf32, #tpu.memory_space<vmem>>, %arg10: memref<16x128xf32, #tpu.memory_space<vmem>>, %arg11: memref<2x16x2048xbf16, #tpu.memory_space<vmem>>, %arg12: memref<4x16x512xbf16, #tpu.memory_space<vmem>>, %arg13: memref<16x128xf32, #tpu.memory_space<vmem>>) attributes {dimension_semantics = [#tpu.dimension_semantics<arbitrary>], iteration_bounds = array<i64: 8>, scalar_prefetch = 0 : i64, scratch_operands = 3 : i64, tpu.core_type = #tpu.core_type<tc>, window_params = [{pipeline_mode = #tpu.pipeline_mode<synchronous>, transform_indices = @transform_0, window_bounds = array<i64: 16, 480>}, {transform_indices = @transform_1, window_bounds = array<i64: 480, 2048>}, {transform_indices = @transform_2, window_bounds = array<i64: 1, 2048>}, {transform_indices = @transform_3, window_bounds = array<i64: 4096, 512>}, {transform_indices = @transform_4, window_bounds = array<i64: 1, 512>}, {transform_indices = @transform_5, window_bounds = array<i64: 2048, 512>}, {transform_indices = @transform_6, window_bounds = array<i64: 1, 512>}, {transform_indices = @transform_7, window_bounds = array<i64: 512, 128>}, {pipeline_mode = #tpu.pipeline_mode<synchronous>, transform_indices = @transform_8, window_bounds = array<i64: 1, 128>}, {pipeline_mode = #tpu.pipeline_mode<synchronous>, transform_indices = @transform_9, window_bounds = array<i64: 16, 128>}]} {
    %c2_i32 = arith.constant 2 : i32
    %0 = arith.cmpi slt, %arg0, %c2_i32 : i32
    %1 = arith.extui %0 : i1 to i32
    %c0_i32 = arith.constant 0 : i32
    %2 = arith.cmpi ne, %1, %c0_i32 : i32
    scf.if %2 {
      %c0 = arith.constant 0 : index
      %c0_4 = arith.constant 0 : index
      %11 = vector.load %arg1[%c0, %c0_4] : memref<16x480xbf16, #tpu.memory_space<vmem>>, vector<16x480xbf16>
      %c0_5 = arith.constant 0 : index
      %c0_6 = arith.constant 0 : index
      %12 = vector.load %arg2[%c0_5, %c0_6] : memref<480x2048xbf16, #tpu.memory_space<vmem>>, vector<480x2048xbf16>
      %cst = arith.constant dense<0.000000e+00> : vector<16x2048xf32>
      %13 = tpu.matmul %11, %12, %cst {dimension_numbers = #tpu.dot_dimension_numbers<[1], [0], [0], [1], [0, 0, 1, 1], [], []>} : vector<16x480xbf16>, vector<480x2048xbf16>, vector<16x2048xf32> -> vector<16x2048xf32>
      %c0_7 = arith.constant 0 : index
      %c0_8 = arith.constant 0 : index
      %14 = vector.load %arg3[%c0_7, %c0_8] : memref<1x2048xf32, #tpu.memory_space<vmem>>, vector<1x2048xf32>
      %15 = vector.broadcast %14 : vector<1x2048xf32> to vector<16x2048xf32>
      %16 = arith.addf %13, %15 : vector<16x2048xf32>
      %cst_9 = arith.constant 0.000000e+00 : f32
      %17 = vector.broadcast %cst_9 : f32 to vector<16x2048xf32>
      %18 = arith.cmpf ogt, %16, %17 : vector<16x2048xf32>
      %cst_10 = arith.constant 0.000000e+00 : f32
      %19 = vector.broadcast %cst_10 : f32 to vector<16x2048xf32>
      %20 = arith.minimumf %16, %19 : vector<16x2048xf32>
      %21 = math.exp %20 : vector<16x2048xf32>
      %cst_11 = arith.constant 1.000000e+00 : f32
      %22 = vector.broadcast %cst_11 : f32 to vector<16x2048xf32>
      %23 = arith.subf %21, %22 : vector<16x2048xf32>
      %24 = arith.select %18, %16, %23 : vector<16x2048xi1>, vector<16x2048xf32>
      %25 = arith.truncf %24 : vector<16x2048xf32> to vector<16x2048xbf16>
      %26 = arith.index_cast %arg0 : i32 to index
      %c0_12 = arith.constant 0 : index
      %c0_13 = arith.constant 0 : index
      %27 = vector.load %arg11[%26, %c0_12, %c0_13] : memref<2x16x2048xbf16, #tpu.memory_space<vmem>>, vector<1x16x2048xbf16>
      %28 = vector.shape_cast %27 : vector<1x16x2048xbf16> to vector<16x2048xbf16>
      %29 = vector.shape_cast %25 : vector<16x2048xbf16> to vector<1x16x2048xbf16>
      tpu.vector_store %arg11[%26, %c0_12, %c0_13], %29 {strides = array<i32>} : memref<2x16x2048xbf16, #tpu.memory_space<vmem>>, vector<1x16x2048xbf16>,
    } else {
    }
    %c2_i32_0 = arith.constant 2 : i32
    %3 = arith.cmpi sge, %arg0, %c2_i32_0 : i32
    %c6_i32 = arith.constant 6 : i32
    %4 = arith.cmpi slt, %arg0, %c6_i32 : i32
    %5 = arith.andi %3, %4 : i1
    %6 = arith.extui %5 : i1 to i32
    %c0_i32_1 = arith.constant 0 : i32
    %7 = arith.cmpi ne, %6, %c0_i32_1 : i32
    scf.if %7 {
      %cst = arith.constant 0.000000e+00 : f32
      %11 = vector.broadcast %cst : f32 to vector<16x512xf32>
      %c0 = arith.constant 0 : index
      %c0_4 = arith.constant 0 : index
      %c0_5 = arith.constant 0 : index
      %12 = vector.load %arg11[%c0, %c0_4, %c0_5] : memref<2x16x2048xbf16, #tpu.memory_space<vmem>>, vector<1x16x2048xbf16>
      %13 = vector.shape_cast %12 : vector<1x16x2048xbf16> to vector<16x2048xbf16>
      %c0_6 = arith.constant 0 : index
      %c0_7 = arith.constant 0 : index
      %14 = vector.load %arg4[%c0_6, %c0_7] : memref<4096x512xbf16, #tpu.memory_space<vmem>>, vector<2048x512xbf16>
      %cst_8 = arith.constant dense<0.000000e+00> : vector<16x512xf32>
      %15 = tpu.matmul %13, %14, %cst_8 {dimension_numbers = #tpu.dot_dimension_numbers<[1], [0], [0], [1], [0, 0, 1, 1], [], []>} : vector<16x2048xbf16>, vector<2048x512xbf16>, vector<16x512xf32> -> vector<16x512xf32>
      %16 = arith.addf %11, %15 : vector<16x512xf32>
      %c1 = arith.constant 1 : index
      %c0_9 = arith.constant 0 : index
      %c0_10 = arith.constant 0 : index
      %17 = vector.load %arg11[%c1, %c0_9, %c0_10] : memref<2x16x2048xbf16, #tpu.memory_space<vmem>>, vector<1x16x2048xbf16>
      %18 = vector.shape_cast %17 : vector<1x16x2048xbf16> to vector<16x2048xbf16>
      %c2048 = arith.constant 2048 : index
      %c0_11 = arith.constant 0 : index
      %19 = vector.load %arg4[%c2048, %c0_11] : memref<4096x512xbf16, #tpu.memory_space<vmem>>, vector<2048x512xbf16>
      %cst_12 = arith.constant dense<0.000000e+00> : vector<16x512xf32>
      %20 = tpu.matmul %18, %19, %cst_12 {dimension_numbers = #tpu.dot_dimension_numbers<[1], [0], [0], [1], [0, 0, 1, 1], [], []>} : vector<16x2048xbf16>, vector<2048x512xbf16>, vector<16x512xf32> -> vector<16x512xf32>
      %21 = arith.addf %16, %20 : vector<16x512xf32>
      %c0_13 = arith.constant 0 : index
      %c0_14 = arith.constant 0 : index
      %22 = vector.load %arg5[%c0_13, %c0_14] : memref<1x512xf32, #tpu.memory_space<vmem>>, vector<1x512xf32>
      %23 = vector.broadcast %22 : vector<1x512xf32> to vector<16x512xf32>
      %24 = arith.addf %21, %23 : vector<16x512xf32>
      %cst_15 = arith.constant 0.000000e+00 : f32
      %25 = vector.broadcast %cst_15 : f32 to vector<16x512xf32>
      %26 = arith.cmpf ogt, %24, %25 : vector<16x512xf32>
      %cst_16 = arith.constant 0.000000e+00 : f32
      %27 = vector.broadcast %cst_16 : f32 to vector<16x512xf32>
      %28 = arith.minimumf %24, %27 : vector<16x512xf32>
      %29 = math.exp %28 : vector<16x512xf32>
      %cst_17 = arith.constant 1.000000e+00 : f32
      %30 = vector.broadcast %cst_17 : f32 to vector<16x512xf32>
      %31 = arith.subf %29, %30 : vector<16x512xf32>
      %32 = arith.select %26, %24, %31 : vector<16x512xi1>, vector<16x512xf32>
      %33 = arith.truncf %32 : vector<16x512xf32> to vector<16x512xbf16>
      %c2_i32_18 = arith.constant 2 : i32
      %34 = arith.subi %arg0, %c2_i32_18 : i32
      %35 = arith.index_cast %34 : i32 to index
      %c0_19 = arith.constant 0 : index
      %c0_20 = arith.constant 0 : index
      %36 = vector.load %arg12[%35, %c0_19, %c0_20] : memref<4x16x512xbf16, #tpu.memory_space<vmem>>, vector<1x16x512xbf16>
      %37 = vector.shape_cast %36 : vector<1x16x512xbf16> to vector<16x512xbf16>
      %38 = vector.shape_cast %33 : vector<16x512xbf16> to vector<1x16x512xbf16>
      tpu.vector_store %arg12[%35, %c0_19, %c0_20], %38 {strides = array<i32>} : memref<4x16x512xbf16, #tpu.memory_space<vmem>>, vector<1x16x512xbf16>,
    } else {
    }
    %c6_i32_2 = arith.constant 6 : i32
    %8 = arith.cmpi sge, %arg0, %c6_i32_2 : i32
    %9 = arith.extui %8 : i1 to i32
    %c0_i32_3 = arith.constant 0 : i32
    %10 = arith.cmpi ne, %9, %c0_i32_3 : i32
    scf.if %10 {
      %c6_i32_4 = arith.constant 6 : i32
      %11 = arith.subi %arg0, %c6_i32_4 : i32
      %c0_i32_5 = arith.constant 0 : i32
      %12 = arith.cmpi eq, %11, %c0_i32_5 : i32
      %13 = arith.extui %12 : i1 to i32
      %c0_i32_6 = arith.constant 0 : i32
      %14 = arith.cmpi ne, %13, %c0_i32_6 : i32
      scf.if %14 {
        %cst_37 = arith.constant 0.000000e+00 : f32
        %56 = vector.broadcast %cst_37 : f32 to vector<16x128xf32>
        %c0_38 = arith.constant 0 : index
        %c0_39 = arith.constant 0 : index
        %57 = vector.load %arg13[%c0_38, %c0_39] : memref<16x128xf32, #tpu.memory_space<vmem>>, vector<16x128xf32>
        tpu.vector_store %arg13[%c0_38, %c0_39], %56 {strides = array<i32>} : memref<16x128xf32, #tpu.memory_space<vmem>>, vector<16x128xf32>,
      } else {
      }
      %cst = arith.constant 0.000000e+00 : f32
      %15 = vector.broadcast %cst : f32 to vector<16x512xf32>
      %c0 = arith.constant 0 : index
      %c0_7 = arith.constant 0 : index
      %c0_8 = arith.constant 0 : index
      %16 = vector.load %arg12[%c0, %c0_7, %c0_8] : memref<4x16x512xbf16, #tpu.memory_space<vmem>>, vector<1x16x512xbf16>
      %17 = vector.shape_cast %16 : vector<1x16x512xbf16> to vector<16x512xbf16>
      %c0_9 = arith.constant 0 : index
      %c0_10 = arith.constant 0 : index
      %18 = vector.load %arg6[%c0_9, %c0_10] : memref<2048x512xbf16, #tpu.memory_space<vmem>>, vector<512x512xbf16>
      %cst_11 = arith.constant dense<0.000000e+00> : vector<16x512xf32>
      %19 = tpu.matmul %17, %18, %cst_11 {dimension_numbers = #tpu.dot_dimension_numbers<[1], [0], [0], [1], [0, 0, 1, 1], [], []>} : vector<16x512xbf16>, vector<512x512xbf16>, vector<16x512xf32> -> vector<16x512xf32>
      %20 = arith.addf %15, %19 : vector<16x512xf32>
      %c1 = arith.constant 1 : index
      %c0_12 = arith.constant 0 : index
      %c0_13 = arith.constant 0 : index
      %21 = vector.load %arg12[%c1, %c0_12, %c0_13] : memref<4x16x512xbf16, #tpu.memory_space<vmem>>, vector<1x16x512xbf16>
      %22 = vector.shape_cast %21 : vector<1x16x512xbf16> to vector<16x512xbf16>
      %c512 = arith.constant 512 : index
      %c0_14 = arith.constant 0 : index
      %23 = vector.load %arg6[%c512, %c0_14] : memref<2048x512xbf16, #tpu.memory_space<vmem>>, vector<512x512xbf16>
      %cst_15 = arith.constant dense<0.000000e+00> : vector<16x512xf32>
      %24 = tpu.matmul %22, %23, %cst_15 {dimension_numbers = #tpu.dot_dimension_numbers<[1], [0], [0], [1], [0, 0, 1, 1], [], []>} : vector<16x512xbf16>, vector<512x512xbf16>, vector<16x512xf32> -> vector<16x512xf32>
      %25 = arith.addf %20, %24 : vector<16x512xf32>
      %c2 = arith.constant 2 : index
      %c0_16 = arith.constant 0 : index
      %c0_17 = arith.constant 0 : index
      %26 = vector.load %arg12[%c2, %c0_16, %c0_17] : memref<4x16x512xbf16, #tpu.memory_space<vmem>>, vector<1x16x512xbf16>
      %27 = vector.shape_cast %26 : vector<1x16x512xbf16> to vector<16x512xbf16>
      %c1024 = arith.constant 1024 : index
      %c0_18 = arith.constant 0 : index
      %28 = vector.load %arg6[%c1024, %c0_18] : memref<2048x512xbf16, #tpu.memory_space<vmem>>, vector<512x512xbf16>
      %cst_19 = arith.constant dense<0.000000e+00> : vector<16x512xf32>
      %29 = tpu.matmul %27, %28, %cst_19 {dimension_numbers = #tpu.dot_dimension_numbers<[1], [0], [0], [1], [0, 0, 1, 1], [], []>} : vector<16x512xbf16>, vector<512x512xbf16>, vector<16x512xf32> -> vector<16x512xf32>
      %30 = arith.addf %25, %29 : vector<16x512xf32>
      %c3 = arith.constant 3 : index
      %c0_20 = arith.constant 0 : index
      %c0_21 = arith.constant 0 : index
      %31 = vector.load %arg12[%c3, %c0_20, %c0_21] : memref<4x16x512xbf16, #tpu.memory_space<vmem>>, vector<1x16x512xbf16>
      %32 = vector.shape_cast %31 : vector<1x16x512xbf16> to vector<16x512xbf16>
      %c1536 = arith.constant 1536 : index
      %c0_22 = arith.constant 0 : index
      %33 = vector.load %arg6[%c1536, %c0_22] : memref<2048x512xbf16, #tpu.memory_space<vmem>>, vector<512x512xbf16>
      %cst_23 = arith.constant dense<0.000000e+00> : vector<16x512xf32>
      %34 = tpu.matmul %32, %33, %cst_23 {dimension_numbers = #tpu.dot_dimension_numbers<[1], [0], [0], [1], [0, 0, 1, 1], [], []>} : vector<16x512xbf16>, vector<512x512xbf16>, vector<16x512xf32> -> vector<16x512xf32>
      %35 = arith.addf %30, %34 : vector<16x512xf32>
      %c0_24 = arith.constant 0 : index
      %c0_25 = arith.constant 0 : index
      %36 = vector.load %arg7[%c0_24, %c0_25] : memref<1x512xf32, #tpu.memory_space<vmem>>, vector<1x512xf32>
      %37 = vector.broadcast %36 : vector<1x512xf32> to vector<16x512xf32>
      %38 = arith.addf %35, %37 : vector<16x512xf32>
      %cst_26 = arith.constant 0.000000e+00 : f32
      %39 = vector.broadcast %cst_26 : f32 to vector<16x512xf32>
      %40 = arith.cmpf ogt, %38, %39 : vector<16x512xf32>
      %cst_27 = arith.constant 0.000000e+00 : f32
      %41 = vector.broadcast %cst_27 : f32 to vector<16x512xf32>
      %42 = arith.minimumf %38, %41 : vector<16x512xf32>
      %43 = math.exp %42 : vector<16x512xf32>
      %cst_28 = arith.constant 1.000000e+00 : f32
      %44 = vector.broadcast %cst_28 : f32 to vector<16x512xf32>
      %45 = arith.subf %43, %44 : vector<16x512xf32>
      %46 = arith.select %40, %38, %45 : vector<16x512xi1>, vector<16x512xf32>
      %c0_29 = arith.constant 0 : index
      %c0_30 = arith.constant 0 : index
      %47 = vector.load %arg13[%c0_29, %c0_30] : memref<16x128xf32, #tpu.memory_space<vmem>>, vector<16x128xf32>
      %48 = arith.truncf %46 : vector<16x512xf32> to vector<16x512xbf16>
      %c0_31 = arith.constant 0 : index
      %c0_32 = arith.constant 0 : index
      %49 = vector.load %arg8[%c0_31, %c0_32] : memref<512x128xbf16, #tpu.memory_space<vmem>>, vector<512x128xbf16>
      %cst_33 = arith.constant dense<0.000000e+00> : vector<16x128xf32>
      %50 = tpu.matmul %48, %49, %cst_33 {dimension_numbers = #tpu.dot_dimension_numbers<[1], [0], [0], [1], [0, 0, 1, 1], [], []>} : vector<16x512xbf16>, vector<512x128xbf16>, vector<16x128xf32> -> vector<16x128xf32>
      %51 = arith.addf %47, %50 : vector<16x128xf32>
      %c0_34 = arith.constant 0 : index
      %c0_35 = arith.constant 0 : index
      %52 = vector.load %arg13[%c0_34, %c0_35] : memref<16x128xf32, #tpu.memory_space<vmem>>, vector<16x128xf32>
      tpu.vector_store %arg13[%c0_34, %c0_35], %51 {strides = array<i32>} : memref<16x128xf32, #tpu.memory_space<vmem>>, vector<16x128xf32>,
      %c7_i32 = arith.constant 7 : i32
      %53 = arith.cmpi eq, %arg0, %c7_i32 : i32
      %54 = arith.extui %53 : i1 to i32
      %c0_i32_36 = arith.constant 0 : i32
      %55 = arith.cmpi ne, %54, %c0_i32_36 : i32
      scf.if %55 {
        %c0_37 = arith.constant 0 : index
        %c0_38 = arith.constant 0 : index
        %56 = vector.load %arg13[%c0_37, %c0_38] : memref<16x128xf32, #tpu.memory_space<vmem>>, vector<16x128xf32>
        %c0_39 = arith.constant 0 : index
        %c0_40 = arith.constant 0 : index
        %57 = vector.load %arg9[%c0_39, %c0_40] : memref<1x128xf32, #tpu.memory_space<vmem>>, vector<1x128xf32>
        %58 = vector.broadcast %57 : vector<1x128xf32> to vector<16x128xf32>
        %59 = arith.addf %56, %58 : vector<16x128xf32>
        %c0_41 = arith.constant 0 : index
        %c0_42 = arith.constant 0 : index
        %60 = vector.load %arg10[%c0_41, %c0_42] : memref<16x128xf32, #tpu.memory_space<vmem>>, vector<16x128xf32>
        tpu.vector_store %arg10[%c0_41, %c0_42], %59 {strides = array<i32>} : memref<16x128xf32, #tpu.memory_space<vmem>>, vector<16x128xf32>,
      } else {
      }
    } else {
    }
    return
  }
  func.func @transform_0(%arg0: i32) -> (i32, i32) {
    %c0_i32 = arith.constant 0 : i32
    %c0_i32_0 = arith.constant 0 : i32
    %c0_i32_1 = arith.constant 0 : i32
    return %c0_i32, %c0_i32_0 : i32, i32
  }
  func.func @transform_1(%arg0: i32) -> (i32, i32) {
    %c1_i32 = arith.constant 1 : i32
    %0 = arith.minsi %arg0, %c1_i32 : i32
    %c0_i32 = arith.constant 0 : i32
    %c0_i32_0 = arith.constant 0 : i32
    return %c0_i32, %0 : i32, i32
  }
  func.func @transform_2(%arg0: i32) -> (i32, i32) {
    %c1_i32 = arith.constant 1 : i32
    %0 = arith.minsi %arg0, %c1_i32 : i32
    %c0_i32 = arith.constant 0 : i32
    %c0_i32_0 = arith.constant 0 : i32
    return %c0_i32, %0 : i32, i32
  }
  func.func @transform_3(%arg0: i32) -> (i32, i32) {
    %c2_i32 = arith.constant 2 : i32
    %0 = arith.subi %arg0, %c2_i32 : i32
    %c0_i32 = arith.constant 0 : i32
    %c3_i32 = arith.constant 3 : i32
    %1 = arith.maxsi %c0_i32, %0 : i32
    %2 = arith.minsi %c3_i32, %1 : i32
    %c0_i32_0 = arith.constant 0 : i32
    %c0_i32_1 = arith.constant 0 : i32
    return %c0_i32_0, %2 : i32, i32
  }
  func.func @transform_4(%arg0: i32) -> (i32, i32) {
    %c2_i32 = arith.constant 2 : i32
    %0 = arith.subi %arg0, %c2_i32 : i32
    %c0_i32 = arith.constant 0 : i32
    %c3_i32 = arith.constant 3 : i32
    %1 = arith.maxsi %c0_i32, %0 : i32
    %2 = arith.minsi %c3_i32, %1 : i32
    %c0_i32_0 = arith.constant 0 : i32
    %c0_i32_1 = arith.constant 0 : i32
    return %c0_i32_0, %2 : i32, i32
  }
  func.func @transform_5(%arg0: i32) -> (i32, i32) {
    %c2_i32 = arith.constant 2 : i32
    %0 = arith.subi %arg0, %c2_i32 : i32
    %c4_i32 = arith.constant 4 : i32
    %1 = arith.subi %0, %c4_i32 : i32
    %c0_i32 = arith.constant 0 : i32
    %c1_i32 = arith.constant 1 : i32
    %2 = arith.maxsi %c0_i32, %1 : i32
    %3 = arith.minsi %c1_i32, %2 : i32
    %c0_i32_0 = arith.constant 0 : i32
    %c0_i32_1 = arith.constant 0 : i32
    return %c0_i32_0, %3 : i32, i32
  }
  func.func @transform_6(%arg0: i32) -> (i32, i32) {
    %c2_i32 = arith.constant 2 : i32
    %0 = arith.subi %arg0, %c2_i32 : i32
    %c4_i32 = arith.constant 4 : i32
    %1 = arith.subi %0, %c4_i32 : i32
    %c0_i32 = arith.constant 0 : i32
    %c1_i32 = arith.constant 1 : i32
    %2 = arith.maxsi %c0_i32, %1 : i32
    %3 = arith.minsi %c1_i32, %2 : i32
    %c0_i32_0 = arith.constant 0 : i32
    %c0_i32_1 = arith.constant 0 : i32
    return %c0_i32_0, %3 : i32, i32
  }
  func.func @transform_7(%arg0: i32) -> (i32, i32) {
    %c2_i32 = arith.constant 2 : i32
    %0 = arith.subi %arg0, %c2_i32 : i32
    %c4_i32 = arith.constant 4 : i32
    %1 = arith.subi %0, %c4_i32 : i32
    %c0_i32 = arith.constant 0 : i32
    %c1_i32 = arith.constant 1 : i32
    %2 = arith.maxsi %c0_i32, %1 : i32
    %3 = arith.minsi %c1_i32, %2 : i32
    %c0_i32_0 = arith.constant 0 : i32
    %c0_i32_1 = arith.constant 0 : i32
    return %3, %c0_i32_0 : i32, i32
  }
  func.func @transform_8(%arg0: i32) -> (i32, i32) {
    %c0_i32 = arith.constant 0 : i32
    %c0_i32_0 = arith.constant 0 : i32
    %c0_i32_1 = arith.constant 0 : i32
    return %c0_i32, %c0_i32_0 : i32, i32
  }
  func.func @transform_9(%arg0: i32) -> (i32, i32) {
    %c0_i32 = arith.constant 0 : i32
    %c0_i32_0 = arith.constant 0 : i32
    %c0_i32_1 = arith.constant 0 : i32
    return %c0_i32, %c0_i32_0 : i32, i32
  }
}

</mosaic_0001>

<bundles_post_ra>
// kernel: value_policy_net.1
= control target key start
LH: loop header
LB: loop body
LE: loop exit
PB: predicated region body
PF: predicated region fallthrough
CT: control target
= control target key end

     0   :  { %s25905_s0 = inlined_call_operand.vmem [shape: bf16[16,480], index: 0, kind: input, shape index: {}]   ;;  %s25906_s1 = inlined_call_operand.hbm [shape: bf16[480,4096], index: 1, kind: input, shape index: {}]   ;;  %s25907_s2 = inlined_call_operand.hbm [shape: f32[1,4096], index: 2, kind: input, shape index: {}]   ;;  %s25908_s3 = inlined_call_operand.hbm [shape: bf16[4096,2048], index: 3, kind: input, shape index: {}]   ;;  %s25909_s4 = inlined_call_operand.hbm [shape: f32[1,2048], index: 4, kind: input, shape index: {}]   ;;  %s25910_s5 = inlined_call_operand.hbm [shape: bf16[2048,1024], index: 5, kind: input, shape index: {}]   ;;  %s25911_s6 = inlined_call_operand.hbm [shape: f32[1,1024], index: 6, kind: input, shape index: {}]   ;;  %s25912_s7 = inlined_call_operand.hbm [shape: bf16[1024,128], index: 7, kind: input, shape index: {}]   ;;  %s25913_s8 = inlined_call_operand.hbm [shape: f32[1,128], index: 8, kind: input, shape index: {}]   ;;  %s25914_s9 = inlined_call_operand.vmem [shape: f32[16,128], index: 9, kind: output, shape index: {}]  }
   0x1   :  { %25949 = sst [smem:[#allocation39_spill]] %s25905_s0 }
   0x2   :  { %25950 = sst [smem:[#allocation40_spill]] %s25906_s1 }
   0x3   :  { %25951 = sst [smem:[#allocation41_spill]] %s25907_s2 }
   0x4   :  { %25952 = sst [smem:[#allocation42_spill]] %s25908_s3 }
   0x5   :  { %25953 = sst [smem:[#allocation43_spill]] %s25909_s4 }
   0x6   :  { %25954 = sst [smem:[#allocation44_spill]] %s25910_s5 }
   0x7   :  { %25955 = sst [smem:[#allocation45_spill]] %s25911_s6 }
   0x8   :  { %25956 = sst [smem:[#allocation46_spill]] %s25912_s7 }
   0x9   :  { %25957 = sst [smem:[#allocation47_spill]] %s25913_s8 }
   0xa   :  { %25958 = sst [smem:[#allocation48_spill]] %s25914_s9 }
   0xb   :  { %14 = vsyncpa [#allocation6], 0 }
   0xc   :  { %16 = vsyncpa [#allocation6 + $0x1], 0 }
   0xd   :  { %17 = vsyncpa [#allocation8], 0 }
   0xe   :  { %19 = vsyncpa [#allocation8 + $0x1], 0 }
   0xf   :  { %20 = vsyncpa [#allocation11], 0 }
  0x10   :  { %22 = vsyncpa [#allocation11 + $0x1], 0 }
  0x11   :  { %23 = vsyncpa [#allocation14], 0 }
  0x12   :  { %25 = vsyncpa [#allocation14 + $0x1], 0 }
  0x13   :  { %26 = vsyncpa [#allocation17], 0  ;;  %s22449_s30 = smov 0   ;;  %s22451_s10 = smov 0  }
  0x14   :  { %s22453_s11 = smov 0   ;;  %s22455_s12 = smov 0  }
  0x15   :  { %s22457_s13 = smov 0   ;;  %s22459_s14 = smov 0  }
  0x16   :  { %s22461_s15 = smov 0   ;;  %s22463_s16 = smov 0  }
  0x17   :  { %s22465_s17 = smov 0   ;;  %s22467_s18 = smov 0  }
  0x18 LB: > { %25959 = sst [smem:[#allocation25_spill]] %s22353_s11  ;;  %s22500_s19 = sadd.s32 1, %s22381_s18   ;;  %s22381_s18 = sphi %s22467_s18, %s26031_s18   ;;  %s22377_s17 = sphi %s22465_s17, %s26037_s17   ;;  %s22373_s16 = sphi %s22463_s16, %s26043_s16   ;;  %s22369_s15 = sphi %s22461_s15, %s26042_s15   ;;  %s22365_s14 = sphi %s22459_s14, %s26035_s14   ;;  %s22361_s13 = sphi %s22457_s13, %s26041_s13   ;;  %s22357_s12 = sphi %s22455_s12, %s26040_s12   ;;  %s22353_s11 = sphi %s22453_s11, %s26033_s11   ;;  %s22349_s10 = sphi %s22451_s10, %s26039_s10   ;;  %s22345_s30 = sphi %s22449_s30, %s26038_s30  }
  0x19   : > { %25960 = sst [smem:[#allocation26_spill]] %s22365_s14  ;;  %p57_p0 = scmp.lt.s32.totalorder %s22381_s18, 1 }
  0x1a   : > { %25961 = sst [smem:[#allocation27_spill]] %s22377_s17  ;;  %p59_p1 = scmp.lt.s32.totalorder %s22500_s19, 1 }
  0x1b   : > { %25962 = sst [smem:[#allocation28_spill]] %s22500_s19  ;;  %s64_s20 = sadd.s32 1, %s22377_s17 }
  0x1c   : > { %s22506_s21 = scalar_select %p57_p0, %s22381_s18, 1 }
  0x1d   : > { %s60_s22 = scalar_select %p59_p1, %s22500_s19, 1 }
  0x1e   : > { %p71_p2 = scmp.ne.s32.totalorder %s22377_s17, %s22373_s16  ;;  %p25923_p3 = scmp.eq.s32.totalorder %s22381_s18, 0 }
  0x1f   : > { %s61_s23 = ssub.s32 %s22506_s21, %s60_s22  ;;  %s22518_s24 = sadd.s32 4294967290, %s22500_s19 }
  0x20   : > { %p62_p5 = scmp.eq.s32.totalorder %s61_s23, 0  ;;  %p73_p6 = por %p25923_p3, %p71_p2 }
  0x21   : > { %p25922_p8 = scmp.lt.s32.totalorder %s22381_s18, 8  ;;  %s22526_s26 = sand.u32 1, %s22377_s17  }
  0x22   : > { %s22521_s25 = scalar_select %p62_p5, %s22377_s17, %s64_s20  }
  0x23   : > { %s22529_s27 = sand.u32 1, %s22381_s18   ;;  %s19444_s28 = smul.u32 3840, %s22526_s26 }
  0x24   : > { %25963 = sst [smem:[#allocation29_spill]] %s22521_s25  ;;  %p22534_p9 = pnand %p25922_p8, %p73_p6 }
  0x25   : > { %s17096_s22 = sshll.u32 %s22526_s26, 4  ;;  %s371_s20 = scalar_lea.vmem [#allocation5], %s19444_s28 }
  0x26   : > { %s25964_s29 = scalar_select %p22534_p9, 1, 0 }
  0x27   : > { %s380_s23 = sshll.u32 %s371_s20, 4  ;;  %s19362_s25 = sshll.u32 %s22506_s21, 8  ;;  %s22539_s23 = int_to_ptr.vmem [resolvable:$true] %s380_s23 }
  0x28   : > { %25965 = sst [smem:[#allocation30_spill]] %s22539_s23  ;;  %s394_s17 = scalar_lea.vmem [#allocation7], %s17096_s22 }
  0x29   : > { %s404_s9 = sshll.u32 %s394_s17, 4  ;;  %s25966_s2 = sld [smem:[#allocation41_spill]]  ;;  %s405_s9 = int_to_ptr.vmem [resolvable:$true] %s404_s9 }
  0x2a   : > { %s25924_s8 = scalar_lea.sflag [#allocation8], %s22529_s27  ;;  %p25929_p11 = pneg %p22534_p9 }
  0x2f   : > { %s402_s5 = scalar_lea.hbm %s25966_s2, %s19362_s25  ;;  %s22058_s23 = scalar_lea.hbm %s25966_s2, 512 }
  0x30   : > { %s22053_s1 = scalar_lea.hbm %s402_s5, 256  ;;  %p22059_p0 = scmp.lt.s32.totalorder %s402_s5, %s25966_s2 }
  0x31   : > { %p22054_p10 = scmp.ne.s32.totalorder %s402_s5, %s22053_s1  ;;  %p22060_p1 = scmp.lt.s32.totalorder %s22058_s23, %s22053_s1 }
  0x33   : > { %p22056_p12 = pnand %p25929_p11, %p22054_p10  ;;  %p22061_p2 = por %p22060_p1, %p22059_p0 }
  0x35   : > { %p22057_p13 = pneg %p22056_p12 }
  0x37   : > { %p22062_p5 = pnand %p22061_p2, %p22057_p13 }
  0x39   : > { %22065 = shalt.err (!%p22062_p5)
}
  0x3a   : > { %s22066_s0 = scalar_lea.vmem %s405_s9, 256  ;;  %s22383_s7 = smov [#allocation7]  }
  0x3b   : > { %p22067_p6 = scmp.ne.s32.totalorder %s405_s9, %s22066_s0  ;;  %s22071_s25 = sshll.u32 %s22383_s7, 4  ;;  %s22072_s25 = int_to_ptr.vmem [resolvable:$false] %s22071_s25 }
  0x3c   : > { %s22073_s28 = scalar_lea.vmem %s22072_s25, 512  ;;  %p22074_p12 = scmp.lt.s32.totalorder %s405_s9, %s22072_s25 }
  0x3d   : > { %p22069_p4 = pnand %p22067_p6, %p25929_p11  ;;  %p22075_p7 = scmp.lt.s32.totalorder %s22073_s28, %s22066_s0 }
  0x3f   : > { %p22070_p10 = pneg %p22069_p4  ;;  %p22076_p8 = por %p22075_p7, %p22074_p12 }
  0x41   : > { %p22077_p3 = pnand %p22076_p8, %p22070_p10 }
  0x43   : > { %22080 = shalt.err (!%p22077_p3)
}
  0x44   : > { %19474 = dma.hbm_to_vmem [thread:$0]  (!%p22534_p9), %s402_s5, 256, %s405_s9, %s25924_s8  }
  0x45   : > { %s17031_s1 = sadd.s32 4294967294, %s22381_s18  ;;  %s17037_s23 = sadd.s32 4294967294, %s22500_s19 }
  0x46   : > { %p118_p4 = scmp.gt.s32.totalorder %s17031_s1, 0  ;;  %p17032_p7 = scmp.lt.s32.totalorder %s17031_s1, 3 }
  0x47   : > { %p123_p3 = scmp.gt.s32.totalorder %s17037_s23, 0  ;;  %p17038_p8 = scmp.lt.s32.totalorder %s17037_s23, 3 }
  0x48   : > { %s26045_s1 = smov (!%p118_p4, %s17031_s1), 0  ;;  %s130_s20 = sadd.s32 1, %s22365_s14 }
  0x49   : > { %s26047_s23 = smov (!%p123_p3, %s17037_s23), 0  ;;  %s26049_s1 = smov (!%p17032_p7, %s26045_s1), 3 }
  0x4a   : > { %s26051_s23 = smov (!%p17038_p8, %s26047_s23), 3  ;;  %p137_p13 = scmp.ne.s32.totalorder %s22365_s14, %s22361_s13 }
  0x4b   : > { %s127_s22 = ssub.s32 %s26049_s1, %s26051_s23  ;;  %p25967_p2 = scmp.eq.s32.totalorder %s22381_s18, 0 }
  0x4c   : > { %p128_p1 = scmp.eq.s32.totalorder %s127_s22, 0  ;;  %s413_s5 = sand.u32 1, %s22365_s14  }
  0x4d   : > { %p139_p5 = por %p137_p13, %p25967_p2  ;;  %s19365_s9 = sshll.u32 %s26049_s1, 8 }
  0x4e   : > { %s22575_s17 = scalar_select %p128_p1, %s22365_s14, %s130_s20  }
  0x4f   : > { %s17099_s0 = sshll.u32 %s413_s5, 13  ;;  %s25969_s3 = sld [smem:[#allocation42_spill]] }
  0x50   : > { %25968 = sst [smem:[#allocation31_spill]] %s22575_s17  ;;  %p25970_p6 = scmp.lt.s32.totalorder %s22381_s18, 8 }
  0x51   : > { %s415_s23 = scalar_lea.vmem [#allocation9], %s17099_s0  ;;  %s17108_s2 = sshll.u32 %s413_s5, 2 }
  0x52   : > { %p22584_p10 = pnand %p25970_p6, %p139_p5  ;;  %s427_s22 = sshll.u32 %s415_s23, 4  ;;  %s22588_s22 = int_to_ptr.vmem [resolvable:$true] %s427_s22 }
  0x53   : > { %s19368_s20 = sshll.u32 %s26049_s1, 6  ;;  %s25972_s4 = sld [smem:[#allocation43_spill]] }
  0x54   : > { %s25971_s8 = scalar_select %p22584_p10, 1, 0 }
  0x55   : > { %s22580_s28 = scalar_lea.hbm %s25969_s3, %s19365_s9  ;;  %s441_s9 = scalar_lea.vmem [#allocation10], %s17108_s2 }
  0x56   : > { %s454_s7 = sshll.u32 %s441_s9, 4  ;;  %s25932_s25 = scalar_lea.sflag [#allocation11], %s22529_s27  ;;  %s455_s7 = int_to_ptr.vmem [resolvable:$true] %s454_s7 }
  0x57   : > { %p25934_p4 = pneg %p22584_p10 }
  0x59   : > { %s22593_s19 = scalar_lea.hbm %s25972_s4, %s19368_s20  ;;  %s22086_s14 = scalar_lea.hbm %s25972_s4, 256 }
  0x5a   : > { %s22081_s3 = scalar_lea.hbm %s22593_s19, 64  ;;  %p22087_p8 = scmp.lt.s32.totalorder %s22593_s19, %s25972_s4 }
  0x5b   : > { %p22082_p12 = scmp.ne.s32.totalorder %s22593_s19, %s22081_s3  ;;  %p22088_p13 = scmp.lt.s32.totalorder %s22086_s14, %s22081_s3 }
  0x5d   : > { %p22084_p7 = pnand %p25934_p4, %p22082_p12  ;;  %p22089_p1 = por %p22088_p13, %p22087_p8 }
  0x5f   : > { %p22085_p3 = pneg %p22084_p7 }
  0x61   : > { %p22090_p2 = pnand %p22089_p1, %p22085_p3 }
  0x63   : > { %22093 = shalt.err (!%p22090_p2)
}
  0x64   : > { %s22094_s2 = scalar_lea.vmem %s455_s7, 64  ;;  %s22384_s23 = smov [#allocation10]  }
  0x65   : > { %p22095_p5 = scmp.ne.s32.totalorder %s455_s7, %s22094_s2  ;;  %s22099_s20 = sshll.u32 %s22384_s23, 4  ;;  %s22100_s20 = int_to_ptr.vmem [resolvable:$false] %s22099_s20 }
  0x66   : > { %s22101_s9 = scalar_lea.vmem %s22100_s20, 128  ;;  %p22102_p7 = scmp.lt.s32.totalorder %s455_s7, %s22100_s20 }
  0x67   : > { %p22097_p6 = pnand %p22095_p5, %p25934_p4  ;;  %p22103_p11 = scmp.lt.s32.totalorder %s22101_s9, %s22094_s2 }
  0x69   : > { %p22098_p12 = pneg %p22097_p6  ;;  %p22104_p0 = por %p22103_p11, %p22102_p7 }
  0x6b   : > { %p22105_p9 = pnand %p22104_p0, %p22098_p12 }
  0x6d   : > { %22108 = shalt.err (!%p22105_p9)
}
  0x6e   : > { %19480 = dma.hbm_to_vmem [thread:$0]  (!%p22584_p10), %s22593_s19, 64, %s455_s7, %s25932_s25  }
  0x6f   : > { %s17055_s3 = sadd.s32 4294967290, %s22381_s18  ;;  %p17062_p9 = scmp.lt.s32.totalorder %s22518_s24, 1 }
  0x70   : > { %p190_p11 = scmp.gt.s32.totalorder %s17055_s3, 0  ;;  %p17056_p0 = scmp.lt.s32.totalorder %s17055_s3, 1 }
  0x71   : > { %p25973_p3 = scmp.gt.s32.totalorder %s22518_s24, 0  ;;  %s202_s1 = sadd.s32 1, %s22353_s11 }
  0x72   : > { %s26055_s3 = smov (!%p190_p11, %s17055_s3), 0  ;;  %p209_p8 = scmp.ne.s32.totalorder %s22353_s11, %s22349_s10 }
  0x73   : > { %s26053_s24 = smov (!%p25973_p3, %s22518_s24), 0  ;;  %s26059_s3 = smov (!%p17056_p0, %s26055_s3), 1 }
  0x74   : > { %s26057_s24 = smov (!%p17062_p9, %s26053_s24), 1  ;;  %p25974_p2 = scmp.eq.s32.totalorder %s22381_s18, 0 }
  0x75   : > { %s199_s5 = ssub.s32 %s26059_s3, %s26057_s24  ;;  %s22634_s19 = sand.u32 1, %s22353_s11  }
  0x76   : > { %p200_p1 = scmp.eq.s32.totalorder %s199_s5, 0  ;;  %p211_p5 = por %p209_p8, %p25974_p2 }
  0x77   : > { %s17117_s14 = sshll.u32 %s22634_s19, 12  ;;  %p25976_p6 = scmp.lt.s32.totalorder %s22381_s18, 8 }
  0x78   : > { %s22637_s7 = scalar_select %p200_p1, %s22353_s11, %s202_s1  }
  0x79   : > { %p22642_p12 = pnand %p25976_p6, %p211_p5  ;;  %s17126_s0 = sshll.u32 %s22634_s19, 2 }
  0x7a   : > { %25975 = sst [smem:[#allocation32_spill]] %s22637_s7  ;;  %s465_s24 = scalar_lea.vmem [#allocation12], %s17117_s14 }
  0x7b   : > { %s25977_s17 = scalar_select %p22642_p12, 1, 0 }
  0x7c   : > { %s477_s2 = sshll.u32 %s465_s24, 4  ;;  %s19374_s23 = sshll.u32 %s26059_s3, 6  ;;  %s22647_s2 = int_to_ptr.vmem [resolvable:$true] %s477_s2 }
  0x7d   : > { %25978 = sst [smem:[#allocation33_spill]] %s22647_s2  ;;  %s491_s20 = scalar_lea.vmem [#allocation13], %s17126_s0 }
  0x7e   : > { %s504_s9 = sshll.u32 %s491_s20, 4  ;;  %s25979_s6 = sld [smem:[#allocation45_spill]]  ;;  %s505_s9 = int_to_ptr.vmem [resolvable:$true] %s504_s9 }
  0x7f   : > { %p22656_p9 = pneg %p22642_p12 }
  0x81   : > { %s25980_s11 = scalar_select %p22656_p9, 1, 0 }
  0x84   : > { %s502_s1 = scalar_lea.hbm %s25979_s6, %s19374_s23  ;;  %s22114_s24 = scalar_lea.hbm %s25979_s6, 128 }
  0x85   : > { %s22109_s7 = scalar_lea.hbm %s502_s1, 64  ;;  %p22115_p3 = scmp.lt.s32.totalorder %s502_s1, %s25979_s6 }
  0x86   : > { %p22110_p7 = scmp.ne.s32.totalorder %s502_s1, %s22109_s7  ;;  %p22116_p8 = scmp.lt.s32.totalorder %s22114_s24, %s22109_s7 }
  0x88   : > { %p22112_p11 = pnand %p22656_p9, %p22110_p7  ;;  %p22117_p1 = por %p22116_p8, %p22115_p3 }
  0x8a   : > { %p22113_p0 = pneg %p22112_p11 }
  0x8c   : > { %p22118_p2 = pnand %p22117_p1, %p22113_p0 }
  0x8e   : > { %22121 = shalt.err (!%p22118_p2)
}
  0x8f   : > { %s22122_s23 = scalar_lea.vmem %s505_s9, 64  ;;  %s22385_s5 = smov [#allocation13]  }
  0x90   : > { %p22123_p5 = scmp.ne.s32.totalorder %s505_s9, %s22122_s23  ;;  %s22127_s4 = sshll.u32 %s22385_s5, 4  ;;  %s22128_s4 = int_to_ptr.vmem [resolvable:$false] %s22127_s4 }
  0x91   : > { %s22129_s2 = scalar_lea.vmem %s22128_s4, 128  ;;  %p22130_p7 = scmp.lt.s32.totalorder %s505_s9, %s22128_s4 }
  0x92   : > { %p22125_p6 = pnand %p22123_p5, %p22656_p9  ;;  %p22131_p11 = scmp.lt.s32.totalorder %s22129_s2, %s22122_s23 }
  0x94   : > { %p22126_p4 = pneg %p22125_p6  ;;  %p22132_p13 = por %p22131_p11, %p22130_p7 }
  0x96   : > { %p22133_p10 = pnand %p22132_p13, %p22126_p4 }
  0x98   : > { %22136 = shalt.err (!%p22133_p10)
}
  0x99   : > { %s25981_s7 = scalar_lea.sflag [#allocation14], %s22529_s27  ;;  %s17135_s4 = sshll.u32 %s22634_s19, 8 }
  0x9a   : > { %19486 = dma.hbm_to_vmem [thread:$0]  (!%p22642_p12), %s502_s1, 64, %s505_s9, %s25981_s7  }
  0x9b   : > { %s22676_s2 = sadd.s32 4294967295, %s22381_s18   ;;  %s515_s14 = scalar_lea.vmem [#allocation15], %s17135_s4 }
  0x9c   : > { %p25940_p10 = scmp.eq.s32.totalorder %s22676_s2, 0  ;;  %s527_s0 = sshll.u32 %s515_s14, 4  ;;  %s22680_s0 = int_to_ptr.vmem [resolvable:$true] %s527_s0 }
  0x9d   : > { %p17091_p4 = scmp.ge.s32.totalorder %s22381_s18, 1  ;;  %p25982_p13 = scmp.ne.s32.totalorder %s22373_s16, %s22369_s15 }
  0x9e   : > { %p25984_p3 = scmp.ne.s32.totalorder %s22361_s13, %s22357_s12  ;;  %p25986_p1 = scmp.ne.s32.totalorder %s22349_s10, %s22345_s30 }
  0x9f   : > { %p22687_p0 = por %p25940_p10, %p25982_p13  ;;  %p340_p5 = scmp.lt.s32.totalorder %s22381_s18, 9 }
  0xa0   : > { %p22696_p8 = por %p25984_p3, %p25940_p10  ;;  %p22705_p2 = por %p25986_p1, %p25940_p10 }
  0xa1   : > { %s25983_s9 = scalar_select %p22687_p0, 1, 0 }
  0xa2   : > { %s25985_s19 = scalar_select %p22696_p8, 1, 0 }
  0xa3   : > { %s25987_s1 = scalar_select %p22705_p2, 1, 0 }
  0xa4   : > { %s19361_s15 = sshll.u32 %s22506_s21, 10  ;;  %p22711_p6 = pnand %p17091_p4, %p340_p5 }
  0xa5   : > { %s22386_s20 = smov [#allocation16]   ;;  %s25989_s5 = sld [smem:[#allocation40_spill]] }
  0xa6   : > { %s25988_s24 = scalar_select %p22711_p6, 1, 0 }
  0xa7   : > { %s356_s25 = sshll.u32 %s22386_s20, 4  ;;  %p19464_p7 = pneg %p22711_p6  ;;  %s22715_s25 = int_to_ptr.vmem [resolvable:$true] %s356_s25 }
  0xa8   : > { %p25991_p13 = scmp.ne.s32.totalorder %s25964_s29, 0 }
  0xa9   : > { %p22726_p11 = pnand %p19464_p7, %p25940_p10 }
  0xaa   : > { %p25992_p3 = pneg %p25991_p13 }
  0xab   : > { %s22720_s7 = scalar_lea.hbm %s25989_s5, %s19361_s15  ;;  %s22142_s15 = scalar_lea.hbm %s25989_s5, 122880 }
  0xac   : > { %s22137_s21 = scalar_lea.hbm %s22720_s7, 61440  ;;  %p22143_p2 = scmp.lt.s32.totalorder %s22720_s7, %s25989_s5 }
  0xad   : > { %p22138_p4 = scmp.ne.s32.totalorder %s22720_s7, %s22137_s21  ;;  %p22144_p8 = scmp.lt.s32.totalorder %s22142_s15, %s22137_s21 }
  0xaf   : > { %p22140_p1 = pnand %p22138_p4, %p25992_p3  ;;  %p22145_p7 = por %p22144_p8, %p22143_p2 }
  0xb1   : > { %p22141_p5 = pneg %p22140_p1 }
  0xb3   : > { %p22146_p10 = pnand %p22145_p7, %p22141_p5 }
  0xb5   : > { %22149 = shalt.err (!%p22146_p10)
}
  0xb6   : > { %s25993_s23 = sld [smem:[#allocation30_spill]]  ;;  %p25994_p4 = pmov %p25992_p3 }
  0xb7   : > { %s22387_s4 = smov [#allocation5]  }
  0xb8   : > { %s22155_s14 = sshll.u32 %s22387_s4, 4  ;;  %s22156_s14 = int_to_ptr.vmem [resolvable:$false] %s22155_s14 }
  0xb9   : > { %s22157_s6 = scalar_lea.vmem %s22156_s14, 122880 }
  0xbc   : > { %s22150_s18 = scalar_lea.vmem %s25993_s23, 61440  ;;  %p22158_p6 = scmp.lt.s32.totalorder %s25993_s23, %s22156_s14 }
  0xbd   : > { %p22151_p0 = scmp.ne.s32.totalorder %s25993_s23, %s22150_s18  ;;  %p22159_p12 = scmp.lt.s32.totalorder %s22157_s6, %s22150_s18 }
  0xbf   : > { %p22153_p3 = pnand %p22151_p0, %p25994_p4  ;;  %p22160_p9 = por %p22159_p12, %p22158_p6 }
  0xc1   : > { %p22154_p1 = pneg %p22153_p3 }
  0xc3   : > { %p22161_p8 = pnand %p22160_p9, %p22154_p1 }
  0xc5   : > { %22164 = shalt.err (!%p22161_p8)
}
  0xc6   : > { %s22388_s21 = smov 2048   ;;  %s22389_s15 = smov 1024  }
  0xc7   : > { %s25947_s20 = smov 64   ;;  %s25995_s12 = scalar_lea.sflag [#allocation6], %s22526_s26 }
  0xc8   : > { %19471 = dma.hbm_to_vmem [thread:$0]  (!%p25991_p13), %s22720_s7, 61440, %s25993_s23, %s25995_s12, %s22388_s21, %s22389_s15, %s25947_s20  }
  0xc9   : > { %p22167_p12 = pneg %p22726_p11  ;;  %s22176_s6 = scalar_lea.vmem %s22715_s25, 16 }
  0xca   : > { %p22177_p9 = scmp.ne.s32.totalorder %s22715_s25, %s22176_s6  ;;  %s22183_s18 = scalar_lea.vmem %s22715_s25, 32 }
  0xcb   : > { %p22184_p2 = scmp.lt.s32.totalorder %s22715_s25, %s22715_s25  ;;  %p22185_p6 = scmp.lt.s32.totalorder %s22183_s18, %s22176_s6 }
  0xcc   : > { %p22179_p10 = pnand %p22177_p9, %p22167_p12 }
  0xcd   : > { %p22186_p5 = por %p22185_p6, %p22184_p2 }
  0xce   : > { %p22180_p0 = pneg %p22179_p10 }
  0xd0   : > { %p22187_p7 = pnand %p22186_p5, %p22180_p0 }
  0xd2   : > { %22190 = shalt.err (!%p22187_p7)
}
  0xd3   : > { %s25996_s26 = sld [smem:[#allocation47_spill]]  ;;  %s22191_s7 = scalar_lea.hbm %s22580_s28, 131072 }
  0xd4   : > { %p22192_p13 = scmp.ne.s32.totalorder %s22580_s28, %s22191_s7  ;;  %p25997_p4 = scmp.ne.s32.totalorder %s25971_s8, 0 }
  0xd5   : > { %s25999_s21 = sld [smem:[#allocation42_spill]] }
  0xd6   : > { %p25998_p3 = pneg %p25997_p4 }
  0xd8   : > { %p22194_p1 = pnand %p22192_p13, %p25998_p3 }
  0xd9   : > { %19467 = dma.hbm_to_vmem [thread:$0]  (!%p22726_p11), %s25996_s26, 16, %s22715_s25, [#allocation17]  }
  0xda   : > { %p22195_p8 = pneg %p22194_p1 }
  0xdb   : > { %s22196_s12 = scalar_lea.hbm %s25999_s21, 524288  ;;  %p22197_p12 = scmp.lt.s32.totalorder %s22580_s28, %s25999_s21 }
  0xdc   : > { %p22198_p9 = scmp.lt.s32.totalorder %s22196_s12, %s22191_s7 }
  0xde   : > { %p22199_p10 = por %p22198_p9, %p22197_p12 }
  0xe0   : > { %p22200_p0 = pnand %p22199_p10, %p22195_p8 }
  0xe2   : > { %22203 = shalt.err (!%p22200_p0)
}
  0xe3   : > { %s22204_s25 = scalar_lea.vmem %s22588_s22, 131072  ;;  %p26000_p2 = pmov %p25998_p3 }
  0xe4   : > { %p22205_p11 = scmp.ne.s32.totalorder %s22588_s22, %s22204_s25  ;;  %s22391_s18 = smov [#allocation9]  }
  0xe5   : > { %s22209_s29 = sshll.u32 %s22391_s18, 4  ;;  %s22210_s29 = int_to_ptr.vmem [resolvable:$false] %s22209_s29 }
  0xe6   : > { %p22207_p6 = pnand %p22205_p11, %p26000_p2  ;;  %s22211_s4 = scalar_lea.vmem %s22210_s29, 262144 }
  0xe7   : > { %p22212_p7 = scmp.lt.s32.totalorder %s22588_s22, %s22210_s29  ;;  %p22213_p13 = scmp.lt.s32.totalorder %s22211_s4, %s22204_s25 }
  0xe8   : > { %p22208_p5 = pneg %p22207_p6 }
  0xe9   : > { %p22214_p3 = por %p22213_p13, %p22212_p7 }
  0xeb   : > { %p22215_p1 = pnand %p22214_p3, %p22208_p5 }
  0xed   : > { %22218 = shalt.err (!%p22215_p1)
}
  0xee   : > { %s22392_s26 = smov 256   ;;  %s22393_s7 = smov 16  }
  0xef   : > { %s26001_s23 = scalar_lea.sflag [#allocation8], %s22529_s27  ;;  %s19371_s14 = sshll.u32 %s26059_s3, 8 }
  0xf0   : > { %19477 = dma.hbm_to_vmem [thread:$0]  (!%p25997_p4), %s22580_s28, 131072, %s22588_s22, %s26001_s23, %s22389_s15, %s22392_s26, %s22393_s7  }
  0xf1   : > { %s26002_s30 = sld [smem:[#allocation44_spill]]  ;;  %s19377_s18 = sshll.u32 %s26059_s3, 12 }
  0xf2   : > { %p26004_p12 = scmp.ne.s32.totalorder %s25980_s11, 0 }
  0xf7   : > { %s26003_s6 = smov %s26002_s30  ;;  %s22801_s25 = scalar_lea.hbm %s26002_s30, %s19371_s14 }
  0xf8   : > { %s22219_s29 = scalar_lea.hbm %s22801_s25, 65536  ;;  %s22224_s20 = scalar_lea.hbm %s26003_s6, 131072 }
  0xf9   : > { %p22220_p8 = scmp.ne.s32.totalorder %s22801_s25, %s22219_s29  ;;  %p22225_p4 = scmp.lt.s32.totalorder %s22801_s25, %s26003_s6 }
  0xfa   : > { %p22226_p0 = scmp.lt.s32.totalorder %s22224_s20, %s22219_s29 }
  0xfb   : > { %p22222_p9 = pnand %p22220_p8, %p26004_p12 }
  0xfc   : > { %p22227_p11 = por %p22226_p0, %p22225_p4 }
  0xfd   : > { %p22223_p10 = pneg %p22222_p9 }
  0xff   : > { %p22228_p2 = pnand %p22227_p11, %p22223_p10 }
 0x101   : > { %22231 = shalt.err (!%p22228_p2)
}
 0x102   : > { %s26005_s15 = sld [smem:[#allocation33_spill]]  ;;  %s22394_s14 = smov [#allocation12]  }
 0x103   : > { %s22237_s21 = sshll.u32 %s22394_s14, 4  ;;  %s22238_s21 = int_to_ptr.vmem [resolvable:$false] %s22237_s21 }
 0x104   : > { %s22239_s12 = scalar_lea.vmem %s22238_s21, 131072 }
 0x108   : > { %s22232_s23 = scalar_lea.vmem %s26005_s15, 65536  ;;  %p22240_p13 = scmp.lt.s32.totalorder %s26005_s15, %s22238_s21 }
 0x109   : > { %p22233_p6 = scmp.ne.s32.totalorder %s26005_s15, %s22232_s23  ;;  %p22241_p3 = scmp.lt.s32.totalorder %s22239_s12, %s22232_s23 }
 0x10b   : > { %p22235_p5 = pnand %p22233_p6, %p26004_p12  ;;  %p22242_p1 = por %p22241_p3, %p22240_p13 }
 0x10d   : > { %p22236_p7 = pneg %p22235_p5 }
 0x10f   : > { %p22243_p8 = pnand %p22242_p1, %p22236_p7 }
 0x111   : > { %22246 = shalt.err (!%p22243_p8)
}
 0x112   : > { %s22395_s20 = smov 512   ;;  %p26006_p9 = scmp.ne.s32.totalorder %s25977_s17, 0 }
 0x113   : > { %s26007_s30 = scalar_lea.sflag [#allocation11], %s22529_s27  ;;  %s26008_s4 = sld [smem:[#allocation46_spill]] }
 0x114   : > { %19483 = dma.hbm_to_vmem [thread:$0]  (!%p26006_p9), %s22801_s25, 65536, %s26005_s15, %s26007_s30, %s22395_s20, %s22392_s26, %s22393_s7  }
 0x119   : > { %s22833_s28 = scalar_lea.hbm %s26008_s4, %s19377_s18  ;;  %s22252_s21 = scalar_lea.hbm %s26008_s4, 8192 }
 0x11a   : > { %s22247_s22 = scalar_lea.hbm %s22833_s28, 4096  ;;  %p22253_p11 = scmp.lt.s32.totalorder %s22833_s28, %s26008_s4 }
 0x11b   : > { %p22248_p10 = scmp.ne.s32.totalorder %s22833_s28, %s22247_s22  ;;  %p22254_p2 = scmp.lt.s32.totalorder %s22252_s21, %s22247_s22 }
 0x11d   : > { %p22250_p4 = pnand %p22248_p10, %p26004_p12  ;;  %p22255_p6 = por %p22254_p2, %p22253_p11 }
 0x11f   : > { %p22251_p0 = pneg %p22250_p4 }
 0x121   : > { %p22256_p5 = pnand %p22255_p6, %p22251_p0 }
 0x123   : > { %22259 = shalt.err (!%p22256_p5)
}
 0x124   : > { %s22260_s3 = scalar_lea.vmem %s22680_s0, 4096  ;;  %s22396_s7 = smov [#allocation15]  }
 0x125   : > { %p22261_p7 = scmp.ne.s32.totalorder %s22680_s0, %s22260_s3  ;;  %s22265_s25 = sshll.u32 %s22396_s7, 4  ;;  %s22266_s25 = int_to_ptr.vmem [resolvable:$false] %s22265_s25 }
 0x126   : > { %s22267_s18 = scalar_lea.vmem %s22266_s25, 8192  ;;  %p22268_p1 = scmp.lt.s32.totalorder %s22680_s0, %s22266_s25 }
 0x127   : > { %p22263_p13 = pnand %p22261_p7, %p26004_p12  ;;  %p22269_p8 = scmp.lt.s32.totalorder %s22267_s18, %s22260_s3 }
 0x129   : > { %p22264_p3 = pneg %p22263_p13  ;;  %p22270_p10 = por %p22269_p8, %p22268_p1 }
 0x12b   : > { %p22271_p4 = pnand %p22270_p10, %p22264_p3 }
 0x12d   : > { %22274 = shalt.err (!%p22271_p4)
}
 0x12e   : > { %s22397_s15 = smov 4   ;;  %s26009_s20 = smov 64  }
 0x12f   : > { %s26010_s30 = scalar_lea.sflag [#allocation14], %s22529_s27  ;;  %p26011_p12 = scmp.ne.s32.totalorder %s25988_s24, 0 }
 0x130   : > { %19489 = dma.hbm_to_vmem [thread:$0]  (!%p26006_p9), %s22833_s28, 4096, %s22680_s0, %s26010_s30, %s26009_s20, %s26009_s20, %s22397_s15  }
 0x131   : > { %539 = sbr.rel (%p26011_p12) target bundleno = 3286 (0xcd6), region = 56  ;;  %s541_s11 = sand.u32 (!%p26011_p12), 1, %s22373_s16  }
 0x132   : > { %s19445_s29 = smul.u32 (!%p26011_p12), 3840, %s541_s11  ;;  %s542_s8 = scalar_lea.sflag (!%p26011_p12), [#allocation6], %s541_s11 }
 0x133   : > { %p26012_p0 = scmp.ne.s32.totalorder (!%p26011_p12), %s25983_s9, 0 }
 0x134   : > { %s22862_s22 = scalar_lea.vmem (!%p26011_p12), [#allocation5], %s19445_s29 }
 0x136   : > { %22316 = dma.done.wait (%p26012_p0), %s542_s8, 61440  }
 0x137   : > { %22318 = vsyncadd (%p26012_p0), %s542_s8, 4294905856  ;;  %s550_s27 = sand.u32 1, %s22676_s2   ;;  %s17145_s17 = sshll.u32 %s541_s11, 4 }
 0x138   : > { %s551_s0 = scalar_lea.sflag [#allocation8], %s550_s27  ;;  %s22869_s28 = scalar_lea.vmem [#allocation7], %s17145_s17 }
 0x139   : > { %22320 = dma.done.wait (%p26012_p0), %s551_s0, 256  }
 0x13a   : > { %22322 = vsyncadd (%p26012_p0), %s551_s0, 4294967040  ;;  %s561_s24 = sand.u32 1, %s22361_s13   ;;  %p26013_p9 = scmp.ne.s32.totalorder %s25985_s19, 0 }
 0x13b   : > { %s17146_s23 = sshll.u32 %s561_s24, 13 }
 0x13c   : > { %s22876_s14 = scalar_lea.vmem [#allocation9], %s17146_s23 }
 0x13d   : > { %22324 = dma.done.wait (%p26013_p9), %s551_s0, 131072  }
 0x13e   : > { %22326 = vsyncadd (%p26013_p9), %s551_s0, 4294836224  ;;  %s22882_s21 = sshll.u32 %s561_s24, 2  ;;  %s569_s12 = scalar_lea.sflag [#allocation11], %s550_s27 }
 0x13f   : > { %s572_s26 = scalar_lea.vmem [#allocation10], %s22882_s21 }
 0x140   : > { %22328 = dma.done.wait (%p26013_p9), %s569_s12, 64  }
 0x141   : > { %22330 = vsyncadd (%p26013_p9), %s569_s12, 4294967232  ;;  %s579_s9 = sand.u32 1, %s22349_s10   ;;  %p26014_p11 = scmp.ne.s32.totalorder %s25987_s1, 0 }
 0x142   : > { %s17148_s3 = sshll.u32 %s579_s9, 12 }
 0x143   : > { %s22890_s7 = scalar_lea.vmem [#allocation12], %s17148_s3 }
 0x144   : > { %22332 = dma.done.wait (%p26014_p11), %s569_s12, 65536  }
 0x145   : > { %22334 = vsyncadd (%p26014_p11), %s569_s12, 4294901760  ;;  %s17149_s25 = sshll.u32 %s579_s9, 2  ;;  %s587_s18 = scalar_lea.sflag [#allocation14], %s550_s27 }
 0x146   : > { %s22896_s15 = scalar_lea.vmem [#allocation13], %s17149_s25 }
 0x147   : > { %22336 = dma.done.wait (%p26014_p11), %s587_s18, 4160  }
 0x148   : > { %22338 = vsyncadd (%p26014_p11), %s587_s18, 4294963136  ;;  %s17150_s19 = sshll.u32 %s579_s9, 8  ;;  %p26015_p2 = scmp.eq.s32.totalorder %s22676_s2, 0 }
 0x149   : > { %s22902_s20 = scalar_lea.vmem [#allocation15], %s17150_s19 }
 0x14a   : > { %22340 = dma.done.wait (%p26015_p2), [#allocation17], 16   ;;  %p26016_p6 = pmov %p26015_p2 }
 0x14b   : > { %p17152_p5 = scmp.ge.s32.totalorder %s22676_s2, 2 }
 0x14c   : > { %22342 = vsyncadd (%p26016_p6), [#allocation17], 4294967280  ;;  %s26017_s11 = sld [smem:[#allocation39_spill]] (!%p17152_p5) }
 0x14d   : > { %703 = sbr.rel (%p17152_p5) target bundleno = 1052 (0x41c), region = 92 }
 0x152   : > { %v820_v0 = vld [vmem:[%s22862_s22 + $0x380] sm:$0xff]  ;;  %s26018_s29 = smov %s26017_s11  ;;  %v22942_v50 = vld [vmem:[%s26017_s11 + $0xc] ss:$16 sps:$4 sm:$0xff]   ;;  %vm3691_vm0 = vcmask 785408   ;;  %s19394_s11 = sshll.u32 %s22676_s2, 7 }
 0x153   : > { %v828_v1 = vld [vmem:[%s22862_s22 + $0x3c0] sm:$0xff]  ;;  %17637 = vmatprep.mubr.msk.bf16.mxu1 %vm3691_vm0, %v22942_v50  ;;  %s23300_s8 = scalar_lea.vmem [#allocation2], %s19394_s11 }
 0x154   : > { %v1076_v2 = vld [vmem:[%s22862_s22 + $0xb80] sm:$0xff]  ;;  %v17270_v3 = vcombine.high %v820_v0, %v828_v1  ;;  %v17269_v5 = vcombine.low %v820_v0, %v828_v1 }
 0x155   : > { %v1084_v4 = vld [vmem:[%s22862_s22 + $0xbc0] sm:$0xff] }
 0x156   : > { %v804_v6 = vld [vmem:[%s22862_s22 + $0x300] sm:$0xff]  ;;  %v17526_v8 = vcombine.high %v1076_v2, %v1084_v4  ;;  %v17525_v9 = vcombine.low %v1076_v2, %v1084_v4  ;;  %3695 = vmatprep.subr.bf16.mxu0 %v17270_v3 }
 0x157   : > { %v812_v7 = vld [vmem:[%s22862_s22 + $0x340] sm:$0xff]  ;;  %3696 = vmatpush1.bf16.msra.mxu0 %v17269_v5 }
 0x158   : > { %v17254_v10 = vcombine.high %v804_v6, %v812_v7  ;;  %v1060_v11 = vld [vmem:[%s22862_s22 + $0xb00] sm:$0xff]  ;;  %3738 = vmatprep.subr.bf16.mxu1 %v17526_v8  ;;  %v17253_v18 = vcombine.low %v804_v6, %v812_v7 }
 0x159   : > { %v1068_v12 = vld [vmem:[%s22862_s22 + $0xb40] sm:$0xff]  ;;  %3739 = vmatpush1.bf16.msra.mxu1 %v17525_v9 }
 0x15a   : > { %v788_v13 = vld [vmem:[%s22862_s22 + $0x280] sm:$0xff]  ;;  %v17510_v14 = vcombine.high %v1060_v11, %v1068_v12  ;;  %3697 = vmatprep.subr.bf16.mxu0 %v17254_v10  ;;  %v17509_v19 = vcombine.low %v1060_v11, %v1068_v12 }
 0x15b   : > { %v796_v15 = vld [vmem:[%s22862_s22 + $0x2c0] sm:$0xff]  ;;  %3698 = vmatpush1.bf16.msra.mxu0 %v17253_v18 }
 0x15c   : > { %v1044_v16 = vld [vmem:[%s22862_s22 + $0xa80] sm:$0xff]  ;;  %v17238_v20 = vcombine.high %v788_v13, %v796_v15  ;;  %3740 = vmatprep.subr.bf16.mxu1 %v17510_v14  ;;  %v17237_v26 = vcombine.low %v788_v13, %v796_v15 }
 0x15d   : > { %v1052_v17 = vld [vmem:[%s22862_s22 + $0xac0] sm:$0xff]  ;;  %3741 = vmatpush1.bf16.msra.mxu1 %v17509_v19 }
 0x15e   : > { %v17494_v21 = vcombine.high %v1044_v16, %v1052_v17  ;;  %v772_v22 = vld [vmem:[%s22862_s22 + $0x200] sm:$0xff]  ;;  %3699 = vmatprep.subr.bf16.mxu0 %v17238_v20  ;;  %v17493_v27 = vcombine.low %v1044_v16, %v1052_v17 }
 0x15f   : > { %v780_v23 = vld [vmem:[%s22862_s22 + $0x240] sm:$0xff]  ;;  %3700 = vmatpush1.bf16.msra.mxu0 %v17237_v26 }
 0x160   : > { %v1028_v24 = vld [vmem:[%s22862_s22 + $0xa00] sm:$0xff]  ;;  %v17222_v28 = vcombine.high %v772_v22, %v780_v23  ;;  %3742 = vmatprep.subr.bf16.mxu1 %v17494_v21  ;;  %v17221_v34 = vcombine.low %v772_v22, %v780_v23 }
 0x161   : > { %v1036_v25 = vld [vmem:[%s22862_s22 + $0xa40] sm:$0xff]  ;;  %3743 = vmatpush1.bf16.msra.mxu1 %v17493_v27 }
 0x162   : > { %v17478_v29 = vcombine.high %v1028_v24, %v1036_v25  ;;  %v756_v30 = vld [vmem:[%s22862_s22 + $0x180] sm:$0xff]  ;;  %3701 = vmatprep.subr.bf16.mxu0 %v17222_v28  ;;  %v17477_v35 = vcombine.low %v1028_v24, %v1036_v25 }
 0x163   : > { %v764_v31 = vld [vmem:[%s22862_s22 + $0x1c0] sm:$0xff]  ;;  %3702 = vmatpush1.bf16.msra.mxu0 %v17221_v34 }
 0x164   : > { %v1012_v32 = vld [vmem:[%s22862_s22 + $0x980] sm:$0xff]  ;;  %v17206_v36 = vcombine.high %v756_v30, %v764_v31  ;;  %3744 = vmatprep.subr.bf16.mxu1 %v17478_v29  ;;  %v17205_v42 = vcombine.low %v756_v30, %v764_v31 }
 0x165   : > { %v1020_v33 = vld [vmem:[%s22862_s22 + $0x9c0] sm:$0xff]  ;;  %3745 = vmatpush1.bf16.msra.mxu1 %v17477_v35 }
 0x166   : > { %v17462_v37 = vcombine.high %v1012_v32, %v1020_v33  ;;  %v740_v38 = vld [vmem:[%s22862_s22 + $0x100] sm:$0xff]  ;;  %3703 = vmatprep.subr.bf16.mxu0 %v17206_v36  ;;  %v17461_v43 = vcombine.low %v1012_v32, %v1020_v33 }
 0x167   : > { %v748_v39 = vld [vmem:[%s22862_s22 + $0x140] sm:$0xff]  ;;  %3704 = vmatpush1.bf16.msra.mxu0 %v17205_v42 }
 0x168   : > { %v996_v40 = vld [vmem:[%s22862_s22 + $0x900] sm:$0xff]  ;;  %v17190_v44 = vcombine.high %v740_v38, %v748_v39  ;;  %3746 = vmatprep.subr.bf16.mxu1 %v17462_v37  ;;  %v17189_v51 = vcombine.low %v740_v38, %v748_v39 }
 0x169   : > { %v1004_v41 = vld [vmem:[%s22862_s22 + $0x940] sm:$0xff]  ;;  %3747 = vmatpush1.bf16.msra.mxu1 %v17461_v43 }
 0x16a   : > { %v724_v45 = vld [vmem:[%s22862_s22 + $0x80] sm:$0xff]  ;;  %v17446_v46 = vcombine.high %v996_v40, %v1004_v41  ;;  %3705 = vmatprep.subr.bf16.mxu0 %v17190_v44  ;;  %v17445_v52 = vcombine.low %v996_v40, %v1004_v41 }
 0x16b   : > { %v732_v47 = vld [vmem:[%s22862_s22 + $0xc0] sm:$0xff]  ;;  %3706 = vmatpush1.bf16.msra.mxu0 %v17189_v51  ;;  %v821_v51 = vld [vmem:[%s22862_s22 + $0x388] sm:$0xff] }
 0x16c   : > { %v980_v48 = vld [vmem:[%s22862_s22 + $0x880] sm:$0xff]  ;;  %v17174_v53 = vcombine.high %v724_v45, %v732_v47  ;;  %3748 = vmatprep.subr.bf16.mxu1 %v17446_v46  ;;  %v17173_v60 = vcombine.low %v724_v45, %v732_v47 }
 0x16d   : > { %v988_v49 = vld [vmem:[%s22862_s22 + $0x8c0] sm:$0xff]  ;;  %3749 = vmatpush1.bf16.msra.mxu1 %v17445_v52  ;;  %v829_v52 = vld [vmem:[%s22862_s22 + $0x3c8] sm:$0xff] }
 0x16e   : > { %v708_v54 = vld [vmem:[%s22862_s22] sm:$0xff]  ;;  %v17430_v55 = vcombine.high %v980_v48, %v988_v49  ;;  %3707 = vmatprep.subr.bf16.mxu0 %v17174_v53  ;;  %v17429_v61 = vcombine.low %v980_v48, %v988_v49 }
 0x16f   : > { %v716_v56 = vld [vmem:[%s22862_s22 + $0x40] sm:$0xff]  ;;  %3708 = vmatpush1.bf16.msra.mxu0 %v17173_v60  ;;  %v805_v60 = vld [vmem:[%s22862_s22 + $0x308] sm:$0xff] }
 0x170   : > { %v964_v57 = vld [vmem:[%s22862_s22 + $0x800] sm:$0xff]  ;;  %v17158_v62 = vcombine.high %v708_v54, %v716_v56  ;;  %3750 = vmatprep.subr.bf16.mxu1 %v17430_v55  ;;  %v17157_v4 = vcombine.low %v708_v54, %v716_v56  ;;  %v17272_v56 = vcombine.high %v821_v51, %v829_v52 }
 0x171   : > { %v972_v58 = vld [vmem:[%s22862_s22 + $0x840] sm:$0xff]  ;;  %3751 = vmatpush1.bf16.msra.mxu1 %v17429_v61  ;;  %v813_v61 = vld [vmem:[%s22862_s22 + $0x348] sm:$0xff] }
 0x172   : > { %v22953_v59 = vld [vmem:[%s26018_s29 + $0x4] ss:$16 sps:$4 sm:$0xff]   ;;  %v17414_v63 = vcombine.high %v964_v57, %v972_v58  ;;  %3709 = vmatprep.subr.bf16.mxu0 %v17158_v62  ;;  %v17413_v5 = vcombine.low %v964_v57, %v972_v58  ;;  %v22991_v62 = vld [vmem:[%s26018_s29 + $0x8] ss:$16 sps:$4 sm:$0xff]  }
 0x173   : > { %v948_v0 = vld [vmem:[%s22862_s22 + $0x780] sm:$0xff]  ;;  %3727 = vmatprep.mubr.bf16.mxu0 %v22953_v59  ;;  %3710 = vmatpush1.bf16.msra.mxu0 %v17157_v4  ;;  %v1085_v4 = vld [vmem:[%s22862_s22 + $0xbc8] sm:$0xff] }
 0x174   : > { %v956_v1 = vld [vmem:[%s22862_s22 + $0x7c0] sm:$0xff]  ;;  %3752 = vmatprep.subr.bf16.mxu1 %v17414_v63 }
 0x175   : > { %v1172_v2 = vld [vmem:[%s22862_s22 + $0xe80] sm:$0xff]  ;;  %v17398_v6 = vcombine.high %v948_v0, %v956_v1  ;;  %v17397_v12 = vcombine.low %v948_v0, %v956_v1  ;;  %3753 = vmatpush1.bf16.msra.mxu1 %v17413_v5  ;;  %v17271_v0 = vcombine.low %v821_v51, %v829_v52  ;;  %v789_v5 = vld [vmem:[%s22862_s22 + $0x288] sm:$0xff] }
 0x176   : > { %v1180_v3 = vld [vmem:[%s22862_s22 + $0xec0] sm:$0xff] }
 0x177   : > { %v17622_v7 = vcombine.high %v1172_v2, %v1180_v3  ;;  %v932_v8 = vld [vmem:[%s22862_s22 + $0x700] sm:$0xff]  ;;  %3711 = vmatprep.subr.bf16.mxu0 %v17398_v6  ;;  %v17621_v13 = vcombine.low %v1172_v2, %v1180_v3  ;;  %v17256_v2 = vcombine.high %v805_v60, %v813_v61  ;;  %v1077_v3 = vld [vmem:[%s22862_s22 + $0xb88] sm:$0xff] }
 0x178   : > { %v940_v9 = vld [vmem:[%s22862_s22 + $0x740] sm:$0xff]  ;;  %3712 = vmatpush2.bf16.msra.mxu0 %v17397_v12  ;;  %v797_v6 = vld [vmem:[%s22862_s22 + $0x2c8] sm:$0xff] }
 0x179   : > { %v1156_v10 = vld [vmem:[%s22862_s22 + $0xe00] sm:$0xff]  ;;  %v17382_v14 = vcombine.high %v932_v8, %v940_v9  ;;  %3758 = vmatprep.subr.bf16.mxu1 %v17622_v7  ;;  %v17381_v20 = vcombine.low %v932_v8, %v940_v9  ;;  %v17255_v8 = vcombine.low %v805_v60, %v813_v61  ;;  %v17528_v9 = vcombine.high %v1077_v3, %v1085_v4  ;;  %v1069_v12 = vld [vmem:[%s22862_s22 + $0xb48] sm:$0xff] }
 0x17a   : > { %v1164_v11 = vld [vmem:[%s22862_s22 + $0xe40] sm:$0xff]  ;;  %3759 = vmatpush2.bf16.msra.mxu1 %v17621_v13 }
 0x17b   : > { %v17606_v15 = vcombine.high %v1156_v10, %v1164_v11  ;;  %v916_v16 = vld [vmem:[%s22862_s22 + $0x680] sm:$0xff]  ;;  %3713 = vmatprep.subr.bf16.mxu0 %v17382_v14  ;;  %v17605_v21 = vcombine.low %v1156_v10, %v1164_v11  ;;  %v17240_v10 = vcombine.high %v789_v5, %v797_v6  ;;  %v1061_v11 = vld [vmem:[%s22862_s22 + $0xb08] sm:$0xff] }
 0x17c   : > { %v924_v17 = vld [vmem:[%s22862_s22 + $0x6c0] sm:$0xff]  ;;  %3714 = vmatpush2.bf16.msra.mxu0 %v17381_v20  ;;  %v773_v14 = vld [vmem:[%s22862_s22 + $0x208] sm:$0xff] }
 0x17d   : > { %v1140_v18 = vld [vmem:[%s22862_s22 + $0xd80] sm:$0xff]  ;;  %v17366_v22 = vcombine.high %v916_v16, %v924_v17  ;;  %3760 = vmatprep.subr.bf16.mxu1 %v17606_v15  ;;  %v17365_v28 = vcombine.low %v916_v16, %v924_v17  ;;  %v781_v15 = vld [vmem:[%s22862_s22 + $0x248] sm:$0xff]  ;;  %v17527_v16 = vcombine.low %v1077_v3, %v1085_v4  ;;  %v17239_v17 = vcombine.low %v789_v5, %v797_v6 }
 0x17e   : > { %v1148_v19 = vld [vmem:[%s22862_s22 + $0xdc0] sm:$0xff]  ;;  %3761 = vmatpush2.bf16.msra.mxu1 %v17605_v21  ;;  %v1045_v20 = vld [vmem:[%s22862_s22 + $0xa88] sm:$0xff] }
 0x17f   : > { %v17590_v23 = vcombine.high %v1140_v18, %v1148_v19  ;;  %v900_v24 = vld [vmem:[%s22862_s22 + $0x600] sm:$0xff]  ;;  %3715 = vmatprep.subr.bf16.mxu0 %v17366_v22  ;;  %v17589_v29 = vcombine.low %v1140_v18, %v1148_v19  ;;  %v17512_v18 = vcombine.high %v1061_v11, %v1069_v12  ;;  %v17224_v19 = vcombine.high %v773_v14, %v781_v15  ;;  %v1053_v21 = vld [vmem:[%s22862_s22 + $0xac8] sm:$0xff] }
 0x180   : > { %v908_v25 = vld [vmem:[%s22862_s22 + $0x640] sm:$0xff]  ;;  %3716 = vmatpush2.bf16.msra.mxu0 %v17365_v28  ;;  %v757_v22 = vld [vmem:[%s22862_s22 + $0x188] sm:$0xff] }
 0x181   : > { %v1124_v26 = vld [vmem:[%s22862_s22 + $0xd00] sm:$0xff]  ;;  %v17350_v30 = vcombine.high %v900_v24, %v908_v25  ;;  %3762 = vmatprep.subr.bf16.mxu1 %v17590_v23  ;;  %v17349_v36 = vcombine.low %v900_v24, %v908_v25  ;;  %v765_v23 = vld [vmem:[%s22862_s22 + $0x1c8] sm:$0xff]  ;;  %v17511_v24 = vcombine.low %v1061_v11, %v1069_v12  ;;  %v17223_v25 = vcombine.low %v773_v14, %v781_v15 }
 0x182   : > { %v1132_v27 = vld [vmem:[%s22862_s22 + $0xd40] sm:$0xff]  ;;  %3763 = vmatpush2.bf16.msra.mxu1 %v17589_v29  ;;  %v1029_v28 = vld [vmem:[%s22862_s22 + $0xa08] sm:$0xff] }
 0x183   : > { %v17574_v31 = vcombine.high %v1124_v26, %v1132_v27  ;;  %v884_v32 = vld [vmem:[%s22862_s22 + $0x580] sm:$0xff]  ;;  %3717 = vmatprep.subr.bf16.mxu0 %v17350_v30  ;;  %v17573_v37 = vcombine.low %v1124_v26, %v1132_v27  ;;  %v17496_v26 = vcombine.high %v1045_v20, %v1053_v21  ;;  %v17208_v27 = vcombine.high %v757_v22, %v765_v23  ;;  %v1037_v29 = vld [vmem:[%s22862_s22 + $0xa48] sm:$0xff] }
 0x184   : > { %v892_v33 = vld [vmem:[%s22862_s22 + $0x5c0] sm:$0xff]  ;;  %3718 = vmatpush2.bf16.msra.mxu0 %v17349_v36  ;;  %v741_v30 = vld [vmem:[%s22862_s22 + $0x108] sm:$0xff] }
 0x185   : > { %v1108_v34 = vld [vmem:[%s22862_s22 + $0xc80] sm:$0xff]  ;;  %v17334_v38 = vcombine.high %v884_v32, %v892_v33  ;;  %3764 = vmatprep.subr.bf16.mxu1 %v17574_v31  ;;  %v17333_v44 = vcombine.low %v884_v32, %v892_v33  ;;  %v749_v31 = vld [vmem:[%s22862_s22 + $0x148] sm:$0xff]  ;;  %v17495_v32 = vcombine.low %v1045_v20, %v1053_v21  ;;  %v17207_v33 = vcombine.low %v757_v22, %v765_v23 }
 0x186   : > { %v1116_v35 = vld [vmem:[%s22862_s22 + $0xcc0] sm:$0xff]  ;;  %3765 = vmatpush2.bf16.msra.mxu1 %v17573_v37  ;;  %v1013_v36 = vld [vmem:[%s22862_s22 + $0x988] sm:$0xff] }
 0x187   : > { %v17558_v39 = vcombine.high %v1108_v34, %v1116_v35  ;;  %v868_v40 = vld [vmem:[%s22862_s22 + $0x500] sm:$0xff]  ;;  %3719 = vmatprep.subr.bf16.mxu0 %v17334_v38  ;;  %v17557_v45 = vcombine.low %v1108_v34, %v1116_v35  ;;  %v17480_v34 = vcombine.high %v1029_v28, %v1037_v29  ;;  %v17192_v35 = vcombine.high %v741_v30, %v749_v31  ;;  %v1021_v37 = vld [vmem:[%s22862_s22 + $0x9c8] sm:$0xff] }
 0x188   : > { %v876_v41 = vld [vmem:[%s22862_s22 + $0x540] sm:$0xff]  ;;  %3720 = vmatpush2.bf16.msra.mxu0 %v17333_v44  ;;  %v725_v38 = vld [vmem:[%s22862_s22 + $0x88] sm:$0xff] }
 0x189   : > { %v1092_v42 = vld [vmem:[%s22862_s22 + $0xc00] sm:$0xff]  ;;  %v17318_v46 = vcombine.high %v868_v40, %v876_v41  ;;  %3766 = vmatprep.subr.bf16.mxu1 %v17558_v39  ;;  %v17317_v53 = vcombine.low %v868_v40, %v876_v41  ;;  %v733_v39 = vld [vmem:[%s22862_s22 + $0xc8] sm:$0xff]  ;;  %v17479_v40 = vcombine.low %v1029_v28, %v1037_v29  ;;  %v17191_v41 = vcombine.low %v741_v30, %v749_v31 }
 0x18a   : > { %v1100_v43 = vld [vmem:[%s22862_s22 + $0xc40] sm:$0xff]  ;;  %3767 = vmatpush2.bf16.msra.mxu1 %v17557_v45  ;;  %v997_v44 = vld [vmem:[%s22862_s22 + $0x908] sm:$0xff] }
 0x18b   : > { %v17542_v47 = vcombine.high %v1092_v42, %v1100_v43  ;;  %v852_v48 = vld [vmem:[%s22862_s22 + $0x480] sm:$0xff]  ;;  %3721 = vmatprep.subr.bf16.mxu0 %v17318_v46  ;;  %v17541_v54 = vcombine.low %v1092_v42, %v1100_v43  ;;  %v17464_v42 = vcombine.high %v1013_v36, %v1021_v37  ;;  %v17176_v43 = vcombine.high %v725_v38, %v733_v39  ;;  %v1005_v45 = vld [vmem:[%s22862_s22 + $0x948] sm:$0xff] }
 0x18c   : > { %v860_v49 = vld [vmem:[%s22862_s22 + $0x4c0] sm:$0xff]  ;;  %3722 = vmatpush2.bf16.msra.mxu0 %v17317_v53  ;;  %v709_v46 = vld [vmem:[%s22862_s22 + $0x8] sm:$0xff]  ;;  %v17448_v51 = vcombine.high %v997_v44, %v1005_v45 }
 0x18d   : > { %v17302_v55 = vcombine.high %v852_v48, %v860_v49  ;;  %3768 = vmatprep.subr.bf16.mxu1 %v17542_v47  ;;  %v836_v57 = vld [vmem:[%s22862_s22 + $0x400] sm:$0xff]  ;;  %v17301_v63 = vcombine.low %v852_v48, %v860_v49  ;;  %v717_v47 = vld [vmem:[%s22862_s22 + $0x48] sm:$0xff]  ;;  %v17463_v48 = vcombine.low %v1013_v36, %v1021_v37  ;;  %v17175_v49 = vcombine.low %v725_v38, %v733_v39 }
 0x18e   : > { %v844_v58 = vld [vmem:[%s22862_s22 + $0x440] sm:$0xff]  ;;  %3769 = vmatpush2.bf16.msra.mxu1 %v17541_v54  ;;  %v17160_v52 = vcombine.high %v709_v46, %v717_v47  ;;  %v981_v53 = vld [vmem:[%s22862_s22 + $0x888] sm:$0xff] }
 0x18f   : > { %3723 = vmatprep.subr.bf16.mxu0 %v17302_v55  ;;  %v17286_v1 = vcombine.high %v836_v57, %v844_v58  ;;  %3781 = vmatprep.subr.bf16.mxu1 %v17272_v56  ;;  %v17285_v7 = vcombine.low %v836_v57, %v844_v58  ;;  %v23004_v13 = vld [vmem:[%s26018_s29] ss:$16 sps:$4 sm:$0xff]   ;;  %v989_v54 = vld [vmem:[%s22862_s22 + $0x8c8] sm:$0xff]  ;;  %v17447_v57 = vcombine.low %v997_v44, %v1005_v45 }
 0x190   : > { %3724 = vmatpush2.bf16.msra.mxu0 %v17301_v63  ;;  %v949_v55 = vld [vmem:[%s22862_s22 + $0x788] sm:$0xff]  ;;  %v17159_v58 = vcombine.low %v709_v46, %v717_v47  ;;  %v17432_v60 = vcombine.high %v981_v53, %v989_v54  ;;  %v17431_v3 = vcombine.low %v981_v53, %v989_v54 }
 0x191   : > { %3771 = vmatmul.mubr.bf16.vlgmr.msra.gmra.mxu1 %v22991_v62  ;;  %3725 = vmatprep.subr.bf16.mxu0 %v17286_v1  ;;  %v957_v56 = vld [vmem:[%s22862_s22 + $0x7c8] sm:$0xff] }
 0x192   : > { %3782 = vmatpush1.bf16.msra.mxu1 %v17271_v0  ;;  %3813 = vmatprep.mubr.bf16.mxu1 %v22953_v59  ;;  %v17400_v61 = vcombine.high %v949_v55, %v957_v56  ;;  %v965_v63 = vld [vmem:[%s22862_s22 + $0x808] sm:$0xff]  ;;  %v17399_v4 = vcombine.low %v949_v55, %v957_v56 }
 0x193   : > { %3783 = vmatprep.subr.bf16.mxu1 %v17256_v2  ;;  %v973_v0 = vld [vmem:[%s22862_s22 + $0x848] sm:$0xff] }
 0x194   : > { %3726 = vmatpush2.bf16.msra.mxu0 %v17285_v7  ;;  %v933_v1 = vld [vmem:[%s22862_s22 + $0x708] sm:$0xff]  ;;  %v17416_v5 = vcombine.high %v965_v63, %v973_v0  ;;  %v17415_v11 = vcombine.low %v965_v63, %v973_v0 }
 0x195   : > { %3824 = vmatprep.subr.bf16.mxu0 %v17528_v9  ;;  %v941_v2 = vld [vmem:[%s22862_s22 + $0x748] sm:$0xff] }
 0x196   : > { %3784 = vmatpush1.bf16.msra.mxu1 %v17255_v8  ;;  %v17384_v6 = vcombine.high %v933_v1, %v941_v2  ;;  %v1173_v7 = vld [vmem:[%s22862_s22 + $0xe88] sm:$0xff]  ;;  %v17383_v12 = vcombine.low %v933_v1, %v941_v2 }
 0x197   : > { %3785 = vmatprep.subr.bf16.mxu1 %v17240_v10  ;;  %3728 = vmatmul.mubr.bf16.vlgmr.msra.gmra.mxu0 %v23004_v13  ;;  %v1181_v8 = vld [vmem:[%s22862_s22 + $0xec8] sm:$0xff] }
 0x198   : > { %3825 = vmatpush1.bf16.msra.mxu0 %v17527_v16  ;;  %17638 = vmatprep.mubr.msk.bf16.mxu0 %vm3691_vm0, %v22942_v50  ;;  %v917_v9 = vld [vmem:[%s22862_s22 + $0x688] sm:$0xff]  ;;  %v17624_v14 = vcombine.high %v1173_v7, %v1181_v8  ;;  %v17623_v20 = vcombine.low %v1173_v7, %v1181_v8 }
 0x199   : > { %3826 = vmatprep.subr.bf16.mxu0 %v17512_v18  ;;  %v925_v10 = vld [vmem:[%s22862_s22 + $0x6c8] sm:$0xff] }
 0x19a   : > { %3786 = vmatpush1.bf16.msra.mxu1 %v17239_v17  ;;  %v17368_v15 = vcombine.high %v917_v9, %v925_v10  ;;  %v1157_v16 = vld [vmem:[%s22862_s22 + $0xe08] sm:$0xff]  ;;  %v17367_v21 = vcombine.low %v917_v9, %v925_v10 }
 0x19b   : > { %3787 = vmatprep.subr.bf16.mxu1 %v17224_v19  ;;  %v1165_v17 = vld [vmem:[%s22862_s22 + $0xe48] sm:$0xff] }
 0x19c   : > { %3827 = vmatpush1.bf16.msra.mxu0 %v17511_v24  ;;  %v901_v18 = vld [vmem:[%s22862_s22 + $0x608] sm:$0xff]  ;;  %v17608_v22 = vcombine.high %v1157_v16, %v1165_v17  ;;  %v17607_v28 = vcombine.low %v1157_v16, %v1165_v17 }
 0x19d   : > { %3828 = vmatprep.subr.bf16.mxu0 %v17496_v26  ;;  %v909_v19 = vld [vmem:[%s22862_s22 + $0x648] sm:$0xff] }
 0x19e   : > { %3788 = vmatpush1.bf16.msra.mxu1 %v17223_v25  ;;  %v17352_v23 = vcombine.high %v901_v18, %v909_v19  ;;  %v1141_v24 = vld [vmem:[%s22862_s22 + $0xd88] sm:$0xff]  ;;  %v17351_v29 = vcombine.low %v901_v18, %v909_v19 }
 0x19f   : > { %3789 = vmatprep.subr.bf16.mxu1 %v17208_v27  ;;  %v1149_v25 = vld [vmem:[%s22862_s22 + $0xdc8] sm:$0xff] }
 0x1a0   : > { %3829 = vmatpush1.bf16.msra.mxu0 %v17495_v32  ;;  %v885_v26 = vld [vmem:[%s22862_s22 + $0x588] sm:$0xff]  ;;  %v17592_v30 = vcombine.high %v1141_v24, %v1149_v25  ;;  %v17591_v36 = vcombine.low %v1141_v24, %v1149_v25 }
 0x1a1   : > { %3830 = vmatprep.subr.bf16.mxu0 %v17480_v34  ;;  %v893_v27 = vld [vmem:[%s22862_s22 + $0x5c8] sm:$0xff] }
 0x1a2   : > { %3790 = vmatpush1.bf16.msra.mxu1 %v17207_v33  ;;  %v17336_v31 = vcombine.high %v885_v26, %v893_v27  ;;  %v1125_v32 = vld [vmem:[%s22862_s22 + $0xd08] sm:$0xff]  ;;  %v17335_v37 = vcombine.low %v885_v26, %v893_v27 }
 0x1a3   : > { %3791 = vmatprep.subr.bf16.mxu1 %v17192_v35  ;;  %v1133_v33 = vld [vmem:[%s22862_s22 + $0xd48] sm:$0xff] }
 0x1a4   : > { %3831 = vmatpush1.bf16.msra.mxu0 %v17479_v40  ;;  %v869_v34 = vld [vmem:[%s22862_s22 + $0x508] sm:$0xff]  ;;  %v17576_v38 = vcombine.high %v1125_v32, %v1133_v33  ;;  %v17575_v44 = vcombine.low %v1125_v32, %v1133_v33 }
 0x1a5   : > { %3832 = vmatprep.subr.bf16.mxu0 %v17464_v42  ;;  %v877_v35 = vld [vmem:[%s22862_s22 + $0x548] sm:$0xff] }
 0x1a6   : > { %3792 = vmatpush1.bf16.msra.mxu1 %v17191_v41  ;;  %v17320_v39 = vcombine.high %v869_v34, %v877_v35  ;;  %v1109_v40 = vld [vmem:[%s22862_s22 + $0xc88] sm:$0xff]  ;;  %v17319_v45 = vcombine.low %v869_v34, %v877_v35  ;;  %v742_v35 = vld [vmem:[%s22862_s22 + $0x110] sm:$0xff] }
 0x1a7   : > { %3793 = vmatprep.subr.bf16.mxu1 %v17176_v43  ;;  %v1117_v41 = vld [vmem:[%s22862_s22 + $0xcc8] sm:$0xff] }
 0x1a8   : > { %3833 = vmatpush1.bf16.msra.mxu0 %v17463_v48  ;;  %v853_v42 = vld [vmem:[%s22862_s22 + $0x488] sm:$0xff]  ;;  %v17560_v46 = vcombine.high %v1109_v40, %v1117_v41  ;;  %v17559_v53 = vcombine.low %v1109_v40, %v1117_v41 }
 0x1a9   : > { %3834 = vmatprep.subr.bf16.mxu0 %v17448_v51  ;;  %v861_v43 = vld [vmem:[%s22862_s22 + $0x4c8] sm:$0xff] }
 0x1aa   : > { %3794 = vmatpush1.bf16.msra.mxu1 %v17175_v49  ;;  %v17304_v47 = vcombine.high %v853_v42, %v861_v43  ;;  %v1093_v48 = vld [vmem:[%s22862_s22 + $0xc08] sm:$0xff]  ;;  %v17303_v54 = vcombine.low %v853_v42, %v861_v43  ;;  %v726_v43 = vld [vmem:[%s22862_s22 + $0x90] sm:$0xff] }
 0x1ab   : > { %3795 = vmatprep.subr.bf16.mxu1 %v17160_v52  ;;  %v1101_v49 = vld [vmem:[%s22862_s22 + $0xc48] sm:$0xff] }
 0x1ac   : > { %3835 = vmatpush1.bf16.msra.mxu0 %v17447_v57  ;;  %v837_v51 = vld [vmem:[%s22862_s22 + $0x408] sm:$0xff]  ;;  %v17544_v55 = vcombine.high %v1093_v48, %v1101_v49  ;;  %v822_v57 = vld [vmem:[%s22862_s22 + $0x390] sm:$0xff]  ;;  %v17543_v63 = vcombine.low %v1093_v48, %v1101_v49 }
 0x1ad   : > { %3836 = vmatprep.subr.bf16.mxu0 %v17432_v60  ;;  %v845_v52 = vld [vmem:[%s22862_s22 + $0x448] sm:$0xff]  ;;  %v1078_v60 = vld [vmem:[%s22862_s22 + $0xb90] sm:$0xff] }
 0x1ae   : > { %3796 = vmatpush1.bf16.msra.mxu1 %v17159_v58  ;;  %v17288_v56 = vcombine.high %v837_v51, %v845_v52  ;;  %v830_v58 = vld [vmem:[%s22862_s22 + $0x3d0] sm:$0xff]  ;;  %v17287_v0 = vcombine.low %v837_v51, %v845_v52 }
 0x1af   : > { %3797 = vmatprep.subr.bf16.mxu1 %v17400_v61  ;;  %v1086_v61 = vld [vmem:[%s22862_s22 + $0xbd0] sm:$0xff]  ;;  %v17274_v1 = vcombine.high %v822_v57, %v830_v58  ;;  %v17273_v7 = vcombine.low %v822_v57, %v830_v58 }
 0x1b0   : > { %3837 = vmatpush1.bf16.msra.mxu0 %v17431_v3  ;;  %v17530_v2 = vcombine.high %v1078_v60, %v1086_v61  ;;  %v806_v3 = vld [vmem:[%s22862_s22 + $0x310] sm:$0xff]  ;;  %v17529_v8 = vcombine.low %v1078_v60, %v1086_v61 }
 0x1b1   : > { %3838 = vmatprep.subr.bf16.mxu0 %v17416_v5  ;;  %v1062_v5 = vld [vmem:[%s22862_s22 + $0xb10] sm:$0xff] }
 0x1b2   : > { %3798 = vmatpush2.bf16.msra.mxu1 %v17399_v4  ;;  %v814_v4 = vld [vmem:[%s22862_s22 + $0x350] sm:$0xff] }
 0x1b3   : > { %3799 = vmatprep.subr.bf16.mxu1 %v17384_v6  ;;  %v1070_v6 = vld [vmem:[%s22862_s22 + $0xb50] sm:$0xff]  ;;  %v17258_v9 = vcombine.high %v806_v3, %v814_v4  ;;  %v17257_v16 = vcombine.low %v806_v3, %v814_v4 }
 0x1b4   : > { %3839 = vmatpush1.bf16.msra.mxu0 %v17415_v11  ;;  %v17514_v10 = vcombine.high %v1062_v5, %v1070_v6  ;;  %v790_v11 = vld [vmem:[%s22862_s22 + $0x290] sm:$0xff]  ;;  %v17513_v17 = vcombine.low %v1062_v5, %v1070_v6 }
 0x1b5   : > { %3844 = vmatprep.subr.bf16.mxu0 %v17624_v14  ;;  %v1046_v14 = vld [vmem:[%s22862_s22 + $0xa90] sm:$0xff] }
 0x1b6   : > { %3800 = vmatpush2.bf16.msra.mxu1 %v17383_v12  ;;  %v798_v12 = vld [vmem:[%s22862_s22 + $0x2d0] sm:$0xff] }
 0x1b7   : > { %3801 = vmatprep.subr.bf16.mxu1 %v17368_v15  ;;  %v1054_v15 = vld [vmem:[%s22862_s22 + $0xad0] sm:$0xff]  ;;  %v17242_v18 = vcombine.high %v790_v11, %v798_v12  ;;  %v17241_v24 = vcombine.low %v790_v11, %v798_v12 }
 0x1b8   : > { %3845 = vmatpush2.bf16.msra.mxu0 %v17623_v20  ;;  %v17498_v19 = vcombine.high %v1046_v14, %v1054_v15  ;;  %v774_v20 = vld [vmem:[%s22862_s22 + $0x210] sm:$0xff]  ;;  %v17497_v25 = vcombine.low %v1046_v14, %v1054_v15 }
 0x1b9   : > { %3846 = vmatprep.subr.bf16.mxu0 %v17608_v22  ;;  %v1030_v22 = vld [vmem:[%s22862_s22 + $0xa10] sm:$0xff] }
 0x1ba   : > { %3802 = vmatpush2.bf16.msra.mxu1 %v17367_v21  ;;  %v782_v21 = vld [vmem:[%s22862_s22 + $0x250] sm:$0xff] }
 0x1bb   : > { %3803 = vmatprep.subr.bf16.mxu1 %v17352_v23  ;;  %v1038_v23 = vld [vmem:[%s22862_s22 + $0xa50] sm:$0xff]  ;;  %v17226_v26 = vcombine.high %v774_v20, %v782_v21 }
 0x1bc   : > { %3847 = vmatpush2.bf16.msra.mxu0 %v17607_v28  ;;  %v17482_v27 = vcombine.high %v1030_v22, %v1038_v23  ;;  %v758_v28 = vld [vmem:[%s22862_s22 + $0x190] sm:$0xff]  ;;  %v17481_v32 = vcombine.low %v1030_v22, %v1038_v23 }
 0x1bd   : > { %3848 = vmatprep.subr.bf16.mxu0 %v17592_v30  ;;  %v1014_v30 = vld [vmem:[%s22862_s22 + $0x990] sm:$0xff] }
 0x1be   : > { %3804 = vmatpush2.bf16.msra.mxu1 %v17351_v29  ;;  %v766_v29 = vld [vmem:[%s22862_s22 + $0x1d0] sm:$0xff] }
 0x1bf   : > { %3805 = vmatprep.subr.bf16.mxu1 %v17336_v31  ;;  %v17225_v31 = vcombine.low %v774_v20, %v782_v21  ;;  %v17210_v33 = vcombine.high %v758_v28, %v766_v29  ;;  %v710_v52 = vld [vmem:[%s22862_s22 + $0x10] sm:$0xff] }
 0x1c0   : > { %3849 = vmatpush2.bf16.msra.mxu0 %v17591_v36  ;;  %v750_v36 = vld [vmem:[%s22862_s22 + $0x150] sm:$0xff] }
 0x1c1   : > { %3850 = vmatprep.subr.bf16.mxu0 %v17576_v38  ;;  %v1006_v38 = vld [vmem:[%s22862_s22 + $0x950] sm:$0xff]  ;;  %v17194_v41 = vcombine.high %v742_v35, %v750_v36 }
 0x1c2   : > { %3806 = vmatpush2.bf16.msra.mxu1 %v17335_v37  ;;  %v998_v37 = vld [vmem:[%s22862_s22 + $0x910] sm:$0xff] }
 0x1c3   : > { %3807 = vmatprep.subr.bf16.mxu1 %v17320_v39  ;;  %v17209_v39 = vcombine.low %v758_v28, %v766_v29  ;;  %v17450_v42 = vcombine.high %v998_v37, %v1006_v38  ;;  %v17449_v48 = vcombine.low %v998_v37, %v1006_v38  ;;  %v950_v61 = vld [vmem:[%s22862_s22 + $0x790] sm:$0xff] }
 0x1c4   : > { %3851 = vmatpush2.bf16.msra.mxu0 %v17575_v44  ;;  %v734_v44 = vld [vmem:[%s22862_s22 + $0xd0] sm:$0xff] }
 0x1c5   : > { %3852 = vmatprep.subr.bf16.mxu0 %v17560_v46  ;;  %v990_v46 = vld [vmem:[%s22862_s22 + $0x8d0] sm:$0xff]  ;;  %v17178_v49 = vcombine.high %v726_v43, %v734_v44 }
 0x1c6   : > { %3808 = vmatpush2.bf16.msra.mxu1 %v17319_v45  ;;  %v982_v45 = vld [vmem:[%s22862_s22 + $0x890] sm:$0xff] }
 0x1c7   : > { %3809 = vmatprep.subr.bf16.mxu1 %v17304_v47  ;;  %v17193_v47 = vcombine.low %v742_v35, %v750_v36  ;;  %v17434_v51 = vcombine.high %v982_v45, %v990_v46  ;;  %v17433_v57 = vcombine.low %v982_v45, %v990_v46  ;;  %v934_v6 = vld [vmem:[%s22862_s22 + $0x710] sm:$0xff] }
 0x1c8   : > { %3853 = vmatpush2.bf16.msra.mxu0 %v17559_v53  ;;  %v718_v53 = vld [vmem:[%s22862_s22 + $0x50] sm:$0xff] }
 0x1c9   : > { %3854 = vmatprep.subr.bf16.mxu0 %v17544_v55  ;;  %v974_v55 = vld [vmem:[%s22862_s22 + $0x850] sm:$0xff]  ;;  %v17162_v58 = vcombine.high %v710_v52, %v718_v53 }
 0x1ca   : > { %3810 = vmatpush2.bf16.msra.mxu1 %v17303_v54  ;;  %v966_v54 = vld [vmem:[%s22862_s22 + $0x810] sm:$0xff] }
 0x1cb   : > { %3811 = vmatprep.subr.bf16.mxu1 %v17288_v56  ;;  %v17177_v56 = vcombine.low %v726_v43, %v734_v44  ;;  %v17418_v60 = vcombine.high %v966_v54, %v974_v55  ;;  %v17417_v3 = vcombine.low %v966_v54, %v974_v55  ;;  %v918_v15 = vld [vmem:[%s22862_s22 + $0x690] sm:$0xff] }
 0x1cc   : > { %3855 = vmatpush2.bf16.msra.mxu0 %v17543_v63  ;;  %v958_v63 = vld [vmem:[%s22862_s22 + $0x7d0] sm:$0xff] }
 0x1cd   : > { %3867 = vmatprep.subr.bf16.mxu0 %v17274_v1  ;;  %v1182_v1 = vld [vmem:[%s22862_s22 + $0xed0] sm:$0xff]  ;;  %v17402_v4 = vcombine.high %v950_v61, %v958_v63 }
 0x1ce   : > { %3812 = vmatpush2.bf16.msra.mxu1 %v17287_v0  ;;  %v1174_v0 = vld [vmem:[%s22862_s22 + $0xe90] sm:$0xff] }
 0x1cf   : > { %3910 = vmatprep.subr.bf16.mxu1 %v17530_v2  ;;  %3857 = vmatmul.mubr.bf16.vlgmr.msra.gmra.mxu0 %v22991_v62  ;;  %v17161_v2 = vcombine.low %v710_v52, %v718_v53  ;;  %v17626_v5 = vcombine.high %v1174_v0, %v1182_v1  ;;  %v17625_v11 = vcombine.low %v1174_v0, %v1182_v1  ;;  %v902_v23 = vld [vmem:[%s22862_s22 + $0x610] sm:$0xff]  ;;  %v1079_v1 = vld [vmem:[%s22862_s22 + $0xb98] sm:$0xff] }
 0x1d0   : > { %3868 = vmatpush1.bf16.msra.mxu0 %v17273_v7  ;;  %3899 = vmatprep.mubr.bf16.mxu0 %v22953_v59  ;;  %v942_v7 = vld [vmem:[%s22862_s22 + $0x750] sm:$0xff] }
 0x1d1   : > { %3814 = vmatmul.mubr.bf16.vlgmr.msra.gmra.mxu1 %v23004_v13  ;;  %3869 = vmatprep.subr.bf16.mxu0 %v17258_v9  ;;  %v1166_v9 = vld [vmem:[%s22862_s22 + $0xe50] sm:$0xff]  ;;  %v17386_v12 = vcombine.high %v934_v6, %v942_v7 }
 0x1d2   : > { %3911 = vmatpush1.bf16.msra.mxu1 %v17529_v8  ;;  %17639 = vmatprep.mubr.msk.bf16.mxu1 %vm3691_vm0, %v22942_v50  ;;  %v1022_v50 = vld [vmem:[%s22862_s22 + $0x9d0] sm:$0xff] }
 0x1d3   : > { %3912 = vmatprep.subr.bf16.mxu1 %v17514_v10  ;;  %v17466_v34 = vcombine.high %v1014_v30, %v1022_v50  ;;  %v17465_v40 = vcombine.low %v1014_v30, %v1022_v50  ;;  %v1158_v8 = vld [vmem:[%s22862_s22 + $0xe10] sm:$0xff]  ;;  %v17401_v10 = vcombine.low %v950_v61, %v958_v63 }
 0x1d4   : > { %3870 = vmatpush1.bf16.msra.mxu0 %v17257_v16  ;;  %v17610_v14 = vcombine.high %v1158_v8, %v1166_v9  ;;  %v926_v16 = vld [vmem:[%s22862_s22 + $0x6d0] sm:$0xff]  ;;  %v17609_v20 = vcombine.low %v1158_v8, %v1166_v9  ;;  %v1063_v9 = vld [vmem:[%s22862_s22 + $0xb18] sm:$0xff] }
 0x1d5   : > { %3871 = vmatprep.subr.bf16.mxu0 %v17242_v18  ;;  %v1150_v18 = vld [vmem:[%s22862_s22 + $0xdd0] sm:$0xff]  ;;  %v17370_v21 = vcombine.high %v918_v15, %v926_v16 }
 0x1d6   : > { %3913 = vmatpush1.bf16.msra.mxu1 %v17513_v17  ;;  %v1142_v17 = vld [vmem:[%s22862_s22 + $0xd90] sm:$0xff] }
 0x1d7   : > { %3914 = vmatprep.subr.bf16.mxu1 %v17498_v19  ;;  %v17385_v19 = vcombine.low %v934_v6, %v942_v7  ;;  %v17594_v22 = vcombine.high %v1142_v17, %v1150_v18  ;;  %v17593_v28 = vcombine.low %v1142_v17, %v1150_v18  ;;  %v886_v50 = vld [vmem:[%s22862_s22 + $0x590] sm:$0xff]  ;;  %v1047_v17 = vld [vmem:[%s22862_s22 + $0xa98] sm:$0xff] }
 0x1d8   : > { %3872 = vmatpush1.bf16.msra.mxu0 %v17241_v24  ;;  %v910_v24 = vld [vmem:[%s22862_s22 + $0x650] sm:$0xff]  ;;  %v1055_v18 = vld [vmem:[%s22862_s22 + $0xad8] sm:$0xff] }
 0x1d9   : > { %3873 = vmatprep.subr.bf16.mxu0 %v17226_v26  ;;  %v1134_v26 = vld [vmem:[%s22862_s22 + $0xd50] sm:$0xff]  ;;  %v17354_v29 = vcombine.high %v902_v23, %v910_v24 }
 0x1da   : > { %3915 = vmatpush1.bf16.msra.mxu1 %v17497_v25  ;;  %v1126_v25 = vld [vmem:[%s22862_s22 + $0xd10] sm:$0xff] }
 0x1db   : > { %3916 = vmatprep.subr.bf16.mxu1 %v17482_v27  ;;  %v17369_v27 = vcombine.low %v918_v15, %v926_v16  ;;  %v17578_v30 = vcombine.high %v1126_v25, %v1134_v26  ;;  %v17577_v35 = vcombine.low %v1126_v25, %v1134_v26  ;;  %v870_v38 = vld [vmem:[%s22862_s22 + $0x510] sm:$0xff]  ;;  %v1039_v25 = vld [vmem:[%s22862_s22 + $0xa58] sm:$0xff] }
 0x1dc   : > { %3874 = vmatpush1.bf16.msra.mxu0 %v17225_v31  ;;  %v894_v31 = vld [vmem:[%s22862_s22 + $0x5d0] sm:$0xff]  ;;  %v743_v26 = vld [vmem:[%s22862_s22 + $0x118] sm:$0xff] }
 0x1dd   : > { %3875 = vmatprep.subr.bf16.mxu0 %v17210_v33  ;;  %v1118_v33 = vld [vmem:[%s22862_s22 + $0xcd0] sm:$0xff]  ;;  %v17338_v36 = vcombine.high %v886_v50, %v894_v31 }
 0x1de   : > { %3917 = vmatpush1.bf16.msra.mxu1 %v17481_v32  ;;  %v1110_v32 = vld [vmem:[%s22862_s22 + $0xc90] sm:$0xff] }
 0x1df   : > { %3918 = vmatprep.subr.bf16.mxu1 %v17466_v34  ;;  %v17353_v34 = vcombine.low %v902_v23, %v910_v24  ;;  %v17562_v37 = vcombine.high %v1110_v32, %v1118_v33  ;;  %v17561_v43 = vcombine.low %v1110_v32, %v1118_v33  ;;  %v854_v46 = vld [vmem:[%s22862_s22 + $0x490] sm:$0xff]  ;;  %v17500_v23 = vcombine.high %v1047_v17, %v1055_v18  ;;  %v1031_v24 = vld [vmem:[%s22862_s22 + $0xa18] sm:$0xff] }
 0x1e0   : > { %3876 = vmatpush1.bf16.msra.mxu0 %v17209_v39  ;;  %v878_v39 = vld [vmem:[%s22862_s22 + $0x550] sm:$0xff]  ;;  %v1023_v32 = vld [vmem:[%s22862_s22 + $0x9d8] sm:$0xff] }
 0x1e1   : > { %3877 = vmatprep.subr.bf16.mxu0 %v17194_v41  ;;  %v1102_v41 = vld [vmem:[%s22862_s22 + $0xc50] sm:$0xff]  ;;  %v17322_v44 = vcombine.high %v870_v38, %v878_v39  ;;  %v727_v33 = vld [vmem:[%s22862_s22 + $0x98] sm:$0xff] }
 0x1e2   : > { %3919 = vmatpush1.bf16.msra.mxu1 %v17465_v40  ;;  %v1094_v40 = vld [vmem:[%s22862_s22 + $0xc10] sm:$0xff] }
 0x1e3   : > { %3920 = vmatprep.subr.bf16.mxu1 %v17450_v42  ;;  %v17337_v42 = vcombine.low %v886_v50, %v894_v31  ;;  %v17546_v45 = vcombine.high %v1094_v40, %v1102_v41  ;;  %v17545_v52 = vcombine.low %v1094_v40, %v1102_v41  ;;  %v838_v55 = vld [vmem:[%s22862_s22 + $0x410] sm:$0xff]  ;;  %v1015_v31 = vld [vmem:[%s22862_s22 + $0x998] sm:$0xff] }
 0x1e4   : > { %3878 = vmatpush1.bf16.msra.mxu0 %v17193_v47  ;;  %v862_v47 = vld [vmem:[%s22862_s22 + $0x4d0] sm:$0xff]  ;;  %v1007_v40 = vld [vmem:[%s22862_s22 + $0x958] sm:$0xff] }
 0x1e5   : > { %3879 = vmatprep.subr.bf16.mxu0 %v17178_v49  ;;  %v831_v49 = vld [vmem:[%s22862_s22 + $0x3d8] sm:$0xff]  ;;  %v17306_v53 = vcombine.high %v854_v46, %v862_v47 }
 0x1e6   : > { %3921 = vmatpush1.bf16.msra.mxu1 %v17449_v48  ;;  %v823_v48 = vld [vmem:[%s22862_s22 + $0x398] sm:$0xff] }
 0x1e7   : > { %3922 = vmatprep.subr.bf16.mxu1 %v17434_v51  ;;  %v17321_v51 = vcombine.low %v870_v38, %v878_v39  ;;  %v17276_v54 = vcombine.high %v823_v48, %v831_v49  ;;  %v17275_v61 = vcombine.low %v823_v48, %v831_v49  ;;  %v999_v39 = vld [vmem:[%s22862_s22 + $0x918] sm:$0xff] }
 0x1e8   : > { %3880 = vmatpush1.bf16.msra.mxu0 %v17177_v56  ;;  %v846_v56 = vld [vmem:[%s22862_s22 + $0x450] sm:$0xff]  ;;  %v711_v41 = vld [vmem:[%s22862_s22 + $0x18] sm:$0xff] }
 0x1e9   : > { %3881 = vmatprep.subr.bf16.mxu0 %v17162_v58  ;;  %v815_v58 = vld [vmem:[%s22862_s22 + $0x358] sm:$0xff]  ;;  %v17290_v63 = vcombine.high %v838_v55, %v846_v56 }
 0x1ea   : > { %3923 = vmatpush1.bf16.msra.mxu1 %v17433_v57  ;;  %v807_v57 = vld [vmem:[%s22862_s22 + $0x318] sm:$0xff] }
 0x1eb   : > { %3924 = vmatprep.subr.bf16.mxu1 %v17418_v60  ;;  %v17305_v60 = vcombine.low %v854_v46, %v862_v47  ;;  %v17260_v0 = vcombine.high %v807_v57, %v815_v58  ;;  %v17259_v6 = vcombine.low %v807_v57, %v815_v58  ;;  %v983_v47 = vld [vmem:[%s22862_s22 + $0x898] sm:$0xff] }
 0x1ec   : > { %3882 = vmatpush1.bf16.msra.mxu0 %v17161_v2  ;;  %v1087_v2 = vld [vmem:[%s22862_s22 + $0xbd8] sm:$0xff] }
 0x1ed   : > { %3883 = vmatprep.subr.bf16.mxu0 %v17402_v4  ;;  %v799_v4 = vld [vmem:[%s22862_s22 + $0x2d8] sm:$0xff]  ;;  %v17532_v7 = vcombine.high %v1079_v1, %v1087_v2 }
 0x1ee   : > { %3925 = vmatpush1.bf16.msra.mxu1 %v17417_v3  ;;  %v791_v3 = vld [vmem:[%s22862_s22 + $0x298] sm:$0xff] }
 0x1ef   : > { %3930 = vmatprep.subr.bf16.mxu1 %v17626_v5  ;;  %v17289_v5 = vcombine.low %v838_v55, %v846_v56  ;;  %v17244_v8 = vcombine.high %v791_v3, %v799_v4  ;;  %v991_v48 = vld [vmem:[%s22862_s22 + $0x8d8] sm:$0xff] }
 0x1f0   : > { %3884 = vmatpush2.bf16.msra.mxu0 %v17401_v10  ;;  %v1071_v10 = vld [vmem:[%s22862_s22 + $0xb58] sm:$0xff] }
 0x1f1   : > { %3885 = vmatprep.subr.bf16.mxu0 %v17386_v12  ;;  %v783_v12 = vld [vmem:[%s22862_s22 + $0x258] sm:$0xff]  ;;  %v17516_v15 = vcombine.high %v1063_v9, %v1071_v10 }
 0x1f2   : > { %3931 = vmatpush2.bf16.msra.mxu1 %v17625_v11  ;;  %v775_v11 = vld [vmem:[%s22862_s22 + $0x218] sm:$0xff] }
 0x1f3   : > { %3932 = vmatprep.subr.bf16.mxu1 %v17610_v14  ;;  %v17243_v14 = vcombine.low %v791_v3, %v799_v4  ;;  %v17228_v16 = vcombine.high %v775_v11, %v783_v12  ;;  %v951_v49 = vld [vmem:[%s22862_s22 + $0x798] sm:$0xff] }
 0x1f4   : > { %3886 = vmatpush2.bf16.msra.mxu0 %v17385_v19  ;;  %v759_v19 = vld [vmem:[%s22862_s22 + $0x198] sm:$0xff] }
 0x1f5   : > { %3887 = vmatprep.subr.bf16.mxu0 %v17370_v21  ;;  %v23146_v21 = vld [vmem:[%s26018_s29 + $0xc] ss:$16 sps:$4 sm:$0xff]  }
 0x1f6   : > { %3933 = vmatpush2.bf16.msra.mxu1 %v17609_v20  ;;  %v17515_v20 = vcombine.low %v1063_v9, %v1071_v10  ;;  %v967_v56 = vld [vmem:[%s22862_s22 + $0x818] sm:$0xff] }
 0x1f7   : > { %3934 = vmatprep.subr.bf16.mxu1 %v17594_v22  ;;  %v17227_v22 = vcombine.low %v775_v11, %v783_v12  ;;  %v975_v57 = vld [vmem:[%s22862_s22 + $0x858] sm:$0xff] }
 0x1f8   : > { %3888 = vmatpush2.bf16.msra.mxu0 %v17369_v27  ;;  %v751_v27 = vld [vmem:[%s22862_s22 + $0x158] sm:$0xff] }
 0x1f9   : > { %3889 = vmatprep.subr.bf16.mxu0 %v17354_v29  ;;  %v17196_v50 = vcombine.high %v743_v26, %v751_v27  ;;  %v935_v58 = vld [vmem:[%s22862_s22 + $0x718] sm:$0xff] }
 0x1fa   : > { %3935 = vmatpush2.bf16.msra.mxu1 %v17593_v28  ;;  %v17499_v28 = vcombine.low %v1047_v17, %v1055_v18  ;;  %v1183_v3 = vld [vmem:[%s22862_s22 + $0xed8] sm:$0xff] }
 0x1fb   : > { %3936 = vmatprep.subr.bf16.mxu1 %v17578_v30  ;;  %v17484_v30 = vcombine.high %v1031_v24, %v1039_v25  ;;  %v919_v4 = vld [vmem:[%s22862_s22 + $0x698] sm:$0xff] }
 0x1fc   : > { %3890 = vmatpush2.bf16.msra.mxu0 %v17353_v34  ;;  %v735_v34 = vld [vmem:[%s22862_s22 + $0xd8] sm:$0xff] }
 0x1fd   : > { %3891 = vmatprep.subr.bf16.mxu0 %v17338_v36  ;;  %v17195_v36 = vcombine.low %v743_v26, %v751_v27  ;;  %v17180_v38 = vcombine.high %v727_v33, %v735_v34  ;;  %v1159_v10 = vld [vmem:[%s22862_s22 + $0xe18] sm:$0xff] }
 0x1fe   : > { %3937 = vmatpush2.bf16.msra.mxu1 %v17577_v35  ;;  %v17483_v35 = vcombine.low %v1031_v24, %v1039_v25  ;;  %v1167_v11 = vld [vmem:[%s22862_s22 + $0xe58] sm:$0xff] }
 0x1ff   : > { %3938 = vmatprep.subr.bf16.mxu1 %v17562_v37  ;;  %v17468_v37 = vcombine.high %v1015_v31, %v1023_v32  ;;  %v903_v12 = vld [vmem:[%s22862_s22 + $0x618] sm:$0xff] }
 0x200   : > { %3892 = vmatpush2.bf16.msra.mxu0 %v17337_v42  ;;  %v719_v42 = vld [vmem:[%s22862_s22 + $0x58] sm:$0xff] }
 0x201   : > { %3893 = vmatprep.subr.bf16.mxu0 %v17322_v44  ;;  %v17179_v44 = vcombine.low %v727_v33, %v735_v34  ;;  %v17164_v46 = vcombine.high %v711_v41, %v719_v42  ;;  %v1143_v18 = vld [vmem:[%s22862_s22 + $0xd98] sm:$0xff] }
 0x202   : > { %3939 = vmatpush2.bf16.msra.mxu1 %v17561_v43  ;;  %v17467_v43 = vcombine.low %v1015_v31, %v1023_v32  ;;  %v1127_v25 = vld [vmem:[%s22862_s22 + $0xd18] sm:$0xff] }
 0x203   : > { %3940 = vmatprep.subr.bf16.mxu1 %v17546_v45  ;;  %v17452_v45 = vcombine.high %v999_v39, %v1007_v40  ;;  %v1135_v26 = vld [vmem:[%s22862_s22 + $0xd58] sm:$0xff] }
 0x204   : > { %3894 = vmatpush2.bf16.msra.mxu0 %v17321_v51  ;;  %v959_v51 = vld [vmem:[%s22862_s22 + $0x7d8] sm:$0xff] }
 0x205   : > { %3895 = vmatprep.subr.bf16.mxu0 %v17306_v53  ;;  %v17163_v53 = vcombine.low %v711_v41, %v719_v42  ;;  %v17404_v55 = vcombine.high %v951_v49, %v959_v51  ;;  %v871_v27 = vld [vmem:[%s22862_s22 + $0x518] sm:$0xff] }
 0x206   : > { %3941 = vmatpush2.bf16.msra.mxu1 %v17545_v52  ;;  %v17451_v52 = vcombine.low %v999_v39, %v1007_v40  ;;  %v1111_v32 = vld [vmem:[%s22862_s22 + $0xc98] sm:$0xff] }
 0x207   : > { %3953 = vmatprep.subr.bf16.mxu1 %v17276_v54  ;;  %v17436_v54 = vcombine.high %v983_v47, %v991_v48  ;;  %v1119_v33 = vld [vmem:[%s22862_s22 + $0xcd8] sm:$0xff] }
 0x208   : > { %3896 = vmatpush2.bf16.msra.mxu0 %v17305_v60  ;;  %v943_v60 = vld [vmem:[%s22862_s22 + $0x758] sm:$0xff] }
 0x209   : > { %3943 = vmatmul.mubr.bf16.vlgmr.msra.gmra.mxu1 %v22991_v62  ;;  %3897 = vmatprep.subr.bf16.mxu0 %v17290_v63  ;;  %v17531_v62 = vcombine.low %v1079_v1, %v1087_v2  ;;  %v17403_v63 = vcombine.low %v951_v49, %v959_v51  ;;  %v17388_v1 = vcombine.high %v935_v58, %v943_v60  ;;  %v1175_v2 = vld [vmem:[%s22862_s22 + $0xe98] sm:$0xff]  ;;  %v832_v49 = vld [vmem:[%s22862_s22 + $0x3e0] sm:$0xff] }
 0x20a   : > { %3954 = vmatpush1.bf16.msra.mxu1 %v17275_v61  ;;  %3985 = vmatprep.mubr.bf16.mxu1 %v22953_v59  ;;  %v767_v59 = vld [vmem:[%s22862_s22 + $0x1d8] sm:$0xff]  ;;  %v17435_v61 = vcombine.low %v983_v47, %v991_v48  ;;  %v824_v48 = vld [vmem:[%s22862_s22 + $0x3a0] sm:$0xff] }
 0x20b   : > { %3955 = vmatprep.subr.bf16.mxu1 %v17260_v0  ;;  %v17211_v29 = vcombine.low %v759_v19, %v767_v59  ;;  %v17420_v0 = vcombine.high %v967_v56, %v975_v57  ;;  %v855_v34 = vld [vmem:[%s22862_s22 + $0x498] sm:$0xff]  ;;  %v1080_v51 = vld [vmem:[%s22862_s22 + $0xba0] sm:$0xff] }
 0x20c   : > { %3898 = vmatpush2.bf16.msra.mxu0 %v17289_v5  ;;  %v927_v5 = vld [vmem:[%s22862_s22 + $0x6d8] sm:$0xff] }
 0x20d   : > { %3996 = vmatprep.subr.bf16.mxu0 %v17532_v7  ;;  %v17387_v7 = vcombine.low %v935_v58, %v943_v60  ;;  %v17372_v9 = vcombine.high %v919_v4, %v927_v5  ;;  %v1095_v40 = vld [vmem:[%s22862_s22 + $0xc18] sm:$0xff]  ;;  %v816_v58 = vld [vmem:[%s22862_s22 + $0x360] sm:$0xff] }
 0x20e   : > { %3956 = vmatpush1.bf16.msra.mxu1 %v17259_v6  ;;  %v17419_v6 = vcombine.low %v967_v56, %v975_v57  ;;  %v1103_v41 = vld [vmem:[%s22862_s22 + $0xc58] sm:$0xff]  ;;  %v808_v57 = vld [vmem:[%s22862_s22 + $0x320] sm:$0xff] }
 0x20f   : > { %3957 = vmatprep.subr.bf16.mxu1 %v17244_v8  ;;  %3900 = vmatmul.mubr.bf16.vlgmr.msra.gmra.mxu0 %v23004_v13  ;;  %v17212_v13 = vcombine.high %v759_v19, %v767_v59  ;;  %v17628_v8 = vcombine.high %v1175_v2, %v1183_v3  ;;  %v1151_v19 = vld [vmem:[%s22862_s22 + $0xdd8] sm:$0xff]  ;;  %v1064_v60 = vld [vmem:[%s22862_s22 + $0xb20] sm:$0xff] }
 0x210   : > { %3997 = vmatpush1.bf16.msra.mxu0 %v17531_v62  ;;  %17640 = vmatprep.mubr.msk.bf16.mxu0 %vm3691_vm0, %v23146_v21  ;;  %v911_v62 = vld [vmem:[%s22862_s22 + $0x658] sm:$0xff] }
 0x211   : > { %3998 = vmatprep.subr.bf16.mxu0 %v17516_v15  ;;  %v17371_v15 = vcombine.low %v919_v4, %v927_v5  ;;  %v17356_v17 = vcombine.high %v903_v12, %v911_v62  ;;  %v887_v59 = vld [vmem:[%s22862_s22 + $0x598] sm:$0xff]  ;;  %v800_v4 = vld [vmem:[%s22862_s22 + $0x2e0] sm:$0xff] }
 0x212   : > { %3958 = vmatpush1.bf16.msra.mxu1 %v17243_v14  ;;  %v17627_v14 = vcombine.low %v1175_v2, %v1183_v3  ;;  %v839_v42 = vld [vmem:[%s22862_s22 + $0x418] sm:$0xff]  ;;  %v792_v3 = vld [vmem:[%s22862_s22 + $0x2a0] sm:$0xff] }
 0x213   : > { %3959 = vmatprep.subr.bf16.mxu1 %v17228_v16  ;;  %v17612_v16 = vcombine.high %v1159_v10, %v1167_v11  ;;  %v23207_v5 = vld [vmem:[%s26018_s29 + $0x8] ss:$16 sps:$4 sm:$0xff]  }
 0x214   : > { %3999 = vmatpush1.bf16.msra.mxu0 %v17515_v20  ;;  %v895_v20 = vld [vmem:[%s22862_s22 + $0x5d8] sm:$0xff] }
 0x215   : > { %4000 = vmatprep.subr.bf16.mxu0 %v17500_v23  ;;  %v17355_v23 = vcombine.low %v903_v12, %v911_v62  ;;  %v17340_v24 = vcombine.high %v887_v59, %v895_v20  ;;  %v17246_v12 = vcombine.high %v792_v3, %v800_v4 }
 0x216   : > { %3960 = vmatpush1.bf16.msra.mxu1 %v17227_v22  ;;  %v17611_v22 = vcombine.low %v1159_v10, %v1167_v11  ;;  %v1192_v10 = vlaneseq }
 0x217   : > { %3961 = vmatprep.subr.bf16.mxu1 %v17212_v13  ;;  %v17596_v13 = vcombine.high %v1143_v18, %v1151_v19 }
 0x218   : > { %4001 = vmatpush1.bf16.msra.mxu0 %v17499_v28  ;;  %v879_v28 = vld [vmem:[%s22862_s22 + $0x558] sm:$0xff] }
 0x219   : > { %4002 = vmatprep.subr.bf16.mxu0 %v17484_v30  ;;  %v17339_v30 = vcombine.low %v887_v59, %v895_v20  ;;  %v17324_v31 = vcombine.high %v871_v27, %v879_v28  ;;  %v23230_v59 = vshrl.u32 %v1192_v10, 7 }
 0x21a   : > { %3962 = vmatpush1.bf16.msra.mxu1 %v17211_v29  ;;  %v17595_v29 = vcombine.low %v1143_v18, %v1151_v19  ;;  %v23227_v18 = vld [vmem:[%s26018_s29 + $0x4] ss:$16 sps:$4 sm:$0xff]   ;;  %v17245_v19 = vcombine.low %v792_v3, %v800_v4 }
 0x21b   : > { %3963 = vmatprep.subr.bf16.mxu1 %v17196_v50  ;;  %v17580_v50 = vcombine.high %v1127_v25, %v1135_v26 }
 0x21c   : > { %4003 = vmatpush1.bf16.msra.mxu0 %v17483_v35  ;;  %v863_v35 = vld [vmem:[%s22862_s22 + $0x4d8] sm:$0xff] }
 0x21d   : > { %4004 = vmatprep.subr.bf16.mxu0 %v17468_v37  ;;  %v17323_v37 = vcombine.low %v871_v27, %v879_v28  ;;  %v17308_v39 = vcombine.high %v855_v34, %v863_v35  ;;  %v1194_v28 = vsub.s32 0, %v23230_v59 }
 0x21e   : > { %3964 = vmatpush1.bf16.msra.mxu1 %v17195_v36  ;;  %v17579_v36 = vcombine.low %v1127_v25, %v1135_v26  ;;  %v1016_v25 = vld [vmem:[%s22862_s22 + $0x9a0] sm:$0xff] }
 0x21f   : > { %3965 = vmatprep.subr.bf16.mxu1 %v17180_v38  ;;  %v17564_v38 = vcombine.high %v1111_v32, %v1119_v33  ;;  %v1024_v26 = vld [vmem:[%s22862_s22 + $0x9e0] sm:$0xff] }
 0x220   : > { %4005 = vmatpush1.bf16.msra.mxu0 %v17467_v43  ;;  %v847_v43 = vld [vmem:[%s22862_s22 + $0x458] sm:$0xff] }
 0x221   : > { %4006 = vmatprep.subr.bf16.mxu0 %v17452_v45  ;;  %v17307_v45 = vcombine.low %v855_v34, %v863_v35  ;;  %v17292_v47 = vcombine.high %v839_v42, %v847_v43  ;;  %v752_v34 = vld [vmem:[%s22862_s22 + $0x160] sm:$0xff] }
 0x222   : > { %3966 = vmatpush1.bf16.msra.mxu1 %v17179_v44  ;;  %v17563_v44 = vcombine.low %v1111_v32, %v1119_v33  ;;  %v1198_v32 = vsub.s32 1, %v23230_v59  ;;  %v744_v33 = vld [vmem:[%s22862_s22 + $0x120] sm:$0xff] }
 0x223   : > { %3967 = vmatprep.subr.bf16.mxu1 %v17164_v46  ;;  %v17548_v46 = vcombine.high %v1095_v40, %v1103_v41  ;;  %v1000_v35 = vld [vmem:[%s22862_s22 + $0x920] sm:$0xff] }
 0x224   : > { %4007 = vmatpush1.bf16.msra.mxu0 %v17451_v52  ;;  %v1088_v52 = vld [vmem:[%s22862_s22 + $0xbe0] sm:$0xff] }
 0x225   : > { %4008 = vmatprep.subr.bf16.mxu0 %v17436_v54  ;;  %v17291_v54 = vcombine.low %v839_v42, %v847_v43  ;;  %v17534_v56 = vcombine.high %v1080_v51, %v1088_v52 }
 0x226   : > { %3968 = vmatpush1.bf16.msra.mxu1 %v17163_v53  ;;  %v17547_v53 = vcombine.low %v1095_v40, %v1103_v41  ;;  %v17469_v40 = vcombine.low %v1016_v25, %v1024_v26  ;;  %v17198_v41 = vcombine.high %v744_v33, %v752_v34 }
 0x227   : > { %3969 = vmatprep.subr.bf16.mxu1 %v17404_v55  ;;  %v17278_v55 = vcombine.high %v824_v48, %v832_v49 }
 0x228   : > { %4009 = vmatpush1.bf16.msra.mxu0 %v17435_v61  ;;  %v1072_v61 = vld [vmem:[%s22862_s22 + $0xb60] sm:$0xff] }
 0x229   : > { %4010 = vmatprep.subr.bf16.mxu0 %v17420_v0  ;;  %v17533_v0 = vcombine.low %v1080_v51, %v1088_v52  ;;  %v17518_v2 = vcombine.high %v1064_v60, %v1072_v61  ;;  %v17517_v11 = vcombine.low %v1064_v60, %v1072_v61  ;;  %v17197_v52 = vcombine.low %v744_v33, %v752_v34  ;;  %v712_v60 = vld [vmem:[%s22862_s22 + $0x20] sm:$0xff] }
 0x22a   : > { %3970 = vmatpush2.bf16.msra.mxu1 %v17403_v63  ;;  %v17277_v63 = vcombine.low %v824_v48, %v832_v49  ;;  %v992_v48 = vld [vmem:[%s22862_s22 + $0x8e0] sm:$0xff] }
 0x22b   : > { %3971 = vmatprep.subr.bf16.mxu1 %v17388_v1  ;;  %v17262_v1 = vcombine.high %v808_v57, %v816_v58  ;;  %v720_v61 = vld [vmem:[%s22862_s22 + $0x60] sm:$0xff] }
 0x22c   : > { %4011 = vmatpush1.bf16.msra.mxu0 %v17419_v6  ;;  %v1048_v6 = vld [vmem:[%s22862_s22 + $0xaa0] sm:$0xff] }
 0x22d   : > { %4016 = vmatprep.subr.bf16.mxu0 %v17628_v8  ;;  %v23215_v8 = vld [vmem:[%s26018_s29] ss:$16 sps:$4 sm:$0xff]  }
 0x22e   : > { %3972 = vmatpush2.bf16.msra.mxu1 %v17387_v7  ;;  %v1056_v7 = vld [vmem:[%s22862_s22 + $0xae0] sm:$0xff] }
 0x22f   : > { %3973 = vmatprep.subr.bf16.mxu1 %v17372_v9  ;;  %v17261_v9 = vcombine.low %v808_v57, %v816_v58  ;;  %v17502_v62 = vcombine.high %v1048_v6, %v1056_v7  ;;  %v17501_v20 = vcombine.low %v1048_v6, %v1056_v7  ;;  %v936_v33 = vld [vmem:[%s22862_s22 + $0x720] sm:$0xff] }
 0x230   : > { %4017 = vmatpush2.bf16.msra.mxu0 %v17627_v14  ;;  %v776_v14 = vld [vmem:[%s22862_s22 + $0x220] sm:$0xff] }
 0x231   : > { %4018 = vmatprep.subr.bf16.mxu0 %v17612_v16  ;;  %v1032_v16 = vld [vmem:[%s22862_s22 + $0xa20] sm:$0xff] }
 0x232   : > { %3974 = vmatpush2.bf16.msra.mxu1 %v17371_v15  ;;  %v784_v15 = vld [vmem:[%s22862_s22 + $0x260] sm:$0xff] }
 0x233   : > { %3975 = vmatprep.subr.bf16.mxu1 %v17356_v17  ;;  %v1040_v17 = vld [vmem:[%s22862_s22 + $0xa60] sm:$0xff]  ;;  %v17229_v27 = vcombine.low %v776_v14, %v784_v15 }
 0x234   : > { %4019 = vmatpush2.bf16.msra.mxu0 %v17611_v22  ;;  %v17230_v22 = vcombine.high %v776_v14, %v784_v15  ;;  %v944_v34 = vld [vmem:[%s22862_s22 + $0x760] sm:$0xff] }
 0x235   : > { %4020 = vmatprep.subr.bf16.mxu0 %v17596_v13  ;;  %v760_v13 = vld [vmem:[%s22862_s22 + $0x1a0] sm:$0xff] }
 0x236   : > { %3976 = vmatpush2.bf16.msra.mxu1 %v17355_v23  ;;  %v17486_v23 = vcombine.high %v1032_v16, %v1040_v17 }
 0x237   : > { %3977 = vmatprep.subr.bf16.mxu1 %v17340_v24  ;;  %v768_v24 = vld [vmem:[%s22862_s22 + $0x1e0] sm:$0xff] }
 0x238   : > { %4021 = vmatpush2.bf16.msra.mxu0 %v17595_v29  ;;  %v17485_v29 = vcombine.low %v1032_v16, %v1040_v17  ;;  %v952_v16 = vld [vmem:[%s22862_s22 + $0x7a0] sm:$0xff] }
 0x239   : > { %4022 = vmatprep.subr.bf16.mxu0 %v17580_v50  ;;  %v17214_v50 = vcombine.high %v760_v13, %v768_v24  ;;  %v960_v17 = vld [vmem:[%s22862_s22 + $0x7e0] sm:$0xff] }
 0x23a   : > { %3978 = vmatpush2.bf16.msra.mxu1 %v17339_v30  ;;  %v23238_v30 = vld [vmem:[%s22869_s28] sm:$0xff] }
 0x23b   : > { %3979 = vmatprep.subr.bf16.mxu1 %v17324_v31  ;;  %v17470_v31 = vcombine.high %v1016_v25, %v1024_v26  ;;  %v1199_v42 = vrot.slane %v23238_v30, %v1198_v32  ;;  %v17165_v25 = vcombine.low %v712_v60, %v720_v61 }
 0x23c   : > { %4023 = vmatpush2.bf16.msra.mxu0 %v17579_v36  ;;  %v1008_v36 = vld [vmem:[%s22862_s22 + $0x960] sm:$0xff] }
 0x23d   : > { %4024 = vmatprep.subr.bf16.mxu0 %v17564_v38  ;;  %v1195_v38 = vrot.slane %v23238_v30, %v1194_v28  ;;  %v17454_v43 = vcombine.high %v1000_v35, %v1008_v36 }
 0x23e   : > { %3980 = vmatpush2.bf16.msra.mxu1 %v17323_v37 }
 0x23f   : > { %3981 = vmatprep.subr.bf16.mxu1 %v17308_v39  ;;  %v17213_v39 = vcombine.low %v760_v13, %v768_v24 }
 0x240   : > { %4025 = vmatpush2.bf16.msra.mxu0 %v17563_v44  ;;  %v728_v44 = vld [vmem:[%s22862_s22 + $0xa0] sm:$0xff] }
 0x241   : > { %4026 = vmatprep.subr.bf16.mxu0 %v17548_v46 }
 0x242   : > { %3982 = vmatpush2.bf16.msra.mxu1 %v17307_v45  ;;  %v736_v45 = vld [vmem:[%s22862_s22 + $0xe0] sm:$0xff] }
 0x243   : > { %3983 = vmatprep.subr.bf16.mxu1 %v17292_v47  ;;  %v984_v47 = vld [vmem:[%s22862_s22 + $0x8a0] sm:$0xff]  ;;  %v17181_v7 = vcombine.low %v728_v44, %v736_v45 }
 0x244   : > { %4027 = vmatpush2.bf16.msra.mxu0 %v17547_v53  ;;  %v17438_v58 = vcombine.high %v984_v47, %v992_v48  ;;  %v17437_v10 = vcombine.low %v984_v47, %v992_v48  ;;  %v17389_v47 = vcombine.low %v936_v33, %v944_v34 }
 0x245   : > { %4039 = vmatprep.subr.bf16.mxu0 %v17278_v55  ;;  %v17182_v55 = vcombine.high %v728_v44, %v736_v45  ;;  %v928_v44 = vld [vmem:[%s22862_s22 + $0x6e0] sm:$0xff] }
 0x246   : > { %3984 = vmatpush2.bf16.msra.mxu1 %v17291_v54  ;;  %v17453_v54 = vcombine.low %v1000_v35, %v1008_v36  ;;  %v1160_v36 = vld [vmem:[%s22862_s22 + $0xe20] sm:$0xff] }
 0x247   : > { %4082 = vmatprep.subr.bf16.mxu1 %v17534_v56  ;;  %4029 = vmatmul.mubr.bf16.vlgmr.msra.gmra.mxu0 %v23207_v5  ;;  %v1144_v45 = vld [vmem:[%s22862_s22 + $0xda0] sm:$0xff] }
 0x248   : > { %4040 = vmatpush1.bf16.msra.mxu0 %v17277_v63  ;;  %4071 = vmatprep.mubr.bf16.mxu0 %v23227_v18 }
 0x249   : > { %3986 = vmatmul.mubr.bf16.vlgmr.msra.gmra.mxu1 %v23215_v8  ;;  %4041 = vmatprep.subr.bf16.mxu0 %v17262_v1  ;;  %v976_v1 = vld [vmem:[%s22862_s22 + $0x860] sm:$0xff] }
 0x24a   : > { %4083 = vmatpush1.bf16.msra.mxu1 %v17533_v0  ;;  %17641 = vmatprep.mubr.msk.bf16.mxu1 %vm3691_vm0, %v23146_v21  ;;  %v968_v0 = vld [vmem:[%s22862_s22 + $0x820] sm:$0xff] }
 0x24b   : > { %4084 = vmatprep.subr.bf16.mxu1 %v17518_v2  ;;  %v17422_v15 = vcombine.high %v968_v0, %v976_v1 }
 0x24c   : > { %4042 = vmatpush1.bf16.msra.mxu0 %v17261_v9 }
 0x24d   : > { %4043 = vmatprep.subr.bf16.mxu0 %v17246_v12 }
 0x24e   : > { %4085 = vmatpush1.bf16.msra.mxu1 %v17517_v11  ;;  %v17166_v11 = vcombine.high %v712_v60, %v720_v61 }
 0x24f   : > { %4086 = vmatprep.subr.bf16.mxu1 %v17502_v62 }
 0x250   : > { %4044 = vmatpush1.bf16.msra.mxu0 %v17245_v19 }
 0x251   : > { %4045 = vmatprep.subr.bf16.mxu0 %v17230_v22  ;;  %v3772_v37 = vpop.f32.mrf.mxu1  ;;  %v1184_v22 = vld [vmem:[%s22862_s22 + $0xee0] sm:$0xff] }
 0x252   : > { %4087 = vmatpush1.bf16.msra.mxu1 %v17501_v20  ;;  %v1176_v20 = vld [vmem:[%s22862_s22 + $0xea0] sm:$0xff] }
 0x253   : > { %4088 = vmatprep.subr.bf16.mxu1 %v17486_v23  ;;  %v3774_v49 = vpop.f32.mrf.mxu1 }
 0x254   : > { %4046 = vmatpush1.bf16.msra.mxu0 %v17229_v27  ;;  %v17421_v27 = vcombine.low %v968_v0, %v976_v1  ;;  %v888_v1 = vld [vmem:[%s22862_s22 + $0x5a0] sm:$0xff] }
 0x255   : > { %4047 = vmatprep.subr.bf16.mxu0 %v17214_v50  ;;  %v3776_v2 = vpop.f32.mrf.mxu1 }
 0x256   : > { %4089 = vmatpush1.bf16.msra.mxu1 %v17485_v29  ;;  %v17406_v29 = vcombine.high %v952_v16, %v960_v17 }
 0x257   : > { %4090 = vmatprep.subr.bf16.mxu1 %v17470_v31  ;;  %v3729_v46 = vpop.f32.mrf.mxu0  ;;  %v3778_v23 = vpop.f32.mrf.mxu1  ;;  %v17630_v31 = vcombine.high %v1176_v20, %v1184_v22 }
 0x258   : > { %v3730_v51 = vadd.f32 %v3729_v46, %v1195_v38  ;;  %4048 = vmatpush1.bf16.msra.mxu0 %v17213_v39  ;;  %v1152_v46 = vld [vmem:[%s22862_s22 + $0xde0] sm:$0xff] }
 0x259   : > { %v3731_v53 = vpop.f32.mrf.mxu0  ;;  %4049 = vmatprep.subr.bf16.mxu0 %v17198_v41  ;;  %v17390_v41 = vcombine.high %v936_v33, %v944_v34  ;;  %v17597_v60 = vcombine.low %v1144_v45, %v1152_v46  ;;  %v864_v33 = vld [vmem:[%s22862_s22 + $0x4e0] sm:$0xff] }
 0x25a   : > { %4091 = vmatpush1.bf16.msra.mxu1 %v17469_v40  ;;  %v23255_v56 = vadd.f32 %v3772_v37, %v3730_v51  ;;  %v3732_v57 = vadd.f32 %v3731_v53, %v1199_v42  ;;  %v1168_v37 = vld [vmem:[%s22862_s22 + $0xe60] sm:$0xff]  ;;  %v17629_v40 = vcombine.low %v1176_v20, %v1184_v22  ;;  %v17598_v51 = vcombine.high %v1144_v45, %v1152_v46 }
 0x25b   : > { %4092 = vmatprep.subr.bf16.mxu1 %v17454_v43  ;;  %v3733_v63 = vpop.f32.mrf.mxu0  ;;  %v920_v43 = vld [vmem:[%s22862_s22 + $0x6a0] sm:$0xff]  ;;  %v17613_v48 = vcombine.low %v1160_v36, %v1168_v37 }
 0x25c   : > { %v4415_v3 = vmin.f32 %v23255_v56, 0.0  ;;  %v23262_v4 = vadd.f32 %v3774_v49, %v3732_v57  ;;  %v3734_v6 = vadd.f32 %v3733_v63, %v1195_v38  ;;  %4050 = vmatpush1.bf16.msra.mxu0 %v17197_v52  ;;  %v17405_v38 = vcombine.low %v952_v16, %v960_v17  ;;  %v904_v52 = vld [vmem:[%s22862_s22 + $0x620] sm:$0xff] }
 0x25d   : > { %v3735_v9 = vpop.f32.mrf.mxu0  ;;  %4051 = vmatprep.subr.bf16.mxu0 %v17182_v55  ;;  %v17374_v49 = vcombine.high %v920_v43, %v928_v44  ;;  %v912_v53 = vld [vmem:[%s22862_s22 + $0x660] sm:$0xff]  ;;  %v17373_v57 = vcombine.low %v920_v43, %v928_v44  ;;  %vm4383_vm1 = vcmp.gt.f32.partialorder %v23255_v56, 0.0  ;;  %v817_v44 = vld [vmem:[%s22862_s22 + $0x368] sm:$0xff] }
 0x25e   : > { %4093 = vmatpush1.bf16.msra.mxu1 %v17453_v54  ;;  %v4447_v12 = vmul.f32 1.442695, %v4415_v3  ;;  %v4416_v62 = vmin.f32 %v23262_v4, 0.0  ;;  %v23265_v14 = vadd.f32 %v3776_v2, %v3734_v6  ;;  %v3736_v19 = vadd.f32 %v3735_v9, %v1199_v42  ;;  %v1128_v54 = vld [vmem:[%s22862_s22 + $0xd20] sm:$0xff] }
 0x25f   : > { %4094 = vmatprep.subr.bf16.mxu1 %v17438_v58  ;;  %v17614_v42 = vcombine.high %v1160_v36, %v1168_v37  ;;  %v1136_v55 = vld [vmem:[%s22862_s22 + $0xd60] sm:$0xff]  ;;  %v17358_v61 = vcombine.high %v904_v52, %v912_v53  ;;  %vm4384_vm2 = vcmp.gt.f32.partialorder %v23262_v4, 0.0  ;;  %v825_v36 = vld [vmem:[%s22862_s22 + $0x3a8] sm:$0xff] }
 0x260   : > { %19588 = vpow2.f32 %v4447_v12  ;;  %v4449_v13 = vmul.f32 1.442695, %v4416_v62  ;;  %v4431_v24 = vmin.f32 %v23265_v14, 0.0  ;;  %4052 = vmatpush1.bf16.msra.mxu0 %v17181_v7  ;;  %v23272_v26 = vadd.f32 %v3778_v23, %v3736_v19  ;;  %v896_v2 = vld [vmem:[%s22862_s22 + $0x5e0] sm:$0xff]  ;;  %v833_v37 = vld [vmem:[%s22862_s22 + $0x3e8] sm:$0xff] }
 0x261   : > { %4053 = vmatprep.subr.bf16.mxu0 %v17166_v11  ;;  %v17582_v0 = vcombine.high %v1128_v54, %v1136_v55  ;;  %v1112_v6 = vld [vmem:[%s22862_s22 + $0xca0] sm:$0xff]  ;;  %v17581_v12 = vcombine.low %v1128_v54, %v1136_v55  ;;  %v17342_v62 = vcombine.high %v888_v1, %v896_v2  ;;  %vm4399_vm3 = vcmp.gt.f32.partialorder %v23265_v14, 0.0 }
 0x262   : > { %4095 = vmatpush1.bf16.msra.mxu1 %v17437_v10  ;;  %19590 = vpow2.f32 %v4449_v13  ;;  %v4479_v50 = vmul.f32 1.442695, %v4431_v24  ;;  %v4432_v35 = vmin.f32 %v23272_v26, 0.0  ;;  %v1120_v7 = vld [vmem:[%s22862_s22 + $0xce0] sm:$0xff]  ;;  %v17357_v10 = vcombine.low %v904_v52, %v912_v53  ;;  %v793_v52 = vld [vmem:[%s22862_s22 + $0x2a8] sm:$0xff] }
 0x263   : > { %4096 = vmatprep.subr.bf16.mxu1 %v17422_v15  ;;  %v17566_v17 = vcombine.high %v1112_v6, %v1120_v7  ;;  %v872_v19 = vld [vmem:[%s22862_s22 + $0x520] sm:$0xff]  ;;  %vm4400_vm4 = vcmp.gt.f32.partialorder %v23272_v26, 0.0  ;;  %v17279_v46 = vcombine.low %v825_v36, %v833_v37  ;;  %v801_v53 = vld [vmem:[%s22862_s22 + $0x2e8] sm:$0xff] }
 0x264   : > { %19592 = vpow2.f32 %v4479_v50  ;;  %4054 = vmatpush1.bf16.msra.mxu0 %v17165_v25  ;;  %v4481_v39 = vmul.f32 1.442695, %v4432_v35  ;;  %v880_v20 = vld [vmem:[%s22862_s22 + $0x560] sm:$0xff] }
 0x265   : > { %4055 = vmatprep.subr.bf16.mxu0 %v17406_v29  ;;  %v1096_v13 = vld [vmem:[%s22862_s22 + $0xc20] sm:$0xff]  ;;  %v17326_v29 = vcombine.high %v872_v19, %v880_v20 }
 0x266   : > { %4097 = vmatpush1.bf16.msra.mxu1 %v17421_v27  ;;  %19594 = vpow2.f32 %v4481_v39  ;;  %v1104_v24 = vld [vmem:[%s22862_s22 + $0xc60] sm:$0xff]  ;;  %v17341_v27 = vcombine.low %v888_v1, %v896_v2  ;;  %v17325_v39 = vcombine.low %v872_v19, %v880_v20  ;;  %v17247_v2 = vcombine.low %v793_v52, %v801_v53  ;;  %v1033_v19 = vld [vmem:[%s22862_s22 + $0xa28] sm:$0xff] }
 0x267   : > { %4102 = vmatprep.subr.bf16.mxu1 %v17630_v31  ;;  %v17550_v50 = vcombine.high %v1096_v13, %v1104_v24  ;;  %v856_v31 = vld [vmem:[%s22862_s22 + $0x4a0] sm:$0xff]  ;;  %v1041_v20 = vld [vmem:[%s22862_s22 + $0xa68] sm:$0xff] }
 0x268   : > { %4056 = vmatpush2.bf16.msra.mxu0 %v17405_v38  ;;  %v848_v43 = vld [vmem:[%s22862_s22 + $0x460] sm:$0xff]  ;;  %v17309_v45 = vcombine.low %v856_v31, %v864_v33 }
 0x269   : > { %4057 = vmatprep.subr.bf16.mxu0 %v17390_v41  ;;  %v17310_v41 = vcombine.high %v856_v31, %v864_v33  ;;  %v729_v33 = vld [vmem:[%s22862_s22 + $0xa8] sm:$0xff] }
 0x26a   : > { %4103 = vmatpush2.bf16.msra.mxu1 %v17629_v40  ;;  %v17549_v40 = vcombine.low %v1096_v13, %v1104_v24  ;;  %v753_v13 = vld [vmem:[%s22862_s22 + $0x168] sm:$0xff] }
 0x26b   : > { %4104 = vmatprep.subr.bf16.mxu1 %v17614_v42  ;;  %v17280_v42 = vcombine.high %v825_v36, %v833_v37  ;;  %v17487_v36 = vcombine.low %v1033_v19, %v1041_v20 }
 0x26c   : > { %4058 = vmatpush2.bf16.msra.mxu0 %v17389_v47 }
 0x26d   : > { %v19589_v58 = vpop.eup %19588  ;;  %4059 = vmatprep.subr.bf16.mxu0 %v17374_v49  ;;  %v1081_v49 = vld [vmem:[%s22862_s22 + $0xba8] sm:$0xff] }
 0x26e   : > { %4105 = vmatpush2.bf16.msra.mxu1 %v17613_v48  ;;  %v17645_v63 = vadd.f32 -1.0, %v19589_v58  ;;  %v17248_v58 = vcombine.high %v793_v52, %v801_v53 }
 0x26f   : > { %4106 = vmatprep.subr.bf16.mxu1 %v17598_v51  ;;  %v19591_v3 = vpop.eup %19590  ;;  %v1089_v51 = vld [vmem:[%s22862_s22 + $0xbe8] sm:$0xff] }
 0x270   : > { %v17646_v9 = vadd.f32 -1.0, %v19591_v3  ;;  %4060 = vmatpush2.bf16.msra.mxu0 %v17373_v57  ;;  %v4543_v15 = vsel %vm4383_vm1, %v23255_v56, %v17645_v63  ;;  %v17536_v57 = vcombine.high %v1081_v49, %v1089_v51  ;;  %v777_v63 = vld [vmem:[%s22862_s22 + $0x228] sm:$0xff]  ;;  %v17535_v1 = vcombine.low %v1081_v49, %v1089_v51 }
 0x271   : > { %v19593_v11 = vpop.eup %19592  ;;  %4061 = vmatprep.subr.bf16.mxu0 %v17358_v61  ;;  %v1073_v61 = vld [vmem:[%s22862_s22 + $0xb68] sm:$0xff] }
 0x272   : > { %4107 = vmatpush2.bf16.msra.mxu1 %v17597_v60  ;;  %v4544_v16 = vsel %vm4384_vm2, %v23262_v4, %v17646_v9  ;;  %v17661_v23 = vadd.f32 -1.0, %v19593_v11  ;;  %v17565_v4 = vcombine.low %v1112_v6, %v1120_v7  ;;  %v1065_v60 = vld [vmem:[%s22862_s22 + $0xb28] sm:$0xff] }
 0x273   : > { %4108 = vmatprep.subr.bf16.mxu1 %v17582_v0  ;;  %v19378_v22 = vpack.c.bf16 %v4544_v16, %v4543_v15  ;;  %v19595_v25 = vpop.eup %19594  ;;  %v785_v0 = vld [vmem:[%s22862_s22 + $0x268] sm:$0xff]  ;;  %v17520_v3 = vcombine.high %v1065_v60, %v1073_v61  ;;  %v1202_v15 = vsub.s32 2, %v23230_v59 }
 0x274   : > { %4062 = vmatpush2.bf16.msra.mxu0 %v17357_v10  ;;  %v17662_v56 = vadd.f32 -1.0, %v19595_v25  ;;  %v4559_v34 = vsel %vm4399_vm3, %v23265_v14, %v17661_v23  ;;  %v840_v14 = vld [vmem:[%s22862_s22 + $0x420] sm:$0xff]  ;;  %v17232_v6 = vcombine.high %v777_v63, %v785_v0  ;;  %v1049_v7 = vld [vmem:[%s22862_s22 + $0xaa8] sm:$0xff] }
 0x275   : > { %4674 = vst [vmem:[%s23300_s8] sm:$0xff] %v19378_v22  ;;  %4063 = vmatprep.subr.bf16.mxu0 %v17342_v62  ;;  %v17294_v47 = vcombine.high %v840_v14, %v848_v43  ;;  %v17293_v54 = vcombine.low %v840_v14, %v848_v43  ;;  %v1057_v9 = vld [vmem:[%s22862_s22 + $0xae8] sm:$0xff]  ;;  %v17231_v62 = vcombine.low %v777_v63, %v785_v0  ;;  %v1206_v22 = vsub.s32 3, %v23230_v59 }
 0x276   : > { %4109 = vmatpush2.bf16.msra.mxu1 %v17581_v12  ;;  %v4560_v35 = vsel %vm4400_vm4, %v23272_v26, %v17662_v56  ;;  %v809_v26 = vld [vmem:[%s22862_s22 + $0x328] sm:$0xff]  ;;  %v17519_v12 = vcombine.low %v1065_v60, %v1073_v61  ;;  %v17504_v16 = vcombine.high %v1049_v7, %v1057_v9  ;;  %v1203_v24 = vrot.slane %v23238_v30, %v1202_v15 }
 0x277   : > { %4110 = vmatprep.subr.bf16.mxu1 %v17566_v17  ;;  %v19386_v38 = vpack.c.bf16 %v4560_v35, %v4559_v34  ;;  %v17264_v48 = vcombine.high %v809_v26, %v817_v44  ;;  %v17263_v55 = vcombine.low %v809_v26, %v817_v44  ;;  %v761_v10 = vld [vmem:[%s22862_s22 + $0x1a8] sm:$0xff]  ;;  %v1207_v31 = vrot.slane %v23238_v30, %v1206_v22 }
 0x278   : > { %4064 = vmatpush2.bf16.msra.mxu0 %v17341_v27  ;;  %v769_v11 = vld [vmem:[%s22862_s22 + $0x1e8] sm:$0xff]  ;;  %v17488_v27 = vcombine.high %v1033_v19, %v1041_v20 }
 0x279   : > { %4065 = vmatprep.subr.bf16.mxu0 %v17326_v29  ;;  %4682 = vst [vmem:[%s23300_s8 + $0x40] sm:$0xff] %v19386_v38  ;;  %v17216_v17 = vcombine.high %v761_v10, %v769_v11  ;;  %v745_v23 = vld [vmem:[%s22862_s22 + $0x128] sm:$0xff]  ;;  %v17215_v25 = vcombine.low %v761_v10, %v769_v11 }
 0x27a   : > { %4111 = vmatpush2.bf16.msra.mxu1 %v17565_v4  ;;  %v17200_v56 = vcombine.high %v745_v23, %v753_v13  ;;  %v1017_v4 = vld [vmem:[%s22862_s22 + $0x9a8] sm:$0xff] }
 0x27b   : > { %4112 = vmatprep.subr.bf16.mxu1 %v17550_v50  ;;  %v1025_v29 = vld [vmem:[%s22862_s22 + $0x9e8] sm:$0xff] }
 0x27c   : > { %4066 = vmatpush2.bf16.msra.mxu0 %v17325_v39  ;;  %v737_v34 = vld [vmem:[%s22862_s22 + $0xe8] sm:$0xff]  ;;  %v17199_v39 = vcombine.low %v745_v23, %v753_v13  ;;  %v17471_v49 = vcombine.low %v1017_v4, %v1025_v29 }
 0x27d   : > { %4067 = vmatprep.subr.bf16.mxu0 %v17310_v41  ;;  %v1001_v14 = vld [vmem:[%s22862_s22 + $0x928] sm:$0xff] }
 0x27e   : > { %4113 = vmatpush2.bf16.msra.mxu1 %v17549_v40  ;;  %v17472_v40 = vcombine.high %v1017_v4, %v1025_v29  ;;  %v1009_v43 = vld [vmem:[%s22862_s22 + $0x968] sm:$0xff] }
 0x27f   : > { %4125 = vmatprep.subr.bf16.mxu1 %v17280_v42  ;;  %v17184_v42 = vcombine.high %v729_v33, %v737_v34  ;;  %v985_v60 = vld [vmem:[%s22862_s22 + $0x8a8] sm:$0xff] }
 0x280   : > { %4068 = vmatpush2.bf16.msra.mxu0 %v17309_v45  ;;  %v713_v45 = vld [vmem:[%s22862_s22 + $0x28] sm:$0xff] }
 0x281   : > { %4115 = vmatmul.mubr.bf16.vlgmr.msra.gmra.mxu1 %v23207_v5  ;;  %4069 = vmatprep.subr.bf16.mxu0 %v17294_v47  ;;  %v993_v61 = vld [vmem:[%s22862_s22 + $0x8e8] sm:$0xff] }
 0x282   : > { %4126 = vmatpush1.bf16.msra.mxu1 %v17279_v46  ;;  %4157 = vmatprep.mubr.bf16.mxu1 %v23227_v18  ;;  %v721_v46 = vld [vmem:[%s22862_s22 + $0x68] sm:$0xff] }
 0x283   : > { %4127 = vmatprep.subr.bf16.mxu1 %v17264_v48  ;;  %v17183_v48 = vcombine.low %v729_v33, %v737_v34  ;;  %v969_v19 = vld [vmem:[%s22862_s22 + $0x828] sm:$0xff] }
 0x284   : > { %4070 = vmatpush2.bf16.msra.mxu0 %v17293_v54  ;;  %v977_v20 = vld [vmem:[%s22862_s22 + $0x868] sm:$0xff] }
 0x285   : > { %4168 = vmatprep.subr.bf16.mxu0 %v17536_v57  ;;  %v937_v13 = vld [vmem:[%s22862_s22 + $0x728] sm:$0xff] }
 0x286   : > { %4128 = vmatpush1.bf16.msra.mxu1 %v17263_v55  ;;  %v17456_v55 = vcombine.high %v1001_v14, %v1009_v43  ;;  %v921_v33 = vld [vmem:[%s22862_s22 + $0x6a8] sm:$0xff] }
 0x287   : > { %4129 = vmatprep.subr.bf16.mxu1 %v17248_v58  ;;  %4072 = vmatmul.mubr.bf16.vlgmr.msra.gmra.mxu0 %v23215_v8  ;;  %v17168_v58 = vcombine.high %v713_v45, %v721_v46  ;;  %v929_v34 = vld [vmem:[%s22862_s22 + $0x6e8] sm:$0xff] }
 0x288   : > { %4169 = vmatpush1.bf16.msra.mxu0 %v17535_v1  ;;  %17642 = vmatprep.mubr.msk.bf16.mxu0 %vm3691_vm0, %v23146_v21  ;;  %v17503_v21 = vcombine.low %v1049_v7, %v1057_v9  ;;  %v17167_v7 = vcombine.low %v713_v45, %v721_v46  ;;  %v17455_v9 = vcombine.low %v1001_v14, %v1009_v43 }
 0x289   : > { %4170 = vmatprep.subr.bf16.mxu0 %v17520_v3  ;;  %v961_v3 = vld [vmem:[%s22862_s22 + $0x7e8] sm:$0xff]  ;;  %v17375_v43 = vcombine.low %v921_v33, %v929_v34 }
 0x28a   : > { %4130 = vmatpush1.bf16.msra.mxu1 %v17247_v2  ;;  %v953_v2 = vld [vmem:[%s22862_s22 + $0x7a8] sm:$0xff] }
 0x28b   : > { %4131 = vmatprep.subr.bf16.mxu1 %v17232_v6 }
 0x28c   : > { %4171 = vmatpush1.bf16.msra.mxu0 %v17519_v12 }
 0x28d   : > { %4172 = vmatprep.subr.bf16.mxu0 %v17504_v16 }
 0x28e   : > { %4132 = vmatpush1.bf16.msra.mxu1 %v17231_v62  ;;  %v17440_v62 = vcombine.high %v985_v60, %v993_v61 }
 0x28f   : > { %4133 = vmatprep.subr.bf16.mxu1 %v17216_v17  ;;  %v3858_v50 = vpop.f32.mrf.mxu0  ;;  %v17408_v17 = vcombine.high %v953_v2, %v961_v3 }
 0x290   : > { %4173 = vmatpush1.bf16.msra.mxu0 %v17503_v21  ;;  %v945_v21 = vld [vmem:[%s22862_s22 + $0x768] sm:$0xff] }
 0x291   : > { %v3815_v35 = vpop.f32.mrf.mxu1  ;;  %v3860_v38 = vpop.f32.mrf.mxu0  ;;  %4174 = vmatprep.subr.bf16.mxu0 %v17488_v27  ;;  %v17407_v27 = vcombine.low %v953_v2, %v961_v3  ;;  %v17392_v29 = vcombine.high %v937_v13, %v945_v21  ;;  %v1137_v2 = vld [vmem:[%s22862_s22 + $0xd68] sm:$0xff] }
 0x292   : > { %v3816_v37 = vadd.f32 %v3815_v35, %v1203_v24  ;;  %4134 = vmatpush1.bf16.msra.mxu1 %v17215_v25  ;;  %v17439_v25 = vcombine.low %v985_v60, %v993_v61  ;;  %v17423_v35 = vcombine.low %v969_v19, %v977_v20 }
 0x293   : > { %v3817_v41 = vpop.f32.mrf.mxu1  ;;  %4135 = vmatprep.subr.bf16.mxu1 %v17200_v56  ;;  %v3862_v54 = vpop.f32.mrf.mxu0  ;;  %v17424_v56 = vcombine.high %v969_v19, %v977_v20 }
 0x294   : > { %v23351_v26 = vadd.f32 %v3858_v50, %v3816_v37  ;;  %v3818_v44 = vadd.f32 %v3817_v41, %v1207_v31  ;;  %4175 = vmatpush1.bf16.msra.mxu0 %v17487_v36  ;;  %v1177_v50 = vld [vmem:[%s22862_s22 + $0xea8] sm:$0xff]  ;;  %v17391_v36 = vcombine.low %v937_v13, %v945_v21 }
 0x295   : > { %v3819_v47 = vpop.f32.mrf.mxu1  ;;  %4176 = vmatprep.subr.bf16.mxu0 %v17472_v40  ;;  %v3864_v12 = vpop.f32.mrf.mxu0  ;;  %v1169_v40 = vld [vmem:[%s22862_s22 + $0xe68] sm:$0xff] }
 0x296   : > { %v4417_v51 = vmin.f32 %v23351_v26, 0.0  ;;  %v23356_v52 = vadd.f32 %v3860_v38, %v3818_v44  ;;  %v3820_v53 = vadd.f32 %v3819_v47, %v1203_v24  ;;  %4136 = vmatpush1.bf16.msra.mxu1 %v17199_v39  ;;  %v17376_v38 = vcombine.high %v921_v33, %v929_v34  ;;  %v1161_v39 = vld [vmem:[%s22862_s22 + $0xe28] sm:$0xff] }
 0x297   : > { %v3821_v57 = vpop.f32.mrf.mxu1  ;;  %4137 = vmatprep.subr.bf16.mxu1 %v17184_v42  ;;  %v905_v41 = vld [vmem:[%s22862_s22 + $0x628] sm:$0xff]  ;;  %v17616_v44 = vcombine.high %v1161_v39, %v1169_v40  ;;  %vm4385_vm5 = vcmp.gt.f32.partialorder %v23351_v26, 0.0 }
 0x298   : > { %v4451_v63 = vmul.f32 1.442695, %v4417_v51  ;;  %v4418_v0 = vmin.f32 %v23356_v52, 0.0  ;;  %v23361_v1 = vadd.f32 %v3862_v54, %v3820_v53  ;;  %v3822_v6 = vadd.f32 %v3821_v57, %v1207_v31  ;;  %4177 = vmatpush1.bf16.msra.mxu0 %v17471_v49  ;;  %v1185_v31 = vld [vmem:[%s22862_s22 + $0xee8] sm:$0xff] }
 0x299   : > { %4178 = vmatprep.subr.bf16.mxu0 %v17456_v55  ;;  %v17632_v37 = vcombine.high %v1177_v50, %v1185_v31  ;;  %v913_v42 = vld [vmem:[%s22862_s22 + $0x668] sm:$0xff]  ;;  %v17631_v14 = vcombine.low %v1177_v50, %v1185_v31  ;;  %v17615_v55 = vcombine.low %v1161_v39, %v1169_v40  ;;  %vm4386_vm6 = vcmp.gt.f32.partialorder %v23356_v52, 0.0  ;;  %v834_v39 = vld [vmem:[%s22862_s22 + $0x3f0] sm:$0xff] }
 0x29a   : > { %19596 = vpow2.f32 %v4451_v63  ;;  %v4453_v10 = vmul.f32 1.442695, %v4418_v0  ;;  %v4433_v11 = vmin.f32 %v23361_v1, 0.0  ;;  %4138 = vmatpush1.bf16.msra.mxu1 %v17183_v48  ;;  %v23366_v16 = vadd.f32 %v3864_v12, %v3822_v6  ;;  %v1145_v47 = vld [vmem:[%s22862_s22 + $0xda8] sm:$0xff]  ;;  %v1082_v40 = vld [vmem:[%s22862_s22 + $0xbb0] sm:$0xff] }
 0x29b   : > { %4139 = vmatprep.subr.bf16.mxu1 %v17168_v58  ;;  %v17360_v46 = vcombine.high %v905_v41, %v913_v42  ;;  %v1153_v48 = vld [vmem:[%s22862_s22 + $0xde8] sm:$0xff]  ;;  %v17359_v58 = vcombine.low %v905_v41, %v913_v42  ;;  %vm4401_vm7 = vcmp.gt.f32.partialorder %v23361_v1, 0.0  ;;  %v1090_v41 = vld [vmem:[%s22862_s22 + $0xbf0] sm:$0xff] }
 0x29c   : > { %19598 = vpow2.f32 %v4453_v10  ;;  %v4483_v23 = vmul.f32 1.442695, %v4433_v11  ;;  %v4434_v24 = vmin.f32 %v23366_v16, 0.0  ;;  %4179 = vmatpush1.bf16.msra.mxu0 %v17455_v9  ;;  %v889_v51 = vld [vmem:[%s22862_s22 + $0x5a8] sm:$0xff]  ;;  %v17600_v60 = vcombine.high %v1145_v47, %v1153_v48 }
 0x29d   : > { %4180 = vmatprep.subr.bf16.mxu0 %v17440_v62  ;;  %v897_v53 = vld [vmem:[%s22862_s22 + $0x5e8] sm:$0xff]  ;;  %v17599_v12 = vcombine.low %v1145_v47, %v1153_v48  ;;  %vm4402_vm8 = vcmp.gt.f32.partialorder %v23366_v16, 0.0  ;;  %v1066_v47 = vld [vmem:[%s22862_s22 + $0xb30] sm:$0xff] }
 0x29e   : > { %19600 = vpow2.f32 %v4483_v23  ;;  %4140 = vmatpush1.bf16.msra.mxu1 %v17167_v7  ;;  %v4485_v4 = vmul.f32 1.442695, %v4434_v24  ;;  %v17344_v63 = vcombine.high %v889_v51, %v897_v53  ;;  %v1129_v0 = vld [vmem:[%s22862_s22 + $0xd28] sm:$0xff]  ;;  %v1074_v48 = vld [vmem:[%s22862_s22 + $0xb70] sm:$0xff] }
 0x29f   : > { %4141 = vmatprep.subr.bf16.mxu1 %v17408_v17  ;;  %v873_v7 = vld [vmem:[%s22862_s22 + $0x528] sm:$0xff]  ;;  %v17343_v17 = vcombine.low %v889_v51, %v897_v53  ;;  %v17584_v19 = vcombine.high %v1129_v0, %v1137_v2  ;;  %v17537_v51 = vcombine.low %v1082_v40, %v1090_v41 }
 0x2a0   : > { %19602 = vpow2.f32 %v4485_v4  ;;  %4181 = vmatpush1.bf16.msra.mxu0 %v17439_v25  ;;  %v881_v9 = vld [vmem:[%s22862_s22 + $0x568] sm:$0xff] }
 0x2a1   : > { %4182 = vmatprep.subr.bf16.mxu0 %v17424_v56  ;;  %v1121_v23 = vld [vmem:[%s22862_s22 + $0xce8] sm:$0xff]  ;;  %v17327_v4 = vcombine.low %v873_v7, %v881_v9 }
 0x2a2   : > { %4142 = vmatpush2.bf16.msra.mxu1 %v17407_v27  ;;  %v857_v13 = vld [vmem:[%s22862_s22 + $0x4a8] sm:$0xff]  ;;  %v17583_v27 = vcombine.low %v1129_v0, %v1137_v2 }
 0x2a3   : > { %4143 = vmatprep.subr.bf16.mxu1 %v17392_v29  ;;  %v865_v21 = vld [vmem:[%s22862_s22 + $0x4e8] sm:$0xff] }
 0x2a4   : > { %4183 = vmatpush1.bf16.msra.mxu0 %v17423_v35  ;;  %v17312_v50 = vcombine.high %v857_v13, %v865_v21  ;;  %v1097_v31 = vld [vmem:[%s22862_s22 + $0xc28] sm:$0xff]  ;;  %v17311_v35 = vcombine.low %v857_v13, %v865_v21  ;;  %v1214_v21 = vsub.s32 5, %v23230_v59 }
 0x2a5   : > { %4188 = vmatprep.subr.bf16.mxu0 %v17632_v37  ;;  %v1105_v33 = vld [vmem:[%s22862_s22 + $0xc68] sm:$0xff] }
 0x2a6   : > { %4144 = vmatpush2.bf16.msra.mxu1 %v17391_v36  ;;  %v841_v34 = vld [vmem:[%s22862_s22 + $0x428] sm:$0xff]  ;;  %v17552_v36 = vcombine.high %v1097_v31, %v1105_v33  ;;  %v17551_v42 = vcombine.low %v1097_v31, %v1105_v33 }
 0x2a7   : > { %v19597_v45 = vpop.eup %19596  ;;  %4145 = vmatprep.subr.bf16.mxu1 %v17376_v38  ;;  %v826_v38 = vld [vmem:[%s22862_s22 + $0x3b0] sm:$0xff] }
 0x2a8   : > { %v17647_v49 = vadd.f32 -1.0, %v19597_v45  ;;  %4189 = vmatpush2.bf16.msra.mxu0 %v17631_v14  ;;  %v810_v45 = vld [vmem:[%s22862_s22 + $0x330] sm:$0xff] }
 0x2a9   : > { %v19599_v54 = vpop.eup %19598  ;;  %4190 = vmatprep.subr.bf16.mxu0 %v17616_v44  ;;  %v17538_v44 = vcombine.high %v1082_v40, %v1090_v41 }
 0x2aa   : > { %v17648_v57 = vadd.f32 -1.0, %v19599_v54  ;;  %4146 = vmatpush2.bf16.msra.mxu1 %v17375_v43  ;;  %v4545_v3 = vsel %vm4385_vm5, %v23351_v26, %v17647_v49  ;;  %v17328_v26 = vcombine.high %v873_v7, %v881_v9  ;;  %v17282_v43 = vcombine.high %v826_v38, %v834_v39  ;;  %v1042_v7 = vld [vmem:[%s22862_s22 + $0xa70] sm:$0xff] }
 0x2ab   : > { %v19601_v61 = vpop.eup %19600  ;;  %4147 = vmatprep.subr.bf16.mxu1 %v17360_v46  ;;  %v818_v46 = vld [vmem:[%s22862_s22 + $0x370] sm:$0xff]  ;;  %v17281_v49 = vcombine.low %v826_v38, %v834_v39  ;;  %v17522_v54 = vcombine.high %v1066_v47, %v1074_v48 }
 0x2ac   : > { %v4546_v6 = vsel %vm4386_vm6, %v23356_v52, %v17648_v57  ;;  %v17663_v11 = vadd.f32 -1.0, %v19601_v61  ;;  %4191 = vmatpush2.bf16.msra.mxu0 %v17615_v55  ;;  %v1113_v52 = vld [vmem:[%s22862_s22 + $0xca8] sm:$0xff]  ;;  %v17266_v53 = vcombine.high %v810_v45, %v818_v46  ;;  %v794_v55 = vld [vmem:[%s22862_s22 + $0x2b0] sm:$0xff]  ;;  %v17265_v61 = vcombine.low %v810_v45, %v818_v46 }
 0x2ad   : > { %v19379_v10 = vpack.c.bf16 %v4546_v6, %v4545_v3  ;;  %v19603_v62 = vpop.eup %19602  ;;  %4192 = vmatprep.subr.bf16.mxu0 %v17600_v60  ;;  %v17568_v29 = vcombine.high %v1113_v52, %v1121_v23  ;;  %v802_v57 = vld [vmem:[%s22862_s22 + $0x2f0] sm:$0xff] }
 0x2ae   : > { %4148 = vmatpush2.bf16.msra.mxu1 %v17359_v58  ;;  %v17664_v20 = vadd.f32 -1.0, %v19603_v62  ;;  %v4561_v24 = vsel %vm4401_vm7, %v23361_v1, %v17663_v11  ;;  %v849_v1 = vld [vmem:[%s22862_s22 + $0x468] sm:$0xff]  ;;  %v1050_v58 = vld [vmem:[%s22862_s22 + $0xab0] sm:$0xff]  ;;  %v17250_v0 = vcombine.high %v794_v55, %v802_v57  ;;  %v17249_v9 = vcombine.low %v794_v55, %v802_v57 }
 0x2af   : > { %4675 = vst [vmem:[%s23300_s8 + $0x8] sm:$0xff] %v19379_v10  ;;  %4149 = vmatprep.subr.bf16.mxu1 %v17344_v63  ;;  %v17296_v37 = vcombine.high %v841_v34, %v849_v1  ;;  %v17295_v14 = vcombine.low %v841_v34, %v849_v1  ;;  %v1058_v60 = vld [vmem:[%s22862_s22 + $0xaf0] sm:$0xff]  ;;  %v17521_v63 = vcombine.low %v1066_v47, %v1074_v48 }
 0x2b0   : > { %v4562_v25 = vsel %vm4402_vm8, %v23366_v16, %v17664_v20  ;;  %4193 = vmatpush2.bf16.msra.mxu0 %v17599_v12  ;;  %v17567_v16 = vcombine.low %v1113_v52, %v1121_v23  ;;  %v17506_v2 = vcombine.high %v1050_v58, %v1058_v60  ;;  %v778_v3 = vld [vmem:[%s22862_s22 + $0x230] sm:$0xff]  ;;  %v17505_v10 = vcombine.low %v1050_v58, %v1058_v60 }
 0x2b1   : > { %v19387_v56 = vpack.c.bf16 %v4562_v25, %v4561_v24  ;;  %4194 = vmatprep.subr.bf16.mxu0 %v17584_v19  ;;  %v786_v6 = vld [vmem:[%s22862_s22 + $0x270] sm:$0xff]  ;;  %v1215_v34 = vrot.slane %v23238_v30, %v1214_v21 }
 0x2b2   : > { %4150 = vmatpush2.bf16.msra.mxu1 %v17343_v17  ;;  %v17234_v11 = vcombine.high %v778_v3, %v786_v6  ;;  %v762_v62 = vld [vmem:[%s22862_s22 + $0x1b0] sm:$0xff] }
 0x2b3   : > { %4151 = vmatprep.subr.bf16.mxu1 %v17328_v26  ;;  %4683 = vst [vmem:[%s23300_s8 + $0x48] sm:$0xff] %v19387_v56  ;;  %v770_v17 = vld [vmem:[%s22862_s22 + $0x1f0] sm:$0xff]  ;;  %v17233_v26 = vcombine.low %v778_v3, %v786_v6 }
 0x2b4   : > { %4195 = vmatpush2.bf16.msra.mxu0 %v17583_v27  ;;  %v1018_v19 = vld [vmem:[%s22862_s22 + $0x9b0] sm:$0xff]  ;;  %v17218_v23 = vcombine.high %v762_v62, %v770_v17 }
 0x2b5   : > { %4196 = vmatprep.subr.bf16.mxu0 %v17568_v29  ;;  %v1026_v20 = vld [vmem:[%s22862_s22 + $0x9f0] sm:$0xff] }
 0x2b6   : > { %4152 = vmatpush2.bf16.msra.mxu1 %v17327_v4  ;;  %v17474_v13 = vcombine.high %v1018_v19, %v1026_v20  ;;  %v746_v24 = vld [vmem:[%s22862_s22 + $0x130] sm:$0xff]  ;;  %v17473_v31 = vcombine.low %v1018_v19, %v1026_v20 }
 0x2b7   : > { %4153 = vmatprep.subr.bf16.mxu1 %v17312_v50  ;;  %v754_v25 = vld [vmem:[%s22862_s22 + $0x170] sm:$0xff]  ;;  %v17217_v50 = vcombine.low %v762_v62, %v770_v17 }
 0x2b8   : > { %4197 = vmatpush2.bf16.msra.mxu0 %v17567_v16  ;;  %v1002_v27 = vld [vmem:[%s22862_s22 + $0x930] sm:$0xff]  ;;  %v17202_v33 = vcombine.high %v746_v24, %v754_v25  ;;  %v17201_v41 = vcombine.low %v746_v24, %v754_v25 }
 0x2b9   : > { %4198 = vmatprep.subr.bf16.mxu0 %v17552_v36  ;;  %v1010_v56 = vld [vmem:[%s22862_s22 + $0x970] sm:$0xff] }
 0x2ba   : > { %4154 = vmatpush2.bf16.msra.mxu1 %v17311_v35  ;;  %v17458_v1 = vcombine.high %v1002_v27, %v1010_v56  ;;  %v730_v16 = vld [vmem:[%s22862_s22 + $0xb0] sm:$0xff] }
 0x2bb   : > { %4155 = vmatprep.subr.bf16.mxu1 %v17296_v37  ;;  %v738_v35 = vld [vmem:[%s22862_s22 + $0xf0] sm:$0xff] }
 0x2bc   : > { %4199 = vmatpush2.bf16.msra.mxu0 %v17551_v42  ;;  %v986_v37 = vld [vmem:[%s22862_s22 + $0x8b0] sm:$0xff]  ;;  %v17185_v58 = vcombine.low %v730_v16, %v738_v35 }
 0x2bd   : > { %4211 = vmatprep.subr.bf16.mxu0 %v17282_v43  ;;  %v994_v38 = vld [vmem:[%s22862_s22 + $0x8f0] sm:$0xff]  ;;  %v17186_v43 = vcombine.high %v730_v16, %v738_v35 }
 0x2be   : > { %4156 = vmatpush2.bf16.msra.mxu1 %v17295_v14  ;;  %v17457_v14 = vcombine.low %v1002_v27, %v1010_v56  ;;  %v17442_v45 = vcombine.high %v986_v37, %v994_v38  ;;  %v714_v46 = vld [vmem:[%s22862_s22 + $0x30] sm:$0xff] }
 0x2bf   : > { %4254 = vmatprep.subr.bf16.mxu1 %v17538_v44  ;;  %4201 = vmatmul.mubr.bf16.vlgmr.msra.gmra.mxu0 %v23207_v5  ;;  %v23426_v5 = vld [vmem:[%s26018_s29 + $0xc] ss:$16 sps:$4 sm:$0xff]   ;;  %v722_v47 = vld [vmem:[%s22862_s22 + $0x70] sm:$0xff] }
 0x2c0   : > { %4212 = vmatpush1.bf16.msra.mxu0 %v17281_v49  ;;  %4243 = vmatprep.mubr.bf16.mxu0 %v23227_v18  ;;  %v1210_v18 = vsub.s32 4, %v23230_v59  ;;  %v970_v49 = vld [vmem:[%s22862_s22 + $0x830] sm:$0xff]  ;;  %v17169_v19 = vcombine.low %v714_v46, %v722_v47 }
 0x2c1   : > { %4158 = vmatmul.mubr.bf16.vlgmr.msra.gmra.mxu1 %v23215_v8  ;;  %4213 = vmatprep.subr.bf16.mxu0 %v17266_v53  ;;  %v1034_v8 = vld [vmem:[%s22862_s22 + $0xa30] sm:$0xff] }
 0x2c2   : > { %4255 = vmatpush1.bf16.msra.mxu1 %v17537_v51  ;;  %17643 = vmatprep.mubr.msk.bf16.mxu1 %vm3691_vm0, %v23426_v5  ;;  %v17490_v12 = vcombine.high %v1034_v8, %v1042_v7  ;;  %v17489_v52 = vcombine.low %v1034_v8, %v1042_v7  ;;  %v1211_v29 = vrot.slane %v23238_v30, %v1210_v18  ;;  %v978_v51 = vld [vmem:[%s22862_s22 + $0x870] sm:$0xff] }
 0x2c3   : > { %4256 = vmatprep.subr.bf16.mxu1 %v17522_v54  ;;  %v17426_v6 = vcombine.high %v970_v49, %v978_v51  ;;  %v954_v8 = vld [vmem:[%s22862_s22 + $0x7b0] sm:$0xff] }
 0x2c4   : > { %4214 = vmatpush1.bf16.msra.mxu0 %v17265_v61  ;;  %v17441_v61 = vcombine.low %v986_v37, %v994_v38  ;;  %v962_v7 = vld [vmem:[%s22862_s22 + $0x7f0] sm:$0xff] }
 0x2c5   : > { %4215 = vmatprep.subr.bf16.mxu0 %v17250_v0  ;;  %v938_v24 = vld [vmem:[%s22862_s22 + $0x730] sm:$0xff] }
 0x2c6   : > { %4257 = vmatpush1.bf16.msra.mxu1 %v17521_v63  ;;  %v17170_v63 = vcombine.high %v714_v46, %v722_v47  ;;  %v946_v25 = vld [vmem:[%s22862_s22 + $0x770] sm:$0xff] }
 0x2c7   : > { %4258 = vmatprep.subr.bf16.mxu1 %v17506_v2  ;;  %v1162_v56 = vld [vmem:[%s22862_s22 + $0xe30] sm:$0xff]  ;;  %v17393_v37 = vcombine.low %v938_v24, %v946_v25 }
 0x2c8   : > { %4216 = vmatpush1.bf16.msra.mxu0 %v17249_v9  ;;  %v930_v16 = vld [vmem:[%s22862_s22 + $0x6f0] sm:$0xff] }
 0x2c9   : > { %4217 = vmatprep.subr.bf16.mxu0 %v17234_v11  ;;  %v3944_v4 = vpop.f32.mrf.mxu1  ;;  %v1186_v11 = vld [vmem:[%s22862_s22 + $0xef0] sm:$0xff] }
 0x2ca   : > { %4259 = vmatpush1.bf16.msra.mxu1 %v17505_v10  ;;  %v1178_v10 = vld [vmem:[%s22862_s22 + $0xeb0] sm:$0xff] }
 0x2cb   : > { %4260 = vmatprep.subr.bf16.mxu1 %v17490_v12  ;;  %v3946_v39 = vpop.f32.mrf.mxu1  ;;  %v1146_v35 = vld [vmem:[%s22862_s22 + $0xdb0] sm:$0xff] }
 0x2cc   : > { %4218 = vmatpush1.bf16.msra.mxu0 %v17233_v26  ;;  %v17425_v26 = vcombine.low %v970_v49, %v978_v51  ;;  %v890_v51 = vld [vmem:[%s22862_s22 + $0x5b0] sm:$0xff] }
 0x2cd   : > { %4219 = vmatprep.subr.bf16.mxu0 %v17218_v23  ;;  %v3948_v53 = vpop.f32.mrf.mxu1 }
 0x2ce   : > { %4261 = vmatpush1.bf16.msra.mxu1 %v17489_v52  ;;  %v17410_v52 = vcombine.high %v954_v8, %v962_v7 }
 0x2cf   : > { %4262 = vmatprep.subr.bf16.mxu1 %v17474_v13  ;;  %v3901_v36 = vpop.f32.mrf.mxu0  ;;  %v3950_v12 = vpop.f32.mrf.mxu1  ;;  %v17634_v13 = vcombine.high %v1178_v10, %v1186_v11 }
 0x2d0   : > { %v3902_v40 = vadd.f32 %v3901_v36, %v1211_v29  ;;  %4220 = vmatpush1.bf16.msra.mxu0 %v17217_v50  ;;  %v1154_v36 = vld [vmem:[%s22862_s22 + $0xdf0] sm:$0xff] }
 0x2d1   : > { %v3903_v42 = vpop.f32.mrf.mxu0  ;;  %4221 = vmatprep.subr.bf16.mxu0 %v17202_v33  ;;  %v17394_v33 = vcombine.high %v938_v24, %v946_v25  ;;  %v17601_v46 = vcombine.low %v1146_v35, %v1154_v36  ;;  %v866_v24 = vld [vmem:[%s22862_s22 + $0x4f0] sm:$0xff] }
 0x2d2   : > { %4263 = vmatpush1.bf16.msra.mxu1 %v17473_v31  ;;  %v23453_v30 = vadd.f32 %v3944_v4, %v3902_v40  ;;  %v3904_v44 = vadd.f32 %v3903_v42, %v1215_v34  ;;  %v1170_v4 = vld [vmem:[%s22862_s22 + $0xe70] sm:$0xff]  ;;  %v17633_v31 = vcombine.low %v1178_v10, %v1186_v11  ;;  %v17602_v40 = vcombine.high %v1146_v35, %v1154_v36 }
 0x2d3   : > { %4264 = vmatprep.subr.bf16.mxu1 %v17458_v1  ;;  %v3905_v48 = vpop.f32.mrf.mxu0  ;;  %v922_v1 = vld [vmem:[%s22862_s22 + $0x6b0] sm:$0xff]  ;;  %v17617_v38 = vcombine.low %v1162_v56, %v1170_v4 }
 0x2d4   : > { %v4419_v54 = vmin.f32 %v23453_v30, 0.0  ;;  %v23460_v55 = vadd.f32 %v3946_v39, %v3904_v44  ;;  %v3906_v57 = vadd.f32 %v3905_v48, %v1211_v29  ;;  %4222 = vmatpush1.bf16.msra.mxu0 %v17201_v41  ;;  %v17409_v29 = vcombine.low %v954_v8, %v962_v7  ;;  %v906_v41 = vld [vmem:[%s22862_s22 + $0x630] sm:$0xff] }
 0x2d5   : > { %v3907_v60 = vpop.f32.mrf.mxu0  ;;  %4223 = vmatprep.subr.bf16.mxu0 %v17186_v43  ;;  %v17378_v39 = vcombine.high %v922_v1, %v930_v16  ;;  %v914_v42 = vld [vmem:[%s22862_s22 + $0x670] sm:$0xff]  ;;  %v17377_v44 = vcombine.low %v922_v1, %v930_v16  ;;  %vm4387_vm9 = vcmp.gt.f32.partialorder %v23453_v30, 0.0  ;;  %v819_v16 = vld [vmem:[%s22862_s22 + $0x378] sm:$0xff] }
 0x2d6   : > { %4265 = vmatpush1.bf16.msra.mxu1 %v17457_v14  ;;  %v4455_v0 = vmul.f32 1.442695, %v4419_v54  ;;  %v4420_v2 = vmin.f32 %v23460_v55, 0.0  ;;  %v23463_v3 = vadd.f32 %v3948_v53, %v3906_v57  ;;  %v3908_v9 = vadd.f32 %v3907_v60, %v1215_v34  ;;  %v1130_v14 = vld [vmem:[%s22862_s22 + $0xd30] sm:$0xff] }
 0x2d7   : > { %4266 = vmatprep.subr.bf16.mxu1 %v17442_v45  ;;  %v17618_v34 = vcombine.high %v1162_v56, %v1170_v4  ;;  %v1138_v43 = vld [vmem:[%s22862_s22 + $0xd70] sm:$0xff]  ;;  %v17362_v47 = vcombine.high %v906_v41, %v914_v42  ;;  %vm4388_vm10 = vcmp.gt.f32.partialorder %v23460_v55, 0.0  ;;  %v827_v56 = vld [vmem:[%s22862_s22 + $0x3b8] sm:$0xff] }
 0x2d8   : > { %19604 = vpow2.f32 %v4455_v0  ;;  %v4457_v62 = vmul.f32 1.442695, %v4420_v2  ;;  %v4435_v17 = vmin.f32 %v23463_v3, 0.0  ;;  %4224 = vmatpush1.bf16.msra.mxu0 %v17185_v58  ;;  %v23470_v20 = vadd.f32 %v3950_v12, %v3908_v9  ;;  %v898_v53 = vld [vmem:[%s22862_s22 + $0x5f0] sm:$0xff]  ;;  %v835_v4 = vld [vmem:[%s22862_s22 + $0x3f8] sm:$0xff] }
 0x2d9   : > { %4225 = vmatprep.subr.bf16.mxu0 %v17170_v63  ;;  %v17586_v49 = vcombine.high %v1130_v14, %v1138_v43  ;;  %v1114_v57 = vld [vmem:[%s22862_s22 + $0xcb0] sm:$0xff]  ;;  %v17585_v0 = vcombine.low %v1130_v14, %v1138_v43  ;;  %v17346_v2 = vcombine.high %v890_v51, %v898_v53  ;;  %vm4403_vm11 = vcmp.gt.f32.partialorder %v23463_v3, 0.0  ;;  %v23518_v14 = vld [vmem:[%s26018_s29 + $0x8] ss:$16 sps:$4 sm:$0xff]  }
 0x2da   : > { %4267 = vmatpush1.bf16.msra.mxu1 %v17441_v61  ;;  %19606 = vpow2.f32 %v4457_v62  ;;  %v4487_v23 = vmul.f32 1.442695, %v4435_v17  ;;  %v4436_v27 = vmin.f32 %v23470_v20, 0.0  ;;  %v1122_v58 = vld [vmem:[%s22862_s22 + $0xcf0] sm:$0xff]  ;;  %v17361_v61 = vcombine.low %v906_v41, %v914_v42  ;;  %v795_v41 = vld [vmem:[%s22862_s22 + $0x2b8] sm:$0xff] }
 0x2db   : > { %4268 = vmatprep.subr.bf16.mxu1 %v17426_v6  ;;  %v17570_v7 = vcombine.high %v1114_v57, %v1122_v58  ;;  %v874_v9 = vld [vmem:[%s22862_s22 + $0x530] sm:$0xff]  ;;  %vm4404_vm12 = vcmp.gt.f32.partialorder %v23470_v20, 0.0  ;;  %v17283_v36 = vcombine.low %v827_v56, %v835_v4  ;;  %v803_v42 = vld [vmem:[%s22862_s22 + $0x2f8] sm:$0xff] }
 0x2dc   : > { %19608 = vpow2.f32 %v4487_v23  ;;  %4226 = vmatpush1.bf16.msra.mxu0 %v17169_v19  ;;  %v4489_v50 = vmul.f32 1.442695, %v4436_v27  ;;  %v882_v10 = vld [vmem:[%s22862_s22 + $0x570] sm:$0xff] }
 0x2dd   : > { %4227 = vmatprep.subr.bf16.mxu0 %v17410_v52  ;;  %v1098_v62 = vld [vmem:[%s22862_s22 + $0xc30] sm:$0xff] }
 0x2de   : > { %4269 = vmatpush1.bf16.msra.mxu1 %v17425_v26  ;;  %19610 = vpow2.f32 %v4489_v50  ;;  %v1106_v17 = vld [vmem:[%s22862_s22 + $0xc70] sm:$0xff]  ;;  %v17345_v26 = vcombine.low %v890_v51, %v898_v53  ;;  %v17329_v50 = vcombine.low %v874_v9, %v882_v10  ;;  %v779_v51 = vld [vmem:[%s22862_s22 + $0x238] sm:$0xff] }
 0x2df   : > { %4274 = vmatprep.subr.bf16.mxu1 %v17634_v13  ;;  %v17554_v23 = vcombine.high %v1098_v62, %v1106_v17  ;;  %v858_v13 = vld [vmem:[%s22862_s22 + $0x4b0] sm:$0xff]  ;;  %v787_v53 = vld [vmem:[%s22862_s22 + $0x278] sm:$0xff] }
 0x2e0   : > { %4228 = vmatpush2.bf16.msra.mxu0 %v17409_v29  ;;  %v850_v1 = vld [vmem:[%s22862_s22 + $0x470] sm:$0xff]  ;;  %v17313_v35 = vcombine.low %v858_v13, %v866_v24 }
 0x2e1   : > { %4229 = vmatprep.subr.bf16.mxu0 %v17394_v33  ;;  %v17314_v33 = vcombine.high %v858_v13, %v866_v24  ;;  %v1019_v24 = vld [vmem:[%s22862_s22 + $0x9b8] sm:$0xff] }
 0x2e2   : > { %4275 = vmatpush2.bf16.msra.mxu1 %v17633_v31  ;;  %v17553_v31 = vcombine.low %v1098_v62, %v1106_v17  ;;  %v1043_v62 = vld [vmem:[%s22862_s22 + $0xa78] sm:$0xff]  ;;  %v1222_v17 = vsub.s32 7, %v23230_v59 }
 0x2e3   : > { %4276 = vmatprep.subr.bf16.mxu1 %v17618_v34  ;;  %v17284_v34 = vcombine.high %v827_v56, %v835_v4  ;;  %v731_v4 = vld [vmem:[%s22862_s22 + $0xb8] sm:$0xff] }
 0x2e4   : > { %4230 = vmatpush2.bf16.msra.mxu0 %v17393_v37 }
 0x2e5   : > { %v19605_v45 = vpop.eup %19604  ;;  %4231 = vmatprep.subr.bf16.mxu0 %v17378_v39  ;;  %v1083_v39 = vld [vmem:[%s22862_s22 + $0xbb8] sm:$0xff] }
 0x2e6   : > { %4277 = vmatpush2.bf16.msra.mxu1 %v17617_v38  ;;  %v17649_v48 = vadd.f32 -1.0, %v19605_v45 }
 0x2e7   : > { %4278 = vmatprep.subr.bf16.mxu1 %v17602_v40  ;;  %v19607_v54 = vpop.eup %19606  ;;  %v1091_v40 = vld [vmem:[%s22862_s22 + $0xbf8] sm:$0xff] }
 0x2e8   : > { %v17650_v60 = vadd.f32 -1.0, %v19607_v54  ;;  %4232 = vmatpush2.bf16.msra.mxu0 %v17377_v44  ;;  %v4547_v6 = vsel %vm4387_vm9, %v23453_v30, %v17649_v48  ;;  %v17569_v30 = vcombine.low %v1114_v57, %v1122_v58  ;;  %v17540_v45 = vcombine.high %v1083_v39, %v1091_v40  ;;  %v1075_v48 = vld [vmem:[%s22862_s22 + $0xb78] sm:$0xff] }
 0x2e9   : > { %v19609_v63 = vpop.eup %19608  ;;  %4233 = vmatprep.subr.bf16.mxu0 %v17362_v47  ;;  %v1067_v47 = vld [vmem:[%s22862_s22 + $0xb38] sm:$0xff]  ;;  %v17539_v54 = vcombine.low %v1083_v39, %v1091_v40  ;;  %v17251_v57 = vcombine.low %v795_v41, %v803_v42 }
 0x2ea   : > { %4279 = vmatpush2.bf16.msra.mxu1 %v17601_v46  ;;  %v4548_v8 = vsel %vm4388_vm10, %v23460_v55, %v17650_v60  ;;  %v17665_v12 = vadd.f32 -1.0, %v19609_v63  ;;  %v17330_v55 = vcombine.high %v874_v9, %v882_v10  ;;  %v17252_v46 = vcombine.high %v795_v41, %v803_v42  ;;  %v1059_v63 = vld [vmem:[%s22862_s22 + $0xaf8] sm:$0xff] }
 0x2eb   : > { %4280 = vmatprep.subr.bf16.mxu1 %v17586_v49  ;;  %v19380_v11 = vpack.c.bf16 %v4548_v8, %v4547_v6  ;;  %v19611_v19 = vpop.eup %19610  ;;  %v19658_v49 = vld [vmem:[%s26018_s29 + $0x4] ss:$16 sps:$4 sm:$0xff]   ;;  %v17524_v58 = vcombine.high %v1067_v47, %v1075_v48  ;;  %v17236_v60 = vcombine.high %v779_v51, %v787_v53  ;;  %v771_v6 = vld [vmem:[%s22862_s22 + $0x1f8] sm:$0xff]  ;;  %v17523_v8 = vcombine.low %v1067_v47, %v1075_v48 }
 0x2ec   : > { %4234 = vmatpush2.bf16.msra.mxu0 %v17361_v61  ;;  %v17666_v52 = vadd.f32 -1.0, %v19611_v19  ;;  %v4563_v25 = vsel %vm4403_vm11, %v23463_v3, %v17665_v12  ;;  %v842_v3 = vld [vmem:[%s22862_s22 + $0x430] sm:$0xff]  ;;  %v1051_v61 = vld [vmem:[%s22862_s22 + $0xab8] sm:$0xff]  ;;  %v1218_v9 = vsub.s32 6, %v23230_v59 }
 0x2ed   : > { %4676 = vst [vmem:[%s23300_s8 + $0x10] sm:$0xff] %v19380_v11  ;;  %4235 = vmatprep.subr.bf16.mxu0 %v17346_v2  ;;  %v17298_v37 = vcombine.high %v842_v3, %v850_v1  ;;  %v17297_v43 = vcombine.low %v842_v3, %v850_v1  ;;  %v763_v2 = vld [vmem:[%s22862_s22 + $0x1b8] sm:$0xff]  ;;  %v17508_v10 = vcombine.high %v1051_v61, %v1059_v63 }
 0x2ee   : > { %4281 = vmatpush2.bf16.msra.mxu1 %v17585_v0  ;;  %v4564_v27 = vsel %vm4404_vm12, %v23470_v20, %v17666_v52  ;;  %v811_v20 = vld [vmem:[%s22862_s22 + $0x338] sm:$0xff]  ;;  %v23533_v0 = vld [vmem:[%s26018_s29] ss:$16 sps:$4 sm:$0xff]   ;;  %v17220_v11 = vcombine.high %v763_v2, %v771_v6 }
 0x2ef   : > { %4282 = vmatprep.subr.bf16.mxu1 %v17570_v7  ;;  %v19388_v29 = vpack.c.bf16 %v4564_v27, %v4563_v25  ;;  %v17268_v38 = vcombine.high %v811_v20, %v819_v16  ;;  %v17267_v44 = vcombine.low %v811_v20, %v819_v16  ;;  %v17235_v7 = vcombine.low %v779_v51, %v787_v53  ;;  %v1035_v12 = vld [vmem:[%s22862_s22 + $0xa38] sm:$0xff]  ;;  %v19660_v52 = vld [vmem:[%s22869_s28] sm:$0xff] }
 0x2f0   : > { %4236 = vmatpush2.bf16.msra.mxu0 %v17345_v26  ;;  %v747_v19 = vld [vmem:[%s22862_s22 + $0x138] sm:$0xff]  ;;  %v1223_v56 = vrot.slane %v19660_v52, %v1222_v17 }
 0x2f1   : > { %4237 = vmatprep.subr.bf16.mxu0 %v17330_v55  ;;  %4684 = vst [vmem:[%s23300_s8 + $0x50] sm:$0xff] %v19388_v29  ;;  %v755_v26 = vld [vmem:[%s22862_s22 + $0x178] sm:$0xff]  ;;  %v17219_v55 = vcombine.low %v763_v2, %v771_v6 }
 0x2f2   : > { %4283 = vmatpush2.bf16.msra.mxu1 %v17569_v30  ;;  %v1219_v30 = vrot.slane %v19660_v52, %v1218_v9  ;;  %v17204_v13 = vcombine.high %v747_v19, %v755_v26  ;;  %v1027_v25 = vld [vmem:[%s22862_s22 + $0x9f8] sm:$0xff]  ;;  %v17203_v3 = vcombine.low %v747_v19, %v755_v26 }
 0x2f3   : > { %4284 = vmatprep.subr.bf16.mxu1 %v17554_v23  ;;  %v17492_v23 = vcombine.high %v1035_v12, %v1043_v62  ;;  %v739_v29 = vld [vmem:[%s22862_s22 + $0xf8] sm:$0xff]  ;;  %v17476_v1 = vcombine.high %v1019_v24, %v1027_v25 }
 0x2f4   : > { %4238 = vmatpush2.bf16.msra.mxu0 %v17329_v50  ;;  %v17188_v16 = vcombine.high %v731_v4, %v739_v29  ;;  %v715_v39 = vld [vmem:[%s22862_s22 + $0x38] sm:$0xff]  ;;  %v17187_v42 = vcombine.low %v731_v4, %v739_v29 }
 0x2f5   : > { %4239 = vmatprep.subr.bf16.mxu0 %v17314_v33  ;;  %v723_v40 = vld [vmem:[%s22862_s22 + $0x78] sm:$0xff] }
 0x2f6   : > { %4285 = vmatpush2.bf16.msra.mxu1 %v17553_v31  ;;  %v17491_v31 = vcombine.low %v1035_v12, %v1043_v62  ;;  %v17172_v51 = vcombine.high %v715_v39, %v723_v40  ;;  %v987_v53 = vld [vmem:[%s22862_s22 + $0x8b8] sm:$0xff]  ;;  %v17171_v6 = vcombine.low %v715_v39, %v723_v40 }
 0x2f7   : > { %4297 = vmatprep.subr.bf16.mxu1 %v17284_v34  ;;  %v971_v26 = vld [vmem:[%s22862_s22 + $0x838] sm:$0xff] }
 0x2f8   : > { %4240 = vmatpush2.bf16.msra.mxu0 %v17313_v35  ;;  %v1003_v35 = vld [vmem:[%s22862_s22 + $0x938] sm:$0xff] }
 0x2f9   : > { %4287 = vmatmul.mubr.bf16.vlgmr.msra.gmra.mxu1 %v23518_v14  ;;  %4241 = vmatprep.subr.bf16.mxu0 %v17298_v37  ;;  %v1179_v4 = vld [vmem:[%s22862_s22 + $0xeb8] sm:$0xff] }
 0x2fa   : > { %4298 = vmatpush1.bf16.msra.mxu1 %v17283_v36  ;;  %4329 = vmatprep.mubr.bf16.mxu1 %v19658_v49  ;;  %v1011_v36 = vld [vmem:[%s22862_s22 + $0x978] sm:$0xff] }
 0x2fb   : > { %4299 = vmatprep.subr.bf16.mxu1 %v17268_v38  ;;  %v17460_v48 = vcombine.high %v1003_v35, %v1011_v36  ;;  %v1187_v29 = vld [vmem:[%s22862_s22 + $0xef8] sm:$0xff] }
 0x2fc   : > { %4242 = vmatpush2.bf16.msra.mxu0 %v17297_v43  ;;  %v17475_v43 = vcombine.low %v1019_v24, %v1027_v25 }
 0x2fd   : > { %4340 = vmatprep.subr.bf16.mxu0 %v17540_v45 }
 0x2fe   : > { %4300 = vmatpush1.bf16.msra.mxu1 %v17267_v44 }
 0x2ff   : > { %4301 = vmatprep.subr.bf16.mxu1 %v17252_v46  ;;  %4244 = vmatmul.mubr.bf16.vlgmr.msra.gmra.mxu0 %v23533_v0 }
 0x300   : > { %4341 = vmatpush1.bf16.msra.mxu0 %v17539_v54  ;;  %17644 = vmatprep.mubr.msk.bf16.mxu0 %vm3691_vm0, %v23426_v5  ;;  %v17507_v5 = vcombine.low %v1051_v61, %v1059_v63  ;;  %v995_v54 = vld [vmem:[%s22862_s22 + $0x8f8] sm:$0xff] }
 0x301   : > { %4342 = vmatprep.subr.bf16.mxu0 %v17524_v58  ;;  %v955_v61 = vld [vmem:[%s22862_s22 + $0x7b8] sm:$0xff]  ;;  %v17444_v12 = vcombine.high %v987_v53, %v995_v54 }
 0x302   : > { %4302 = vmatpush1.bf16.msra.mxu1 %v17251_v57  ;;  %v963_v63 = vld [vmem:[%s22862_s22 + $0x7f8] sm:$0xff] }
 0x303   : > { %4303 = vmatprep.subr.bf16.mxu1 %v17236_v60  ;;  %v17412_v19 = vcombine.high %v955_v61, %v963_v63  ;;  %v17411_v24 = vcombine.low %v955_v61, %v963_v63  ;;  %v1131_v63 = vld [vmem:[%s22862_s22 + $0xd38] sm:$0xff] }
 0x304   : > { %4343 = vmatpush1.bf16.msra.mxu0 %v17523_v8  ;;  %v17459_v8 = vcombine.low %v1003_v35, %v1011_v36  ;;  %v907_v35 = vld [vmem:[%s22862_s22 + $0x638] sm:$0xff] }
 0x305   : > { %4344 = vmatprep.subr.bf16.mxu0 %v17508_v10  ;;  %v915_v36 = vld [vmem:[%s22862_s22 + $0x678] sm:$0xff] }
 0x306   : > { %4304 = vmatpush1.bf16.msra.mxu1 %v17235_v7 }
 0x307   : > { %4305 = vmatprep.subr.bf16.mxu1 %v17220_v11  ;;  %v4030_v27 = vpop.f32.mrf.mxu0 }
 0x308   : > { %4345 = vmatpush1.bf16.msra.mxu0 %v17507_v5  ;;  %v979_v5 = vld [vmem:[%s22862_s22 + $0x878] sm:$0xff] }
 0x309   : > { %v3987_v50 = vpop.f32.mrf.mxu1  ;;  %v4032_v34 = vpop.f32.mrf.mxu0  ;;  %4346 = vmatprep.subr.bf16.mxu0 %v17492_v23  ;;  %v17428_v25 = vcombine.high %v971_v26, %v979_v5 }
 0x30a   : > { %v3988_v33 = vadd.f32 %v3987_v50, %v1219_v30  ;;  %4306 = vmatpush1.bf16.msra.mxu1 %v17219_v55  ;;  %v947_v55 = vld [vmem:[%s22862_s22 + $0x778] sm:$0xff] }
 0x30b   : > { %v3989_v20 = vpop.f32.mrf.mxu1  ;;  %4307 = vmatprep.subr.bf16.mxu1 %v17204_v13  ;;  %v4034_v47 = vpop.f32.mrf.mxu0  ;;  %v17443_v13 = vcombine.low %v987_v53, %v995_v54  ;;  %v923_v50 = vld [vmem:[%s22862_s22 + $0x6b8] sm:$0xff]  ;;  %v17363_v54 = vcombine.low %v907_v35, %v915_v36 }
 0x30c   : > { %v23557_v37 = vadd.f32 %v4030_v27, %v3988_v33  ;;  %v3990_v38 = vadd.f32 %v3989_v20, %v1223_v56  ;;  %4347 = vmatpush1.bf16.msra.mxu0 %v17491_v31  ;;  %v931_v31 = vld [vmem:[%s22862_s22 + $0x6f8] sm:$0xff]  ;;  %v17427_v33 = vcombine.low %v971_v26, %v979_v5 }
 0x30d   : > { %v3991_v41 = vpop.f32.mrf.mxu1  ;;  %4348 = vmatprep.subr.bf16.mxu0 %v17476_v1  ;;  %v4036_v11 = vpop.f32.mrf.mxu0  ;;  %v17380_v1 = vcombine.high %v923_v50, %v931_v31  ;;  %v1163_v20 = vld [vmem:[%s22862_s22 + $0xe38] sm:$0xff]  ;;  %v17379_v39 = vcombine.low %v923_v50, %v931_v31 }
 0x30e   : > { %v4421_v44 = vmin.f32 %v23557_v37, 0.0  ;;  %v23562_v45 = vadd.f32 %v4032_v34, %v3990_v38  ;;  %v3992_v46 = vadd.f32 %v3991_v41, %v1219_v30  ;;  %4308 = vmatpush1.bf16.msra.mxu1 %v17203_v3  ;;  %v939_v30 = vld [vmem:[%s22862_s22 + $0x738] sm:$0xff]  ;;  %v17636_v3 = vcombine.high %v1179_v4, %v1187_v29 }
 0x30f   : > { %v3993_v49 = vpop.f32.mrf.mxu1  ;;  %4309 = vmatprep.subr.bf16.mxu1 %v17188_v16  ;;  %v17395_v34 = vcombine.low %v939_v30, %v947_v55  ;;  %v1171_v16 = vld [vmem:[%s22862_s22 + $0xe78] sm:$0xff]  ;;  %v17635_v38 = vcombine.low %v1179_v4, %v1187_v29  ;;  %vm4389_vm13 = vcmp.gt.f32.partialorder %v23557_v37, 0.0 }
 0x310   : > { %v4459_v57 = vmul.f32 1.442695, %v4421_v44  ;;  %v4422_v58 = vmin.f32 %v23562_v45, 0.0  ;;  %v23567_v60 = vadd.f32 %v4034_v47, %v3992_v46  ;;  %v3994_v2 = vadd.f32 %v3993_v49, %v1223_v56  ;;  %4349 = vmatpush1.bf16.msra.mxu0 %v17475_v43  ;;  %v1147_v43 = vld [vmem:[%s22862_s22 + $0xdb8] sm:$0xff] }
 0x311   : > { %4350 = vmatprep.subr.bf16.mxu0 %v17460_v48  ;;  %v17396_v56 = vcombine.high %v939_v30, %v947_v55  ;;  %v17620_v40 = vcombine.high %v1163_v20, %v1171_v16  ;;  %v1155_v44 = vld [vmem:[%s22862_s22 + $0xdf8] sm:$0xff]  ;;  %vm4390_vm14 = vcmp.gt.f32.partialorder %v23562_v45, 0.0 }
 0x312   : > { %19612 = vpow2.f32 %v4459_v57  ;;  %v4461_v7 = vmul.f32 1.442695, %v4422_v58  ;;  %v4437_v10 = vmin.f32 %v23567_v60, 0.0  ;;  %4310 = vmatpush1.bf16.msra.mxu1 %v17187_v42  ;;  %v23572_v62 = vadd.f32 %v4036_v11, %v3994_v2  ;;  %v891_v47 = vld [vmem:[%s22862_s22 + $0x5b8] sm:$0xff] }
 0x313   : > { %4311 = vmatprep.subr.bf16.mxu1 %v17172_v51  ;;  %v17364_v42 = vcombine.high %v907_v35, %v915_v36  ;;  %v899_v48 = vld [vmem:[%s22862_s22 + $0x5f8] sm:$0xff]  ;;  %v17619_v51 = vcombine.low %v1163_v20, %v1171_v16  ;;  %v17604_v57 = vcombine.high %v1147_v43, %v1155_v44  ;;  %vm4405_vm15 = vcmp.gt.f32.partialorder %v23567_v60, 0.0 }
 0x314   : > { %19614 = vpow2.f32 %v4461_v7  ;;  %v4491_v52 = vmul.f32 1.442695, %v4437_v10  ;;  %v4438_v23 = vmin.f32 %v23572_v62, 0.0  ;;  %4351 = vmatpush1.bf16.msra.mxu0 %v17459_v8  ;;  %v17348_v61 = vcombine.high %v891_v47, %v899_v48  ;;  %v1139_v2 = vld [vmem:[%s22862_s22 + $0xd78] sm:$0xff] }
 0x315   : > { %4352 = vmatprep.subr.bf16.mxu0 %v17444_v12  ;;  %v875_v7 = vld [vmem:[%s22862_s22 + $0x538] sm:$0xff]  ;;  %v17347_v5 = vcombine.low %v891_v47, %v899_v48  ;;  %vm4406_vm0 = vcmp.gt.f32.partialorder %v23572_v62, 0.0 }
 0x316   : > { %19616 = vpow2.f32 %v4491_v52  ;;  %4312 = vmatpush1.bf16.msra.mxu1 %v17171_v6  ;;  %v4493_v27 = vmul.f32 1.442695, %v4438_v23  ;;  %v883_v10 = vld [vmem:[%s22862_s22 + $0x578] sm:$0xff]  ;;  %v17588_v52 = vcombine.high %v1131_v63, %v1139_v2 }
 0x317   : > { %4313 = vmatprep.subr.bf16.mxu1 %v17412_v19  ;;  %v17603_v19 = vcombine.low %v1147_v43, %v1155_v44  ;;  %v1123_v55 = vld [vmem:[%s22862_s22 + $0xcf8] sm:$0xff]  ;;  %v17331_v4 = vcombine.low %v875_v7, %v883_v10 }
 0x318   : > { %19618 = vpow2.f32 %v4493_v27  ;;  %4353 = vmatpush1.bf16.msra.mxu0 %v17443_v13  ;;  %v859_v23 = vld [vmem:[%s22862_s22 + $0x4b8] sm:$0xff]  ;;  %v17587_v27 = vcombine.low %v1131_v63, %v1139_v2 }
 0x319   : > { %4354 = vmatprep.subr.bf16.mxu0 %v17428_v25  ;;  %v867_v13 = vld [vmem:[%s22862_s22 + $0x4f8] sm:$0xff] }
 0x31a   : > { %4314 = vmatpush2.bf16.msra.mxu1 %v17411_v24  ;;  %v17316_v50 = vcombine.high %v859_v23, %v867_v13  ;;  %v1099_v31 = vld [vmem:[%s22862_s22 + $0xc38] sm:$0xff] }
 0x31b   : > { %4315 = vmatprep.subr.bf16.mxu1 %v17396_v56  ;;  %v23616_v36 = vld [vmem:[%s22869_s28 + $0x8] sm:$0xff] }
 0x31c   : > { %4355 = vmatpush1.bf16.msra.mxu0 %v17427_v33  ;;  %v1107_v33 = vld [vmem:[%s22862_s22 + $0xc78] sm:$0xff] }
 0x31d   : > { %4360 = vmatprep.subr.bf16.mxu0 %v17636_v3  ;;  %v851_v3 = vld [vmem:[%s22862_s22 + $0x478] sm:$0xff]  ;;  %v17555_v16 = vcombine.low %v1099_v31, %v1107_v33 }
 0x31e   : > { %4316 = vmatpush2.bf16.msra.mxu1 %v17395_v34  ;;  %v843_v34 = vld [vmem:[%s22862_s22 + $0x438] sm:$0xff] }
 0x31f   : > { %v19613_v41 = vpop.eup %19612  ;;  %4317 = vmatprep.subr.bf16.mxu1 %v17380_v1  ;;  %v17300_v20 = vcombine.high %v843_v34, %v851_v3  ;;  %v17299_v35 = vcombine.low %v843_v34, %v851_v3 }
 0x320   : > { %v17651_v46 = vadd.f32 -1.0, %v19613_v41  ;;  %4361 = vmatpush2.bf16.msra.mxu0 %v17635_v38 }
 0x321   : > { %v19615_v49 = vpop.eup %19614  ;;  %4362 = vmatprep.subr.bf16.mxu0 %v17620_v40  ;;  %v1231_v40 = vrot.slane %v23616_v36, %v1198_v32 }
 0x322   : > { %v17652_v53 = vadd.f32 -1.0, %v19615_v49  ;;  %4318 = vmatpush2.bf16.msra.mxu1 %v17379_v39  ;;  %v4549_v6 = vsel %vm4389_vm13, %v23557_v37, %v17651_v46  ;;  %v17332_v37 = vcombine.high %v875_v7, %v883_v10  ;;  %v1227_v39 = vrot.slane %v23616_v36, %v1194_v28 }
 0x323   : > { %v19617_v58 = vpop.eup %19616  ;;  %4319 = vmatprep.subr.bf16.mxu1 %v17364_v42 }
 0x324   : > { %v4550_v8 = vsel %vm4390_vm14, %v23562_v45, %v17652_v53  ;;  %v17667_v12 = vadd.f32 -1.0, %v19617_v58  ;;  %4363 = vmatpush2.bf16.msra.mxu0 %v17619_v51  ;;  %v1115_v45 = vld [vmem:[%s22862_s22 + $0xcb8] sm:$0xff] }
 0x325   : > { %v19381_v11 = vpack.c.bf16 %v4550_v8, %v4549_v6  ;;  %v19619_v26 = vpop.eup %19618  ;;  %4364 = vmatprep.subr.bf16.mxu0 %v17604_v57  ;;  %v17572_v29 = vcombine.high %v1115_v45, %v1123_v55  ;;  %v17571_v1 = vcombine.low %v1115_v45, %v1123_v55 }
 0x326   : > { %4320 = vmatpush2.bf16.msra.mxu1 %v17363_v54  ;;  %v17668_v30 = vadd.f32 -1.0, %v19619_v26  ;;  %v4565_v24 = vsel %vm4405_vm15, %v23567_v60, %v17667_v12  ;;  %v17315_v60 = vcombine.low %v859_v23, %v867_v13 }
 0x327   : > { %4677 = vst [vmem:[%s23300_s8 + $0x18] sm:$0xff] %v19381_v11  ;;  %4321 = vmatprep.subr.bf16.mxu1 %v17348_v61 }
 0x328   : > { %v4566_v25 = vsel %vm4406_vm0, %v23572_v62, %v17668_v30  ;;  %4365 = vmatpush2.bf16.msra.mxu0 %v17603_v19  ;;  %v17556_v62 = vcombine.high %v1099_v31, %v1107_v33 }
 0x329   : > { %v19389_v56 = vpack.c.bf16 %v4566_v25, %v4565_v24  ;;  %4366 = vmatprep.subr.bf16.mxu0 %v17588_v52  ;;  %v1235_v25 = vrot.slane %v23616_v36, %v1202_v15 }
 0x32a   : > { %4322 = vmatpush2.bf16.msra.mxu1 %v17347_v5 }
 0x32b   : > { %4323 = vmatprep.subr.bf16.mxu1 %v17332_v37  ;;  %4685 = vst [vmem:[%s23300_s8 + $0x58] sm:$0xff] %v19389_v56  ;;  %v1239_v56 = vrot.slane %v23616_v36, %v1206_v22 }
 0x32c   : > { %4367 = vmatpush2.bf16.msra.mxu0 %v17587_v27 }
 0x32d   : > { %4368 = vmatprep.subr.bf16.mxu0 %v17572_v29 }
 0x32e   : > { %4324 = vmatpush2.bf16.msra.mxu1 %v17331_v4 }
 0x32f   : > { %4325 = vmatprep.subr.bf16.mxu1 %v17316_v50 }
 0x330   : > { %4369 = vmatpush2.bf16.msra.mxu0 %v17571_v1 }
 0x331   : > { %4370 = vmatprep.subr.bf16.mxu0 %v17556_v62 }
 0x332   : > { %4326 = vmatpush2.bf16.msra.mxu1 %v17315_v60 }
 0x333   : > { %4327 = vmatprep.subr.bf16.mxu1 %v17300_v20 }
 0x334   : > { %4371 = vmatpush2.bf16.msra.mxu0 %v17555_v16 }
 0x336   : > { %4328 = vmatpush2.bf16.msra.mxu1 %v17299_v35 }
 0x337   : > { %4373 = vmatmul.mubr.bf16.vlgmr.msra.gmra.mxu0 %v23518_v14 }
 0x339   : > { %4330 = vmatmul.mubr.bf16.vlgmr.msra.gmra.mxu1 %v23533_v0 }
 0x341   : > { %v4116_v38 = vpop.f32.mrf.mxu1 }
 0x343   : > { %v4118_v42 = vpop.f32.mrf.mxu1 }
 0x345   : > { %v4120_v48 = vpop.f32.mrf.mxu1 }
 0x347   : > { %v4073_v41 = vpop.f32.mrf.mxu0  ;;  %v4122_v61 = vpop.f32.mrf.mxu1 }
 0x348   : > { %v4074_v43 = vadd.f32 %v4073_v41, %v1227_v39 }
 0x349   : > { %v4075_v44 = vpop.f32.mrf.mxu0 }
 0x34a   : > { %v4117_v46 = vadd.f32 %v4116_v38, %v4074_v43  ;;  %v4076_v47 = vadd.f32 %v4075_v44, %v1231_v40 }
 0x34b   : > { %v4077_v14 = vpop.f32.mrf.mxu0 }
 0x34c   : > { %v4423_v0 = vmin.f32 %v4117_v46, 0.0  ;;  %v4119_v49 = vadd.f32 %v4118_v42, %v4076_v47  ;;  %v4078_v51 = vadd.f32 %v4077_v14, %v1227_v39  ;;  %vm4391_vm1 = vcmp.gt.f32.partialorder %v4117_v46, 0.0 }
 0x34d   : > { %v4079_v53 = vpop.f32.mrf.mxu0 }
 0x34e   : > { %v4463_v54 = vmul.f32 1.442695, %v4423_v0  ;;  %v4424_v57 = vmin.f32 %v4119_v49, 0.0  ;;  %v4121_v58 = vadd.f32 %v4120_v48, %v4078_v51  ;;  %v4080_v28 = vadd.f32 %v4079_v53, %v1231_v40 }
 0x34f   : > { %vm4392_vm2 = vcmp.gt.f32.partialorder %v4119_v49, 0.0 }
 0x350   : > { %19620 = vpow2.f32 %v4463_v54  ;;  %v4465_v63 = vmul.f32 1.442695, %v4424_v57  ;;  %v4439_v32 = vmin.f32 %v4121_v58, 0.0  ;;  %v4123_v2 = vadd.f32 %v4122_v61, %v4080_v28 }
 0x351   : > { %vm4407_vm3 = vcmp.gt.f32.partialorder %v4121_v58, 0.0 }
 0x352   : > { %19622 = vpow2.f32 %v4465_v63  ;;  %v4495_v6 = vmul.f32 1.442695, %v4439_v32  ;;  %v4440_v8 = vmin.f32 %v4123_v2, 0.0  ;;  %vm4408_vm4 = vcmp.gt.f32.partialorder %v4123_v2, 0.0 }
 0x354   : > { %19624 = vpow2.f32 %v4495_v6  ;;  %v4497_v7 = vmul.f32 1.442695, %v4440_v8  ;;  %v1243_v6 = vrot.slane %v23616_v36, %v1210_v18  ;;  %v1247_v8 = vrot.slane %v23616_v36, %v1214_v21 }
 0x356   : > { %19626 = vpow2.f32 %v4497_v7 }
 0x35d   : > { %v19621_v10 = vpop.eup %19620 }
 0x35e   : > { %v17653_v11 = vadd.f32 -1.0, %v19621_v10 }
 0x35f   : > { %v19623_v12 = vpop.eup %19622 }
 0x360   : > { %v17654_v19 = vadd.f32 -1.0, %v19623_v12  ;;  %v4551_v5 = vsel %vm4391_vm1, %v4117_v46, %v17653_v11 }
 0x361   : > { %v19625_v26 = vpop.eup %19624 }
 0x362   : > { %v4552_v52 = vsel %vm4392_vm2, %v4119_v49, %v17654_v19  ;;  %v17669_v37 = vadd.f32 -1.0, %v19625_v26 }
 0x363   : > { %v19382_v30 = vpack.c.bf16 %v4552_v52, %v4551_v5  ;;  %v19627_v45 = vpop.eup %19626 }
 0x364   : > { %v17670_v55 = vadd.f32 -1.0, %v19627_v45  ;;  %v4567_v23 = vsel %vm4407_vm3, %v4121_v58, %v17669_v37 }
 0x365   : > { %4678 = vst [vmem:[%s23300_s8 + $0x20] sm:$0xff] %v19382_v30 }
 0x366   : > { %v4568_v13 = vsel %vm4408_vm4, %v4123_v2, %v17670_v55 }
 0x367   : > { %v19390_v24 = vpack.c.bf16 %v4568_v13, %v4567_v23 }
 0x369   : > { %4686 = vst [vmem:[%s23300_s8 + $0x60] sm:$0xff] %v19390_v24 }
 0x37f   : > { %v4202_v27 = vpop.f32.mrf.mxu0 }
 0x381   : > { %v4159_v4 = vpop.f32.mrf.mxu1  ;;  %v4204_v50 = vpop.f32.mrf.mxu0 }
 0x382   : > { %v4160_v29 = vadd.f32 %v4159_v4, %v1235_v25 }
 0x383   : > { %v4161_v31 = vpop.f32.mrf.mxu1  ;;  %v4206_v20 = vpop.f32.mrf.mxu0 }
 0x384   : > { %v4203_v33 = vadd.f32 %v4202_v27, %v4160_v29  ;;  %v4162_v34 = vadd.f32 %v4161_v31, %v1239_v56 }
 0x385   : > { %v4163_v3 = vpop.f32.mrf.mxu1  ;;  %v4208_v22 = vpop.f32.mrf.mxu0 }
 0x386   : > { %v4425_v1 = vmin.f32 %v4203_v33, 0.0  ;;  %v4205_v60 = vadd.f32 %v4204_v50, %v4162_v34  ;;  %v4164_v62 = vadd.f32 %v4163_v3, %v1235_v25  ;;  %vm4393_vm5 = vcmp.gt.f32.partialorder %v4203_v33, 0.0 }
 0x387   : > { %v4165_v16 = vpop.f32.mrf.mxu1 }
 0x388   : > { %v4467_v35 = vmul.f32 1.442695, %v4425_v1  ;;  %v4426_v38 = vmin.f32 %v4205_v60, 0.0  ;;  %v4207_v15 = vadd.f32 %v4206_v20, %v4164_v62  ;;  %v4166_v39 = vadd.f32 %v4165_v16, %v1239_v56 }
 0x389   : > { %vm4394_vm6 = vcmp.gt.f32.partialorder %v4205_v60, 0.0 }
 0x38a   : > { %19628 = vpow2.f32 %v4467_v35  ;;  %v4469_v40 = vmul.f32 1.442695, %v4426_v38  ;;  %v4441_v41 = vmin.f32 %v4207_v15, 0.0  ;;  %v4209_v42 = vadd.f32 %v4208_v22, %v4166_v39 }
 0x38b   : > { %vm4409_vm7 = vcmp.gt.f32.partialorder %v4207_v15, 0.0 }
 0x38c   : > { %19630 = vpow2.f32 %v4469_v40  ;;  %v4499_v43 = vmul.f32 1.442695, %v4441_v41  ;;  %v4442_v44 = vmin.f32 %v4209_v42, 0.0  ;;  %vm4410_vm8 = vcmp.gt.f32.partialorder %v4209_v42, 0.0 }
 0x38d   : > { %v1251_v41 = vrot.slane %v23616_v36, %v1218_v9 }
 0x38e   : > { %19632 = vpow2.f32 %v4499_v43  ;;  %v4501_v46 = vmul.f32 1.442695, %v4442_v44 }
 0x390   : > { %19634 = vpow2.f32 %v4501_v46 }
 0x397   : > { %v19629_v47 = vpop.eup %19628 }
 0x398   : > { %v17655_v14 = vadd.f32 -1.0, %v19629_v47 }
 0x399   : > { %v19631_v48 = vpop.eup %19630 }
 0x39a   : > { %v17656_v0 = vadd.f32 -1.0, %v19631_v48  ;;  %v4553_v51 = vsel %vm4393_vm5, %v4203_v33, %v17655_v14 }
 0x39b   : > { %v19633_v49 = vpop.eup %19632 }
 0x39c   : > { %v4554_v53 = vsel %vm4394_vm6, %v4205_v60, %v17656_v0  ;;  %v17671_v57 = vadd.f32 -1.0, %v19633_v49 }
 0x39d   : > { %v19383_v54 = vpack.c.bf16 %v4554_v53, %v4553_v51  ;;  %v19635_v58 = vpop.eup %19634 }
 0x39e   : > { %v17672_v28 = vadd.f32 -1.0, %v19635_v58  ;;  %v4569_v61 = vsel %vm4409_vm7, %v4207_v15, %v17671_v57 }
 0x39f   : > { %4679 = vst [vmem:[%s23300_s8 + $0x28] sm:$0xff] %v19383_v54 }
 0x3a0   : > { %v4570_v63 = vsel %vm4410_vm8, %v4209_v42, %v17672_v28  ;;  %v1255_v42 = vrot.slane %v23616_v36, %v1222_v17 }
 0x3a1   : > { %v19391_v32 = vpack.c.bf16 %v4570_v63, %v4569_v61 }
 0x3a3   : > { %4687 = vst [vmem:[%s23300_s8 + $0x68] sm:$0xff] %v19391_v32 }
 0x3b9   : > { %v4288_v2 = vpop.f32.mrf.mxu1 }
 0x3bb   : > { %v4290_v10 = vpop.f32.mrf.mxu1 }
 0x3bd   : > { %v4292_v52 = vpop.f32.mrf.mxu1 }
 0x3bf   : > { %v4245_v7 = vpop.f32.mrf.mxu0  ;;  %v4294_v25 = vpop.f32.mrf.mxu1 }
 0x3c0   : > { %v4246_v11 = vadd.f32 %v4245_v7, %v1243_v6 }
 0x3c1   : > { %v4247_v12 = vpop.f32.mrf.mxu0 }
 0x3c2   : > { %v4289_v19 = vadd.f32 %v4288_v2, %v4246_v11  ;;  %v4248_v26 = vadd.f32 %v4247_v12, %v1247_v8 }
 0x3c3   : > { %v4249_v5 = vpop.f32.mrf.mxu0 }
 0x3c4   : > { %v4427_v30 = vmin.f32 %v4289_v19, 0.0  ;;  %v4291_v37 = vadd.f32 %v4290_v10, %v4248_v26  ;;  %v4250_v45 = vadd.f32 %v4249_v5, %v1243_v6  ;;  %vm4395_vm9 = vcmp.gt.f32.partialorder %v4289_v19, 0.0 }
 0x3c5   : > { %v4251_v55 = vpop.f32.mrf.mxu0 }
 0x3c6   : > { %v4471_v23 = vmul.f32 1.442695, %v4427_v30  ;;  %v4428_v13 = vmin.f32 %v4291_v37, 0.0  ;;  %v4293_v24 = vadd.f32 %v4292_v52, %v4250_v45  ;;  %v4252_v18 = vadd.f32 %v4251_v55, %v1247_v8 }
 0x3c7   : > { %vm4396_vm10 = vcmp.gt.f32.partialorder %v4291_v37, 0.0 }
 0x3c8   : > { %19636 = vpow2.f32 %v4471_v23  ;;  %v4473_v27 = vmul.f32 1.442695, %v4428_v13  ;;  %v4443_v21 = vmin.f32 %v4293_v24, 0.0  ;;  %v4295_v56 = vadd.f32 %v4294_v25, %v4252_v18 }
 0x3c9   : > { %vm4411_vm11 = vcmp.gt.f32.partialorder %v4293_v24, 0.0 }
 0x3ca   : > { %19638 = vpow2.f32 %v4473_v27  ;;  %v4503_v4 = vmul.f32 1.442695, %v4443_v21  ;;  %v4444_v29 = vmin.f32 %v4295_v56, 0.0  ;;  %vm4412_vm12 = vcmp.gt.f32.partialorder %v4295_v56, 0.0 }
 0x3cc   : > { %19640 = vpow2.f32 %v4503_v4  ;;  %v4505_v50 = vmul.f32 1.442695, %v4444_v29 }
 0x3ce   : > { %19642 = vpow2.f32 %v4505_v50 }
 0x3d5   : > { %v19637_v31 = vpop.eup %19636 }
 0x3d6   : > { %v17657_v33 = vadd.f32 -1.0, %v19637_v31 }
 0x3d7   : > { %v19639_v34 = vpop.eup %19638 }
 0x3d8   : > { %v17658_v3 = vadd.f32 -1.0, %v19639_v34  ;;  %v4555_v60 = vsel %vm4395_vm9, %v4289_v19, %v17657_v33 }
 0x3d9   : > { %v19641_v1 = vpop.eup %19640 }
 0x3da   : > { %v4556_v62 = vsel %vm4396_vm10, %v4291_v37, %v17658_v3  ;;  %v17673_v16 = vadd.f32 -1.0, %v19641_v1 }
 0x3db   : > { %v19384_v20 = vpack.c.bf16 %v4556_v62, %v4555_v60  ;;  %v19643_v35 = vpop.eup %19642 }
 0x3dc   : > { %v17674_v38 = vadd.f32 -1.0, %v19643_v35  ;;  %v4571_v15 = vsel %vm4411_vm11, %v4293_v24, %v17673_v16 }
 0x3dd   : > { %4680 = vst [vmem:[%s23300_s8 + $0x30] sm:$0xff] %v19384_v20 }
 0x3de   : > { %v4572_v39 = vsel %vm4412_vm12, %v4295_v56, %v17674_v38 }
 0x3df   : > { %v19392_v40 = vpack.c.bf16 %v4572_v39, %v4571_v15 }
 0x3e1   : > { %4688 = vst [vmem:[%s23300_s8 + $0x70] sm:$0xff] %v19392_v40 }
 0x3f7   : > { %v4374_v22 = vpop.f32.mrf.mxu0 }
 0x3f9   : > { %v4331_v43 = vpop.f32.mrf.mxu1  ;;  %v4376_v46 = vpop.f32.mrf.mxu0 }
 0x3fa   : > { %v4332_v44 = vadd.f32 %v4331_v43, %v1251_v41 }
 0x3fb   : > { %v4333_v47 = vpop.f32.mrf.mxu1  ;;  %v4378_v54 = vpop.f32.mrf.mxu0 }
 0x3fc   : > { %v4375_v14 = vadd.f32 %v4374_v22, %v4332_v44  ;;  %v4334_v48 = vadd.f32 %v4333_v47, %v1255_v42 }
 0x3fd   : > { %v4335_v0 = vpop.f32.mrf.mxu1  ;;  %v4380_v17 = vpop.f32.mrf.mxu0 }
 0x3fe   : > { %v4429_v49 = vmin.f32 %v4375_v14, 0.0  ;;  %v4377_v51 = vadd.f32 %v4376_v46, %v4334_v48  ;;  %v4336_v53 = vadd.f32 %v4335_v0, %v1251_v41  ;;  %vm4397_vm13 = vcmp.gt.f32.partialorder %v4375_v14, 0.0 }
 0x3ff   : > { %v4337_v57 = vpop.f32.mrf.mxu1 }
 0x400   : > { %v4475_v58 = vmul.f32 1.442695, %v4429_v49  ;;  %v4430_v28 = vmin.f32 %v4377_v51, 0.0  ;;  %v4379_v9 = vadd.f32 %v4378_v54, %v4336_v53  ;;  %v4338_v61 = vadd.f32 %v4337_v57, %v1255_v42 }
 0x401   : > { %vm4398_vm14 = vcmp.gt.f32.partialorder %v4377_v51, 0.0 }
 0x402   : > { %19644 = vpow2.f32 %v4475_v58  ;;  %v4477_v59 = vmul.f32 1.442695, %v4430_v28  ;;  %v4445_v63 = vmin.f32 %v4379_v9, 0.0  ;;  %v4381_v36 = vadd.f32 %v4380_v17, %v4338_v61 }
 0x403   : > { %vm4413_vm15 = vcmp.gt.f32.partialorder %v4379_v9, 0.0 }
 0x404   : > { %19646 = vpow2.f32 %v4477_v59  ;;  %v4507_v32 = vmul.f32 1.442695, %v4445_v63  ;;  %v4446_v2 = vmin.f32 %v4381_v36, 0.0  ;;  %vm4414_vm0 = vcmp.gt.f32.partialorder %v4381_v36, 0.0 }
 0x406   : > { %19648 = vpow2.f32 %v4507_v32  ;;  %v4509_v6 = vmul.f32 1.442695, %v4446_v2 }
 0x408   : > { %19650 = vpow2.f32 %v4509_v6 }
 0x40f   : > { %v19645_v8 = vpop.eup %19644 }
 0x410   : > { %v17659_v7 = vadd.f32 -1.0, %v19645_v8 }
 0x411   : > { %v19647_v10 = vpop.eup %19646 }
 0x412   : > { %v17660_v11 = vadd.f32 -1.0, %v19647_v10  ;;  %v4557_v19 = vsel %vm4397_vm13, %v4375_v14, %v17659_v7 }
 0x413   : > { %v19649_v12 = vpop.eup %19648 }
 0x414   : > { %v4558_v26 = vsel %vm4398_vm14, %v4377_v51, %v17660_v11  ;;  %v17675_v52 = vadd.f32 -1.0, %v19649_v12 }
 0x415   : > { %v19385_v5 = vpack.c.bf16 %v4558_v26, %v4557_v19  ;;  %v19651_v30 = vpop.eup %19650 }
 0x416   : > { %v17676_v37 = vadd.f32 -1.0, %v19651_v30  ;;  %v4573_v45 = vsel %vm4413_vm15, %v4379_v9, %v17675_v52 }
 0x417   : > { %4681 = vst [vmem:[%s23300_s8 + $0x38] sm:$0xff] %v19385_v5 }
 0x418   : > { %v4574_v55 = vsel %vm4414_vm0, %v4381_v36, %v17676_v37 }
 0x419   : > { %v19393_v23 = vpack.c.bf16 %v4574_v55, %v4573_v45 }
 0x41b   : > { %4689 = vst [vmem:[%s23300_s8 + $0x78] sm:$0xff] %v19393_v23 }
 0x41c PF: > { %p4691_p7 = scmp.lt.s32.totalorder %s22676_s2, 6 }
 0x41e   : > { %p4692_p13 = pnand %p17152_p5, %p4691_p7 }
 0x420   : > { %4695 = sbr.rel (%p4692_p13) target bundleno = 2315 (0x90b), region = 96 }
 0x425   : > { %v19661_v13 = vld [vmem:[%s22876_s14 + $0x10e4] ss:$16 sps:$4 sm:$0xff]   ;;  %v19665_v18 = vld [vmem:[%s22876_s14 + $0x10e0] ss:$16 sps:$4 sm:$0xff]   ;;  %v5226_v8 = vld [vmem:[#allocation2 + $0x88] sm:$0xff]  ;;  %s18759_s22 = sadd.s32 4294967294, %s22676_s2 }
 0x426   : > { %v19663_v24 = vld [vmem:[%s22876_s14 + $0x12e4] ss:$16 sps:$4 sm:$0xff]   ;;  %8393 = vmatprep.subr.bf16.mxu0 %v19661_v13  ;;  %v19666_v25 = vld [vmem:[%s22876_s14 + $0x12e0] ss:$16 sps:$4 sm:$0xff]   ;;  %v5234_v7 = vld [vmem:[#allocation2 + $0xc8] sm:$0xff]  ;;  %s19399_s28 = sshll.u32 %s18759_s22, 5 }
 0x427   : > { %8436 = vmatprep.subr.bf16.mxu1 %v19663_v24  ;;  %v19667_v27 = vld [vmem:[%s22876_s14 + $0x10c4] ss:$16 sps:$4 sm:$0xff]   ;;  %8394 = vmatpush1.bf16.msra.mxu0 %v19665_v18  ;;  %v19671_v56 = vld [vmem:[%s22876_s14 + $0x10c0] ss:$16 sps:$4 sm:$0xff]   ;;  %v23707_v19 = vcombine.high %v5226_v8, %v5234_v7  ;;  %s25100_s21 = scalar_lea.vmem [#allocation3], %s19399_s28 }
 0x428   : > { %8437 = vmatpush1.bf16.msra.mxu1 %v19666_v25  ;;  %v19669_v21 = vld [vmem:[%s22876_s14 + $0x12c4] ss:$16 sps:$4 sm:$0xff]   ;;  %8395 = vmatprep.subr.bf16.mxu0 %v19667_v27  ;;  %v19672_v4 = vld [vmem:[%s22876_s14 + $0x12c0] ss:$16 sps:$4 sm:$0xff]  }
 0x429   : > { %8438 = vmatprep.subr.bf16.mxu1 %v19669_v21  ;;  %v19673_v29 = vld [vmem:[%s22876_s14 + $0x10a4] ss:$16 sps:$4 sm:$0xff]   ;;  %v19677_v31 = vld [vmem:[%s22876_s14 + $0x10a0] ss:$16 sps:$4 sm:$0xff]   ;;  %8468 = vmatprep.mubr.bf16.mxu1 %v23707_v19 }
 0x42a   : > { %v19675_v50 = vld [vmem:[%s22876_s14 + $0x12a4] ss:$16 sps:$4 sm:$0xff]   ;;  %v19678_v33 = vld [vmem:[%s22876_s14 + $0x12a0] ss:$16 sps:$4 sm:$0xff]  }
 0x42b   : > { %8396 = vmatpush1.bf16.msra.mxu0 %v19671_v56  ;;  %v19679_v34 = vld [vmem:[%s22876_s14 + $0x1084] ss:$16 sps:$4 sm:$0xff]   ;;  %v19683_v1 = vld [vmem:[%s22876_s14 + $0x1080] ss:$16 sps:$4 sm:$0xff]  }
 0x42c   : > { %8439 = vmatpush1.bf16.msra.mxu1 %v19672_v4  ;;  %8397 = vmatprep.subr.bf16.mxu0 %v19673_v29  ;;  %v19681_v3 = vld [vmem:[%s22876_s14 + $0x1284] ss:$16 sps:$4 sm:$0xff]   ;;  %v19684_v60 = vld [vmem:[%s22876_s14 + $0x1280] ss:$16 sps:$4 sm:$0xff]  }
 0x42d   : > { %8440 = vmatprep.subr.bf16.mxu1 %v19675_v50  ;;  %v19685_v62 = vld [vmem:[%s22876_s14 + $0x1064] ss:$16 sps:$4 sm:$0xff]   ;;  %v19689_v16 = vld [vmem:[%s22876_s14 + $0x1060] ss:$16 sps:$4 sm:$0xff]   ;;  %v23729_v50 = vcombine.low %v5226_v8, %v5234_v7 }
 0x42e   : > { %v19687_v20 = vld [vmem:[%s22876_s14 + $0x1264] ss:$16 sps:$4 sm:$0xff]   ;;  %v19690_v35 = vld [vmem:[%s22876_s14 + $0x1260] ss:$16 sps:$4 sm:$0xff]  }
 0x42f   : > { %8398 = vmatpush1.bf16.msra.mxu0 %v19677_v31  ;;  %v19691_v38 = vld [vmem:[%s22876_s14 + $0x1044] ss:$16 sps:$4 sm:$0xff]   ;;  %v19695_v39 = vld [vmem:[%s22876_s14 + $0x1040] ss:$16 sps:$4 sm:$0xff]  }
 0x430   : > { %8441 = vmatpush1.bf16.msra.mxu1 %v19678_v33  ;;  %8399 = vmatprep.subr.bf16.mxu0 %v19679_v34  ;;  %v19693_v15 = vld [vmem:[%s22876_s14 + $0x1244] ss:$16 sps:$4 sm:$0xff]   ;;  %v19696_v40 = vld [vmem:[%s22876_s14 + $0x1240] ss:$16 sps:$4 sm:$0xff]  }
 0x431   : > { %8442 = vmatprep.subr.bf16.mxu1 %v19681_v3  ;;  %v19697_v41 = vld [vmem:[%s22876_s14 + $0x1024] ss:$16 sps:$4 sm:$0xff]   ;;  %v19701_v42 = vld [vmem:[%s22876_s14 + $0x1020] ss:$16 sps:$4 sm:$0xff]  }
 0x432   : > { %v19699_v22 = vld [vmem:[%s22876_s14 + $0x1224] ss:$16 sps:$4 sm:$0xff]   ;;  %v19702_v43 = vld [vmem:[%s22876_s14 + $0x1220] ss:$16 sps:$4 sm:$0xff]  }
 0x433   : > { %8400 = vmatpush1.bf16.msra.mxu0 %v19683_v1  ;;  %v19703_v44 = vld [vmem:[%s22876_s14 + $0x1004] ss:$16 sps:$4 sm:$0xff]   ;;  %v19707_v47 = vld [vmem:[%s22876_s14 + $0x1000] ss:$16 sps:$4 sm:$0xff]  }
 0x434   : > { %8443 = vmatpush1.bf16.msra.mxu1 %v19684_v60  ;;  %8401 = vmatprep.subr.bf16.mxu0 %v19685_v62  ;;  %v19705_v46 = vld [vmem:[%s22876_s14 + $0x1204] ss:$16 sps:$4 sm:$0xff]   ;;  %v19708_v14 = vld [vmem:[%s22876_s14 + $0x1200] ss:$16 sps:$4 sm:$0xff]  }
 0x435   : > { %8444 = vmatprep.subr.bf16.mxu1 %v19687_v20  ;;  %v19709_v48 = vld [vmem:[%s22876_s14 + $0x11e4] ss:$16 sps:$4 sm:$0xff]   ;;  %v19713_v49 = vld [vmem:[%s22876_s14 + $0x11e0] ss:$16 sps:$4 sm:$0xff]  }
 0x436   : > { %v19711_v0 = vld [vmem:[%s22876_s14 + $0x13e4] ss:$16 sps:$4 sm:$0xff]   ;;  %v19714_v51 = vld [vmem:[%s22876_s14 + $0x13e0] ss:$16 sps:$4 sm:$0xff]  }
 0x437   : > { %8402 = vmatpush1.bf16.msra.mxu0 %v19689_v16  ;;  %v19715_v53 = vld [vmem:[%s22876_s14 + $0x11c4] ss:$16 sps:$4 sm:$0xff]   ;;  %v19719_v57 = vld [vmem:[%s22876_s14 + $0x11c0] ss:$16 sps:$4 sm:$0xff]  }
 0x438   : > { %8445 = vmatpush1.bf16.msra.mxu1 %v19690_v35  ;;  %8403 = vmatprep.subr.bf16.mxu0 %v19691_v38  ;;  %v19717_v54 = vld [vmem:[%s22876_s14 + $0x13c4] ss:$16 sps:$4 sm:$0xff]   ;;  %v19720_v58 = vld [vmem:[%s22876_s14 + $0x13c0] ss:$16 sps:$4 sm:$0xff]  }
 0x439   : > { %8446 = vmatprep.subr.bf16.mxu1 %v19693_v15  ;;  %v19721_v28 = vld [vmem:[%s22876_s14 + $0x11a4] ss:$16 sps:$4 sm:$0xff]   ;;  %v19725_v61 = vld [vmem:[%s22876_s14 + $0x11a0] ss:$16 sps:$4 sm:$0xff]  }
 0x43a   : > { %v19723_v9 = vld [vmem:[%s22876_s14 + $0x13a4] ss:$16 sps:$4 sm:$0xff]   ;;  %v19726_v59 = vld [vmem:[%s22876_s14 + $0x13a0] ss:$16 sps:$4 sm:$0xff]  }
 0x43b   : > { %8404 = vmatpush1.bf16.msra.mxu0 %v19695_v39  ;;  %v19727_v63 = vld [vmem:[%s22876_s14 + $0x1184] ss:$16 sps:$4 sm:$0xff]   ;;  %v19731_v36 = vld [vmem:[%s22876_s14 + $0x1180] ss:$16 sps:$4 sm:$0xff]  }
 0x43c   : > { %8447 = vmatpush1.bf16.msra.mxu1 %v19696_v40  ;;  %8405 = vmatprep.subr.bf16.mxu0 %v19697_v41  ;;  %v19729_v17 = vld [vmem:[%s22876_s14 + $0x1384] ss:$16 sps:$4 sm:$0xff]   ;;  %v19732_v32 = vld [vmem:[%s22876_s14 + $0x1380] ss:$16 sps:$4 sm:$0xff]  }
 0x43d   : > { %8448 = vmatprep.subr.bf16.mxu1 %v19699_v22  ;;  %v5225_v2 = vld [vmem:[#allocation2 + $0x80] sm:$0xff] }
 0x43e   : > { %v5233_v6 = vld [vmem:[#allocation2 + $0xc0] sm:$0xff] }
 0x43f   : > { %8406 = vmatpush1.bf16.msra.mxu0 %v19701_v42  ;;  %v19733_v10 = vld [vmem:[%s22876_s14 + $0x1164] ss:$16 sps:$4 sm:$0xff]   ;;  %v23704_v11 = vcombine.high %v5225_v2, %v5233_v6  ;;  %v19737_v26 = vld [vmem:[%s22876_s14 + $0x1160] ss:$16 sps:$4 sm:$0xff]   ;;  %v23727_v29 = vcombine.low %v5225_v2, %v5233_v6 }
 0x440   : > { %8449 = vmatpush1.bf16.msra.mxu1 %v19702_v43  ;;  %8407 = vmatprep.subr.bf16.mxu0 %v19703_v44  ;;  %v19735_v12 = vld [vmem:[%s22876_s14 + $0x1364] ss:$16 sps:$4 sm:$0xff]   ;;  %v19738_v5 = vld [vmem:[%s22876_s14 + $0x1360] ss:$16 sps:$4 sm:$0xff]  }
 0x441   : > { %8450 = vmatprep.subr.bf16.mxu1 %v19705_v46  ;;  %8425 = vmatprep.mubr.bf16.mxu0 %v23704_v11  ;;  %v19739_v52 = vld [vmem:[%s22876_s14 + $0x1144] ss:$16 sps:$4 sm:$0xff]   ;;  %v19743_v37 = vld [vmem:[%s22876_s14 + $0x1140] ss:$16 sps:$4 sm:$0xff]  }
 0x442   : > { %v19741_v30 = vld [vmem:[%s22876_s14 + $0x1344] ss:$16 sps:$4 sm:$0xff]   ;;  %v19744_v45 = vld [vmem:[%s22876_s14 + $0x1340] ss:$16 sps:$4 sm:$0xff]  }
 0x443   : > { %8408 = vmatpush1.bf16.msra.mxu0 %v19707_v47  ;;  %v19745_v55 = vld [vmem:[%s22876_s14 + $0x1124] ss:$16 sps:$4 sm:$0xff]   ;;  %v19749_v13 = vld [vmem:[%s22876_s14 + $0x1120] ss:$16 sps:$4 sm:$0xff]  }
 0x444   : > { %8451 = vmatpush1.bf16.msra.mxu1 %v19708_v14  ;;  %8409 = vmatprep.subr.bf16.mxu0 %v19709_v48  ;;  %v19747_v23 = vld [vmem:[%s22876_s14 + $0x1324] ss:$16 sps:$4 sm:$0xff]   ;;  %v19750_v24 = vld [vmem:[%s22876_s14 + $0x1320] ss:$16 sps:$4 sm:$0xff]  }
 0x445   : > { %8452 = vmatprep.subr.bf16.mxu1 %v19711_v0  ;;  %v19751_v18 = vld [vmem:[%s22876_s14 + $0x1104] ss:$16 sps:$4 sm:$0xff]   ;;  %v19755_v27 = vld [vmem:[%s22876_s14 + $0x1100] ss:$16 sps:$4 sm:$0xff]  }
 0x446   : > { %v19753_v25 = vld [vmem:[%s22876_s14 + $0x1304] ss:$16 sps:$4 sm:$0xff]   ;;  %v19756_v21 = vld [vmem:[%s22876_s14 + $0x1300] ss:$16 sps:$4 sm:$0xff]  }
 0x447   : > { %8410 = vmatpush2.bf16.msra.mxu0 %v19713_v49  ;;  %v19759_v56 = vld [vmem:[%s22876_s14 + $0x14e4] ss:$16 sps:$4 sm:$0xff]   ;;  %v19757_v31 = vld [vmem:[%s22876_s14 + $0x14e0] ss:$16 sps:$4 sm:$0xff]  }
 0x448   : > { %8453 = vmatpush2.bf16.msra.mxu1 %v19714_v51  ;;  %8411 = vmatprep.subr.bf16.mxu0 %v19715_v53  ;;  %v19762_v4 = vld [vmem:[%s22876_s14 + $0x16e4] ss:$16 sps:$4 sm:$0xff]   ;;  %v19760_v33 = vld [vmem:[%s22876_s14 + $0x16e0] ss:$16 sps:$4 sm:$0xff]  }
 0x449   : > { %8454 = vmatprep.subr.bf16.mxu1 %v19717_v54  ;;  %v19765_v34 = vld [vmem:[%s22876_s14 + $0x14c4] ss:$16 sps:$4 sm:$0xff]   ;;  %v19763_v1 = vld [vmem:[%s22876_s14 + $0x14c0] ss:$16 sps:$4 sm:$0xff]  }
 0x44a   : > { %v19768_v3 = vld [vmem:[%s22876_s14 + $0x16c4] ss:$16 sps:$4 sm:$0xff]   ;;  %v19766_v60 = vld [vmem:[%s22876_s14 + $0x16c0] ss:$16 sps:$4 sm:$0xff]  }
 0x44b   : > { %8412 = vmatpush2.bf16.msra.mxu0 %v19719_v57  ;;  %v19771_v62 = vld [vmem:[%s22876_s14 + $0x14a4] ss:$16 sps:$4 sm:$0xff]   ;;  %v19769_v16 = vld [vmem:[%s22876_s14 + $0x14a0] ss:$16 sps:$4 sm:$0xff]   ;;  %v23763_v57 = vld [vmem:[#allocation2 + $0x98] sm:$0xff] }
 0x44c   : > { %8455 = vmatpush2.bf16.msra.mxu1 %v19720_v58  ;;  %8413 = vmatprep.subr.bf16.mxu0 %v19721_v28  ;;  %v19774_v20 = vld [vmem:[%s22876_s14 + $0x16a4] ss:$16 sps:$4 sm:$0xff]   ;;  %v19772_v35 = vld [vmem:[%s22876_s14 + $0x16a0] ss:$16 sps:$4 sm:$0xff]   ;;  %v23765_v58 = vld [vmem:[#allocation2 + $0xd8] sm:$0xff] }
 0x44d   : > { %8456 = vmatprep.subr.bf16.mxu1 %v19723_v9  ;;  %v19777_v38 = vld [vmem:[%s22876_s14 + $0x1484] ss:$16 sps:$4 sm:$0xff]   ;;  %v19775_v39 = vld [vmem:[%s22876_s14 + $0x1480] ss:$16 sps:$4 sm:$0xff]  }
 0x44e   : > { %v19780_v15 = vld [vmem:[%s22876_s14 + $0x1684] ss:$16 sps:$4 sm:$0xff]   ;;  %v19778_v40 = vld [vmem:[%s22876_s14 + $0x1680] ss:$16 sps:$4 sm:$0xff]  }
 0x44f   : > { %8414 = vmatpush2.bf16.msra.mxu0 %v19725_v61  ;;  %v19783_v41 = vld [vmem:[%s22876_s14 + $0x1464] ss:$16 sps:$4 sm:$0xff]   ;;  %v19781_v42 = vld [vmem:[%s22876_s14 + $0x1460] ss:$16 sps:$4 sm:$0xff]  }
 0x450   : > { %8457 = vmatpush2.bf16.msra.mxu1 %v19726_v59  ;;  %8415 = vmatprep.subr.bf16.mxu0 %v19727_v63  ;;  %v19786_v22 = vld [vmem:[%s22876_s14 + $0x1664] ss:$16 sps:$4 sm:$0xff]   ;;  %v19784_v43 = vld [vmem:[%s22876_s14 + $0x1660] ss:$16 sps:$4 sm:$0xff]   ;;  %v23775_v59 = vcombine.high %v23763_v57, %v23765_v58 }
 0x451   : > { %8458 = vmatprep.subr.bf16.mxu1 %v19729_v17  ;;  %v19789_v44 = vld [vmem:[%s22876_s14 + $0x1444] ss:$16 sps:$4 sm:$0xff]   ;;  %v19787_v47 = vld [vmem:[%s22876_s14 + $0x1440] ss:$16 sps:$4 sm:$0xff]  }
 0x452   : > { %v19792_v46 = vld [vmem:[%s22876_s14 + $0x1644] ss:$16 sps:$4 sm:$0xff]   ;;  %v19790_v14 = vld [vmem:[%s22876_s14 + $0x1640] ss:$16 sps:$4 sm:$0xff]  }
 0x453   : > { %8416 = vmatpush2.bf16.msra.mxu0 %v19731_v36  ;;  %v19795_v48 = vld [vmem:[%s22876_s14 + $0x1424] ss:$16 sps:$4 sm:$0xff]   ;;  %v19793_v49 = vld [vmem:[%s22876_s14 + $0x1420] ss:$16 sps:$4 sm:$0xff]  }
 0x454   : > { %8459 = vmatpush2.bf16.msra.mxu1 %v19732_v32  ;;  %8417 = vmatprep.subr.bf16.mxu0 %v19733_v10  ;;  %v19798_v0 = vld [vmem:[%s22876_s14 + $0x1624] ss:$16 sps:$4 sm:$0xff]   ;;  %v19796_v51 = vld [vmem:[%s22876_s14 + $0x1620] ss:$16 sps:$4 sm:$0xff]  }
 0x455   : > { %8460 = vmatprep.subr.bf16.mxu1 %v19735_v12  ;;  %v23759_v53 = vld [vmem:[#allocation2 + $0x90] sm:$0xff] }
 0x456   : > { %v23761_v54 = vld [vmem:[#allocation2 + $0xd0] sm:$0xff] }
 0x457   : > { %8418 = vmatpush2.bf16.msra.mxu0 %v19737_v26  ;;  %v19801_v28 = vld [vmem:[%s22876_s14 + $0x1404] ss:$16 sps:$4 sm:$0xff]   ;;  %v23770_v9 = vcombine.high %v23759_v53, %v23761_v54  ;;  %v19799_v63 = vld [vmem:[%s22876_s14 + $0x1400] ss:$16 sps:$4 sm:$0xff]  }
 0x458   : > { %8461 = vmatpush2.bf16.msra.mxu1 %v19738_v5  ;;  %8419 = vmatprep.subr.bf16.mxu0 %v19739_v52  ;;  %v19804_v61 = vld [vmem:[%s22876_s14 + $0x1604] ss:$16 sps:$4 sm:$0xff]   ;;  %v19802_v17 = vld [vmem:[%s22876_s14 + $0x1600] ss:$16 sps:$4 sm:$0xff]  }
 0x459   : > { %8462 = vmatprep.subr.bf16.mxu1 %v19741_v30  ;;  %v19807_v36 = vld [vmem:[%s22876_s14 + $0x15e4] ss:$16 sps:$4 sm:$0xff]   ;;  %v19805_v2 = vld [vmem:[%s22876_s14 + $0x15e0] ss:$16 sps:$4 sm:$0xff]  }
 0x45a   : > { %v19810_v32 = vld [vmem:[%s22876_s14 + $0x17e4] ss:$16 sps:$4 sm:$0xff]   ;;  %v19808_v6 = vld [vmem:[%s22876_s14 + $0x17e0] ss:$16 sps:$4 sm:$0xff]  }
 0x45b   : > { %8420 = vmatpush2.bf16.msra.mxu0 %v19743_v37  ;;  %v19813_v8 = vld [vmem:[%s22876_s14 + $0x15c4] ss:$16 sps:$4 sm:$0xff]   ;;  %v19811_v10 = vld [vmem:[%s22876_s14 + $0x15c0] ss:$16 sps:$4 sm:$0xff]  }
 0x45c   : > { %8463 = vmatpush2.bf16.msra.mxu1 %v19744_v45  ;;  %8421 = vmatprep.subr.bf16.mxu0 %v19745_v55  ;;  %v19816_v7 = vld [vmem:[%s22876_s14 + $0x17c4] ss:$16 sps:$4 sm:$0xff]   ;;  %v19814_v12 = vld [vmem:[%s22876_s14 + $0x17c0] ss:$16 sps:$4 sm:$0xff]  }
 0x45d   : > { %8464 = vmatprep.subr.bf16.mxu1 %v19747_v23  ;;  %v19819_v26 = vld [vmem:[%s22876_s14 + $0x15a4] ss:$16 sps:$4 sm:$0xff]   ;;  %v19817_v52 = vld [vmem:[%s22876_s14 + $0x15a0] ss:$16 sps:$4 sm:$0xff]  }
 0x45e   : > { %v19822_v5 = vld [vmem:[%s22876_s14 + $0x17a4] ss:$16 sps:$4 sm:$0xff]   ;;  %v19820_v30 = vld [vmem:[%s22876_s14 + $0x17a0] ss:$16 sps:$4 sm:$0xff]  }
 0x45f   : > { %8422 = vmatpush2.bf16.msra.mxu0 %v19749_v13  ;;  %v19825_v37 = vld [vmem:[%s22876_s14 + $0x1584] ss:$16 sps:$4 sm:$0xff]   ;;  %v19823_v55 = vld [vmem:[%s22876_s14 + $0x1580] ss:$16 sps:$4 sm:$0xff]  }
 0x460   : > { %8465 = vmatpush2.bf16.msra.mxu1 %v19750_v24  ;;  %8423 = vmatprep.subr.bf16.mxu0 %v19751_v18  ;;  %v19828_v45 = vld [vmem:[%s22876_s14 + $0x1784] ss:$16 sps:$4 sm:$0xff]   ;;  %v19826_v23 = vld [vmem:[%s22876_s14 + $0x1780] ss:$16 sps:$4 sm:$0xff]  }
 0x461   : > { %8466 = vmatprep.subr.bf16.mxu1 %v19753_v25  ;;  %v19831_v13 = vld [vmem:[%s22876_s14 + $0x1564] ss:$16 sps:$4 sm:$0xff]   ;;  %v19829_v18 = vld [vmem:[%s22876_s14 + $0x1560] ss:$16 sps:$4 sm:$0xff]  }
 0x462   : > { %v19834_v24 = vld [vmem:[%s22876_s14 + $0x1764] ss:$16 sps:$4 sm:$0xff]   ;;  %v19832_v25 = vld [vmem:[%s22876_s14 + $0x1760] ss:$16 sps:$4 sm:$0xff]  }
 0x463   : > { %8424 = vmatpush2.bf16.msra.mxu0 %v19755_v27  ;;  %v19837_v27 = vld [vmem:[%s22876_s14 + $0x1544] ss:$16 sps:$4 sm:$0xff]  }
 0x464   : > { %8467 = vmatpush2.bf16.msra.mxu1 %v19756_v21  ;;  %8479 = vmatprep.subr.bf16.mxu0 %v19759_v56  ;;  %v19840_v21 = vld [vmem:[%s22876_s14 + $0x1744] ss:$16 sps:$4 sm:$0xff]   ;;  %v19835_v56 = vld [vmem:[%s22876_s14 + $0x1540] ss:$16 sps:$4 sm:$0xff]  }
 0x465   : > { %8522 = vmatprep.subr.bf16.mxu1 %v19762_v4  ;;  %v19838_v4 = vld [vmem:[%s22876_s14 + $0x1740] ss:$16 sps:$4 sm:$0xff]  }
 0x466   : > { %8426 = vmatmul.mubr.bf16.vlgmr.msra.gmra.mxu0 %v23727_v29 }
 0x467   : > { %8469 = vmatmul.mubr.bf16.vlgmr.msra.gmra.mxu1 %v23729_v50  ;;  %8480 = vmatpush1.bf16.msra.mxu0 %v19757_v31  ;;  %v19843_v31 = vld [vmem:[%s22876_s14 + $0x1524] ss:$16 sps:$4 sm:$0xff]  }
 0x468   : > { %8523 = vmatpush1.bf16.msra.mxu1 %v19760_v33  ;;  %8481 = vmatprep.subr.bf16.mxu0 %v19765_v34  ;;  %v19846_v33 = vld [vmem:[%s22876_s14 + $0x1724] ss:$16 sps:$4 sm:$0xff]   ;;  %v19841_v34 = vld [vmem:[%s22876_s14 + $0x1520] ss:$16 sps:$4 sm:$0xff]  }
 0x469   : > { %8524 = vmatprep.subr.bf16.mxu1 %v19768_v3  ;;  %8511 = vmatprep.mubr.bf16.mxu0 %v23770_v9  ;;  %v19844_v3 = vld [vmem:[%s22876_s14 + $0x1720] ss:$16 sps:$4 sm:$0xff]  }
 0x46a   : > { %8554 = vmatprep.mubr.bf16.mxu1 %v23775_v59 }
 0x46b   : > { %8482 = vmatpush1.bf16.msra.mxu0 %v19763_v1  ;;  %v19849_v1 = vld [vmem:[%s22876_s14 + $0x1504] ss:$16 sps:$4 sm:$0xff]  }
 0x46c   : > { %8525 = vmatpush1.bf16.msra.mxu1 %v19766_v60  ;;  %8483 = vmatprep.subr.bf16.mxu0 %v19771_v62  ;;  %v19852_v60 = vld [vmem:[%s22876_s14 + $0x1704] ss:$16 sps:$4 sm:$0xff]   ;;  %v19847_v62 = vld [vmem:[%s22876_s14 + $0x1500] ss:$16 sps:$4 sm:$0xff]  }
 0x46d   : > { %8526 = vmatprep.subr.bf16.mxu1 %v19774_v20  ;;  %v19850_v20 = vld [vmem:[%s22876_s14 + $0x1700] ss:$16 sps:$4 sm:$0xff]  }
 0x46f   : > { %8484 = vmatpush1.bf16.msra.mxu0 %v19769_v16  ;;  %v19855_v16 = vld [vmem:[%s22876_s14 + $0x18e4] ss:$16 sps:$4 sm:$0xff]  }
 0x470   : > { %8527 = vmatpush1.bf16.msra.mxu1 %v19772_v35  ;;  %8485 = vmatprep.subr.bf16.mxu0 %v19777_v38  ;;  %v19858_v35 = vld [vmem:[%s22876_s14 + $0x1ae4] ss:$16 sps:$4 sm:$0xff]   ;;  %v23817_v38 = vcombine.low %v23759_v53, %v23761_v54  ;;  %v19865_v53 = vld [vmem:[%s22876_s14 + $0x18a0] ss:$16 sps:$4 sm:$0xff]  }
 0x471   : > { %8528 = vmatprep.subr.bf16.mxu1 %v19780_v15  ;;  %v23821_v15 = vcombine.low %v23763_v57, %v23765_v58  ;;  %v19868_v54 = vld [vmem:[%s22876_s14 + $0x1aa0] ss:$16 sps:$4 sm:$0xff]   ;;  %v19873_v57 = vld [vmem:[%s22876_s14 + $0x1884] ss:$16 sps:$4 sm:$0xff]  }
 0x472   : > { %v19876_v58 = vld [vmem:[%s22876_s14 + $0x1a84] ss:$16 sps:$4 sm:$0xff]  }
 0x473   : > { %8486 = vmatpush1.bf16.msra.mxu0 %v19775_v39  ;;  %v19853_v39 = vld [vmem:[%s22876_s14 + $0x18e0] ss:$16 sps:$4 sm:$0xff]  }
 0x474   : > { %8529 = vmatpush1.bf16.msra.mxu1 %v19778_v40  ;;  %8487 = vmatprep.subr.bf16.mxu0 %v19783_v41  ;;  %v19856_v40 = vld [vmem:[%s22876_s14 + $0x1ae0] ss:$16 sps:$4 sm:$0xff]   ;;  %v19861_v41 = vld [vmem:[%s22876_s14 + $0x18c4] ss:$16 sps:$4 sm:$0xff]  }
 0x475   : > { %8530 = vmatprep.subr.bf16.mxu1 %v19786_v22  ;;  %v19864_v22 = vld [vmem:[%s22876_s14 + $0x1ac4] ss:$16 sps:$4 sm:$0xff]  }
 0x477   : > { %8488 = vmatpush1.bf16.msra.mxu0 %v19781_v42  ;;  %v19859_v42 = vld [vmem:[%s22876_s14 + $0x18c0] ss:$16 sps:$4 sm:$0xff]  }
 0x478   : > { %8531 = vmatpush1.bf16.msra.mxu1 %v19784_v43  ;;  %8489 = vmatprep.subr.bf16.mxu0 %v19789_v44  ;;  %v19862_v43 = vld [vmem:[%s22876_s14 + $0x1ac0] ss:$16 sps:$4 sm:$0xff]  }
 0x479   : > { %8532 = vmatprep.subr.bf16.mxu1 %v19792_v46  ;;  %v23829_v44 = vld [vmem:[#allocation2 + $0xa0] sm:$0xff] }
 0x47a   : > { %v23833_v46 = vld [vmem:[#allocation2 + $0xe0] sm:$0xff] }
 0x47b   : > { %8490 = vmatpush1.bf16.msra.mxu0 %v19787_v47  ;;  %v23835_v47 = vld [vmem:[#allocation2 + $0xa8] sm:$0xff] }
 0x47c   : > { %8533 = vmatpush1.bf16.msra.mxu1 %v19790_v14  ;;  %8491 = vmatprep.subr.bf16.mxu0 %v19795_v48  ;;  %v23837_v14 = vld [vmem:[#allocation2 + $0xe8] sm:$0xff]  ;;  %v19867_v48 = vld [vmem:[%s22876_s14 + $0x18a4] ss:$16 sps:$4 sm:$0xff]  }
 0x47d   : > { %8534 = vmatprep.subr.bf16.mxu1 %v19798_v0  ;;  %v23842_v0 = vcombine.high %v23829_v44, %v23833_v46 }
 0x47f   : > { %8492 = vmatpush1.bf16.msra.mxu0 %v19793_v49  ;;  %v19870_v49 = vld [vmem:[%s22876_s14 + $0x1aa4] ss:$16 sps:$4 sm:$0xff]  }
 0x480   : > { %8535 = vmatpush1.bf16.msra.mxu1 %v19796_v51  ;;  %8493 = vmatprep.subr.bf16.mxu0 %v19801_v28  ;;  %v23847_v51 = vcombine.high %v23835_v47, %v23837_v14  ;;  %v19871_v28 = vld [vmem:[%s22876_s14 + $0x1880] ss:$16 sps:$4 sm:$0xff]  }
 0x481   : > { %8536 = vmatprep.subr.bf16.mxu1 %v19804_v61  ;;  %v19874_v61 = vld [vmem:[%s22876_s14 + $0x1a80] ss:$16 sps:$4 sm:$0xff]  }
 0x483   : > { %8494 = vmatpush1.bf16.msra.mxu0 %v19799_v63  ;;  %v19879_v63 = vld [vmem:[%s22876_s14 + $0x1864] ss:$16 sps:$4 sm:$0xff]  }
 0x484   : > { %8537 = vmatpush1.bf16.msra.mxu1 %v19802_v17  ;;  %8495 = vmatprep.subr.bf16.mxu0 %v19807_v36  ;;  %v19882_v17 = vld [vmem:[%s22876_s14 + $0x1a64] ss:$16 sps:$4 sm:$0xff]   ;;  %v19877_v36 = vld [vmem:[%s22876_s14 + $0x1860] ss:$16 sps:$4 sm:$0xff]  }
 0x485   : > { %8538 = vmatprep.subr.bf16.mxu1 %v19810_v32  ;;  %v19880_v32 = vld [vmem:[%s22876_s14 + $0x1a60] ss:$16 sps:$4 sm:$0xff]  }
 0x487   : > { %8496 = vmatpush2.bf16.msra.mxu0 %v19805_v2  ;;  %v19885_v2 = vld [vmem:[%s22876_s14 + $0x1844] ss:$16 sps:$4 sm:$0xff]  }
 0x488   : > { %8539 = vmatpush2.bf16.msra.mxu1 %v19808_v6  ;;  %8497 = vmatprep.subr.bf16.mxu0 %v19813_v8  ;;  %v19888_v6 = vld [vmem:[%s22876_s14 + $0x1a44] ss:$16 sps:$4 sm:$0xff]   ;;  %v19883_v8 = vld [vmem:[%s22876_s14 + $0x1840] ss:$16 sps:$4 sm:$0xff]  }
 0x489   : > { %8540 = vmatprep.subr.bf16.mxu1 %v19816_v7  ;;  %v19886_v7 = vld [vmem:[%s22876_s14 + $0x1a40] ss:$16 sps:$4 sm:$0xff]  }
 0x48b   : > { %8498 = vmatpush2.bf16.msra.mxu0 %v19811_v10  ;;  %v19891_v10 = vld [vmem:[%s22876_s14 + $0x1824] ss:$16 sps:$4 sm:$0xff]  }
 0x48c   : > { %8541 = vmatpush2.bf16.msra.mxu1 %v19814_v12  ;;  %8499 = vmatprep.subr.bf16.mxu0 %v19819_v26  ;;  %v19894_v12 = vld [vmem:[%s22876_s14 + $0x1a24] ss:$16 sps:$4 sm:$0xff]   ;;  %v19889_v26 = vld [vmem:[%s22876_s14 + $0x1820] ss:$16 sps:$4 sm:$0xff]  }
 0x48d   : > { %8542 = vmatprep.subr.bf16.mxu1 %v19822_v5  ;;  %v19892_v5 = vld [vmem:[%s22876_s14 + $0x1a20] ss:$16 sps:$4 sm:$0xff]  }
 0x48f   : > { %8500 = vmatpush2.bf16.msra.mxu0 %v19817_v52  ;;  %v19897_v52 = vld [vmem:[%s22876_s14 + $0x1804] ss:$16 sps:$4 sm:$0xff]  }
 0x490   : > { %8543 = vmatpush2.bf16.msra.mxu1 %v19820_v30  ;;  %8501 = vmatprep.subr.bf16.mxu0 %v19825_v37  ;;  %v19900_v30 = vld [vmem:[%s22876_s14 + $0x1a04] ss:$16 sps:$4 sm:$0xff]   ;;  %v19895_v37 = vld [vmem:[%s22876_s14 + $0x1800] ss:$16 sps:$4 sm:$0xff]  }
 0x491   : > { %8544 = vmatprep.subr.bf16.mxu1 %v19828_v45  ;;  %v19898_v45 = vld [vmem:[%s22876_s14 + $0x1a00] ss:$16 sps:$4 sm:$0xff]  }
 0x493   : > { %8502 = vmatpush2.bf16.msra.mxu0 %v19823_v55  ;;  %v19903_v55 = vld [vmem:[%s22876_s14 + $0x19e4] ss:$16 sps:$4 sm:$0xff]  }
 0x494   : > { %8545 = vmatpush2.bf16.msra.mxu1 %v19826_v23  ;;  %8503 = vmatprep.subr.bf16.mxu0 %v19831_v13  ;;  %v19906_v23 = vld [vmem:[%s22876_s14 + $0x1be4] ss:$16 sps:$4 sm:$0xff]   ;;  %v19901_v13 = vld [vmem:[%s22876_s14 + $0x19e0] ss:$16 sps:$4 sm:$0xff]  }
 0x495   : > { %8546 = vmatprep.subr.bf16.mxu1 %v19834_v24  ;;  %v19904_v24 = vld [vmem:[%s22876_s14 + $0x1be0] ss:$16 sps:$4 sm:$0xff]  }
 0x497   : > { %8504 = vmatpush2.bf16.msra.mxu0 %v19829_v18  ;;  %v19909_v18 = vld [vmem:[%s22876_s14 + $0x19c4] ss:$16 sps:$4 sm:$0xff]  }
 0x498   : > { %8547 = vmatpush2.bf16.msra.mxu1 %v19832_v25  ;;  %8505 = vmatprep.subr.bf16.mxu0 %v19837_v27  ;;  %v19912_v25 = vld [vmem:[%s22876_s14 + $0x1bc4] ss:$16 sps:$4 sm:$0xff]   ;;  %v19907_v27 = vld [vmem:[%s22876_s14 + $0x19c0] ss:$16 sps:$4 sm:$0xff]  }
 0x499   : > { %8548 = vmatprep.subr.bf16.mxu1 %v19840_v21  ;;  %v19910_v21 = vld [vmem:[%s22876_s14 + $0x1bc0] ss:$16 sps:$4 sm:$0xff]  }
 0x49b   : > { %8506 = vmatpush2.bf16.msra.mxu0 %v19835_v56  ;;  %v19915_v56 = vld [vmem:[%s22876_s14 + $0x19a4] ss:$16 sps:$4 sm:$0xff]  }
 0x49c   : > { %8549 = vmatpush2.bf16.msra.mxu1 %v19838_v4  ;;  %8507 = vmatprep.subr.bf16.mxu0 %v19843_v31  ;;  %v19918_v4 = vld [vmem:[%s22876_s14 + $0x1ba4] ss:$16 sps:$4 sm:$0xff]   ;;  %v19913_v31 = vld [vmem:[%s22876_s14 + $0x19a0] ss:$16 sps:$4 sm:$0xff]  }
 0x49d   : > { %8550 = vmatprep.subr.bf16.mxu1 %v19846_v33  ;;  %v19916_v33 = vld [vmem:[%s22876_s14 + $0x1ba0] ss:$16 sps:$4 sm:$0xff]  }
 0x49f   : > { %8508 = vmatpush2.bf16.msra.mxu0 %v19841_v34  ;;  %v19921_v34 = vld [vmem:[%s22876_s14 + $0x1984] ss:$16 sps:$4 sm:$0xff]  }
 0x4a0   : > { %8551 = vmatpush2.bf16.msra.mxu1 %v19844_v3  ;;  %8509 = vmatprep.subr.bf16.mxu0 %v19849_v1  ;;  %v19924_v3 = vld [vmem:[%s22876_s14 + $0x1b84] ss:$16 sps:$4 sm:$0xff]   ;;  %v19919_v1 = vld [vmem:[%s22876_s14 + $0x1980] ss:$16 sps:$4 sm:$0xff]  }
 0x4a1   : > { %8552 = vmatprep.subr.bf16.mxu1 %v19852_v60  ;;  %v19922_v60 = vld [vmem:[%s22876_s14 + $0x1b80] ss:$16 sps:$4 sm:$0xff]  }
 0x4a3   : > { %8510 = vmatpush2.bf16.msra.mxu0 %v19847_v62  ;;  %v19927_v62 = vld [vmem:[%s22876_s14 + $0x1964] ss:$16 sps:$4 sm:$0xff]  }
 0x4a4   : > { %8553 = vmatpush2.bf16.msra.mxu1 %v19850_v20  ;;  %8565 = vmatprep.subr.bf16.mxu0 %v19855_v16  ;;  %v19930_v20 = vld [vmem:[%s22876_s14 + $0x1b64] ss:$16 sps:$4 sm:$0xff]   ;;  %v19925_v16 = vld [vmem:[%s22876_s14 + $0x1960] ss:$16 sps:$4 sm:$0xff]  }
 0x4a5   : > { %8608 = vmatprep.subr.bf16.mxu1 %v19858_v35  ;;  %v19928_v35 = vld [vmem:[%s22876_s14 + $0x1b60] ss:$16 sps:$4 sm:$0xff]  }
 0x4a6   : > { %8512 = vmatmul.mubr.bf16.vlgmr.msra.gmra.mxu0 %v23817_v38 }
 0x4a7   : > { %8555 = vmatmul.mubr.bf16.vlgmr.msra.gmra.mxu1 %v23821_v15  ;;  %8566 = vmatpush1.bf16.msra.mxu0 %v19853_v39  ;;  %v19933_v39 = vld [vmem:[%s22876_s14 + $0x1944] ss:$16 sps:$4 sm:$0xff]  }
 0x4a8   : > { %8609 = vmatpush1.bf16.msra.mxu1 %v19856_v40  ;;  %8567 = vmatprep.subr.bf16.mxu0 %v19861_v41  ;;  %v19936_v40 = vld [vmem:[%s22876_s14 + $0x1b44] ss:$16 sps:$4 sm:$0xff]   ;;  %v19931_v41 = vld [vmem:[%s22876_s14 + $0x1940] ss:$16 sps:$4 sm:$0xff]  }
 0x4a9   : > { %8610 = vmatprep.subr.bf16.mxu1 %v19864_v22  ;;  %8597 = vmatprep.mubr.bf16.mxu0 %v23842_v0  ;;  %v19934_v22 = vld [vmem:[%s22876_s14 + $0x1b40] ss:$16 sps:$4 sm:$0xff]  }
 0x4aa   : > { %8640 = vmatprep.mubr.bf16.mxu1 %v23847_v51 }
 0x4ab   : > { %8568 = vmatpush1.bf16.msra.mxu0 %v19859_v42  ;;  %v19939_v42 = vld [vmem:[%s22876_s14 + $0x1924] ss:$16 sps:$4 sm:$0xff]  }
 0x4ac   : > { %8611 = vmatpush1.bf16.msra.mxu1 %v19862_v43  ;;  %8569 = vmatprep.subr.bf16.mxu0 %v19867_v48  ;;  %v19942_v43 = vld [vmem:[%s22876_s14 + $0x1b24] ss:$16 sps:$4 sm:$0xff]   ;;  %v19937_v48 = vld [vmem:[%s22876_s14 + $0x1920] ss:$16 sps:$4 sm:$0xff]  }
 0x4ad   : > { %8612 = vmatprep.subr.bf16.mxu1 %v19870_v49  ;;  %v19940_v49 = vld [vmem:[%s22876_s14 + $0x1b20] ss:$16 sps:$4 sm:$0xff]  }
 0x4af   : > { %8570 = vmatpush1.bf16.msra.mxu0 %v19865_v53  ;;  %v19945_v53 = vld [vmem:[%s22876_s14 + $0x1904] ss:$16 sps:$4 sm:$0xff]  }
 0x4b0   : > { %8613 = vmatpush1.bf16.msra.mxu1 %v19868_v54  ;;  %8571 = vmatprep.subr.bf16.mxu0 %v19873_v57  ;;  %v19948_v54 = vld [vmem:[%s22876_s14 + $0x1b04] ss:$16 sps:$4 sm:$0xff]   ;;  %v19943_v57 = vld [vmem:[%s22876_s14 + $0x1900] ss:$16 sps:$4 sm:$0xff]  }
 0x4b1   : > { %8614 = vmatprep.subr.bf16.mxu1 %v19876_v58  ;;  %v19946_v58 = vld [vmem:[%s22876_s14 + $0x1b00] ss:$16 sps:$4 sm:$0xff]  }
 0x4b3   : > { %8572 = vmatpush1.bf16.msra.mxu0 %v19871_v28  ;;  %v19951_v28 = vld [vmem:[%s22876_s14 + $0x1ce4] ss:$16 sps:$4 sm:$0xff]  }
 0x4b4   : > { %8615 = vmatpush1.bf16.msra.mxu1 %v19874_v61  ;;  %8573 = vmatprep.subr.bf16.mxu0 %v19879_v63  ;;  %v19954_v61 = vld [vmem:[%s22876_s14 + $0x1ee4] ss:$16 sps:$4 sm:$0xff]   ;;  %v19949_v63 = vld [vmem:[%s22876_s14 + $0x1ce0] ss:$16 sps:$4 sm:$0xff]  }
 0x4b5   : > { %8616 = vmatprep.subr.bf16.mxu1 %v19882_v17  ;;  %v19952_v17 = vld [vmem:[%s22876_s14 + $0x1ee0] ss:$16 sps:$4 sm:$0xff]  }
 0x4b7   : > { %8574 = vmatpush1.bf16.msra.mxu0 %v19877_v36  ;;  %v23909_v36 = vld [vmem:[#allocation2 + $0xb0] sm:$0xff] }
 0x4b8   : > { %8617 = vmatpush1.bf16.msra.mxu1 %v19880_v32  ;;  %8575 = vmatprep.subr.bf16.mxu0 %v19885_v2  ;;  %v23911_v32 = vld [vmem:[#allocation2 + $0xf0] sm:$0xff]  ;;  %v23915_v2 = vcombine.low %v23829_v44, %v23833_v46 }
 0x4b9   : > { %8618 = vmatprep.subr.bf16.mxu1 %v19888_v6  ;;  %v23919_v6 = vcombine.low %v23835_v47, %v23837_v14  ;;  %v23929_v44 = vcombine.high %v23909_v36, %v23911_v32  ;;  %v19955_v47 = vld [vmem:[%s22876_s14 + $0x1cc0] ss:$16 sps:$4 sm:$0xff]  }
 0x4ba   : > { %v19958_v14 = vld [vmem:[%s22876_s14 + $0x1ec0] ss:$16 sps:$4 sm:$0xff]  }
 0x4bb   : > { %8576 = vmatpush1.bf16.msra.mxu0 %v19883_v8  ;;  %v23921_v8 = vld [vmem:[#allocation2 + $0xb8] sm:$0xff] }
 0x4bc   : > { %8619 = vmatpush1.bf16.msra.mxu1 %v19886_v7  ;;  %8577 = vmatprep.subr.bf16.mxu0 %v19891_v10  ;;  %v23923_v7 = vld [vmem:[#allocation2 + $0xf8] sm:$0xff]  ;;  %v19957_v10 = vld [vmem:[%s22876_s14 + $0x1cc4] ss:$16 sps:$4 sm:$0xff]  }
 0x4bd   : > { %8620 = vmatprep.subr.bf16.mxu1 %v19894_v12  ;;  %v19960_v12 = vld [vmem:[%s22876_s14 + $0x1ec4] ss:$16 sps:$4 sm:$0xff]   ;;  %v23933_v46 = vcombine.high %v23921_v8, %v23923_v7 }
 0x4bf   : > { %8578 = vmatpush1.bf16.msra.mxu0 %v19889_v26  ;;  %v19963_v26 = vld [vmem:[%s22876_s14 + $0x1ca4] ss:$16 sps:$4 sm:$0xff]  }
 0x4c0   : > { %8621 = vmatpush1.bf16.msra.mxu1 %v19892_v5  ;;  %8579 = vmatprep.subr.bf16.mxu0 %v19897_v52  ;;  %v19966_v5 = vld [vmem:[%s22876_s14 + $0x1ea4] ss:$16 sps:$4 sm:$0xff]   ;;  %v19961_v52 = vld [vmem:[%s22876_s14 + $0x1ca0] ss:$16 sps:$4 sm:$0xff]  }
 0x4c1   : > { %8622 = vmatprep.subr.bf16.mxu1 %v19900_v30  ;;  %v19964_v30 = vld [vmem:[%s22876_s14 + $0x1ea0] ss:$16 sps:$4 sm:$0xff]  }
 0x4c3   : > { %8580 = vmatpush1.bf16.msra.mxu0 %v19895_v37  ;;  %v19969_v37 = vld [vmem:[%s22876_s14 + $0x1c84] ss:$16 sps:$4 sm:$0xff]  }
 0x4c4   : > { %8623 = vmatpush1.bf16.msra.mxu1 %v19898_v45  ;;  %8581 = vmatprep.subr.bf16.mxu0 %v19903_v55  ;;  %v19972_v45 = vld [vmem:[%s22876_s14 + $0x1e84] ss:$16 sps:$4 sm:$0xff]   ;;  %v19967_v55 = vld [vmem:[%s22876_s14 + $0x1c80] ss:$16 sps:$4 sm:$0xff]  }
 0x4c5   : > { %8624 = vmatprep.subr.bf16.mxu1 %v19906_v23  ;;  %v19970_v23 = vld [vmem:[%s22876_s14 + $0x1e80] ss:$16 sps:$4 sm:$0xff]  }
 0x4c7   : > { %8582 = vmatpush2.bf16.msra.mxu0 %v19901_v13  ;;  %v19975_v13 = vld [vmem:[%s22876_s14 + $0x1c64] ss:$16 sps:$4 sm:$0xff]  }
 0x4c8   : > { %8625 = vmatpush2.bf16.msra.mxu1 %v19904_v24  ;;  %8583 = vmatprep.subr.bf16.mxu0 %v19909_v18  ;;  %v19978_v24 = vld [vmem:[%s22876_s14 + $0x1e64] ss:$16 sps:$4 sm:$0xff]   ;;  %v19973_v18 = vld [vmem:[%s22876_s14 + $0x1c60] ss:$16 sps:$4 sm:$0xff]  }
 0x4c9   : > { %8626 = vmatprep.subr.bf16.mxu1 %v19912_v25  ;;  %v19976_v25 = vld [vmem:[%s22876_s14 + $0x1e60] ss:$16 sps:$4 sm:$0xff]  }
 0x4cb   : > { %8584 = vmatpush2.bf16.msra.mxu0 %v19907_v27  ;;  %v19981_v27 = vld [vmem:[%s22876_s14 + $0x1c44] ss:$16 sps:$4 sm:$0xff]  }
 0x4cc   : > { %8627 = vmatpush2.bf16.msra.mxu1 %v19910_v21  ;;  %8585 = vmatprep.subr.bf16.mxu0 %v19915_v56  ;;  %v19984_v21 = vld [vmem:[%s22876_s14 + $0x1e44] ss:$16 sps:$4 sm:$0xff]   ;;  %v19979_v56 = vld [vmem:[%s22876_s14 + $0x1c40] ss:$16 sps:$4 sm:$0xff]  }
 0x4cd   : > { %8628 = vmatprep.subr.bf16.mxu1 %v19918_v4  ;;  %v19982_v4 = vld [vmem:[%s22876_s14 + $0x1e40] ss:$16 sps:$4 sm:$0xff]  }
 0x4cf   : > { %8586 = vmatpush2.bf16.msra.mxu0 %v19913_v31  ;;  %v19987_v31 = vld [vmem:[%s22876_s14 + $0x1c24] ss:$16 sps:$4 sm:$0xff]  }
 0x4d0   : > { %8629 = vmatpush2.bf16.msra.mxu1 %v19916_v33  ;;  %8587 = vmatprep.subr.bf16.mxu0 %v19921_v34  ;;  %v19990_v33 = vld [vmem:[%s22876_s14 + $0x1e24] ss:$16 sps:$4 sm:$0xff]   ;;  %v19985_v34 = vld [vmem:[%s22876_s14 + $0x1c20] ss:$16 sps:$4 sm:$0xff]  }
 0x4d1   : > { %8630 = vmatprep.subr.bf16.mxu1 %v19924_v3  ;;  %v19988_v3 = vld [vmem:[%s22876_s14 + $0x1e20] ss:$16 sps:$4 sm:$0xff]  }
 0x4d3   : > { %8588 = vmatpush2.bf16.msra.mxu0 %v19919_v1  ;;  %v19993_v1 = vld [vmem:[%s22876_s14 + $0x1c04] ss:$16 sps:$4 sm:$0xff]  }
 0x4d4   : > { %8631 = vmatpush2.bf16.msra.mxu1 %v19922_v60  ;;  %8589 = vmatprep.subr.bf16.mxu0 %v19927_v62  ;;  %v19996_v60 = vld [vmem:[%s22876_s14 + $0x1e04] ss:$16 sps:$4 sm:$0xff]   ;;  %v19991_v62 = vld [vmem:[%s22876_s14 + $0x1c00] ss:$16 sps:$4 sm:$0xff]  }
 0x4d5   : > { %8632 = vmatprep.subr.bf16.mxu1 %v19930_v20  ;;  %v19994_v20 = vld [vmem:[%s22876_s14 + $0x1e00] ss:$16 sps:$4 sm:$0xff]  }
 0x4d7   : > { %8590 = vmatpush2.bf16.msra.mxu0 %v19925_v16  ;;  %v19999_v16 = vld [vmem:[%s22876_s14 + $0x1de4] ss:$16 sps:$4 sm:$0xff]  }
 0x4d8   : > { %8633 = vmatpush2.bf16.msra.mxu1 %v19928_v35  ;;  %8591 = vmatprep.subr.bf16.mxu0 %v19933_v39  ;;  %v20002_v35 = vld [vmem:[%s22876_s14 + $0x1fe4] ss:$16 sps:$4 sm:$0xff]   ;;  %v19997_v39 = vld [vmem:[%s22876_s14 + $0x1de0] ss:$16 sps:$4 sm:$0xff]  }
 0x4d9   : > { %8634 = vmatprep.subr.bf16.mxu1 %v19936_v40  ;;  %v20000_v40 = vld [vmem:[%s22876_s14 + $0x1fe0] ss:$16 sps:$4 sm:$0xff]  }
 0x4db   : > { %8592 = vmatpush2.bf16.msra.mxu0 %v19931_v41  ;;  %v20005_v41 = vld [vmem:[%s22876_s14 + $0x1dc4] ss:$16 sps:$4 sm:$0xff]  }
 0x4dc   : > { %8635 = vmatpush2.bf16.msra.mxu1 %v19934_v22  ;;  %8593 = vmatprep.subr.bf16.mxu0 %v19939_v42  ;;  %v20008_v22 = vld [vmem:[%s22876_s14 + $0x1fc4] ss:$16 sps:$4 sm:$0xff]   ;;  %v20003_v42 = vld [vmem:[%s22876_s14 + $0x1dc0] ss:$16 sps:$4 sm:$0xff]  }
 0x4dd   : > { %8636 = vmatprep.subr.bf16.mxu1 %v19942_v43  ;;  %v20006_v43 = vld [vmem:[%s22876_s14 + $0x1fc0] ss:$16 sps:$4 sm:$0xff]  }
 0x4df   : > { %8594 = vmatpush2.bf16.msra.mxu0 %v19937_v48  ;;  %v20011_v48 = vld [vmem:[%s22876_s14 + $0x1da4] ss:$16 sps:$4 sm:$0xff]  }
 0x4e0   : > { %8637 = vmatpush2.bf16.msra.mxu1 %v19940_v49  ;;  %8595 = vmatprep.subr.bf16.mxu0 %v19945_v53  ;;  %v20014_v49 = vld [vmem:[%s22876_s14 + $0x1fa4] ss:$16 sps:$4 sm:$0xff]   ;;  %v20009_v53 = vld [vmem:[%s22876_s14 + $0x1da0] ss:$16 sps:$4 sm:$0xff]  }
 0x4e1   : > { %8638 = vmatprep.subr.bf16.mxu1 %v19948_v54  ;;  %v20012_v54 = vld [vmem:[%s22876_s14 + $0x1fa0] ss:$16 sps:$4 sm:$0xff]  }
 0x4e3   : > { %8596 = vmatpush2.bf16.msra.mxu0 %v19943_v57  ;;  %v20017_v57 = vld [vmem:[%s22876_s14 + $0x1d84] ss:$16 sps:$4 sm:$0xff]  }
 0x4e4   : > { %8639 = vmatpush2.bf16.msra.mxu1 %v19946_v58  ;;  %8651 = vmatprep.subr.bf16.mxu0 %v19951_v28  ;;  %v20020_v58 = vld [vmem:[%s22876_s14 + $0x1f84] ss:$16 sps:$4 sm:$0xff]   ;;  %v20015_v28 = vld [vmem:[%s22876_s14 + $0x1d80] ss:$16 sps:$4 sm:$0xff]  }
 0x4e5   : > { %8694 = vmatprep.subr.bf16.mxu1 %v19954_v61  ;;  %v20018_v61 = vld [vmem:[%s22876_s14 + $0x1f80] ss:$16 sps:$4 sm:$0xff]  }
 0x4e6   : > { %8598 = vmatmul.mubr.bf16.vlgmr.msra.gmra.mxu0 %v23915_v2 }
 0x4e7   : > { %8641 = vmatmul.mubr.bf16.vlgmr.msra.gmra.mxu1 %v23919_v6  ;;  %8652 = vmatpush1.bf16.msra.mxu0 %v19949_v63  ;;  %v20023_v63 = vld [vmem:[%s22876_s14 + $0x1d64] ss:$16 sps:$4 sm:$0xff]  }
 0x4e8   : > { %8695 = vmatpush1.bf16.msra.mxu1 %v19952_v17  ;;  %8653 = vmatprep.subr.bf16.mxu0 %v19957_v10  ;;  %v20026_v17 = vld [vmem:[%s22876_s14 + $0x1f64] ss:$16 sps:$4 sm:$0xff]   ;;  %v20021_v10 = vld [vmem:[%s22876_s14 + $0x1d60] ss:$16 sps:$4 sm:$0xff]  }
 0x4e9   : > { %8696 = vmatprep.subr.bf16.mxu1 %v19960_v12  ;;  %8683 = vmatprep.mubr.bf16.mxu0 %v23929_v44  ;;  %v20024_v12 = vld [vmem:[%s22876_s14 + $0x1f60] ss:$16 sps:$4 sm:$0xff]  }
 0x4ea   : > { %8726 = vmatprep.mubr.bf16.mxu1 %v23933_v46 }
 0x4eb   : > { %8654 = vmatpush1.bf16.msra.mxu0 %v19955_v47  ;;  %v20029_v47 = vld [vmem:[%s22876_s14 + $0x1d44] ss:$16 sps:$4 sm:$0xff]  }
 0x4ec   : > { %8697 = vmatpush1.bf16.msra.mxu1 %v19958_v14  ;;  %8655 = vmatprep.subr.bf16.mxu0 %v19963_v26  ;;  %v20032_v14 = vld [vmem:[%s22876_s14 + $0x1f44] ss:$16 sps:$4 sm:$0xff]   ;;  %v20027_v26 = vld [vmem:[%s22876_s14 + $0x1d40] ss:$16 sps:$4 sm:$0xff]  }
 0x4ed   : > { %8698 = vmatprep.subr.bf16.mxu1 %v19966_v5  ;;  %v20030_v5 = vld [vmem:[%s22876_s14 + $0x1f40] ss:$16 sps:$4 sm:$0xff]  }
 0x4ef   : > { %8656 = vmatpush1.bf16.msra.mxu0 %v19961_v52  ;;  %v20035_v52 = vld [vmem:[%s22876_s14 + $0x1d24] ss:$16 sps:$4 sm:$0xff]  }
 0x4f0   : > { %8699 = vmatpush1.bf16.msra.mxu1 %v19964_v30  ;;  %8657 = vmatprep.subr.bf16.mxu0 %v19969_v37  ;;  %v20038_v30 = vld [vmem:[%s22876_s14 + $0x1f24] ss:$16 sps:$4 sm:$0xff]   ;;  %v20033_v37 = vld [vmem:[%s22876_s14 + $0x1d20] ss:$16 sps:$4 sm:$0xff]  }
 0x4f1   : > { %8700 = vmatprep.subr.bf16.mxu1 %v19972_v45  ;;  %v20036_v45 = vld [vmem:[%s22876_s14 + $0x1f20] ss:$16 sps:$4 sm:$0xff]  }
 0x4f3   : > { %8658 = vmatpush1.bf16.msra.mxu0 %v19967_v55  ;;  %v20041_v55 = vld [vmem:[%s22876_s14 + $0x1d04] ss:$16 sps:$4 sm:$0xff]  }
 0x4f4   : > { %8701 = vmatpush1.bf16.msra.mxu1 %v19970_v23  ;;  %8659 = vmatprep.subr.bf16.mxu0 %v19975_v13  ;;  %v20044_v23 = vld [vmem:[%s22876_s14 + $0x1f04] ss:$16 sps:$4 sm:$0xff]   ;;  %v20039_v13 = vld [vmem:[%s22876_s14 + $0x1d00] ss:$16 sps:$4 sm:$0xff]  }
 0x4f5   : > { %8702 = vmatprep.subr.bf16.mxu1 %v19978_v24  ;;  %v20042_v24 = vld [vmem:[%s22876_s14 + $0x1f00] ss:$16 sps:$4 sm:$0xff]  }
 0x4f7   : > { %8660 = vmatpush1.bf16.msra.mxu0 %v19973_v18  ;;  %v20047_v18 = vld [vmem:[%s22876_s14 + $0x10ec] ss:$16 sps:$4 sm:$0xff]  }
 0x4f8   : > { %8703 = vmatpush1.bf16.msra.mxu1 %v19976_v25  ;;  %8661 = vmatprep.subr.bf16.mxu0 %v19981_v27  ;;  %v20050_v25 = vld [vmem:[%s22876_s14 + $0x12ec] ss:$16 sps:$4 sm:$0xff]   ;;  %v24001_v27 = vcombine.low %v23909_v36, %v23911_v32  ;;  %v20051_v36 = vld [vmem:[%s22876_s14 + $0x10c8] ss:$16 sps:$4 sm:$0xff]  }
 0x4f9   : > { %8704 = vmatprep.subr.bf16.mxu1 %v19984_v21  ;;  %v24005_v21 = vcombine.low %v23921_v8, %v23923_v7  ;;  %v20054_v32 = vld [vmem:[%s22876_s14 + $0x12c8] ss:$16 sps:$4 sm:$0xff]   ;;  %v20059_v8 = vld [vmem:[%s22876_s14 + $0x10ac] ss:$16 sps:$4 sm:$0xff]  }
 0x4fa   : > { %v20062_v7 = vld [vmem:[%s22876_s14 + $0x12ac] ss:$16 sps:$4 sm:$0xff]  }
 0x4fb   : > { %8662 = vmatpush1.bf16.msra.mxu0 %v19979_v56  ;;  %v20045_v56 = vld [vmem:[%s22876_s14 + $0x10e8] ss:$16 sps:$4 sm:$0xff]  }
 0x4fc   : > { %8705 = vmatpush1.bf16.msra.mxu1 %v19982_v4  ;;  %8663 = vmatprep.subr.bf16.mxu0 %v19987_v31  ;;  %v20048_v4 = vld [vmem:[%s22876_s14 + $0x12e8] ss:$16 sps:$4 sm:$0xff]   ;;  %v20053_v31 = vld [vmem:[%s22876_s14 + $0x10cc] ss:$16 sps:$4 sm:$0xff]  }
 0x4fd   : > { %8706 = vmatprep.subr.bf16.mxu1 %v19990_v33  ;;  %v20056_v33 = vld [vmem:[%s22876_s14 + $0x12cc] ss:$16 sps:$4 sm:$0xff]  }
 0x4ff   : > { %8664 = vmatpush1.bf16.msra.mxu0 %v19985_v34  ;;  %v20057_v34 = vld [vmem:[%s22876_s14 + $0x10a8] ss:$16 sps:$4 sm:$0xff]  }
 0x500   : > { %8707 = vmatpush1.bf16.msra.mxu1 %v19988_v3  ;;  %8665 = vmatprep.subr.bf16.mxu0 %v19993_v1  ;;  %v20060_v3 = vld [vmem:[%s22876_s14 + $0x12a8] ss:$16 sps:$4 sm:$0xff]   ;;  %v20065_v1 = vld [vmem:[%s22876_s14 + $0x108c] ss:$16 sps:$4 sm:$0xff]  }
 0x501   : > { %8708 = vmatprep.subr.bf16.mxu1 %v19996_v60  ;;  %v20068_v60 = vld [vmem:[%s22876_s14 + $0x128c] ss:$16 sps:$4 sm:$0xff]  }
 0x503   : > { %8666 = vmatpush1.bf16.msra.mxu0 %v19991_v62  ;;  %v20063_v62 = vld [vmem:[%s22876_s14 + $0x1088] ss:$16 sps:$4 sm:$0xff]  }
 0x504   : > { %8709 = vmatpush1.bf16.msra.mxu1 %v19994_v20  ;;  %8667 = vmatprep.subr.bf16.mxu0 %v19999_v16  ;;  %v20066_v20 = vld [vmem:[%s22876_s14 + $0x1288] ss:$16 sps:$4 sm:$0xff]  }
 0x505   : > { %8710 = vmatprep.subr.bf16.mxu1 %v20002_v35  ;;  %v20069_v16 = vld [vmem:[%s22876_s14 + $0x1068] ss:$16 sps:$4 sm:$0xff]  }
 0x506   : > { %v20072_v35 = vld [vmem:[%s22876_s14 + $0x1268] ss:$16 sps:$4 sm:$0xff]  }
 0x507   : > { %8668 = vmatpush2.bf16.msra.mxu0 %v19997_v39  ;;  %v20077_v39 = vld [vmem:[%s22876_s14 + $0x104c] ss:$16 sps:$4 sm:$0xff]  }
 0x508   : > { %8711 = vmatpush2.bf16.msra.mxu1 %v20000_v40  ;;  %8669 = vmatprep.subr.bf16.mxu0 %v20005_v41  ;;  %v20080_v40 = vld [vmem:[%s22876_s14 + $0x124c] ss:$16 sps:$4 sm:$0xff]   ;;  %v20075_v41 = vld [vmem:[%s22876_s14 + $0x1048] ss:$16 sps:$4 sm:$0xff]  }
 0x509   : > { %8712 = vmatprep.subr.bf16.mxu1 %v20008_v22  ;;  %v20078_v22 = vld [vmem:[%s22876_s14 + $0x1248] ss:$16 sps:$4 sm:$0xff]  }
 0x50b   : > { %8670 = vmatpush2.bf16.msra.mxu0 %v20003_v42  ;;  %v20083_v42 = vld [vmem:[%s22876_s14 + $0x102c] ss:$16 sps:$4 sm:$0xff]  }
 0x50c   : > { %8713 = vmatpush2.bf16.msra.mxu1 %v20006_v43  ;;  %8671 = vmatprep.subr.bf16.mxu0 %v20011_v48  ;;  %v20086_v43 = vld [vmem:[%s22876_s14 + $0x122c] ss:$16 sps:$4 sm:$0xff]   ;;  %v20081_v48 = vld [vmem:[%s22876_s14 + $0x1028] ss:$16 sps:$4 sm:$0xff]  }
 0x50d   : > { %8714 = vmatprep.subr.bf16.mxu1 %v20014_v49  ;;  %v20084_v49 = vld [vmem:[%s22876_s14 + $0x1228] ss:$16 sps:$4 sm:$0xff]  }
 0x50f   : > { %8672 = vmatpush2.bf16.msra.mxu0 %v20009_v53  ;;  %v20089_v53 = vld [vmem:[%s22876_s14 + $0x100c] ss:$16 sps:$4 sm:$0xff]  }
 0x510   : > { %8715 = vmatpush2.bf16.msra.mxu1 %v20012_v54  ;;  %8673 = vmatprep.subr.bf16.mxu0 %v20017_v57  ;;  %v20092_v54 = vld [vmem:[%s22876_s14 + $0x120c] ss:$16 sps:$4 sm:$0xff]   ;;  %v20087_v57 = vld [vmem:[%s22876_s14 + $0x1008] ss:$16 sps:$4 sm:$0xff]  }
 0x511   : > { %8716 = vmatprep.subr.bf16.mxu1 %v20020_v58  ;;  %v20090_v58 = vld [vmem:[%s22876_s14 + $0x1208] ss:$16 sps:$4 sm:$0xff]  }
 0x513   : > { %8674 = vmatpush2.bf16.msra.mxu0 %v20015_v28  ;;  %v20095_v28 = vld [vmem:[%s22876_s14 + $0x11ec] ss:$16 sps:$4 sm:$0xff]  }
 0x514   : > { %8717 = vmatpush2.bf16.msra.mxu1 %v20018_v61  ;;  %8675 = vmatprep.subr.bf16.mxu0 %v20023_v63  ;;  %v20098_v61 = vld [vmem:[%s22876_s14 + $0x13ec] ss:$16 sps:$4 sm:$0xff]   ;;  %v20093_v63 = vld [vmem:[%s22876_s14 + $0x11e8] ss:$16 sps:$4 sm:$0xff]  }
 0x515   : > { %8718 = vmatprep.subr.bf16.mxu1 %v20026_v17  ;;  %v20096_v17 = vld [vmem:[%s22876_s14 + $0x13e8] ss:$16 sps:$4 sm:$0xff]  }
 0x517   : > { %8676 = vmatpush2.bf16.msra.mxu0 %v20021_v10  ;;  %v20101_v10 = vld [vmem:[%s22876_s14 + $0x11cc] ss:$16 sps:$4 sm:$0xff]  }
 0x518   : > { %8719 = vmatpush2.bf16.msra.mxu1 %v20024_v12  ;;  %8677 = vmatprep.subr.bf16.mxu0 %v20029_v47  ;;  %v20104_v12 = vld [vmem:[%s22876_s14 + $0x13cc] ss:$16 sps:$4 sm:$0xff]   ;;  %v20099_v47 = vld [vmem:[%s22876_s14 + $0x11c8] ss:$16 sps:$4 sm:$0xff]  }
 0x519   : > { %8720 = vmatprep.subr.bf16.mxu1 %v20032_v14  ;;  %v20102_v14 = vld [vmem:[%s22876_s14 + $0x13c8] ss:$16 sps:$4 sm:$0xff]  }
 0x51b   : > { %8678 = vmatpush2.bf16.msra.mxu0 %v20027_v26  ;;  %v20107_v26 = vld [vmem:[%s22876_s14 + $0x11ac] ss:$16 sps:$4 sm:$0xff]  }
 0x51c   : > { %8721 = vmatpush2.bf16.msra.mxu1 %v20030_v5  ;;  %8679 = vmatprep.subr.bf16.mxu0 %v20035_v52  ;;  %v20110_v5 = vld [vmem:[%s22876_s14 + $0x13ac] ss:$16 sps:$4 sm:$0xff]   ;;  %v20105_v52 = vld [vmem:[%s22876_s14 + $0x11a8] ss:$16 sps:$4 sm:$0xff]  }
 0x51d   : > { %8722 = vmatprep.subr.bf16.mxu1 %v20038_v30  ;;  %v20108_v30 = vld [vmem:[%s22876_s14 + $0x13a8] ss:$16 sps:$4 sm:$0xff]  }
 0x51f   : > { %8680 = vmatpush2.bf16.msra.mxu0 %v20033_v37  ;;  %v20113_v37 = vld [vmem:[%s22876_s14 + $0x118c] ss:$16 sps:$4 sm:$0xff]  }
 0x520   : > { %8723 = vmatpush2.bf16.msra.mxu1 %v20036_v45  ;;  %8681 = vmatprep.subr.bf16.mxu0 %v20041_v55  ;;  %v20116_v45 = vld [vmem:[%s22876_s14 + $0x138c] ss:$16 sps:$4 sm:$0xff]   ;;  %v20111_v55 = vld [vmem:[%s22876_s14 + $0x1188] ss:$16 sps:$4 sm:$0xff]  }
 0x521   : > { %8724 = vmatprep.subr.bf16.mxu1 %v20044_v23  ;;  %v20114_v23 = vld [vmem:[%s22876_s14 + $0x1388] ss:$16 sps:$4 sm:$0xff]  }
 0x523   : > { %8682 = vmatpush2.bf16.msra.mxu0 %v20039_v13  ;;  %v20119_v13 = vld [vmem:[%s22876_s14 + $0x116c] ss:$16 sps:$4 sm:$0xff]  }
 0x524   : > { %8725 = vmatpush2.bf16.msra.mxu1 %v20042_v24  ;;  %8737 = vmatprep.subr.bf16.mxu0 %v20047_v18  ;;  %v20122_v24 = vld [vmem:[%s22876_s14 + $0x136c] ss:$16 sps:$4 sm:$0xff]   ;;  %v20117_v18 = vld [vmem:[%s22876_s14 + $0x1168] ss:$16 sps:$4 sm:$0xff]  }
 0x525   : > { %8780 = vmatprep.subr.bf16.mxu1 %v20050_v25  ;;  %v20120_v25 = vld [vmem:[%s22876_s14 + $0x1368] ss:$16 sps:$4 sm:$0xff]  }
 0x526   : > { %8684 = vmatmul.mubr.bf16.vlgmr.msra.gmra.mxu0 %v24001_v27 }
 0x527   : > { %8727 = vmatmul.mubr.bf16.vlgmr.msra.gmra.mxu1 %v24005_v21  ;;  %8738 = vmatpush1.bf16.msra.mxu0 %v20045_v56  ;;  %v20125_v56 = vld [vmem:[%s22876_s14 + $0x114c] ss:$16 sps:$4 sm:$0xff]  }
 0x528   : > { %8781 = vmatpush1.bf16.msra.mxu1 %v20048_v4  ;;  %8739 = vmatprep.subr.bf16.mxu0 %v20053_v31  ;;  %v20128_v4 = vld [vmem:[%s22876_s14 + $0x134c] ss:$16 sps:$4 sm:$0xff]   ;;  %v20123_v31 = vld [vmem:[%s22876_s14 + $0x1148] ss:$16 sps:$4 sm:$0xff]  }
 0x529   : > { %8782 = vmatprep.subr.bf16.mxu1 %v20056_v33  ;;  %8769 = vmatprep.mubr.bf16.mxu0 %v23704_v11  ;;  %v20071_v11 = vld [vmem:[%s22876_s14 + $0x106c] ss:$16 sps:$4 sm:$0xff]   ;;  %v20126_v33 = vld [vmem:[%s22876_s14 + $0x1348] ss:$16 sps:$4 sm:$0xff]  }
 0x52a   : > { %8812 = vmatprep.mubr.bf16.mxu1 %v23707_v19  ;;  %v20074_v19 = vld [vmem:[%s22876_s14 + $0x126c] ss:$16 sps:$4 sm:$0xff]  }
 0x52b   : > { %8740 = vmatpush1.bf16.msra.mxu0 %v20051_v36  ;;  %v20131_v36 = vld [vmem:[%s22876_s14 + $0x112c] ss:$16 sps:$4 sm:$0xff]  }
 0x52c   : > { %8783 = vmatpush1.bf16.msra.mxu1 %v20054_v32  ;;  %8741 = vmatprep.subr.bf16.mxu0 %v20059_v8  ;;  %v20134_v32 = vld [vmem:[%s22876_s14 + $0x132c] ss:$16 sps:$4 sm:$0xff]   ;;  %v20129_v8 = vld [vmem:[%s22876_s14 + $0x1128] ss:$16 sps:$4 sm:$0xff]  }
 0x52d   : > { %8784 = vmatprep.subr.bf16.mxu1 %v20062_v7  ;;  %v20132_v7 = vld [vmem:[%s22876_s14 + $0x1328] ss:$16 sps:$4 sm:$0xff]  }
 0x52f   : > { %8742 = vmatpush1.bf16.msra.mxu0 %v20057_v34  ;;  %v20137_v34 = vld [vmem:[%s22876_s14 + $0x110c] ss:$16 sps:$4 sm:$0xff]  }
 0x530   : > { %8785 = vmatpush1.bf16.msra.mxu1 %v20060_v3  ;;  %8743 = vmatprep.subr.bf16.mxu0 %v20065_v1  ;;  %v20140_v3 = vld [vmem:[%s22876_s14 + $0x130c] ss:$16 sps:$4 sm:$0xff]   ;;  %v20135_v1 = vld [vmem:[%s22876_s14 + $0x1108] ss:$16 sps:$4 sm:$0xff]  }
 0x531   : > { %8786 = vmatprep.subr.bf16.mxu1 %v20068_v60  ;;  %v20138_v60 = vld [vmem:[%s22876_s14 + $0x1308] ss:$16 sps:$4 sm:$0xff]  }
 0x533   : > { %8744 = vmatpush1.bf16.msra.mxu0 %v20063_v62  ;;  %v20143_v62 = vld [vmem:[%s22876_s14 + $0x14ec] ss:$16 sps:$4 sm:$0xff]  }
 0x534   : > { %8787 = vmatpush1.bf16.msra.mxu1 %v20066_v20  ;;  %8745 = vmatprep.subr.bf16.mxu0 %v20071_v11  ;;  %v20146_v20 = vld [vmem:[%s22876_s14 + $0x16ec] ss:$16 sps:$4 sm:$0xff]   ;;  %v20141_v11 = vld [vmem:[%s22876_s14 + $0x14e8] ss:$16 sps:$4 sm:$0xff]  }
 0x535   : > { %8788 = vmatprep.subr.bf16.mxu1 %v20074_v19  ;;  %v20144_v19 = vld [vmem:[%s22876_s14 + $0x16e8] ss:$16 sps:$4 sm:$0xff]  }
 0x537   : > { %8746 = vmatpush1.bf16.msra.mxu0 %v20069_v16  ;;  %v20149_v16 = vld [vmem:[%s22876_s14 + $0x14cc] ss:$16 sps:$4 sm:$0xff]  }
 0x538   : > { %8789 = vmatpush1.bf16.msra.mxu1 %v20072_v35  ;;  %8747 = vmatprep.subr.bf16.mxu0 %v20077_v39  ;;  %v20152_v35 = vld [vmem:[%s22876_s14 + $0x16cc] ss:$16 sps:$4 sm:$0xff]   ;;  %v20147_v39 = vld [vmem:[%s22876_s14 + $0x14c8] ss:$16 sps:$4 sm:$0xff]  }
 0x539   : > { %8790 = vmatprep.subr.bf16.mxu1 %v20080_v40  ;;  %v20150_v40 = vld [vmem:[%s22876_s14 + $0x16c8] ss:$16 sps:$4 sm:$0xff]  }
 0x53b   : > { %8748 = vmatpush1.bf16.msra.mxu0 %v20075_v41  ;;  %v20155_v41 = vld [vmem:[%s22876_s14 + $0x14ac] ss:$16 sps:$4 sm:$0xff]  }
 0x53c   : > { %8791 = vmatpush1.bf16.msra.mxu1 %v20078_v22  ;;  %8749 = vmatprep.subr.bf16.mxu0 %v20083_v42  ;;  %v20158_v22 = vld [vmem:[%s22876_s14 + $0x16ac] ss:$16 sps:$4 sm:$0xff]   ;;  %v20153_v42 = vld [vmem:[%s22876_s14 + $0x14a8] ss:$16 sps:$4 sm:$0xff]  }
 0x53d   : > { %8792 = vmatprep.subr.bf16.mxu1 %v20086_v43  ;;  %v20156_v43 = vld [vmem:[%s22876_s14 + $0x16a8] ss:$16 sps:$4 sm:$0xff]  }
 0x53f   : > { %8750 = vmatpush1.bf16.msra.mxu0 %v20081_v48  ;;  %v20159_v48 = vld [vmem:[%s22876_s14 + $0x1488] ss:$16 sps:$4 sm:$0xff]  }
 0x540   : > { %8793 = vmatpush1.bf16.msra.mxu1 %v20084_v49  ;;  %8751 = vmatprep.subr.bf16.mxu0 %v20089_v53  ;;  %v20162_v49 = vld [vmem:[%s22876_s14 + $0x1688] ss:$16 sps:$4 sm:$0xff]  }
 0x541   : > { %8794 = vmatprep.subr.bf16.mxu1 %v20092_v54  ;;  %v20165_v53 = vld [vmem:[%s22876_s14 + $0x1468] ss:$16 sps:$4 sm:$0xff]  }
 0x542   : > { %v20168_v54 = vld [vmem:[%s22876_s14 + $0x1668] ss:$16 sps:$4 sm:$0xff]  }
 0x543   : > { %8752 = vmatpush1.bf16.msra.mxu0 %v20087_v57  ;;  %v20173_v57 = vld [vmem:[%s22876_s14 + $0x144c] ss:$16 sps:$4 sm:$0xff]  }
 0x544   : > { %8795 = vmatpush1.bf16.msra.mxu1 %v20090_v58  ;;  %8753 = vmatprep.subr.bf16.mxu0 %v20095_v28  ;;  %v20176_v58 = vld [vmem:[%s22876_s14 + $0x164c] ss:$16 sps:$4 sm:$0xff]   ;;  %v20171_v28 = vld [vmem:[%s22876_s14 + $0x1448] ss:$16 sps:$4 sm:$0xff]  }
 0x545   : > { %8796 = vmatprep.subr.bf16.mxu1 %v20098_v61  ;;  %v20174_v61 = vld [vmem:[%s22876_s14 + $0x1648] ss:$16 sps:$4 sm:$0xff]  }
 0x547   : > { %8754 = vmatpush2.bf16.msra.mxu0 %v20093_v63  ;;  %v20179_v63 = vld [vmem:[%s22876_s14 + $0x142c] ss:$16 sps:$4 sm:$0xff]  }
 0x548   : > { %8797 = vmatpush2.bf16.msra.mxu1 %v20096_v17  ;;  %8755 = vmatprep.subr.bf16.mxu0 %v20101_v10  ;;  %v20182_v17 = vld [vmem:[%s22876_s14 + $0x162c] ss:$16 sps:$4 sm:$0xff]   ;;  %v20177_v10 = vld [vmem:[%s22876_s14 + $0x1428] ss:$16 sps:$4 sm:$0xff]  }
 0x549   : > { %8798 = vmatprep.subr.bf16.mxu1 %v20104_v12  ;;  %v20180_v12 = vld [vmem:[%s22876_s14 + $0x1628] ss:$16 sps:$4 sm:$0xff]  }
 0x54b   : > { %8756 = vmatpush2.bf16.msra.mxu0 %v20099_v47  ;;  %v20185_v47 = vld [vmem:[%s22876_s14 + $0x140c] ss:$16 sps:$4 sm:$0xff]  }
 0x54c   : > { %8799 = vmatpush2.bf16.msra.mxu1 %v20102_v14  ;;  %8757 = vmatprep.subr.bf16.mxu0 %v20107_v26  ;;  %v20188_v14 = vld [vmem:[%s22876_s14 + $0x160c] ss:$16 sps:$4 sm:$0xff]   ;;  %v20183_v26 = vld [vmem:[%s22876_s14 + $0x1408] ss:$16 sps:$4 sm:$0xff]  }
 0x54d   : > { %8800 = vmatprep.subr.bf16.mxu1 %v20110_v5  ;;  %v20186_v5 = vld [vmem:[%s22876_s14 + $0x1608] ss:$16 sps:$4 sm:$0xff]  }
 0x54f   : > { %8758 = vmatpush2.bf16.msra.mxu0 %v20105_v52  ;;  %v20191_v52 = vld [vmem:[%s22876_s14 + $0x15ec] ss:$16 sps:$4 sm:$0xff]  }
 0x550   : > { %8801 = vmatpush2.bf16.msra.mxu1 %v20108_v30  ;;  %8759 = vmatprep.subr.bf16.mxu0 %v20113_v37  ;;  %v20194_v30 = vld [vmem:[%s22876_s14 + $0x17ec] ss:$16 sps:$4 sm:$0xff]   ;;  %v20189_v37 = vld [vmem:[%s22876_s14 + $0x15e8] ss:$16 sps:$4 sm:$0xff]  }
 0x551   : > { %8802 = vmatprep.subr.bf16.mxu1 %v20116_v45  ;;  %v20192_v45 = vld [vmem:[%s22876_s14 + $0x17e8] ss:$16 sps:$4 sm:$0xff]  }
 0x553   : > { %8760 = vmatpush2.bf16.msra.mxu0 %v20111_v55  ;;  %v20197_v55 = vld [vmem:[%s22876_s14 + $0x15cc] ss:$16 sps:$4 sm:$0xff]  }
 0x554   : > { %8803 = vmatpush2.bf16.msra.mxu1 %v20114_v23  ;;  %8761 = vmatprep.subr.bf16.mxu0 %v20119_v13  ;;  %v20200_v23 = vld [vmem:[%s22876_s14 + $0x17cc] ss:$16 sps:$4 sm:$0xff]   ;;  %v20195_v13 = vld [vmem:[%s22876_s14 + $0x15c8] ss:$16 sps:$4 sm:$0xff]  }
 0x555   : > { %8804 = vmatprep.subr.bf16.mxu1 %v20122_v24  ;;  %v20198_v24 = vld [vmem:[%s22876_s14 + $0x17c8] ss:$16 sps:$4 sm:$0xff]  }
 0x557   : > { %8762 = vmatpush2.bf16.msra.mxu0 %v20117_v18  ;;  %v20203_v18 = vld [vmem:[%s22876_s14 + $0x15ac] ss:$16 sps:$4 sm:$0xff]  }
 0x558   : > { %8805 = vmatpush2.bf16.msra.mxu1 %v20120_v25  ;;  %8763 = vmatprep.subr.bf16.mxu0 %v20125_v56  ;;  %v20206_v25 = vld [vmem:[%s22876_s14 + $0x17ac] ss:$16 sps:$4 sm:$0xff]   ;;  %v20201_v56 = vld [vmem:[%s22876_s14 + $0x15a8] ss:$16 sps:$4 sm:$0xff]  }
 0x559   : > { %8806 = vmatprep.subr.bf16.mxu1 %v20128_v4  ;;  %v20204_v4 = vld [vmem:[%s22876_s14 + $0x17a8] ss:$16 sps:$4 sm:$0xff]  }
 0x55b   : > { %8764 = vmatpush2.bf16.msra.mxu0 %v20123_v31  ;;  %v20209_v31 = vld [vmem:[%s22876_s14 + $0x158c] ss:$16 sps:$4 sm:$0xff]  }
 0x55c   : > { %8807 = vmatpush2.bf16.msra.mxu1 %v20126_v33  ;;  %8765 = vmatprep.subr.bf16.mxu0 %v20131_v36  ;;  %v20212_v33 = vld [vmem:[%s22876_s14 + $0x178c] ss:$16 sps:$4 sm:$0xff]   ;;  %v20207_v36 = vld [vmem:[%s22876_s14 + $0x1588] ss:$16 sps:$4 sm:$0xff]  }
 0x55d   : > { %8808 = vmatprep.subr.bf16.mxu1 %v20134_v32  ;;  %v20210_v32 = vld [vmem:[%s22876_s14 + $0x1788] ss:$16 sps:$4 sm:$0xff]  }
 0x55f   : > { %8766 = vmatpush2.bf16.msra.mxu0 %v20129_v8  ;;  %v20215_v8 = vld [vmem:[%s22876_s14 + $0x156c] ss:$16 sps:$4 sm:$0xff]  }
 0x560   : > { %8809 = vmatpush2.bf16.msra.mxu1 %v20132_v7  ;;  %8767 = vmatprep.subr.bf16.mxu0 %v20137_v34  ;;  %v20218_v7 = vld [vmem:[%s22876_s14 + $0x176c] ss:$16 sps:$4 sm:$0xff]   ;;  %v20213_v34 = vld [vmem:[%s22876_s14 + $0x1568] ss:$16 sps:$4 sm:$0xff]  }
 0x561   : > { %8810 = vmatprep.subr.bf16.mxu1 %v20140_v3  ;;  %v20216_v3 = vld [vmem:[%s22876_s14 + $0x1768] ss:$16 sps:$4 sm:$0xff]  }
 0x563   : > { %8768 = vmatpush2.bf16.msra.mxu0 %v20135_v1  ;;  %v20221_v1 = vld [vmem:[%s22876_s14 + $0x154c] ss:$16 sps:$4 sm:$0xff]  }
 0x564   : > { %8811 = vmatpush2.bf16.msra.mxu1 %v20138_v60  ;;  %8823 = vmatprep.subr.bf16.mxu0 %v20143_v62  ;;  %v20224_v60 = vld [vmem:[%s22876_s14 + $0x174c] ss:$16 sps:$4 sm:$0xff]   ;;  %v20219_v62 = vld [vmem:[%s22876_s14 + $0x1548] ss:$16 sps:$4 sm:$0xff]  }
 0x565   : > { %8866 = vmatprep.subr.bf16.mxu1 %v20146_v20  ;;  %v20222_v20 = vld [vmem:[%s22876_s14 + $0x1748] ss:$16 sps:$4 sm:$0xff]  }
 0x566   : > { %8770 = vmatmul.mubr.bf16.vlgmr.msra.gmra.mxu0 %v23727_v29  ;;  %v20161_v29 = vld [vmem:[%s22876_s14 + $0x148c] ss:$16 sps:$4 sm:$0xff]  }
 0x567   : > { %8813 = vmatmul.mubr.bf16.vlgmr.msra.gmra.mxu1 %v23729_v50  ;;  %8824 = vmatpush1.bf16.msra.mxu0 %v20141_v11  ;;  %v20164_v50 = vld [vmem:[%s22876_s14 + $0x168c] ss:$16 sps:$4 sm:$0xff]  }
 0x568   : > { %8867 = vmatpush1.bf16.msra.mxu1 %v20144_v19  ;;  %8825 = vmatprep.subr.bf16.mxu0 %v20149_v16  ;;  %v20227_v11 = vld [vmem:[%s22876_s14 + $0x152c] ss:$16 sps:$4 sm:$0xff]   ;;  %v20225_v16 = vld [vmem:[%s22876_s14 + $0x1528] ss:$16 sps:$4 sm:$0xff]  }
 0x569   : > { %8868 = vmatprep.subr.bf16.mxu1 %v20152_v35  ;;  %8855 = vmatprep.mubr.bf16.mxu0 %v23770_v9  ;;  %v20167_v9 = vld [vmem:[%s22876_s14 + $0x146c] ss:$16 sps:$4 sm:$0xff]   ;;  %v20228_v35 = vld [vmem:[%s22876_s14 + $0x1728] ss:$16 sps:$4 sm:$0xff]  }
 0x56a   : > { %8898 = vmatprep.mubr.bf16.mxu1 %v23775_v59  ;;  %v20170_v59 = vld [vmem:[%s22876_s14 + $0x166c] ss:$16 sps:$4 sm:$0xff]  }
 0x56b   : > { %8826 = vmatpush1.bf16.msra.mxu0 %v20147_v39  ;;  %v20230_v19 = vld [vmem:[%s22876_s14 + $0x172c] ss:$16 sps:$4 sm:$0xff]  }
 0x56c   : > { %8869 = vmatpush1.bf16.msra.mxu1 %v20150_v40  ;;  %8827 = vmatprep.subr.bf16.mxu0 %v20155_v41  ;;  %v20233_v39 = vld [vmem:[%s22876_s14 + $0x150c] ss:$16 sps:$4 sm:$0xff]   ;;  %v20231_v41 = vld [vmem:[%s22876_s14 + $0x1508] ss:$16 sps:$4 sm:$0xff]  }
 0x56d   : > { %8870 = vmatprep.subr.bf16.mxu1 %v20158_v22  ;;  %v20236_v40 = vld [vmem:[%s22876_s14 + $0x170c] ss:$16 sps:$4 sm:$0xff]   ;;  %v20234_v22 = vld [vmem:[%s22876_s14 + $0x1708] ss:$16 sps:$4 sm:$0xff]  }
 0x56f   : > { %8828 = vmatpush1.bf16.msra.mxu0 %v20153_v42  ;;  %v20239_v42 = vld [vmem:[%s22876_s14 + $0x18ec] ss:$16 sps:$4 sm:$0xff]  }
 0x570   : > { %8871 = vmatpush1.bf16.msra.mxu1 %v20156_v43  ;;  %8829 = vmatprep.subr.bf16.mxu0 %v20161_v29  ;;  %v20242_v43 = vld [vmem:[%s22876_s14 + $0x1aec] ss:$16 sps:$4 sm:$0xff]   ;;  %v20237_v29 = vld [vmem:[%s22876_s14 + $0x18e8] ss:$16 sps:$4 sm:$0xff]  }
 0x571   : > { %8872 = vmatprep.subr.bf16.mxu1 %v20164_v50  ;;  %v20240_v50 = vld [vmem:[%s22876_s14 + $0x1ae8] ss:$16 sps:$4 sm:$0xff]  }
 0x573   : > { %8830 = vmatpush1.bf16.msra.mxu0 %v20159_v48  ;;  %v20245_v48 = vld [vmem:[%s22876_s14 + $0x18cc] ss:$16 sps:$4 sm:$0xff]  }
 0x574   : > { %8873 = vmatpush1.bf16.msra.mxu1 %v20162_v49  ;;  %8831 = vmatprep.subr.bf16.mxu0 %v20167_v9  ;;  %v20248_v49 = vld [vmem:[%s22876_s14 + $0x1acc] ss:$16 sps:$4 sm:$0xff]   ;;  %v20243_v9 = vld [vmem:[%s22876_s14 + $0x18c8] ss:$16 sps:$4 sm:$0xff]  }
 0x575   : > { %8874 = vmatprep.subr.bf16.mxu1 %v20170_v59  ;;  %v20246_v59 = vld [vmem:[%s22876_s14 + $0x1ac8] ss:$16 sps:$4 sm:$0xff]  }
 0x577   : > { %8832 = vmatpush1.bf16.msra.mxu0 %v20165_v53  ;;  %v20251_v53 = vld [vmem:[%s22876_s14 + $0x18ac] ss:$16 sps:$4 sm:$0xff]  }
 0x578   : > { %8875 = vmatpush1.bf16.msra.mxu1 %v20168_v54  ;;  %8833 = vmatprep.subr.bf16.mxu0 %v20173_v57  ;;  %v20254_v54 = vld [vmem:[%s22876_s14 + $0x1aac] ss:$16 sps:$4 sm:$0xff]   ;;  %v20249_v57 = vld [vmem:[%s22876_s14 + $0x18a8] ss:$16 sps:$4 sm:$0xff]  }
 0x579   : > { %8876 = vmatprep.subr.bf16.mxu1 %v20176_v58  ;;  %v20252_v58 = vld [vmem:[%s22876_s14 + $0x1aa8] ss:$16 sps:$4 sm:$0xff]  }
 0x57b   : > { %8834 = vmatpush1.bf16.msra.mxu0 %v20171_v28  ;;  %v20255_v28 = vld [vmem:[%s22876_s14 + $0x1888] ss:$16 sps:$4 sm:$0xff]  }
 0x57c   : > { %8877 = vmatpush1.bf16.msra.mxu1 %v20174_v61  ;;  %8835 = vmatprep.subr.bf16.mxu0 %v20179_v63  ;;  %v20258_v61 = vld [vmem:[%s22876_s14 + $0x1a88] ss:$16 sps:$4 sm:$0xff]  }
 0x57d   : > { %8878 = vmatprep.subr.bf16.mxu1 %v20182_v17  ;;  %v20261_v63 = vld [vmem:[%s22876_s14 + $0x1868] ss:$16 sps:$4 sm:$0xff]  }
 0x57e   : > { %v20264_v17 = vld [vmem:[%s22876_s14 + $0x1a68] ss:$16 sps:$4 sm:$0xff]  }
 0x57f   : > { %8836 = vmatpush1.bf16.msra.mxu0 %v20177_v10  ;;  %v20269_v10 = vld [vmem:[%s22876_s14 + $0x184c] ss:$16 sps:$4 sm:$0xff]  }
 0x580   : > { %8879 = vmatpush1.bf16.msra.mxu1 %v20180_v12  ;;  %8837 = vmatprep.subr.bf16.mxu0 %v20185_v47  ;;  %v20272_v12 = vld [vmem:[%s22876_s14 + $0x1a4c] ss:$16 sps:$4 sm:$0xff]   ;;  %v20267_v47 = vld [vmem:[%s22876_s14 + $0x1848] ss:$16 sps:$4 sm:$0xff]  }
 0x581   : > { %8880 = vmatprep.subr.bf16.mxu1 %v20188_v14  ;;  %v20270_v14 = vld [vmem:[%s22876_s14 + $0x1a48] ss:$16 sps:$4 sm:$0xff]  }
 0x583   : > { %8838 = vmatpush1.bf16.msra.mxu0 %v20183_v26  ;;  %v20275_v26 = vld [vmem:[%s22876_s14 + $0x182c] ss:$16 sps:$4 sm:$0xff]  }
 0x584   : > { %8881 = vmatpush1.bf16.msra.mxu1 %v20186_v5  ;;  %8839 = vmatprep.subr.bf16.mxu0 %v20191_v52  ;;  %v20278_v5 = vld [vmem:[%s22876_s14 + $0x1a2c] ss:$16 sps:$4 sm:$0xff]   ;;  %v20273_v52 = vld [vmem:[%s22876_s14 + $0x1828] ss:$16 sps:$4 sm:$0xff]  }
 0x585   : > { %8882 = vmatprep.subr.bf16.mxu1 %v20194_v30  ;;  %v20276_v30 = vld [vmem:[%s22876_s14 + $0x1a28] ss:$16 sps:$4 sm:$0xff]  }
 0x587   : > { %8840 = vmatpush2.bf16.msra.mxu0 %v20189_v37  ;;  %v20281_v37 = vld [vmem:[%s22876_s14 + $0x180c] ss:$16 sps:$4 sm:$0xff]  }
 0x588   : > { %8883 = vmatpush2.bf16.msra.mxu1 %v20192_v45  ;;  %8841 = vmatprep.subr.bf16.mxu0 %v20197_v55  ;;  %v20284_v45 = vld [vmem:[%s22876_s14 + $0x1a0c] ss:$16 sps:$4 sm:$0xff]   ;;  %v20279_v55 = vld [vmem:[%s22876_s14 + $0x1808] ss:$16 sps:$4 sm:$0xff]  }
 0x589   : > { %8884 = vmatprep.subr.bf16.mxu1 %v20200_v23  ;;  %v20282_v23 = vld [vmem:[%s22876_s14 + $0x1a08] ss:$16 sps:$4 sm:$0xff]  }
 0x58b   : > { %8842 = vmatpush2.bf16.msra.mxu0 %v20195_v13  ;;  %v20287_v13 = vld [vmem:[%s22876_s14 + $0x19ec] ss:$16 sps:$4 sm:$0xff]  }
 0x58c   : > { %8885 = vmatpush2.bf16.msra.mxu1 %v20198_v24  ;;  %8843 = vmatprep.subr.bf16.mxu0 %v20203_v18  ;;  %v20290_v24 = vld [vmem:[%s22876_s14 + $0x1bec] ss:$16 sps:$4 sm:$0xff]   ;;  %v20285_v18 = vld [vmem:[%s22876_s14 + $0x19e8] ss:$16 sps:$4 sm:$0xff]  }
 0x58d   : > { %8886 = vmatprep.subr.bf16.mxu1 %v20206_v25  ;;  %v20288_v25 = vld [vmem:[%s22876_s14 + $0x1be8] ss:$16 sps:$4 sm:$0xff]  }
 0x58f   : > { %8844 = vmatpush2.bf16.msra.mxu0 %v20201_v56  ;;  %v20293_v56 = vld [vmem:[%s22876_s14 + $0x19cc] ss:$16 sps:$4 sm:$0xff]  }
 0x590   : > { %8887 = vmatpush2.bf16.msra.mxu1 %v20204_v4  ;;  %8845 = vmatprep.subr.bf16.mxu0 %v20209_v31  ;;  %v20296_v4 = vld [vmem:[%s22876_s14 + $0x1bcc] ss:$16 sps:$4 sm:$0xff]   ;;  %v20291_v31 = vld [vmem:[%s22876_s14 + $0x19c8] ss:$16 sps:$4 sm:$0xff]  }
 0x591   : > { %8888 = vmatprep.subr.bf16.mxu1 %v20212_v33  ;;  %v20294_v33 = vld [vmem:[%s22876_s14 + $0x1bc8] ss:$16 sps:$4 sm:$0xff]  }
 0x593   : > { %8846 = vmatpush2.bf16.msra.mxu0 %v20207_v36  ;;  %v20299_v36 = vld [vmem:[%s22876_s14 + $0x19ac] ss:$16 sps:$4 sm:$0xff]  }
 0x594   : > { %8889 = vmatpush2.bf16.msra.mxu1 %v20210_v32  ;;  %8847 = vmatprep.subr.bf16.mxu0 %v20215_v8  ;;  %v20302_v32 = vld [vmem:[%s22876_s14 + $0x1bac] ss:$16 sps:$4 sm:$0xff]   ;;  %v20297_v8 = vld [vmem:[%s22876_s14 + $0x19a8] ss:$16 sps:$4 sm:$0xff]  }
 0x595   : > { %8890 = vmatprep.subr.bf16.mxu1 %v20218_v7  ;;  %v20300_v7 = vld [vmem:[%s22876_s14 + $0x1ba8] ss:$16 sps:$4 sm:$0xff]  }
 0x597   : > { %8848 = vmatpush2.bf16.msra.mxu0 %v20213_v34  ;;  %v20305_v34 = vld [vmem:[%s22876_s14 + $0x198c] ss:$16 sps:$4 sm:$0xff]  }
 0x598   : > { %8891 = vmatpush2.bf16.msra.mxu1 %v20216_v3  ;;  %8849 = vmatprep.subr.bf16.mxu0 %v20221_v1  ;;  %v20308_v3 = vld [vmem:[%s22876_s14 + $0x1b8c] ss:$16 sps:$4 sm:$0xff]   ;;  %v20303_v1 = vld [vmem:[%s22876_s14 + $0x1988] ss:$16 sps:$4 sm:$0xff]  }
 0x599   : > { %8892 = vmatprep.subr.bf16.mxu1 %v20224_v60  ;;  %v20306_v60 = vld [vmem:[%s22876_s14 + $0x1b88] ss:$16 sps:$4 sm:$0xff]  }
 0x59b   : > { %8850 = vmatpush2.bf16.msra.mxu0 %v20219_v62  ;;  %v20311_v62 = vld [vmem:[%s22876_s14 + $0x196c] ss:$16 sps:$4 sm:$0xff]  }
 0x59c   : > { %8893 = vmatpush2.bf16.msra.mxu1 %v20222_v20  ;;  %8851 = vmatprep.subr.bf16.mxu0 %v20227_v11  ;;  %v20314_v20 = vld [vmem:[%s22876_s14 + $0x1b6c] ss:$16 sps:$4 sm:$0xff]   ;;  %v20309_v11 = vld [vmem:[%s22876_s14 + $0x1968] ss:$16 sps:$4 sm:$0xff]  }
 0x59d   : > { %8894 = vmatprep.subr.bf16.mxu1 %v20230_v19  ;;  %v20312_v19 = vld [vmem:[%s22876_s14 + $0x1b68] ss:$16 sps:$4 sm:$0xff]  }
 0x59f   : > { %8852 = vmatpush2.bf16.msra.mxu0 %v20225_v16  ;;  %v20317_v16 = vld [vmem:[%s22876_s14 + $0x194c] ss:$16 sps:$4 sm:$0xff]  }
 0x5a0   : > { %8895 = vmatpush2.bf16.msra.mxu1 %v20228_v35  ;;  %8853 = vmatprep.subr.bf16.mxu0 %v20233_v39  ;;  %v20320_v35 = vld [vmem:[%s22876_s14 + $0x1b4c] ss:$16 sps:$4 sm:$0xff]   ;;  %v20315_v39 = vld [vmem:[%s22876_s14 + $0x1948] ss:$16 sps:$4 sm:$0xff]  }
 0x5a1   : > { %8896 = vmatprep.subr.bf16.mxu1 %v20236_v40  ;;  %v20318_v40 = vld [vmem:[%s22876_s14 + $0x1b48] ss:$16 sps:$4 sm:$0xff]  }
 0x5a3   : > { %8854 = vmatpush2.bf16.msra.mxu0 %v20231_v41  ;;  %v20323_v41 = vld [vmem:[%s22876_s14 + $0x192c] ss:$16 sps:$4 sm:$0xff]  }
 0x5a4   : > { %8897 = vmatpush2.bf16.msra.mxu1 %v20234_v22  ;;  %8909 = vmatprep.subr.bf16.mxu0 %v20239_v42  ;;  %v20326_v22 = vld [vmem:[%s22876_s14 + $0x1b2c] ss:$16 sps:$4 sm:$0xff]   ;;  %v20321_v42 = vld [vmem:[%s22876_s14 + $0x1928] ss:$16 sps:$4 sm:$0xff]  }
 0x5a5   : > { %8952 = vmatprep.subr.bf16.mxu1 %v20242_v43  ;;  %v20324_v43 = vld [vmem:[%s22876_s14 + $0x1b28] ss:$16 sps:$4 sm:$0xff]  }
 0x5a6   : > { %8856 = vmatmul.mubr.bf16.vlgmr.msra.gmra.mxu0 %v23817_v38  ;;  %v20257_v38 = vld [vmem:[%s22876_s14 + $0x188c] ss:$16 sps:$4 sm:$0xff]  }
 0x5a7   : > { %8899 = vmatmul.mubr.bf16.vlgmr.msra.gmra.mxu1 %v23821_v15  ;;  %8910 = vmatpush1.bf16.msra.mxu0 %v20237_v29  ;;  %v20260_v15 = vld [vmem:[%s22876_s14 + $0x1a8c] ss:$16 sps:$4 sm:$0xff]  }
 0x5a8   : > { %8953 = vmatpush1.bf16.msra.mxu1 %v20240_v50  ;;  %8911 = vmatprep.subr.bf16.mxu0 %v20245_v48  ;;  %v20329_v29 = vld [vmem:[%s22876_s14 + $0x190c] ss:$16 sps:$4 sm:$0xff]   ;;  %v20327_v48 = vld [vmem:[%s22876_s14 + $0x1908] ss:$16 sps:$4 sm:$0xff]  }
 0x5a9   : > { %8954 = vmatprep.subr.bf16.mxu1 %v20248_v49  ;;  %8941 = vmatprep.mubr.bf16.mxu0 %v23842_v0  ;;  %v20263_v0 = vld [vmem:[%s22876_s14 + $0x186c] ss:$16 sps:$4 sm:$0xff]   ;;  %v20330_v49 = vld [vmem:[%s22876_s14 + $0x1b08] ss:$16 sps:$4 sm:$0xff]  }
 0x5aa   : > { %8984 = vmatprep.mubr.bf16.mxu1 %v23847_v51  ;;  %v20266_v51 = vld [vmem:[%s22876_s14 + $0x1a6c] ss:$16 sps:$4 sm:$0xff]  }
 0x5ab   : > { %8912 = vmatpush1.bf16.msra.mxu0 %v20243_v9  ;;  %v20332_v50 = vld [vmem:[%s22876_s14 + $0x1b0c] ss:$16 sps:$4 sm:$0xff]  }
 0x5ac   : > { %8955 = vmatpush1.bf16.msra.mxu1 %v20246_v59  ;;  %8913 = vmatprep.subr.bf16.mxu0 %v20251_v53  ;;  %v20335_v9 = vld [vmem:[%s22876_s14 + $0x1cec] ss:$16 sps:$4 sm:$0xff]   ;;  %v20333_v53 = vld [vmem:[%s22876_s14 + $0x1ce8] ss:$16 sps:$4 sm:$0xff]  }
 0x5ad   : > { %8956 = vmatprep.subr.bf16.mxu1 %v20254_v54  ;;  %v20338_v59 = vld [vmem:[%s22876_s14 + $0x1eec] ss:$16 sps:$4 sm:$0xff]   ;;  %v20336_v54 = vld [vmem:[%s22876_s14 + $0x1ee8] ss:$16 sps:$4 sm:$0xff]  }
 0x5af   : > { %8914 = vmatpush1.bf16.msra.mxu0 %v20249_v57  ;;  %v20341_v57 = vld [vmem:[%s22876_s14 + $0x1ccc] ss:$16 sps:$4 sm:$0xff]  }
 0x5b0   : > { %8957 = vmatpush1.bf16.msra.mxu1 %v20252_v58  ;;  %8915 = vmatprep.subr.bf16.mxu0 %v20257_v38  ;;  %v20344_v58 = vld [vmem:[%s22876_s14 + $0x1ecc] ss:$16 sps:$4 sm:$0xff]   ;;  %v20339_v38 = vld [vmem:[%s22876_s14 + $0x1cc8] ss:$16 sps:$4 sm:$0xff]  }
 0x5b1   : > { %8958 = vmatprep.subr.bf16.mxu1 %v20260_v15  ;;  %v20342_v15 = vld [vmem:[%s22876_s14 + $0x1ec8] ss:$16 sps:$4 sm:$0xff]  }
 0x5b3   : > { %8916 = vmatpush1.bf16.msra.mxu0 %v20255_v28  ;;  %v20347_v28 = vld [vmem:[%s22876_s14 + $0x1cac] ss:$16 sps:$4 sm:$0xff]  }
 0x5b4   : > { %8959 = vmatpush1.bf16.msra.mxu1 %v20258_v61  ;;  %8917 = vmatprep.subr.bf16.mxu0 %v20263_v0  ;;  %v20350_v61 = vld [vmem:[%s22876_s14 + $0x1eac] ss:$16 sps:$4 sm:$0xff]   ;;  %v20345_v0 = vld [vmem:[%s22876_s14 + $0x1ca8] ss:$16 sps:$4 sm:$0xff]  }
 0x5b5   : > { %8960 = vmatprep.subr.bf16.mxu1 %v20266_v51  ;;  %v20348_v51 = vld [vmem:[%s22876_s14 + $0x1ea8] ss:$16 sps:$4 sm:$0xff]  }
 0x5b7   : > { %8918 = vmatpush1.bf16.msra.mxu0 %v20261_v63  ;;  %v24227_v63 = vpop.f32.mrf.mxu0 }
 0x5b8   : > { %8961 = vmatpush1.bf16.msra.mxu1 %v20264_v17  ;;  %8919 = vmatprep.subr.bf16.mxu0 %v20269_v10  ;;  %v24229_v17 = vpop.f32.mrf.mxu1  ;;  %v20354_v10 = vld [vmem:[%s22876_s14 + $0x1e88] ss:$16 sps:$4 sm:$0xff]  }
 0x5b9   : > { %8962 = vmatprep.subr.bf16.mxu1 %v20272_v12  ;;  %v20362_v12 = vld [vmem:[%s22876_s14 + $0x1e6c] ss:$16 sps:$4 sm:$0xff]  }
 0x5bb   : > { %8920 = vmatpush1.bf16.msra.mxu0 %v20267_v47  ;;  %v24235_v47 = vpop.f32.mrf.mxu0 }
 0x5bc   : > { %8963 = vmatpush1.bf16.msra.mxu1 %v20270_v14  ;;  %8921 = vmatprep.subr.bf16.mxu0 %v20275_v26  ;;  %v24237_v14 = vpop.f32.mrf.mxu1  ;;  %v20357_v26 = vld [vmem:[%s22876_s14 + $0x1c68] ss:$16 sps:$4 sm:$0xff]  }
 0x5bd   : > { %8964 = vmatprep.subr.bf16.mxu1 %v20278_v5  ;;  %v20360_v5 = vld [vmem:[%s22876_s14 + $0x1e68] ss:$16 sps:$4 sm:$0xff]  }
 0x5bf   : > { %8922 = vmatpush1.bf16.msra.mxu0 %v20273_v52  ;;  %v20365_v52 = vld [vmem:[%s22876_s14 + $0x1c4c] ss:$16 sps:$4 sm:$0xff]  }
 0x5c0   : > { %8965 = vmatpush1.bf16.msra.mxu1 %v20276_v30  ;;  %8923 = vmatprep.subr.bf16.mxu0 %v20281_v37  ;;  %v20368_v30 = vld [vmem:[%s22876_s14 + $0x1e4c] ss:$16 sps:$4 sm:$0xff]   ;;  %v24243_v37 = vpop.f32.mrf.mxu0 }
 0x5c1   : > { %8966 = vmatprep.subr.bf16.mxu1 %v20284_v45  ;;  %v24245_v45 = vpop.f32.mrf.mxu1 }
 0x5c3   : > { %8924 = vmatpush1.bf16.msra.mxu0 %v20279_v55  ;;  %v20363_v55 = vld [vmem:[%s22876_s14 + $0x1c48] ss:$16 sps:$4 sm:$0xff]  }
 0x5c4   : > { %8967 = vmatpush1.bf16.msra.mxu1 %v20282_v23  ;;  %8925 = vmatprep.subr.bf16.mxu0 %v20287_v13  ;;  %v20366_v23 = vld [vmem:[%s22876_s14 + $0x1e48] ss:$16 sps:$4 sm:$0xff]   ;;  %v20371_v13 = vld [vmem:[%s22876_s14 + $0x1c2c] ss:$16 sps:$4 sm:$0xff]  }
 0x5c5   : > { %8968 = vmatprep.subr.bf16.mxu1 %v20290_v24  ;;  %v20374_v24 = vld [vmem:[%s22876_s14 + $0x1e2c] ss:$16 sps:$4 sm:$0xff]  }
 0x5c7   : > { %8926 = vmatpush2.bf16.msra.mxu0 %v20285_v18  ;;  %v24251_v18 = vpop.f32.mrf.mxu0 }
 0x5c8   : > { %8969 = vmatpush2.bf16.msra.mxu1 %v20288_v25  ;;  %8927 = vmatprep.subr.bf16.mxu0 %v20293_v56  ;;  %v24253_v25 = vpop.f32.mrf.mxu1  ;;  %v20369_v56 = vld [vmem:[%s22876_s14 + $0x1c28] ss:$16 sps:$4 sm:$0xff]  }
 0x5c9   : > { %8970 = vmatprep.subr.bf16.mxu1 %v20296_v4  ;;  %v20372_v4 = vld [vmem:[%s22876_s14 + $0x1e28] ss:$16 sps:$4 sm:$0xff]  }
 0x5cb   : > { %8928 = vmatpush2.bf16.msra.mxu0 %v20291_v31  ;;  %v24257_v31 = vpop.f32.mrf.mxu0 }
 0x5cc   : > { %8971 = vmatpush2.bf16.msra.mxu1 %v20294_v33  ;;  %8929 = vmatprep.subr.bf16.mxu0 %v20299_v36  ;;  %v24259_v33 = vpop.f32.mrf.mxu1  ;;  %v20377_v36 = vld [vmem:[%s22876_s14 + $0x1c0c] ss:$16 sps:$4 sm:$0xff]  }
 0x5cd   : > { %8972 = vmatprep.subr.bf16.mxu1 %v20302_v32  ;;  %v20380_v32 = vld [vmem:[%s22876_s14 + $0x1e0c] ss:$16 sps:$4 sm:$0xff]  }
 0x5cf   : > { %8930 = vmatpush2.bf16.msra.mxu0 %v20297_v8  ;;  %v20375_v8 = vld [vmem:[%s22876_s14 + $0x1c08] ss:$16 sps:$4 sm:$0xff]  }
 0x5d0   : > { %8973 = vmatpush2.bf16.msra.mxu1 %v20300_v7  ;;  %8931 = vmatprep.subr.bf16.mxu0 %v20305_v34  ;;  %v20378_v7 = vld [vmem:[%s22876_s14 + $0x1e08] ss:$16 sps:$4 sm:$0xff]   ;;  %v24265_v34 = vpop.f32.mrf.mxu0 }
 0x5d1   : > { %8974 = vmatprep.subr.bf16.mxu1 %v20308_v3  ;;  %v24267_v3 = vpop.f32.mrf.mxu1 }
 0x5d3   : > { %8932 = vmatpush2.bf16.msra.mxu0 %v20303_v1  ;;  %v20383_v1 = vld [vmem:[%s22876_s14 + $0x1dec] ss:$16 sps:$4 sm:$0xff]  }
 0x5d4   : > { %8975 = vmatpush2.bf16.msra.mxu1 %v20306_v60  ;;  %8933 = vmatprep.subr.bf16.mxu0 %v20311_v62  ;;  %v20386_v60 = vld [vmem:[%s22876_s14 + $0x1fec] ss:$16 sps:$4 sm:$0xff]   ;;  %v20381_v62 = vld [vmem:[%s22876_s14 + $0x1de8] ss:$16 sps:$4 sm:$0xff]  }
 0x5d5   : > { %8976 = vmatprep.subr.bf16.mxu1 %v20314_v20  ;;  %v20384_v20 = vld [vmem:[%s22876_s14 + $0x1fe8] ss:$16 sps:$4 sm:$0xff]  }
 0x5d7   : > { %8934 = vmatpush2.bf16.msra.mxu0 %v20309_v11  ;;  %v24273_v11 = vpop.f32.mrf.mxu0 }
 0x5d8   : > { %8977 = vmatpush2.bf16.msra.mxu1 %v20312_v19  ;;  %8935 = vmatprep.subr.bf16.mxu0 %v20317_v16  ;;  %v24275_v19 = vpop.f32.mrf.mxu1  ;;  %v20389_v16 = vld [vmem:[%s22876_s14 + $0x1dcc] ss:$16 sps:$4 sm:$0xff]  }
 0x5d9   : > { %8978 = vmatprep.subr.bf16.mxu1 %v20320_v35  ;;  %v20392_v35 = vld [vmem:[%s22876_s14 + $0x1fcc] ss:$16 sps:$4 sm:$0xff]  }
 0x5db   : > { %8936 = vmatpush2.bf16.msra.mxu0 %v20315_v39  ;;  %v20387_v39 = vld [vmem:[%s22876_s14 + $0x1dc8] ss:$16 sps:$4 sm:$0xff]  }
 0x5dc   : > { %8979 = vmatpush2.bf16.msra.mxu1 %v20318_v40  ;;  %8937 = vmatprep.subr.bf16.mxu0 %v20323_v41  ;;  %v20390_v40 = vld [vmem:[%s22876_s14 + $0x1fc8] ss:$16 sps:$4 sm:$0xff]   ;;  %v24281_v41 = vpop.f32.mrf.mxu0 }
 0x5dd   : > { %8980 = vmatprep.subr.bf16.mxu1 %v20326_v22  ;;  %v24283_v22 = vpop.f32.mrf.mxu1 }
 0x5df   : > { %8938 = vmatpush2.bf16.msra.mxu0 %v20321_v42  ;;  %v20395_v42 = vld [vmem:[%s22876_s14 + $0x1dac] ss:$16 sps:$4 sm:$0xff]  }
 0x5e0   : > { %8981 = vmatpush2.bf16.msra.mxu1 %v20324_v43  ;;  %8939 = vmatprep.subr.bf16.mxu0 %v20329_v29  ;;  %v20398_v43 = vld [vmem:[%s22876_s14 + $0x1fac] ss:$16 sps:$4 sm:$0xff]   ;;  %v24287_v29 = vpop.f32.mrf.mxu0 }
 0x5e1   : > { %8982 = vmatprep.subr.bf16.mxu1 %v20332_v50  ;;  %v24289_v50 = vpop.f32.mrf.mxu1 }
 0x5e3   : > { %8940 = vmatpush2.bf16.msra.mxu0 %v20327_v48  ;;  %v20393_v48 = vld [vmem:[%s22876_s14 + $0x1da8] ss:$16 sps:$4 sm:$0xff]  }
 0x5e4   : > { %8983 = vmatpush2.bf16.msra.mxu1 %v20330_v49  ;;  %8995 = vmatprep.subr.bf16.mxu0 %v20335_v9  ;;  %v20396_v49 = vld [vmem:[%s22876_s14 + $0x1fa8] ss:$16 sps:$4 sm:$0xff]   ;;  %v20401_v9 = vld [vmem:[%s22876_s14 + $0x1d8c] ss:$16 sps:$4 sm:$0xff]  }
 0x5e5   : > { %9038 = vmatprep.subr.bf16.mxu1 %v20338_v59  ;;  %v20404_v59 = vld [vmem:[%s22876_s14 + $0x1f8c] ss:$16 sps:$4 sm:$0xff]  }
 0x5e6   : > { %8942 = vmatmul.mubr.bf16.vlgmr.msra.gmra.mxu0 %v23915_v2  ;;  %v20353_v2 = vld [vmem:[%s22876_s14 + $0x1c8c] ss:$16 sps:$4 sm:$0xff]  }
 0x5e7   : > { %8985 = vmatmul.mubr.bf16.vlgmr.msra.gmra.mxu1 %v23919_v6  ;;  %8996 = vmatpush1.bf16.msra.mxu0 %v20333_v53  ;;  %v20356_v6 = vld [vmem:[%s22876_s14 + $0x1e8c] ss:$16 sps:$4 sm:$0xff]   ;;  %v24295_v53 = vpop.f32.mrf.mxu0 }
 0x5e8   : > { %9039 = vmatpush1.bf16.msra.mxu1 %v20336_v54  ;;  %8997 = vmatprep.subr.bf16.mxu0 %v20341_v57  ;;  %v24297_v54 = vpop.f32.mrf.mxu1  ;;  %v20399_v57 = vld [vmem:[%s22876_s14 + $0x1d88] ss:$16 sps:$4 sm:$0xff]  }
 0x5e9   : > { %9040 = vmatprep.subr.bf16.mxu1 %v20344_v58  ;;  %9027 = vmatprep.mubr.bf16.mxu0 %v23929_v44  ;;  %v20351_v44 = vld [vmem:[%s22876_s14 + $0x1c88] ss:$16 sps:$4 sm:$0xff]  }
 0x5ea   : > { %9070 = vmatprep.mubr.bf16.mxu1 %v23933_v46  ;;  %v20359_v46 = vld [vmem:[%s22876_s14 + $0x1c6c] ss:$16 sps:$4 sm:$0xff]   ;;  %v20402_v58 = vld [vmem:[%s22876_s14 + $0x1f88] ss:$16 sps:$4 sm:$0xff]  }
 0x5eb   : > { %8998 = vmatpush1.bf16.msra.mxu0 %v20339_v38  ;;  %v20407_v38 = vld [vmem:[%s22876_s14 + $0x1d6c] ss:$16 sps:$4 sm:$0xff]  }
 0x5ec   : > { %9041 = vmatpush1.bf16.msra.mxu1 %v20342_v15  ;;  %8999 = vmatprep.subr.bf16.mxu0 %v20347_v28  ;;  %v20410_v15 = vld [vmem:[%s22876_s14 + $0x1f6c] ss:$16 sps:$4 sm:$0xff]   ;;  %v24303_v28 = vpop.f32.mrf.mxu0 }
 0x5ed   : > { %9042 = vmatprep.subr.bf16.mxu1 %v20350_v61  ;;  %v24305_v61 = vpop.f32.mrf.mxu1 }
 0x5ef   : > { %9000 = vmatpush1.bf16.msra.mxu0 %v20345_v0  ;;  %v20405_v0 = vld [vmem:[%s22876_s14 + $0x1d68] ss:$16 sps:$4 sm:$0xff]  }
 0x5f0   : > { %9043 = vmatpush1.bf16.msra.mxu1 %v20348_v51  ;;  %9001 = vmatprep.subr.bf16.mxu0 %v20353_v2  ;;  %v20408_v51 = vld [vmem:[%s22876_s14 + $0x1f68] ss:$16 sps:$4 sm:$0xff]   ;;  %v20413_v2 = vld [vmem:[%s22876_s14 + $0x1d4c] ss:$16 sps:$4 sm:$0xff]  }
 0x5f1   : > { %9044 = vmatprep.subr.bf16.mxu1 %v20356_v6  ;;  %v20416_v6 = vld [vmem:[%s22876_s14 + $0x1f4c] ss:$16 sps:$4 sm:$0xff]  }
 0x5f3   : > { %9002 = vmatpush1.bf16.msra.mxu0 %v20351_v44  ;;  %v24311_v44 = vpop.f32.mrf.mxu0 }
 0x5f4   : > { %9045 = vmatpush1.bf16.msra.mxu1 %v20354_v10  ;;  %9003 = vmatprep.subr.bf16.mxu0 %v20359_v46  ;;  %v24313_v10 = vpop.f32.mrf.mxu1  ;;  %v20411_v46 = vld [vmem:[%s22876_s14 + $0x1d48] ss:$16 sps:$4 sm:$0xff]  }
 0x5f5   : > { %9046 = vmatprep.subr.bf16.mxu1 %v20362_v12  ;;  %v20414_v12 = vld [vmem:[%s22876_s14 + $0x1f48] ss:$16 sps:$4 sm:$0xff]  }
 0x5f7   : > { %9004 = vmatpush1.bf16.msra.mxu0 %v20357_v26  ;;  %v24317_v26 = vpop.f32.mrf.mxu0 }
 0x5f8   : > { %9047 = vmatpush1.bf16.msra.mxu1 %v20360_v5  ;;  %9005 = vmatprep.subr.bf16.mxu0 %v20365_v52  ;;  %v24319_v5 = vpop.f32.mrf.mxu1  ;;  %v20419_v52 = vld [vmem:[%s22876_s14 + $0x1d2c] ss:$16 sps:$4 sm:$0xff]  }
 0x5f9   : > { %9048 = vmatprep.subr.bf16.mxu1 %v20368_v30  ;;  %v20422_v30 = vld [vmem:[%s22876_s14 + $0x1f2c] ss:$16 sps:$4 sm:$0xff]  }
 0x5fb   : > { %9006 = vmatpush1.bf16.msra.mxu0 %v20363_v55  ;;  %v20417_v55 = vld [vmem:[%s22876_s14 + $0x1d28] ss:$16 sps:$4 sm:$0xff]  }
 0x5fc   : > { %9049 = vmatpush1.bf16.msra.mxu1 %v20366_v23  ;;  %9007 = vmatprep.subr.bf16.mxu0 %v20371_v13  ;;  %v20420_v23 = vld [vmem:[%s22876_s14 + $0x1f28] ss:$16 sps:$4 sm:$0xff]   ;;  %v24325_v13 = vpop.f32.mrf.mxu0 }
 0x5fd   : > { %9050 = vmatprep.subr.bf16.mxu1 %v20374_v24  ;;  %v24327_v24 = vpop.f32.mrf.mxu1 }
 0x5fe   : > { %26019 = vst [vmem:[#allocation34_spill] sm:$0xff] %v24327_v24 }
 0x5ff   : > { %9008 = vmatpush1.bf16.msra.mxu0 %v20369_v56  ;;  %v20425_v56 = vld [vmem:[%s22876_s14 + $0x1d0c] ss:$16 sps:$4 sm:$0xff]  }
 0x600   : > { %9051 = vmatpush1.bf16.msra.mxu1 %v20372_v4  ;;  %9009 = vmatprep.subr.bf16.mxu0 %v20377_v36  ;;  %v20428_v4 = vld [vmem:[%s22876_s14 + $0x1f0c] ss:$16 sps:$4 sm:$0xff]   ;;  %v20423_v36 = vld [vmem:[%s22876_s14 + $0x1d08] ss:$16 sps:$4 sm:$0xff]  }
 0x601   : > { %9052 = vmatprep.subr.bf16.mxu1 %v20380_v32  ;;  %v20426_v32 = vld [vmem:[%s22876_s14 + $0x1f08] ss:$16 sps:$4 sm:$0xff]  }
 0x603   : > { %9010 = vmatpush1.bf16.msra.mxu0 %v20375_v8  ;;  %v20431_v8 = vld [vmem:[%s22876_s14 + $0xe4] ss:$16 sps:$4 sm:$0xff]  }
 0x604   : > { %9053 = vmatpush1.bf16.msra.mxu1 %v20378_v7  ;;  %9011 = vmatprep.subr.bf16.mxu0 %v20383_v1  ;;  %v24334_v7 = vpop.f32.mrf.mxu0  ;;  %v24336_v1 = vpop.f32.mrf.mxu1 }
 0x605   : > { %9054 = vmatprep.subr.bf16.mxu1 %v20386_v60  ;;  %26020 = vst [vmem:[#allocation35_spill] sm:$0xff] %v24336_v1  ;;  %v20434_v60 = vld [vmem:[%s22876_s14 + $0x2e4] ss:$16 sps:$4 sm:$0xff]  }
 0x606   : > { %v20731_v1 = vld [vmem:[%s22876_s14 + $0xca4] ss:$16 sps:$4 sm:$0xff]  }
 0x607   : > { %9012 = vmatpush2.bf16.msra.mxu0 %v20381_v62  ;;  %v24339_v62 = vld [vmem:[#allocation2] sm:$0xff] }
 0x608   : > { %9055 = vmatpush2.bf16.msra.mxu1 %v20384_v20  ;;  %9013 = vmatprep.subr.bf16.mxu0 %v20389_v16  ;;  %v20429_v20 = vld [vmem:[%s22876_s14 + $0xe0] ss:$16 sps:$4 sm:$0xff]  }
 0x609   : > { %9056 = vmatprep.subr.bf16.mxu1 %v20392_v35  ;;  %v24342_v16 = vld [vmem:[#allocation2 + $0x40] sm:$0xff]  ;;  %v24344_v35 = vld [vmem:[#allocation2 + $0x8] sm:$0xff] }
 0x60b   : > { %9014 = vmatpush2.bf16.msra.mxu0 %v20387_v39  ;;  %v24346_v39 = vld [vmem:[#allocation2 + $0x48] sm:$0xff] }
 0x60c   : > { %9057 = vmatpush2.bf16.msra.mxu1 %v20390_v40  ;;  %9015 = vmatprep.subr.bf16.mxu0 %v20395_v42  ;;  %v20432_v40 = vld [vmem:[%s22876_s14 + $0x2e0] ss:$16 sps:$4 sm:$0xff]   ;;  %v24349_v42 = vpop.f32.mrf.mxu0 }
 0x60d   : > { %9058 = vmatprep.subr.bf16.mxu1 %v20398_v43  ;;  %26021 = vst [vmem:[#allocation36_spill] sm:$0xff] %v24349_v42  ;;  %v24351_v43 = vpop.f32.mrf.mxu1  ;;  %v20734_v42 = vld [vmem:[%s22876_s14 + $0xea4] ss:$16 sps:$4 sm:$0xff]  }
 0x60e   : > { %26022 = vst [vmem:[#allocation37_spill] sm:$0xff] %v24351_v43 }
 0x60f   : > { %9016 = vmatpush2.bf16.msra.mxu0 %v20393_v48  ;;  %v20437_v48 = vld [vmem:[%s22876_s14 + $0xc4] ss:$16 sps:$4 sm:$0xff]  }
 0x610   : > { %9059 = vmatpush2.bf16.msra.mxu1 %v20396_v49  ;;  %9017 = vmatprep.subr.bf16.mxu0 %v20401_v9  ;;  %v20440_v49 = vld [vmem:[%s22876_s14 + $0x2c4] ss:$16 sps:$4 sm:$0xff]   ;;  %v20435_v9 = vld [vmem:[%s22876_s14 + $0xc0] ss:$16 sps:$4 sm:$0xff]  }
 0x611   : > { %9060 = vmatprep.subr.bf16.mxu1 %v20404_v59  ;;  %v20438_v59 = vld [vmem:[%s22876_s14 + $0x2c0] ss:$16 sps:$4 sm:$0xff]  }
 0x613   : > { %9018 = vmatpush2.bf16.msra.mxu0 %v20399_v57  ;;  %v24359_v57 = vcombine.high %v24339_v62, %v24342_v16 }
 0x614   : > { %9061 = vmatpush2.bf16.msra.mxu1 %v20402_v58  ;;  %9019 = vmatprep.subr.bf16.mxu0 %v20407_v38  ;;  %v24363_v58 = vcombine.high %v24344_v35, %v24346_v39 }
 0x615   : > { %9062 = vmatprep.subr.bf16.mxu1 %v20410_v15 }
 0x617   : > { %9020 = vmatpush2.bf16.msra.mxu0 %v20405_v0 }
 0x618   : > { %9063 = vmatpush2.bf16.msra.mxu1 %v20408_v51  ;;  %9021 = vmatprep.subr.bf16.mxu0 %v20413_v2 }
 0x619   : > { %9064 = vmatprep.subr.bf16.mxu1 %v20416_v6  ;;  %v20443_v6 = vld [vmem:[%s22876_s14 + $0xa4] ss:$16 sps:$4 sm:$0xff]  }
 0x61b   : > { %9022 = vmatpush2.bf16.msra.mxu0 %v20411_v46  ;;  %v20446_v46 = vld [vmem:[%s22876_s14 + $0x2a4] ss:$16 sps:$4 sm:$0xff]  }
 0x61c   : > { %9065 = vmatpush2.bf16.msra.mxu1 %v20414_v12  ;;  %9023 = vmatprep.subr.bf16.mxu0 %v20419_v52  ;;  %v20441_v52 = vld [vmem:[%s22876_s14 + $0xa0] ss:$16 sps:$4 sm:$0xff]  }
 0x61d   : > { %9066 = vmatprep.subr.bf16.mxu1 %v20422_v30  ;;  %v20444_v30 = vld [vmem:[%s22876_s14 + $0x2a0] ss:$16 sps:$4 sm:$0xff]  }
 0x61f   : > { %9024 = vmatpush2.bf16.msra.mxu0 %v20417_v55 }
 0x620   : > { %9067 = vmatpush2.bf16.msra.mxu1 %v20420_v23  ;;  %9025 = vmatprep.subr.bf16.mxu0 %v20425_v56 }
 0x621   : > { %9068 = vmatprep.subr.bf16.mxu1 %v20428_v4  ;;  %v20449_v4 = vld [vmem:[%s22876_s14 + $0x84] ss:$16 sps:$4 sm:$0xff]  }
 0x623   : > { %9026 = vmatpush2.bf16.msra.mxu0 %v20423_v36  ;;  %v20452_v36 = vld [vmem:[%s22876_s14 + $0x284] ss:$16 sps:$4 sm:$0xff]  }
 0x624   : > { %9069 = vmatpush2.bf16.msra.mxu1 %v20426_v32  ;;  %11721 = vmatprep.subr.bf16.mxu0 %v20431_v8  ;;  %v20447_v8 = vld [vmem:[%s22876_s14 + $0x80] ss:$16 sps:$4 sm:$0xff]  }
 0x625   : > { %11764 = vmatprep.subr.bf16.mxu1 %v20434_v60  ;;  %v20450_v60 = vld [vmem:[%s22876_s14 + $0x280] ss:$16 sps:$4 sm:$0xff]  }
 0x626   : > { %v8771_v38 = vpop.f32.mrf.mxu0  ;;  %9028 = vmatmul.mubr.bf16.vlgmr.msra.gmra.mxu0 %v24001_v27 }
 0x627   : > { %v8814_v15 = vpop.f32.mrf.mxu1  ;;  %9071 = vmatmul.mubr.bf16.vlgmr.msra.gmra.mxu1 %v24005_v21  ;;  %11722 = vmatpush1.bf16.msra.mxu0 %v20429_v20  ;;  %v20455_v20 = vld [vmem:[%s22876_s14 + $0x64] ss:$16 sps:$4 sm:$0xff]  }
 0x628   : > { %v24367_v0 = vadd.f32 %v8814_v15, %v8771_v38  ;;  %11765 = vmatpush1.bf16.msra.mxu1 %v20432_v40  ;;  %v8773_v51 = vpop.f32.mrf.mxu0  ;;  %11723 = vmatprep.subr.bf16.mxu0 %v20437_v48  ;;  %v20458_v40 = vld [vmem:[%s22876_s14 + $0x264] ss:$16 sps:$4 sm:$0xff]   ;;  %v20453_v48 = vld [vmem:[%s22876_s14 + $0x60] ss:$16 sps:$4 sm:$0xff]  }
 0x629   : > { %v8816_v2 = vpop.f32.mrf.mxu1  ;;  %11766 = vmatprep.subr.bf16.mxu1 %v20440_v49  ;;  %11753 = vmatprep.mubr.bf16.mxu0 %v24359_v57  ;;  %v20456_v49 = vld [vmem:[%s22876_s14 + $0x260] ss:$16 sps:$4 sm:$0xff]  }
 0x62a   : > { %v24371_v12 = vadd.f32 %v8816_v2, %v8773_v51  ;;  %11796 = vmatprep.mubr.bf16.mxu1 %v24363_v58  ;;  %v8775_v27 = vpop.f32.mrf.mxu0  ;;  %v20459_v38 = vld [vmem:[%s22876_s14 + $0x40] ss:$16 sps:$4 sm:$0xff]   ;;  %v20467_v51 = vld [vmem:[%s22876_s14 + $0x24] ss:$16 sps:$4 sm:$0xff]  }
 0x62b   : > { %v8818_v21 = vpop.f32.mrf.mxu1  ;;  %11724 = vmatpush1.bf16.msra.mxu0 %v20435_v9  ;;  %v20461_v9 = vld [vmem:[%s22876_s14 + $0x44] ss:$16 sps:$4 sm:$0xff]   ;;  %v20462_v15 = vld [vmem:[%s22876_s14 + $0x240] ss:$16 sps:$4 sm:$0xff]  }
 0x62c   : > { %v24377_v55 = vadd.f32 %v8818_v21, %v8775_v27  ;;  %11767 = vmatpush1.bf16.msra.mxu1 %v20438_v59  ;;  %v8777_v23 = vpop.f32.mrf.mxu0  ;;  %11725 = vmatprep.subr.bf16.mxu0 %v20443_v6  ;;  %v20464_v59 = vld [vmem:[%s22876_s14 + $0x244] ss:$16 sps:$4 sm:$0xff]   ;;  %v20465_v6 = vld [vmem:[%s22876_s14 + $0x20] ss:$16 sps:$4 sm:$0xff]  }
 0x62d   : > { %v8820_v56 = vpop.f32.mrf.mxu1  ;;  %11768 = vmatprep.subr.bf16.mxu1 %v20446_v46  ;;  %v20470_v2 = vld [vmem:[%s22876_s14 + $0x224] ss:$16 sps:$4 sm:$0xff]   ;;  %v20468_v46 = vld [vmem:[%s22876_s14 + $0x220] ss:$16 sps:$4 sm:$0xff]  }
 0x62e   : > { %v24381_v32 = vadd.f32 %v8820_v56, %v8777_v23  ;;  %v20471_v27 = vld [vmem:[%s22876_s14] ss:$16 sps:$4 sm:$0xff]   ;;  %v20479_v23 = vld [vmem:[%s22876_s14 + $0x1e4] ss:$16 sps:$4 sm:$0xff]  }
 0x62f   : > { %11726 = vmatpush1.bf16.msra.mxu0 %v20441_v52  ;;  %v20473_v52 = vld [vmem:[%s22876_s14 + $0x4] ss:$16 sps:$4 sm:$0xff]   ;;  %v20474_v21 = vld [vmem:[%s22876_s14 + $0x200] ss:$16 sps:$4 sm:$0xff]  }
 0x630   : > { %11769 = vmatpush1.bf16.msra.mxu1 %v20444_v30  ;;  %11727 = vmatprep.subr.bf16.mxu0 %v20449_v4  ;;  %v20476_v30 = vld [vmem:[%s22876_s14 + $0x204] ss:$16 sps:$4 sm:$0xff]   ;;  %v20477_v4 = vld [vmem:[%s22876_s14 + $0x1e0] ss:$16 sps:$4 sm:$0xff]  }
 0x631   : > { %11770 = vmatprep.subr.bf16.mxu1 %v20452_v36  ;;  %v20482_v56 = vld [vmem:[%s22876_s14 + $0x3e4] ss:$16 sps:$4 sm:$0xff]   ;;  %v20480_v36 = vld [vmem:[%s22876_s14 + $0x3e0] ss:$16 sps:$4 sm:$0xff]  }
 0x633   : > { %11728 = vmatpush1.bf16.msra.mxu0 %v20447_v8  ;;  %v20485_v8 = vld [vmem:[%s22876_s14 + $0x1c4] ss:$16 sps:$4 sm:$0xff]  }
 0x634   : > { %11771 = vmatpush1.bf16.msra.mxu1 %v20450_v60  ;;  %11729 = vmatprep.subr.bf16.mxu0 %v20455_v20  ;;  %v20488_v60 = vld [vmem:[%s22876_s14 + $0x3c4] ss:$16 sps:$4 sm:$0xff]   ;;  %v20483_v20 = vld [vmem:[%s22876_s14 + $0x1c0] ss:$16 sps:$4 sm:$0xff]  }
 0x635   : > { %11772 = vmatprep.subr.bf16.mxu1 %v20458_v40  ;;  %v20486_v40 = vld [vmem:[%s22876_s14 + $0x3c0] ss:$16 sps:$4 sm:$0xff]  }
 0x637   : > { %11730 = vmatpush1.bf16.msra.mxu0 %v20453_v48  ;;  %v20491_v48 = vld [vmem:[%s22876_s14 + $0x1a4] ss:$16 sps:$4 sm:$0xff]  }
 0x638   : > { %11773 = vmatpush1.bf16.msra.mxu1 %v20456_v49  ;;  %11731 = vmatprep.subr.bf16.mxu0 %v20461_v9  ;;  %v20494_v49 = vld [vmem:[%s22876_s14 + $0x3a4] ss:$16 sps:$4 sm:$0xff]   ;;  %v20489_v9 = vld [vmem:[%s22876_s14 + $0x1a0] ss:$16 sps:$4 sm:$0xff]  }
 0x639   : > { %11774 = vmatprep.subr.bf16.mxu1 %v20464_v59  ;;  %v20492_v59 = vld [vmem:[%s22876_s14 + $0x3a0] ss:$16 sps:$4 sm:$0xff]  }
 0x63b   : > { %11732 = vmatpush1.bf16.msra.mxu0 %v20459_v38  ;;  %v20497_v38 = vld [vmem:[%s22876_s14 + $0x184] ss:$16 sps:$4 sm:$0xff]  }
 0x63c   : > { %11775 = vmatpush1.bf16.msra.mxu1 %v20462_v15  ;;  %11733 = vmatprep.subr.bf16.mxu0 %v20467_v51  ;;  %v20500_v15 = vld [vmem:[%s22876_s14 + $0x384] ss:$16 sps:$4 sm:$0xff]   ;;  %v20495_v51 = vld [vmem:[%s22876_s14 + $0x180] ss:$16 sps:$4 sm:$0xff]  }
 0x63d   : > { %11776 = vmatprep.subr.bf16.mxu1 %v20470_v2  ;;  %v20498_v2 = vld [vmem:[%s22876_s14 + $0x380] ss:$16 sps:$4 sm:$0xff]  }
 0x63f   : > { %11734 = vmatpush1.bf16.msra.mxu0 %v20465_v6  ;;  %v20503_v6 = vld [vmem:[%s22876_s14 + $0x164] ss:$16 sps:$4 sm:$0xff]  }
 0x640   : > { %11777 = vmatpush1.bf16.msra.mxu1 %v20468_v46  ;;  %11735 = vmatprep.subr.bf16.mxu0 %v20473_v52  ;;  %v20506_v46 = vld [vmem:[%s22876_s14 + $0x364] ss:$16 sps:$4 sm:$0xff]   ;;  %v20501_v52 = vld [vmem:[%s22876_s14 + $0x160] ss:$16 sps:$4 sm:$0xff]  }
 0x641   : > { %11778 = vmatprep.subr.bf16.mxu1 %v20476_v30  ;;  %v20504_v30 = vld [vmem:[%s22876_s14 + $0x360] ss:$16 sps:$4 sm:$0xff]  }
 0x643   : > { %11736 = vmatpush1.bf16.msra.mxu0 %v20471_v27  ;;  %v20509_v27 = vld [vmem:[%s22876_s14 + $0x144] ss:$16 sps:$4 sm:$0xff]  }
 0x644   : > { %11779 = vmatpush1.bf16.msra.mxu1 %v20474_v21  ;;  %11737 = vmatprep.subr.bf16.mxu0 %v20479_v23  ;;  %v20512_v21 = vld [vmem:[%s22876_s14 + $0x344] ss:$16 sps:$4 sm:$0xff]   ;;  %v20507_v23 = vld [vmem:[%s22876_s14 + $0x140] ss:$16 sps:$4 sm:$0xff]  }
 0x645   : > { %11780 = vmatprep.subr.bf16.mxu1 %v20482_v56  ;;  %v20510_v56 = vld [vmem:[%s22876_s14 + $0x340] ss:$16 sps:$4 sm:$0xff]  }
 0x647   : > { %11738 = vmatpush2.bf16.msra.mxu0 %v20477_v4  ;;  %v20515_v4 = vld [vmem:[%s22876_s14 + $0x124] ss:$16 sps:$4 sm:$0xff]  }
 0x648   : > { %11781 = vmatpush2.bf16.msra.mxu1 %v20480_v36  ;;  %11739 = vmatprep.subr.bf16.mxu0 %v20485_v8  ;;  %v20518_v36 = vld [vmem:[%s22876_s14 + $0x324] ss:$16 sps:$4 sm:$0xff]   ;;  %v20513_v8 = vld [vmem:[%s22876_s14 + $0x120] ss:$16 sps:$4 sm:$0xff]  }
 0x649   : > { %11782 = vmatprep.subr.bf16.mxu1 %v20488_v60  ;;  %v20516_v60 = vld [vmem:[%s22876_s14 + $0x320] ss:$16 sps:$4 sm:$0xff]  }
 0x64b   : > { %11740 = vmatpush2.bf16.msra.mxu0 %v20483_v20  ;;  %v20521_v20 = vld [vmem:[%s22876_s14 + $0x104] ss:$16 sps:$4 sm:$0xff]  }
 0x64c   : > { %11783 = vmatpush2.bf16.msra.mxu1 %v20486_v40  ;;  %11741 = vmatprep.subr.bf16.mxu0 %v20491_v48  ;;  %v20524_v40 = vld [vmem:[%s22876_s14 + $0x304] ss:$16 sps:$4 sm:$0xff]   ;;  %v20519_v48 = vld [vmem:[%s22876_s14 + $0x100] ss:$16 sps:$4 sm:$0xff]  }
 0x64d   : > { %11784 = vmatprep.subr.bf16.mxu1 %v20494_v49  ;;  %v20522_v49 = vld [vmem:[%s22876_s14 + $0x300] ss:$16 sps:$4 sm:$0xff]  }
 0x64f   : > { %11742 = vmatpush2.bf16.msra.mxu0 %v20489_v9  ;;  %v20527_v9 = vld [vmem:[%s22876_s14 + $0x4e4] ss:$16 sps:$4 sm:$0xff]  }
 0x650   : > { %11785 = vmatpush2.bf16.msra.mxu1 %v20492_v59  ;;  %11743 = vmatprep.subr.bf16.mxu0 %v20497_v38  ;;  %v20530_v59 = vld [vmem:[%s22876_s14 + $0x6e4] ss:$16 sps:$4 sm:$0xff]  }
 0x651   : > { %11786 = vmatprep.subr.bf16.mxu1 %v20500_v15  ;;  %v24435_v38 = vld [vmem:[#allocation2 + $0x10] sm:$0xff] }
 0x652   : > { %v20525_v15 = vld [vmem:[%s22876_s14 + $0x4e0] ss:$16 sps:$4 sm:$0xff]  }
 0x653   : > { %11744 = vmatpush2.bf16.msra.mxu0 %v20495_v51  ;;  %v24440_v51 = vcombine.low %v24339_v62, %v24342_v16  ;;  %v20531_v62 = vld [vmem:[%s22876_s14 + $0x4c0] ss:$16 sps:$4 sm:$0xff]  }
 0x654   : > { %11787 = vmatpush2.bf16.msra.mxu1 %v20498_v2  ;;  %11745 = vmatprep.subr.bf16.mxu0 %v20503_v6  ;;  %v24444_v2 = vcombine.low %v24344_v35, %v24346_v39  ;;  %v24446_v6 = vld [vmem:[#allocation2 + $0x50] sm:$0xff] }
 0x655   : > { %11788 = vmatprep.subr.bf16.mxu1 %v20506_v46  ;;  %v24448_v46 = vld [vmem:[#allocation2 + $0x18] sm:$0xff]  ;;  %v20534_v16 = vld [vmem:[%s22876_s14 + $0x6c0] ss:$16 sps:$4 sm:$0xff]   ;;  %v24459_v35 = vcombine.high %v24435_v38, %v24446_v6 }
 0x657   : > { %11746 = vmatpush2.bf16.msra.mxu0 %v20501_v52  ;;  %v24450_v52 = vld [vmem:[#allocation2 + $0x58] sm:$0xff] }
 0x658   : > { %11789 = vmatpush2.bf16.msra.mxu1 %v20504_v30  ;;  %11747 = vmatprep.subr.bf16.mxu0 %v20509_v27  ;;  %v20528_v30 = vld [vmem:[%s22876_s14 + $0x6e0] ss:$16 sps:$4 sm:$0xff]   ;;  %v20533_v27 = vld [vmem:[%s22876_s14 + $0x4c4] ss:$16 sps:$4 sm:$0xff]   ;;  %v24463_v39 = vcombine.high %v24448_v46, %v24450_v52 }
 0x659   : > { %11790 = vmatprep.subr.bf16.mxu1 %v20512_v21  ;;  %v20536_v21 = vld [vmem:[%s22876_s14 + $0x6c4] ss:$16 sps:$4 sm:$0xff]  }
 0x65b   : > { %11748 = vmatpush2.bf16.msra.mxu0 %v20507_v23 }
 0x65c   : > { %11791 = vmatpush2.bf16.msra.mxu1 %v20510_v56  ;;  %11749 = vmatprep.subr.bf16.mxu0 %v20515_v4 }
 0x65d   : > { %11792 = vmatprep.subr.bf16.mxu1 %v20518_v36 }
 0x65f   : > { %11750 = vmatpush2.bf16.msra.mxu0 %v20513_v8 }
 0x660   : > { %11793 = vmatpush2.bf16.msra.mxu1 %v20516_v60  ;;  %11751 = vmatprep.subr.bf16.mxu0 %v20521_v20  ;;  %v20539_v60 = vld [vmem:[%s22876_s14 + $0x4a4] ss:$16 sps:$4 sm:$0xff]  }
 0x661   : > { %11794 = vmatprep.subr.bf16.mxu1 %v20524_v40  ;;  %v20542_v20 = vld [vmem:[%s22876_s14 + $0x6a4] ss:$16 sps:$4 sm:$0xff]  }
 0x663   : > { %11752 = vmatpush2.bf16.msra.mxu0 %v20519_v48 }
 0x664   : > { %11795 = vmatpush2.bf16.msra.mxu1 %v20522_v49  ;;  %11807 = vmatprep.subr.bf16.mxu0 %v20527_v9  ;;  %v20537_v49 = vld [vmem:[%s22876_s14 + $0x4a0] ss:$16 sps:$4 sm:$0xff]  }
 0x665   : > { %11850 = vmatprep.subr.bf16.mxu1 %v20530_v59  ;;  %v20540_v9 = vld [vmem:[%s22876_s14 + $0x6a0] ss:$16 sps:$4 sm:$0xff]  }
 0x666   : > { %v8857_v23 = vpop.f32.mrf.mxu0  ;;  %11754 = vmatmul.mubr.bf16.vlgmr.msra.gmra.mxu0 %v24440_v51 }
 0x667   : > { %v8900_v56 = vpop.f32.mrf.mxu1  ;;  %11797 = vmatmul.mubr.bf16.vlgmr.msra.gmra.mxu1 %v24444_v2  ;;  %v8858_v4 = vadd.f32 %v8857_v23, %v24367_v0  ;;  %11808 = vmatpush1.bf16.msra.mxu0 %v20525_v15 }
 0x668   : > { %11851 = vmatpush1.bf16.msra.mxu1 %v20528_v30  ;;  %v8859_v36 = vpop.f32.mrf.mxu0  ;;  %11809 = vmatprep.subr.bf16.mxu0 %v20533_v27 }
 0x669   : > { %v8902_v8 = vpop.f32.mrf.mxu1  ;;  %11852 = vmatprep.subr.bf16.mxu1 %v20536_v21  ;;  %v24470_v40 = vadd.f32 %v8900_v56, %v8858_v4  ;;  %v8860_v48 = vadd.f32 %v8859_v36, %v24371_v12  ;;  %11839 = vmatprep.mubr.bf16.mxu0 %v24459_v35  ;;  %v20545_v12 = vld [vmem:[%s22876_s14 + $0x484] ss:$16 sps:$4 sm:$0xff]  }
 0x66a   : > { %11882 = vmatprep.mubr.bf16.mxu1 %v24463_v39  ;;  %v8861_v0 = vpop.f32.mrf.mxu0  ;;  %v20548_v21 = vld [vmem:[%s22876_s14 + $0x684] ss:$16 sps:$4 sm:$0xff]  }
 0x66b   : > { %v8904_v59 = vpop.f32.mrf.mxu1  ;;  %v24477_v15 = vadd.f32 %v8902_v8, %v8860_v48  ;;  %v8862_v30 = vadd.f32 %v8861_v0, %v24377_v55  ;;  %11810 = vmatpush1.bf16.msra.mxu0 %v20531_v62  ;;  %v20543_v55 = vld [vmem:[%s22876_s14 + $0x480] ss:$16 sps:$4 sm:$0xff]   ;;  %v20554_v8 = vld [vmem:[%s22876_s14 + $0x664] ss:$16 sps:$4 sm:$0xff]  }
 0x66c   : > { %11853 = vmatpush1.bf16.msra.mxu1 %v20534_v16  ;;  %v8863_v27 = vpop.f32.mrf.mxu0  ;;  %11811 = vmatprep.subr.bf16.mxu0 %v20539_v60  ;;  %v20546_v62 = vld [vmem:[%s22876_s14 + $0x680] ss:$16 sps:$4 sm:$0xff]   ;;  %v20551_v16 = vld [vmem:[%s22876_s14 + $0x464] ss:$16 sps:$4 sm:$0xff]  }
 0x66d   : > { %11854 = vmatprep.subr.bf16.mxu1 %v20542_v20  ;;  %v24482_v23 = vadd.f32 %v8904_v59, %v8862_v30  ;;  %v8864_v56 = vadd.f32 %v8863_v27, %v24381_v32  ;;  %v8906_v4 = vpop.f32.mrf.mxu1  ;;  %v20549_v32 = vld [vmem:[%s22876_s14 + $0x460] ss:$16 sps:$4 sm:$0xff]   ;;  %v20557_v20 = vld [vmem:[%s22876_s14 + $0x444] ss:$16 sps:$4 sm:$0xff]  }
 0x66e   : > { %v20552_v60 = vld [vmem:[%s22876_s14 + $0x660] ss:$16 sps:$4 sm:$0xff]   ;;  %v20560_v48 = vld [vmem:[%s22876_s14 + $0x644] ss:$16 sps:$4 sm:$0xff]  }
 0x66f   : > { %v24485_v36 = vadd.f32 %v8906_v4, %v8864_v56  ;;  %11812 = vmatpush1.bf16.msra.mxu0 %v20537_v49  ;;  %v20555_v49 = vld [vmem:[%s22876_s14 + $0x440] ss:$16 sps:$4 sm:$0xff]   ;;  %v20563_v0 = vld [vmem:[%s22876_s14 + $0x424] ss:$16 sps:$4 sm:$0xff]  }
 0x670   : > { %11855 = vmatpush1.bf16.msra.mxu1 %v20540_v9  ;;  %11813 = vmatprep.subr.bf16.mxu0 %v20545_v12  ;;  %v20558_v9 = vld [vmem:[%s22876_s14 + $0x640] ss:$16 sps:$4 sm:$0xff]   ;;  %v20566_v59 = vld [vmem:[%s22876_s14 + $0x624] ss:$16 sps:$4 sm:$0xff]  }
 0x671   : > { %11856 = vmatprep.subr.bf16.mxu1 %v20548_v21  ;;  %v20561_v30 = vld [vmem:[%s22876_s14 + $0x420] ss:$16 sps:$4 sm:$0xff]   ;;  %v20569_v12 = vld [vmem:[%s22876_s14 + $0x404] ss:$16 sps:$4 sm:$0xff]  }
 0x672   : > { %v20564_v27 = vld [vmem:[%s22876_s14 + $0x620] ss:$16 sps:$4 sm:$0xff]   ;;  %v20572_v21 = vld [vmem:[%s22876_s14 + $0x604] ss:$16 sps:$4 sm:$0xff]  }
 0x673   : > { %11814 = vmatpush1.bf16.msra.mxu0 %v20543_v55  ;;  %v20567_v56 = vld [vmem:[%s22876_s14 + $0x400] ss:$16 sps:$4 sm:$0xff]   ;;  %v20575_v55 = vld [vmem:[%s22876_s14 + $0x5e4] ss:$16 sps:$4 sm:$0xff]  }
 0x674   : > { %11857 = vmatpush1.bf16.msra.mxu1 %v20546_v62  ;;  %11815 = vmatprep.subr.bf16.mxu0 %v20551_v16  ;;  %v20570_v4 = vld [vmem:[%s22876_s14 + $0x600] ss:$16 sps:$4 sm:$0xff]   ;;  %v20578_v62 = vld [vmem:[%s22876_s14 + $0x7e4] ss:$16 sps:$4 sm:$0xff]  }
 0x675   : > { %11858 = vmatprep.subr.bf16.mxu1 %v20554_v8  ;;  %v20573_v16 = vld [vmem:[%s22876_s14 + $0x5e0] ss:$16 sps:$4 sm:$0xff]  }
 0x676   : > { %v20576_v8 = vld [vmem:[%s22876_s14 + $0x7e0] ss:$16 sps:$4 sm:$0xff]  }
 0x677   : > { %11816 = vmatpush1.bf16.msra.mxu0 %v20549_v32  ;;  %v20581_v32 = vld [vmem:[%s22876_s14 + $0x5c4] ss:$16 sps:$4 sm:$0xff]  }
 0x678   : > { %11859 = vmatpush1.bf16.msra.mxu1 %v20552_v60  ;;  %11817 = vmatprep.subr.bf16.mxu0 %v20557_v20  ;;  %v20584_v60 = vld [vmem:[%s22876_s14 + $0x7c4] ss:$16 sps:$4 sm:$0xff]   ;;  %v20579_v20 = vld [vmem:[%s22876_s14 + $0x5c0] ss:$16 sps:$4 sm:$0xff]  }
 0x679   : > { %11860 = vmatprep.subr.bf16.mxu1 %v20560_v48  ;;  %v20582_v48 = vld [vmem:[%s22876_s14 + $0x7c0] ss:$16 sps:$4 sm:$0xff]  }
 0x67b   : > { %11818 = vmatpush1.bf16.msra.mxu0 %v20555_v49  ;;  %v20587_v49 = vld [vmem:[%s22876_s14 + $0x5a4] ss:$16 sps:$4 sm:$0xff]  }
 0x67c   : > { %11861 = vmatpush1.bf16.msra.mxu1 %v20558_v9  ;;  %11819 = vmatprep.subr.bf16.mxu0 %v20563_v0  ;;  %v20590_v9 = vld [vmem:[%s22876_s14 + $0x7a4] ss:$16 sps:$4 sm:$0xff]   ;;  %v20585_v0 = vld [vmem:[%s22876_s14 + $0x5a0] ss:$16 sps:$4 sm:$0xff]  }
 0x67d   : > { %11862 = vmatprep.subr.bf16.mxu1 %v20566_v59  ;;  %v20588_v59 = vld [vmem:[%s22876_s14 + $0x7a0] ss:$16 sps:$4 sm:$0xff]  }
 0x67f   : > { %11820 = vmatpush1.bf16.msra.mxu0 %v20561_v30  ;;  %v20593_v30 = vld [vmem:[%s22876_s14 + $0x584] ss:$16 sps:$4 sm:$0xff]  }
 0x680   : > { %11863 = vmatpush1.bf16.msra.mxu1 %v20564_v27  ;;  %11821 = vmatprep.subr.bf16.mxu0 %v20569_v12  ;;  %v20596_v27 = vld [vmem:[%s22876_s14 + $0x784] ss:$16 sps:$4 sm:$0xff]   ;;  %v20591_v12 = vld [vmem:[%s22876_s14 + $0x580] ss:$16 sps:$4 sm:$0xff]  }
 0x681   : > { %11864 = vmatprep.subr.bf16.mxu1 %v20572_v21  ;;  %v20594_v21 = vld [vmem:[%s22876_s14 + $0x780] ss:$16 sps:$4 sm:$0xff]  }
 0x683   : > { %11822 = vmatpush1.bf16.msra.mxu0 %v20567_v56  ;;  %v20599_v56 = vld [vmem:[%s22876_s14 + $0x564] ss:$16 sps:$4 sm:$0xff]  }
 0x684   : > { %11865 = vmatpush1.bf16.msra.mxu1 %v20570_v4  ;;  %11823 = vmatprep.subr.bf16.mxu0 %v20575_v55  ;;  %v20602_v4 = vld [vmem:[%s22876_s14 + $0x764] ss:$16 sps:$4 sm:$0xff]   ;;  %v20597_v55 = vld [vmem:[%s22876_s14 + $0x560] ss:$16 sps:$4 sm:$0xff]  }
 0x685   : > { %11866 = vmatprep.subr.bf16.mxu1 %v20578_v62  ;;  %v20600_v62 = vld [vmem:[%s22876_s14 + $0x760] ss:$16 sps:$4 sm:$0xff]  }
 0x687   : > { %11824 = vmatpush2.bf16.msra.mxu0 %v20573_v16  ;;  %v20605_v16 = vld [vmem:[%s22876_s14 + $0x544] ss:$16 sps:$4 sm:$0xff]  }
 0x688   : > { %11867 = vmatpush2.bf16.msra.mxu1 %v20576_v8  ;;  %11825 = vmatprep.subr.bf16.mxu0 %v20581_v32  ;;  %v20608_v8 = vld [vmem:[%s22876_s14 + $0x744] ss:$16 sps:$4 sm:$0xff]   ;;  %v20603_v32 = vld [vmem:[%s22876_s14 + $0x540] ss:$16 sps:$4 sm:$0xff]  }
 0x689   : > { %11868 = vmatprep.subr.bf16.mxu1 %v20584_v60  ;;  %v20606_v60 = vld [vmem:[%s22876_s14 + $0x740] ss:$16 sps:$4 sm:$0xff]  }
 0x68b   : > { %11826 = vmatpush2.bf16.msra.mxu0 %v20579_v20  ;;  %v20611_v20 = vld [vmem:[%s22876_s14 + $0x524] ss:$16 sps:$4 sm:$0xff]  }
 0x68c   : > { %11869 = vmatpush2.bf16.msra.mxu1 %v20582_v48  ;;  %11827 = vmatprep.subr.bf16.mxu0 %v20587_v49  ;;  %v20614_v48 = vld [vmem:[%s22876_s14 + $0x724] ss:$16 sps:$4 sm:$0xff]   ;;  %v20609_v49 = vld [vmem:[%s22876_s14 + $0x520] ss:$16 sps:$4 sm:$0xff]  }
 0x68d   : > { %11870 = vmatprep.subr.bf16.mxu1 %v20590_v9  ;;  %v20612_v9 = vld [vmem:[%s22876_s14 + $0x720] ss:$16 sps:$4 sm:$0xff]  }
 0x68f   : > { %11828 = vmatpush2.bf16.msra.mxu0 %v20585_v0  ;;  %v20617_v0 = vld [vmem:[%s22876_s14 + $0x504] ss:$16 sps:$4 sm:$0xff]  }
 0x690   : > { %11871 = vmatpush2.bf16.msra.mxu1 %v20588_v59  ;;  %11829 = vmatprep.subr.bf16.mxu0 %v20593_v30  ;;  %v20620_v59 = vld [vmem:[%s22876_s14 + $0x704] ss:$16 sps:$4 sm:$0xff]   ;;  %v20615_v30 = vld [vmem:[%s22876_s14 + $0x500] ss:$16 sps:$4 sm:$0xff]  }
 0x691   : > { %11872 = vmatprep.subr.bf16.mxu1 %v20596_v27  ;;  %v20618_v27 = vld [vmem:[%s22876_s14 + $0x700] ss:$16 sps:$4 sm:$0xff]  }
 0x693   : > { %11830 = vmatpush2.bf16.msra.mxu0 %v20591_v12  ;;  %v20623_v12 = vld [vmem:[%s22876_s14 + $0x8e4] ss:$16 sps:$4 sm:$0xff]  }
 0x694   : > { %11873 = vmatpush2.bf16.msra.mxu1 %v20594_v21  ;;  %11831 = vmatprep.subr.bf16.mxu0 %v20599_v56  ;;  %v20626_v21 = vld [vmem:[%s22876_s14 + $0xae4] ss:$16 sps:$4 sm:$0xff]  }
 0x695   : > { %11874 = vmatprep.subr.bf16.mxu1 %v20602_v4  ;;  %v24539_v56 = vld [vmem:[#allocation2 + $0x20] sm:$0xff]  ;;  %v24543_v4 = vcombine.low %v24435_v38, %v24446_v6 }
 0x696   : > { %v20629_v38 = vld [vmem:[%s22876_s14 + $0x8c4] ss:$16 sps:$4 sm:$0xff]  }
 0x697   : > { %11832 = vmatpush2.bf16.msra.mxu0 %v20597_v55  ;;  %v24547_v55 = vcombine.low %v24448_v46, %v24450_v52  ;;  %v20632_v6 = vld [vmem:[%s22876_s14 + $0xac4] ss:$16 sps:$4 sm:$0xff]  }
 0x698   : > { %11875 = vmatpush2.bf16.msra.mxu1 %v20600_v62  ;;  %11833 = vmatprep.subr.bf16.mxu0 %v20605_v16  ;;  %v24549_v62 = vld [vmem:[#allocation2 + $0x60] sm:$0xff]  ;;  %v24551_v16 = vld [vmem:[#allocation2 + $0x28] sm:$0xff] }
 0x699   : > { %11876 = vmatprep.subr.bf16.mxu1 %v20608_v8  ;;  %v24553_v8 = vld [vmem:[#allocation2 + $0x68] sm:$0xff]  ;;  %v24561_v46 = vcombine.high %v24539_v56, %v24549_v62 }
 0x69a   : > { %v24565_v52 = vcombine.high %v24551_v16, %v24553_v8 }
 0x69b   : > { %11834 = vmatpush2.bf16.msra.mxu0 %v20603_v32  ;;  %v20621_v32 = vld [vmem:[%s22876_s14 + $0x8e0] ss:$16 sps:$4 sm:$0xff]  }
 0x69c   : > { %11877 = vmatpush2.bf16.msra.mxu1 %v20606_v60  ;;  %11835 = vmatprep.subr.bf16.mxu0 %v20611_v20  ;;  %v20624_v60 = vld [vmem:[%s22876_s14 + $0xae0] ss:$16 sps:$4 sm:$0xff]  }
 0x69d   : > { %11878 = vmatprep.subr.bf16.mxu1 %v20614_v48 }
 0x69f   : > { %11836 = vmatpush2.bf16.msra.mxu0 %v20609_v49 }
 0x6a0   : > { %11879 = vmatpush2.bf16.msra.mxu1 %v20612_v9  ;;  %11837 = vmatprep.subr.bf16.mxu0 %v20617_v0  ;;  %v20627_v9 = vld [vmem:[%s22876_s14 + $0x8c0] ss:$16 sps:$4 sm:$0xff]  }
 0x6a1   : > { %11880 = vmatprep.subr.bf16.mxu1 %v20620_v59  ;;  %v20630_v0 = vld [vmem:[%s22876_s14 + $0xac0] ss:$16 sps:$4 sm:$0xff]  }
 0x6a3   : > { %11838 = vmatpush2.bf16.msra.mxu0 %v20615_v30 }
 0x6a4   : > { %11881 = vmatpush2.bf16.msra.mxu1 %v20618_v27  ;;  %11893 = vmatprep.subr.bf16.mxu0 %v20623_v12  ;;  %v20635_v27 = vld [vmem:[%s22876_s14 + $0x8a4] ss:$16 sps:$4 sm:$0xff]  }
 0x6a5   : > { %11936 = vmatprep.subr.bf16.mxu1 %v20626_v21  ;;  %v20638_v12 = vld [vmem:[%s22876_s14 + $0xaa4] ss:$16 sps:$4 sm:$0xff]  }
 0x6a6   : > { %v8943_v20 = vpop.f32.mrf.mxu0  ;;  %11840 = vmatmul.mubr.bf16.vlgmr.msra.gmra.mxu0 %v24543_v4 }
 0x6a7   : > { %v8986_v48 = vpop.f32.mrf.mxu1  ;;  %11883 = vmatmul.mubr.bf16.vlgmr.msra.gmra.mxu1 %v24547_v55  ;;  %v8944_v49 = vadd.f32 %v8943_v20, %v24470_v40  ;;  %11894 = vmatpush1.bf16.msra.mxu0 %v20621_v32 }
 0x6a8   : > { %11937 = vmatpush1.bf16.msra.mxu1 %v20624_v60  ;;  %v8945_v59 = vpop.f32.mrf.mxu0  ;;  %11895 = vmatprep.subr.bf16.mxu0 %v20629_v38  ;;  %v20633_v38 = vld [vmem:[%s22876_s14 + $0x8a0] ss:$16 sps:$4 sm:$0xff]  }
 0x6a9   : > { %v8988_v30 = vpop.f32.mrf.mxu1  ;;  %11938 = vmatprep.subr.bf16.mxu1 %v20632_v6  ;;  %v24574_v21 = vadd.f32 %v8986_v48, %v8944_v49  ;;  %v8946_v43 = vadd.f32 %v8945_v59, %v24477_v15  ;;  %11925 = vmatprep.mubr.bf16.mxu0 %v24561_v46  ;;  %v20636_v6 = vld [vmem:[%s22876_s14 + $0xaa0] ss:$16 sps:$4 sm:$0xff]   ;;  %v20641_v15 = vld [vmem:[%s22876_s14 + $0x884] ss:$16 sps:$4 sm:$0xff]  }
 0x6aa   : > { %11968 = vmatprep.mubr.bf16.mxu1 %v24565_v52  ;;  %v8947_v40 = vpop.f32.mrf.mxu0  ;;  %v20644_v49 = vld [vmem:[%s22876_s14 + $0xa84] ss:$16 sps:$4 sm:$0xff]  }
 0x6ab   : > { %v8990_v32 = vpop.f32.mrf.mxu1  ;;  %v24579_v60 = vadd.f32 %v8988_v30, %v8946_v43  ;;  %v8948_v20 = vadd.f32 %v8947_v40, %v24482_v23  ;;  %11896 = vmatpush1.bf16.msra.mxu0 %v20627_v9  ;;  %v20642_v30 = vld [vmem:[%s22876_s14 + $0xa80] ss:$16 sps:$4 sm:$0xff]  }
 0x6ac   : > { %11939 = vmatpush1.bf16.msra.mxu1 %v20630_v0  ;;  %v8949_v48 = vpop.f32.mrf.mxu0  ;;  %11897 = vmatprep.subr.bf16.mxu0 %v20635_v27  ;;  %v20639_v0 = vld [vmem:[%s22876_s14 + $0x880] ss:$16 sps:$4 sm:$0xff]   ;;  %v20647_v27 = vld [vmem:[%s22876_s14 + $0x864] ss:$16 sps:$4 sm:$0xff]  }
 0x6ad   : > { %11940 = vmatprep.subr.bf16.mxu1 %v20638_v12  ;;  %v24586_v59 = vadd.f32 %v8990_v32, %v8948_v20  ;;  %v8950_v43 = vadd.f32 %v8949_v48, %v24485_v36  ;;  %v8992_v23 = vpop.f32.mrf.mxu1  ;;  %v20650_v12 = vld [vmem:[%s22876_s14 + $0xa64] ss:$16 sps:$4 sm:$0xff]   ;;  %v20645_v36 = vld [vmem:[%s22876_s14 + $0x860] ss:$16 sps:$4 sm:$0xff]  }
 0x6ae   : > { %v20648_v40 = vld [vmem:[%s22876_s14 + $0xa60] ss:$16 sps:$4 sm:$0xff]   ;;  %v20653_v32 = vld [vmem:[%s22876_s14 + $0x844] ss:$16 sps:$4 sm:$0xff]  }
 0x6af   : > { %v24589_v9 = vadd.f32 %v8992_v23, %v8950_v43  ;;  %11898 = vmatpush1.bf16.msra.mxu0 %v20633_v38  ;;  %v20656_v20 = vld [vmem:[%s22876_s14 + $0xa44] ss:$16 sps:$4 sm:$0xff]   ;;  %v20651_v38 = vld [vmem:[%s22876_s14 + $0x840] ss:$16 sps:$4 sm:$0xff]  }
 0x6b0   : > { %11941 = vmatpush1.bf16.msra.mxu1 %v20636_v6  ;;  %11899 = vmatprep.subr.bf16.mxu0 %v20641_v15  ;;  %v20654_v6 = vld [vmem:[%s22876_s14 + $0xa40] ss:$16 sps:$4 sm:$0xff]   ;;  %v20659_v48 = vld [vmem:[%s22876_s14 + $0x824] ss:$16 sps:$4 sm:$0xff]  }
 0x6b1   : > { %11942 = vmatprep.subr.bf16.mxu1 %v20644_v49  ;;  %v20662_v15 = vld [vmem:[%s22876_s14 + $0xa24] ss:$16 sps:$4 sm:$0xff]   ;;  %v20657_v49 = vld [vmem:[%s22876_s14 + $0x820] ss:$16 sps:$4 sm:$0xff]  }
 0x6b2   : > { %v20660_v43 = vld [vmem:[%s22876_s14 + $0xa20] ss:$16 sps:$4 sm:$0xff]   ;;  %v20665_v23 = vld [vmem:[%s22876_s14 + $0x804] ss:$16 sps:$4 sm:$0xff]  }
 0x6b3   : > { %11900 = vmatpush1.bf16.msra.mxu0 %v20639_v0  ;;  %v20668_v0 = vld [vmem:[%s22876_s14 + $0xa04] ss:$16 sps:$4 sm:$0xff]  }
 0x6b4   : > { %11943 = vmatpush1.bf16.msra.mxu1 %v20642_v30  ;;  %11901 = vmatprep.subr.bf16.mxu0 %v20647_v27  ;;  %v20663_v30 = vld [vmem:[%s22876_s14 + $0x800] ss:$16 sps:$4 sm:$0xff]  }
 0x6b5   : > { %11944 = vmatprep.subr.bf16.mxu1 %v20650_v12  ;;  %v20666_v27 = vld [vmem:[%s22876_s14 + $0xa00] ss:$16 sps:$4 sm:$0xff]   ;;  %v20671_v12 = vld [vmem:[%s22876_s14 + $0x9e4] ss:$16 sps:$4 sm:$0xff]  }
 0x6b7   : > { %11902 = vmatpush1.bf16.msra.mxu0 %v20645_v36  ;;  %v20674_v36 = vld [vmem:[%s22876_s14 + $0xbe4] ss:$16 sps:$4 sm:$0xff]  }
 0x6b8   : > { %11945 = vmatpush1.bf16.msra.mxu1 %v20648_v40  ;;  %11903 = vmatprep.subr.bf16.mxu0 %v20653_v32  ;;  %v20669_v40 = vld [vmem:[%s22876_s14 + $0x9e0] ss:$16 sps:$4 sm:$0xff]  }
 0x6b9   : > { %11946 = vmatprep.subr.bf16.mxu1 %v20656_v20  ;;  %v20672_v32 = vld [vmem:[%s22876_s14 + $0xbe0] ss:$16 sps:$4 sm:$0xff]   ;;  %v20677_v20 = vld [vmem:[%s22876_s14 + $0x9c4] ss:$16 sps:$4 sm:$0xff]  }
 0x6bb   : > { %11904 = vmatpush1.bf16.msra.mxu0 %v20651_v38  ;;  %v20680_v38 = vld [vmem:[%s22876_s14 + $0xbc4] ss:$16 sps:$4 sm:$0xff]  }
 0x6bc   : > { %11947 = vmatpush1.bf16.msra.mxu1 %v20654_v6  ;;  %11905 = vmatprep.subr.bf16.mxu0 %v20659_v48  ;;  %v20675_v6 = vld [vmem:[%s22876_s14 + $0x9c0] ss:$16 sps:$4 sm:$0xff]  }
 0x6bd   : > { %11948 = vmatprep.subr.bf16.mxu1 %v20662_v15  ;;  %v20678_v48 = vld [vmem:[%s22876_s14 + $0xbc0] ss:$16 sps:$4 sm:$0xff]   ;;  %v20683_v15 = vld [vmem:[%s22876_s14 + $0x9a4] ss:$16 sps:$4 sm:$0xff]  }
 0x6bf   : > { %11906 = vmatpush1.bf16.msra.mxu0 %v20657_v49  ;;  %v20686_v49 = vld [vmem:[%s22876_s14 + $0xba4] ss:$16 sps:$4 sm:$0xff]  }
 0x6c0   : > { %11949 = vmatpush1.bf16.msra.mxu1 %v20660_v43  ;;  %11907 = vmatprep.subr.bf16.mxu0 %v20665_v23  ;;  %v20681_v43 = vld [vmem:[%s22876_s14 + $0x9a0] ss:$16 sps:$4 sm:$0xff]  }
 0x6c1   : > { %11950 = vmatprep.subr.bf16.mxu1 %v20668_v0  ;;  %v20684_v23 = vld [vmem:[%s22876_s14 + $0xba0] ss:$16 sps:$4 sm:$0xff]   ;;  %v20689_v0 = vld [vmem:[%s22876_s14 + $0x984] ss:$16 sps:$4 sm:$0xff]  }
 0x6c3   : > { %11908 = vmatpush1.bf16.msra.mxu0 %v20663_v30  ;;  %v20692_v30 = vld [vmem:[%s22876_s14 + $0xb84] ss:$16 sps:$4 sm:$0xff]  }
 0x6c4   : > { %11951 = vmatpush1.bf16.msra.mxu1 %v20666_v27  ;;  %11909 = vmatprep.subr.bf16.mxu0 %v20671_v12  ;;  %v20687_v27 = vld [vmem:[%s22876_s14 + $0x980] ss:$16 sps:$4 sm:$0xff]  }
 0x6c5   : > { %11952 = vmatprep.subr.bf16.mxu1 %v20674_v36  ;;  %v20690_v12 = vld [vmem:[%s22876_s14 + $0xb80] ss:$16 sps:$4 sm:$0xff]   ;;  %v20695_v36 = vld [vmem:[%s22876_s14 + $0x964] ss:$16 sps:$4 sm:$0xff]  }
 0x6c7   : > { %11910 = vmatpush2.bf16.msra.mxu0 %v20669_v40  ;;  %v20698_v40 = vld [vmem:[%s22876_s14 + $0xb64] ss:$16 sps:$4 sm:$0xff]  }
 0x6c8   : > { %11953 = vmatpush2.bf16.msra.mxu1 %v20672_v32  ;;  %11911 = vmatprep.subr.bf16.mxu0 %v20677_v20  ;;  %v20693_v32 = vld [vmem:[%s22876_s14 + $0x960] ss:$16 sps:$4 sm:$0xff]  }
 0x6c9   : > { %11954 = vmatprep.subr.bf16.mxu1 %v20680_v38  ;;  %v20696_v20 = vld [vmem:[%s22876_s14 + $0xb60] ss:$16 sps:$4 sm:$0xff]   ;;  %v20701_v38 = vld [vmem:[%s22876_s14 + $0x944] ss:$16 sps:$4 sm:$0xff]  }
 0x6cb   : > { %11912 = vmatpush2.bf16.msra.mxu0 %v20675_v6  ;;  %v20704_v6 = vld [vmem:[%s22876_s14 + $0xb44] ss:$16 sps:$4 sm:$0xff]  }
 0x6cc   : > { %11955 = vmatpush2.bf16.msra.mxu1 %v20678_v48  ;;  %11913 = vmatprep.subr.bf16.mxu0 %v20683_v15  ;;  %v20699_v48 = vld [vmem:[%s22876_s14 + $0x940] ss:$16 sps:$4 sm:$0xff]  }
 0x6cd   : > { %11956 = vmatprep.subr.bf16.mxu1 %v20686_v49  ;;  %v20702_v15 = vld [vmem:[%s22876_s14 + $0xb40] ss:$16 sps:$4 sm:$0xff]   ;;  %v20707_v49 = vld [vmem:[%s22876_s14 + $0x924] ss:$16 sps:$4 sm:$0xff]  }
 0x6cf   : > { %11914 = vmatpush2.bf16.msra.mxu0 %v20681_v43  ;;  %v20710_v43 = vld [vmem:[%s22876_s14 + $0xb24] ss:$16 sps:$4 sm:$0xff]  }
 0x6d0   : > { %11957 = vmatpush2.bf16.msra.mxu1 %v20684_v23  ;;  %11915 = vmatprep.subr.bf16.mxu0 %v20689_v0  ;;  %v20705_v23 = vld [vmem:[%s22876_s14 + $0x920] ss:$16 sps:$4 sm:$0xff]  }
 0x6d1   : > { %11958 = vmatprep.subr.bf16.mxu1 %v20692_v30  ;;  %v20708_v0 = vld [vmem:[%s22876_s14 + $0xb20] ss:$16 sps:$4 sm:$0xff]   ;;  %v20713_v30 = vld [vmem:[%s22876_s14 + $0x904] ss:$16 sps:$4 sm:$0xff]  }
 0x6d3   : > { %11916 = vmatpush2.bf16.msra.mxu0 %v20687_v27  ;;  %v20716_v27 = vld [vmem:[%s22876_s14 + $0xb04] ss:$16 sps:$4 sm:$0xff]  }
 0x6d4   : > { %11959 = vmatpush2.bf16.msra.mxu1 %v20690_v12  ;;  %11917 = vmatprep.subr.bf16.mxu0 %v20695_v36  ;;  %v20711_v12 = vld [vmem:[%s22876_s14 + $0x900] ss:$16 sps:$4 sm:$0xff]  }
 0x6d5   : > { %11960 = vmatprep.subr.bf16.mxu1 %v20698_v40  ;;  %v20714_v36 = vld [vmem:[%s22876_s14 + $0xb00] ss:$16 sps:$4 sm:$0xff]   ;;  %v20719_v40 = vld [vmem:[%s22876_s14 + $0xce4] ss:$16 sps:$4 sm:$0xff]  }
 0x6d7   : > { %11918 = vmatpush2.bf16.msra.mxu0 %v20693_v32  ;;  %v20722_v32 = vld [vmem:[%s22876_s14 + $0xee4] ss:$16 sps:$4 sm:$0xff]  }
 0x6d8   : > { %11961 = vmatpush2.bf16.msra.mxu1 %v20696_v20  ;;  %11919 = vmatprep.subr.bf16.mxu0 %v20701_v38  ;;  %v24643_v20 = vld [vmem:[#allocation2 + $0x30] sm:$0xff]  ;;  %v24647_v38 = vcombine.low %v24539_v56, %v24549_v62 }
 0x6d9   : > { %11962 = vmatprep.subr.bf16.mxu1 %v20704_v6  ;;  %v24651_v6 = vcombine.low %v24551_v16, %v24553_v8  ;;  %v20725_v56 = vld [vmem:[%s22876_s14 + $0xcc4] ss:$16 sps:$4 sm:$0xff]  }
 0x6da   : > { %v20728_v62 = vld [vmem:[%s22876_s14 + $0xec4] ss:$16 sps:$4 sm:$0xff]  }
 0x6db   : > { %11920 = vmatpush2.bf16.msra.mxu0 %v20699_v48  ;;  %26023 = vst [vmem:[#allocation38_spill] sm:$0xff] %v24651_v6  ;;  %v24653_v48 = vld [vmem:[#allocation2 + $0x70] sm:$0xff] }
 0x6dc   : > { %11963 = vmatpush2.bf16.msra.mxu1 %v20702_v15  ;;  %11921 = vmatprep.subr.bf16.mxu0 %v20707_v49  ;;  %v24655_v15 = vld [vmem:[#allocation2 + $0x38] sm:$0xff]  ;;  %v24665_v16 = vcombine.high %v24643_v20, %v24653_v48 }
 0x6dd   : > { %11964 = vmatprep.subr.bf16.mxu1 %v20710_v43  ;;  %v24657_v49 = vld [vmem:[#allocation2 + $0x78] sm:$0xff]  ;;  %v20717_v43 = vld [vmem:[%s22876_s14 + $0xce0] ss:$16 sps:$4 sm:$0xff]  }
 0x6de   : > { %v24669_v8 = vcombine.high %v24655_v15, %v24657_v49 }
 0x6df   : > { %11922 = vmatpush2.bf16.msra.mxu0 %v20705_v23  ;;  %v20720_v23 = vld [vmem:[%s22876_s14 + $0xee0] ss:$16 sps:$4 sm:$0xff]  }
 0x6e0   : > { %11965 = vmatpush2.bf16.msra.mxu1 %v20708_v0  ;;  %11923 = vmatprep.subr.bf16.mxu0 %v20713_v30 }
 0x6e1   : > { %11966 = vmatprep.subr.bf16.mxu1 %v20716_v27 }
 0x6e3   : > { %11924 = vmatpush2.bf16.msra.mxu0 %v20711_v12  ;;  %v20723_v12 = vld [vmem:[%s22876_s14 + $0xcc0] ss:$16 sps:$4 sm:$0xff]  }
 0x6e4   : > { %11967 = vmatpush2.bf16.msra.mxu1 %v20714_v36  ;;  %11979 = vmatprep.subr.bf16.mxu0 %v20719_v40  ;;  %v20726_v36 = vld [vmem:[%s22876_s14 + $0xec0] ss:$16 sps:$4 sm:$0xff]  }
 0x6e5   : > { %12022 = vmatprep.subr.bf16.mxu1 %v20722_v32 }
 0x6e6   : > { %v9029_v0 = vpop.f32.mrf.mxu0  ;;  %11926 = vmatmul.mubr.bf16.vlgmr.msra.gmra.mxu0 %v24647_v38 }
 0x6e7   : > { %v9072_v30 = vpop.f32.mrf.mxu1  ;;  %11969 = vmatmul.mubr.bf16.vlgmr.msra.gmra.mxu1 %v24651_v6  ;;  %v9030_v27 = vadd.f32 %v9029_v0, %v24574_v21  ;;  %11980 = vmatpush1.bf16.msra.mxu0 %v20717_v43 }
 0x6e8   : > { %12023 = vmatpush1.bf16.msra.mxu1 %v20720_v23  ;;  %v9031_v40 = vpop.f32.mrf.mxu0  ;;  %11981 = vmatprep.subr.bf16.mxu0 %v20725_v56  ;;  %v20729_v56 = vld [vmem:[%s22876_s14 + $0xca0] ss:$16 sps:$4 sm:$0xff]  }
 0x6e9   : > { %v9074_v32 = vpop.f32.mrf.mxu1  ;;  %12024 = vmatprep.subr.bf16.mxu1 %v20728_v62  ;;  %v24678_v24 = vadd.f32 %v9072_v30, %v9030_v27  ;;  %v9032_v6 = vadd.f32 %v9031_v40, %v24579_v60  ;;  %12011 = vmatprep.mubr.bf16.mxu0 %v24665_v16  ;;  %v20732_v62 = vld [vmem:[%s22876_s14 + $0xea0] ss:$16 sps:$4 sm:$0xff]   ;;  %v20737_v60 = vld [vmem:[%s22876_s14 + $0xc84] ss:$16 sps:$4 sm:$0xff]  }
 0x6ea   : > { %12054 = vmatprep.mubr.bf16.mxu1 %v24669_v8  ;;  %v9033_v21 = vpop.f32.mrf.mxu0  ;;  %v20740_v27 = vld [vmem:[%s22876_s14 + $0xe84] ss:$16 sps:$4 sm:$0xff]  }
 0x6eb   : > { %v9076_v43 = vpop.f32.mrf.mxu1  ;;  %v24683_v23 = vadd.f32 %v9074_v32, %v9032_v6  ;;  %v9034_v0 = vadd.f32 %v9033_v21, %v24586_v59  ;;  %11982 = vmatpush1.bf16.msra.mxu0 %v20723_v12  ;;  %v20738_v32 = vld [vmem:[%s22876_s14 + $0xe80] ss:$16 sps:$4 sm:$0xff]  }
 0x6ec   : > { %12025 = vmatpush1.bf16.msra.mxu1 %v20726_v36  ;;  %v9035_v30 = vpop.f32.mrf.mxu0  ;;  %11983 = vmatprep.subr.bf16.mxu0 %v20731_v1  ;;  %v20735_v36 = vld [vmem:[%s22876_s14 + $0xc80] ss:$16 sps:$4 sm:$0xff]   ;;  %v20743_v1 = vld [vmem:[%s22876_s14 + $0xc64] ss:$16 sps:$4 sm:$0xff]  }
 0x6ed   : > { %12026 = vmatprep.subr.bf16.mxu1 %v20734_v42  ;;  %v24690_v40 = vadd.f32 %v9076_v43, %v9034_v0  ;;  %v9036_v6 = vadd.f32 %v9035_v30, %v24589_v9  ;;  %v9078_v59 = vpop.f32.mrf.mxu1  ;;  %v20746_v42 = vld [vmem:[%s22876_s14 + $0xe64] ss:$16 sps:$4 sm:$0xff]   ;;  %v20741_v9 = vld [vmem:[%s22876_s14 + $0xc60] ss:$16 sps:$4 sm:$0xff]  }
 0x6ee   : > { %v20744_v21 = vld [vmem:[%s22876_s14 + $0xe60] ss:$16 sps:$4 sm:$0xff]   ;;  %v20749_v43 = vld [vmem:[%s22876_s14 + $0xc44] ss:$16 sps:$4 sm:$0xff]  }
 0x6ef   : > { %v24693_v12 = vadd.f32 %v9078_v59, %v9036_v6  ;;  %11984 = vmatpush1.bf16.msra.mxu0 %v20729_v56  ;;  %v20752_v0 = vld [vmem:[%s22876_s14 + $0xe44] ss:$16 sps:$4 sm:$0xff]   ;;  %v20747_v56 = vld [vmem:[%s22876_s14 + $0xc40] ss:$16 sps:$4 sm:$0xff]  }
 0x6f0   : > { %12027 = vmatpush1.bf16.msra.mxu1 %v20732_v62  ;;  %11985 = vmatprep.subr.bf16.mxu0 %v20737_v60  ;;  %v20750_v62 = vld [vmem:[%s22876_s14 + $0xe40] ss:$16 sps:$4 sm:$0xff]   ;;  %v20755_v30 = vld [vmem:[%s22876_s14 + $0xc24] ss:$16 sps:$4 sm:$0xff]  }
 0x6f1   : > { %12028 = vmatprep.subr.bf16.mxu1 %v20740_v27  ;;  %v20758_v60 = vld [vmem:[%s22876_s14 + $0xe24] ss:$16 sps:$4 sm:$0xff]   ;;  %v20753_v27 = vld [vmem:[%s22876_s14 + $0xc20] ss:$16 sps:$4 sm:$0xff]  }
 0x6f2   : > { %v20756_v6 = vld [vmem:[%s22876_s14 + $0xe20] ss:$16 sps:$4 sm:$0xff]   ;;  %v20761_v59 = vld [vmem:[%s22876_s14 + $0xc04] ss:$16 sps:$4 sm:$0xff]  }
 0x6f3   : > { %11986 = vmatpush1.bf16.msra.mxu0 %v20735_v36  ;;  %v20764_v36 = vld [vmem:[%s22876_s14 + $0xe04] ss:$16 sps:$4 sm:$0xff]  }
 0x6f4   : > { %12029 = vmatpush1.bf16.msra.mxu1 %v20738_v32  ;;  %11987 = vmatprep.subr.bf16.mxu0 %v20743_v1  ;;  %v20759_v32 = vld [vmem:[%s22876_s14 + $0xc00] ss:$16 sps:$4 sm:$0xff]  }
 0x6f5   : > { %12030 = vmatprep.subr.bf16.mxu1 %v20746_v42  ;;  %v20762_v1 = vld [vmem:[%s22876_s14 + $0xe00] ss:$16 sps:$4 sm:$0xff]   ;;  %v20767_v42 = vld [vmem:[%s22876_s14 + $0xde4] ss:$16 sps:$4 sm:$0xff]  }
 0x6f7   : > { %11988 = vmatpush1.bf16.msra.mxu0 %v20741_v9  ;;  %v20770_v9 = vld [vmem:[%s22876_s14 + $0xfe4] ss:$16 sps:$4 sm:$0xff]  }
 0x6f8   : > { %12031 = vmatpush1.bf16.msra.mxu1 %v20744_v21  ;;  %11989 = vmatprep.subr.bf16.mxu0 %v20749_v43  ;;  %v20765_v21 = vld [vmem:[%s22876_s14 + $0xde0] ss:$16 sps:$4 sm:$0xff]  }
 0x6f9   : > { %12032 = vmatprep.subr.bf16.mxu1 %v20752_v0  ;;  %v20768_v43 = vld [vmem:[%s22876_s14 + $0xfe0] ss:$16 sps:$4 sm:$0xff]   ;;  %v20773_v0 = vld [vmem:[%s22876_s14 + $0xdc4] ss:$16 sps:$4 sm:$0xff]  }
 0x6fb   : > { %11990 = vmatpush1.bf16.msra.mxu0 %v20747_v56  ;;  %v20776_v56 = vld [vmem:[%s22876_s14 + $0xfc4] ss:$16 sps:$4 sm:$0xff]  }
 0x6fc   : > { %12033 = vmatpush1.bf16.msra.mxu1 %v20750_v62  ;;  %11991 = vmatprep.subr.bf16.mxu0 %v20755_v30  ;;  %v20771_v62 = vld [vmem:[%s22876_s14 + $0xdc0] ss:$16 sps:$4 sm:$0xff]  }
 0x6fd   : > { %12034 = vmatprep.subr.bf16.mxu1 %v20758_v60  ;;  %v20774_v30 = vld [vmem:[%s22876_s14 + $0xfc0] ss:$16 sps:$4 sm:$0xff]   ;;  %v20779_v60 = vld [vmem:[%s22876_s14 + $0xda4] ss:$16 sps:$4 sm:$0xff]  }
 0x6ff   : > { %11992 = vmatpush1.bf16.msra.mxu0 %v20753_v27  ;;  %v20782_v27 = vld [vmem:[%s22876_s14 + $0xfa4] ss:$16 sps:$4 sm:$0xff]  }
 0x700   : > { %12035 = vmatpush1.bf16.msra.mxu1 %v20756_v6  ;;  %11993 = vmatprep.subr.bf16.mxu0 %v20761_v59  ;;  %v20777_v6 = vld [vmem:[%s22876_s14 + $0xda0] ss:$16 sps:$4 sm:$0xff]  }
 0x701   : > { %12036 = vmatprep.subr.bf16.mxu1 %v20764_v36  ;;  %v20780_v59 = vld [vmem:[%s22876_s14 + $0xfa0] ss:$16 sps:$4 sm:$0xff]   ;;  %v20785_v36 = vld [vmem:[%s22876_s14 + $0xd84] ss:$16 sps:$4 sm:$0xff]  }
 0x703   : > { %11994 = vmatpush1.bf16.msra.mxu0 %v20759_v32  ;;  %v20788_v32 = vld [vmem:[%s22876_s14 + $0xf84] ss:$16 sps:$4 sm:$0xff]  }
 0x704   : > { %12037 = vmatpush1.bf16.msra.mxu1 %v20762_v1  ;;  %11995 = vmatprep.subr.bf16.mxu0 %v20767_v42  ;;  %v20783_v1 = vld [vmem:[%s22876_s14 + $0xd80] ss:$16 sps:$4 sm:$0xff]  }
 0x705   : > { %12038 = vmatprep.subr.bf16.mxu1 %v20770_v9  ;;  %v20786_v42 = vld [vmem:[%s22876_s14 + $0xf80] ss:$16 sps:$4 sm:$0xff]   ;;  %v20791_v9 = vld [vmem:[%s22876_s14 + $0xd64] ss:$16 sps:$4 sm:$0xff]  }
 0x707   : > { %11996 = vmatpush2.bf16.msra.mxu0 %v20765_v21  ;;  %v20794_v21 = vld [vmem:[%s22876_s14 + $0xf64] ss:$16 sps:$4 sm:$0xff]  }
 0x708   : > { %12039 = vmatpush2.bf16.msra.mxu1 %v20768_v43  ;;  %11997 = vmatprep.subr.bf16.mxu0 %v20773_v0  ;;  %v20789_v43 = vld [vmem:[%s22876_s14 + $0xd60] ss:$16 sps:$4 sm:$0xff]  }
 0x709   : > { %12040 = vmatprep.subr.bf16.mxu1 %v20776_v56  ;;  %v20792_v0 = vld [vmem:[%s22876_s14 + $0xf60] ss:$16 sps:$4 sm:$0xff]   ;;  %v20797_v56 = vld [vmem:[%s22876_s14 + $0xd44] ss:$16 sps:$4 sm:$0xff]  }
 0x70b   : > { %11998 = vmatpush2.bf16.msra.mxu0 %v20771_v62  ;;  %v20800_v62 = vld [vmem:[%s22876_s14 + $0xf44] ss:$16 sps:$4 sm:$0xff]  }
 0x70c   : > { %12041 = vmatpush2.bf16.msra.mxu1 %v20774_v30  ;;  %11999 = vmatprep.subr.bf16.mxu0 %v20779_v60  ;;  %v20795_v30 = vld [vmem:[%s22876_s14 + $0xd40] ss:$16 sps:$4 sm:$0xff]  }
 0x70d   : > { %12042 = vmatprep.subr.bf16.mxu1 %v20782_v27  ;;  %v20798_v60 = vld [vmem:[%s22876_s14 + $0xf40] ss:$16 sps:$4 sm:$0xff]   ;;  %v20803_v27 = vld [vmem:[%s22876_s14 + $0xd24] ss:$16 sps:$4 sm:$0xff]  }
 0x70f   : > { %12000 = vmatpush2.bf16.msra.mxu0 %v20777_v6  ;;  %v20806_v6 = vld [vmem:[%s22876_s14 + $0xf24] ss:$16 sps:$4 sm:$0xff]  }
 0x710   : > { %12043 = vmatpush2.bf16.msra.mxu1 %v20780_v59  ;;  %12001 = vmatprep.subr.bf16.mxu0 %v20785_v36  ;;  %v20801_v59 = vld [vmem:[%s22876_s14 + $0xd20] ss:$16 sps:$4 sm:$0xff]  }
 0x711   : > { %12044 = vmatprep.subr.bf16.mxu1 %v20788_v32  ;;  %v20804_v36 = vld [vmem:[%s22876_s14 + $0xf20] ss:$16 sps:$4 sm:$0xff]   ;;  %v20809_v32 = vld [vmem:[%s22876_s14 + $0xd04] ss:$16 sps:$4 sm:$0xff]  }
 0x713   : > { %12002 = vmatpush2.bf16.msra.mxu0 %v20783_v1  ;;  %v20812_v1 = vld [vmem:[%s22876_s14 + $0xf04] ss:$16 sps:$4 sm:$0xff]  }
 0x714   : > { %12045 = vmatpush2.bf16.msra.mxu1 %v20786_v42  ;;  %12003 = vmatprep.subr.bf16.mxu0 %v20791_v9  ;;  %v20807_v42 = vld [vmem:[%s22876_s14 + $0xd00] ss:$16 sps:$4 sm:$0xff]  }
 0x715   : > { %12046 = vmatprep.subr.bf16.mxu1 %v20794_v21  ;;  %v20810_v9 = vld [vmem:[%s22876_s14 + $0xf00] ss:$16 sps:$4 sm:$0xff]   ;;  %v20815_v21 = vld [vmem:[%s22876_s14 + $0xec] ss:$16 sps:$4 sm:$0xff]  }
 0x717   : > { %12004 = vmatpush2.bf16.msra.mxu0 %v20789_v43  ;;  %v20818_v43 = vld [vmem:[%s22876_s14 + $0x2ec] ss:$16 sps:$4 sm:$0xff]  }
 0x718   : > { %12047 = vmatpush2.bf16.msra.mxu1 %v20792_v0  ;;  %12005 = vmatprep.subr.bf16.mxu0 %v20797_v56  ;;  %v24749_v0 = vcombine.low %v24643_v20, %v24653_v48  ;;  %v24753_v56 = vcombine.low %v24655_v15, %v24657_v49  ;;  %v20819_v20 = vld [vmem:[%s22876_s14 + $0xc8] ss:$16 sps:$4 sm:$0xff]   ;;  %v20827_v15 = vld [vmem:[%s22876_s14 + $0xac] ss:$16 sps:$4 sm:$0xff]  }
 0x719   : > { %12048 = vmatprep.subr.bf16.mxu1 %v20800_v62  ;;  %v20813_v62 = vld [vmem:[%s22876_s14 + $0xe8] ss:$16 sps:$4 sm:$0xff]   ;;  %v20830_v49 = vld [vmem:[%s22876_s14 + $0x2ac] ss:$16 sps:$4 sm:$0xff]  }
 0x71a   : > { %v20822_v48 = vld [vmem:[%s22876_s14 + $0x2c8] ss:$16 sps:$4 sm:$0xff]  }
 0x71b   : > { %12006 = vmatpush2.bf16.msra.mxu0 %v20795_v30  ;;  %v20816_v30 = vld [vmem:[%s22876_s14 + $0x2e8] ss:$16 sps:$4 sm:$0xff]  }
 0x71c   : > { %12049 = vmatpush2.bf16.msra.mxu1 %v20798_v60  ;;  %12007 = vmatprep.subr.bf16.mxu0 %v20803_v27  ;;  %v20821_v60 = vld [vmem:[%s22876_s14 + $0xcc] ss:$16 sps:$4 sm:$0xff]  }
 0x71d   : > { %12050 = vmatprep.subr.bf16.mxu1 %v20806_v6  ;;  %v20824_v27 = vld [vmem:[%s22876_s14 + $0x2cc] ss:$16 sps:$4 sm:$0xff]   ;;  %v20825_v6 = vld [vmem:[%s22876_s14 + $0xa8] ss:$16 sps:$4 sm:$0xff]  }
 0x71f   : > { %12008 = vmatpush2.bf16.msra.mxu0 %v20801_v59  ;;  %v20828_v59 = vld [vmem:[%s22876_s14 + $0x2a8] ss:$16 sps:$4 sm:$0xff]  }
 0x720   : > { %12051 = vmatpush2.bf16.msra.mxu1 %v20804_v36  ;;  %12009 = vmatprep.subr.bf16.mxu0 %v20809_v32  ;;  %v20833_v36 = vld [vmem:[%s22876_s14 + $0x8c] ss:$16 sps:$4 sm:$0xff]  }
 0x721   : > { %12052 = vmatprep.subr.bf16.mxu1 %v20812_v1  ;;  %v20836_v32 = vld [vmem:[%s22876_s14 + $0x28c] ss:$16 sps:$4 sm:$0xff]   ;;  %v20831_v1 = vld [vmem:[%s22876_s14 + $0x88] ss:$16 sps:$4 sm:$0xff]  }
 0x723   : > { %12010 = vmatpush2.bf16.msra.mxu0 %v20807_v42  ;;  %v20842_v42 = vld [vmem:[%s22876_s14 + $0x26c] ss:$16 sps:$4 sm:$0xff]  }
 0x724   : > { %12053 = vmatpush2.bf16.msra.mxu1 %v20810_v9  ;;  %12065 = vmatprep.subr.bf16.mxu0 %v20815_v21  ;;  %v20837_v9 = vld [vmem:[%s22876_s14 + $0x68] ss:$16 sps:$4 sm:$0xff]  }
 0x725   : > { %12108 = vmatprep.subr.bf16.mxu1 %v20818_v43  ;;  %v20840_v21 = vld [vmem:[%s22876_s14 + $0x268] ss:$16 sps:$4 sm:$0xff]   ;;  %v20845_v43 = vld [vmem:[%s22876_s14 + $0x4c] ss:$16 sps:$4 sm:$0xff]  }
 0x726   : > { %12012 = vmatmul.mubr.bf16.vlgmr.msra.gmra.mxu0 %v24749_v0 }
 0x727   : > { %12055 = vmatmul.mubr.bf16.vlgmr.msra.gmra.mxu1 %v24753_v56  ;;  %12066 = vmatpush1.bf16.msra.mxu0 %v20813_v62  ;;  %v20848_v62 = vld [vmem:[%s22876_s14 + $0x24c] ss:$16 sps:$4 sm:$0xff]  }
 0x728   : > { %12109 = vmatpush1.bf16.msra.mxu1 %v20816_v30  ;;  %12067 = vmatprep.subr.bf16.mxu0 %v20821_v60  ;;  %v20843_v30 = vld [vmem:[%s22876_s14 + $0x48] ss:$16 sps:$4 sm:$0xff]  }
 0x729   : > { %12110 = vmatprep.subr.bf16.mxu1 %v20824_v27  ;;  %12097 = vmatprep.mubr.bf16.mxu0 %v24359_v57  ;;  %v20834_v57 = vld [vmem:[%s22876_s14 + $0x288] ss:$16 sps:$4 sm:$0xff]   ;;  %v20851_v27 = vld [vmem:[%s22876_s14 + $0x2c] ss:$16 sps:$4 sm:$0xff]  }
 0x72a   : > { %12140 = vmatprep.mubr.bf16.mxu1 %v24363_v58  ;;  %v20839_v58 = vld [vmem:[%s22876_s14 + $0x6c] ss:$16 sps:$4 sm:$0xff]   ;;  %v20846_v60 = vld [vmem:[%s22876_s14 + $0x248] ss:$16 sps:$4 sm:$0xff]  }
 0x72b   : > { %12068 = vmatpush1.bf16.msra.mxu0 %v20819_v20  ;;  %v20854_v20 = vld [vmem:[%s22876_s14 + $0x22c] ss:$16 sps:$4 sm:$0xff]  }
 0x72c   : > { %12111 = vmatpush1.bf16.msra.mxu1 %v20822_v48  ;;  %12069 = vmatprep.subr.bf16.mxu0 %v20827_v15  ;;  %v20849_v48 = vld [vmem:[%s22876_s14 + $0x28] ss:$16 sps:$4 sm:$0xff]  }
 0x72d   : > { %12112 = vmatprep.subr.bf16.mxu1 %v20830_v49  ;;  %v20852_v15 = vld [vmem:[%s22876_s14 + $0x228] ss:$16 sps:$4 sm:$0xff]   ;;  %v20857_v49 = vld [vmem:[%s22876_s14 + $0xc] ss:$16 sps:$4 sm:$0xff]  }
 0x72f   : > { %12070 = vmatpush1.bf16.msra.mxu0 %v20825_v6  ;;  %v20860_v6 = vld [vmem:[%s22876_s14 + $0x20c] ss:$16 sps:$4 sm:$0xff]  }
 0x730   : > { %12113 = vmatpush1.bf16.msra.mxu1 %v20828_v59  ;;  %12071 = vmatprep.subr.bf16.mxu0 %v20833_v36  ;;  %v20855_v59 = vld [vmem:[%s22876_s14 + $0x8] ss:$16 sps:$4 sm:$0xff]  }
 0x731   : > { %12114 = vmatprep.subr.bf16.mxu1 %v20836_v32  ;;  %v20858_v36 = vld [vmem:[%s22876_s14 + $0x208] ss:$16 sps:$4 sm:$0xff]   ;;  %v20863_v32 = vld [vmem:[%s22876_s14 + $0x1ec] ss:$16 sps:$4 sm:$0xff]  }
 0x733   : > { %12072 = vmatpush1.bf16.msra.mxu0 %v20831_v1  ;;  %v20866_v1 = vld [vmem:[%s22876_s14 + $0x3ec] ss:$16 sps:$4 sm:$0xff]  }
 0x734   : > { %12115 = vmatpush1.bf16.msra.mxu1 %v20834_v57  ;;  %12073 = vmatprep.subr.bf16.mxu0 %v20839_v58  ;;  %v20861_v57 = vld [vmem:[%s22876_s14 + $0x1e8] ss:$16 sps:$4 sm:$0xff]  }
 0x735   : > { %12116 = vmatprep.subr.bf16.mxu1 %v20842_v42  ;;  %v20864_v58 = vld [vmem:[%s22876_s14 + $0x3e8] ss:$16 sps:$4 sm:$0xff]   ;;  %v20869_v42 = vld [vmem:[%s22876_s14 + $0x1cc] ss:$16 sps:$4 sm:$0xff]  }
 0x737   : > { %12074 = vmatpush1.bf16.msra.mxu0 %v20837_v9  ;;  %v20872_v9 = vld [vmem:[%s22876_s14 + $0x3cc] ss:$16 sps:$4 sm:$0xff]  }
 0x738   : > { %12117 = vmatpush1.bf16.msra.mxu1 %v20840_v21  ;;  %12075 = vmatprep.subr.bf16.mxu0 %v20845_v43  ;;  %v20867_v21 = vld [vmem:[%s22876_s14 + $0x1c8] ss:$16 sps:$4 sm:$0xff]  }
 0x739   : > { %12118 = vmatprep.subr.bf16.mxu1 %v20848_v62  ;;  %v20870_v43 = vld [vmem:[%s22876_s14 + $0x3c8] ss:$16 sps:$4 sm:$0xff]   ;;  %v20875_v62 = vld [vmem:[%s22876_s14 + $0x1ac] ss:$16 sps:$4 sm:$0xff]  }
 0x73b   : > { %12076 = vmatpush1.bf16.msra.mxu0 %v20843_v30  ;;  %v20878_v30 = vld [vmem:[%s22876_s14 + $0x3ac] ss:$16 sps:$4 sm:$0xff]  }
 0x73c   : > { %12119 = vmatpush1.bf16.msra.mxu1 %v20846_v60  ;;  %12077 = vmatprep.subr.bf16.mxu0 %v20851_v27  ;;  %v20873_v60 = vld [vmem:[%s22876_s14 + $0x1a8] ss:$16 sps:$4 sm:$0xff]  }
 0x73d   : > { %12120 = vmatprep.subr.bf16.mxu1 %v20854_v20  ;;  %v20876_v27 = vld [vmem:[%s22876_s14 + $0x3a8] ss:$16 sps:$4 sm:$0xff]   ;;  %v20881_v20 = vld [vmem:[%s22876_s14 + $0x18c] ss:$16 sps:$4 sm:$0xff]  }
 0x73f   : > { %12078 = vmatpush1.bf16.msra.mxu0 %v20849_v48  ;;  %v20884_v48 = vld [vmem:[%s22876_s14 + $0x38c] ss:$16 sps:$4 sm:$0xff]  }
 0x740   : > { %12121 = vmatpush1.bf16.msra.mxu1 %v20852_v15  ;;  %12079 = vmatprep.subr.bf16.mxu0 %v20857_v49  ;;  %v20879_v15 = vld [vmem:[%s22876_s14 + $0x188] ss:$16 sps:$4 sm:$0xff]  }
 0x741   : > { %12122 = vmatprep.subr.bf16.mxu1 %v20860_v6  ;;  %v20882_v49 = vld [vmem:[%s22876_s14 + $0x388] ss:$16 sps:$4 sm:$0xff]   ;;  %v20887_v6 = vld [vmem:[%s22876_s14 + $0x16c] ss:$16 sps:$4 sm:$0xff]  }
 0x743   : > { %12080 = vmatpush1.bf16.msra.mxu0 %v20855_v59  ;;  %v20890_v59 = vld [vmem:[%s22876_s14 + $0x36c] ss:$16 sps:$4 sm:$0xff]  }
 0x744   : > { %12123 = vmatpush1.bf16.msra.mxu1 %v20858_v36  ;;  %12081 = vmatprep.subr.bf16.mxu0 %v20863_v32  ;;  %v20885_v36 = vld [vmem:[%s22876_s14 + $0x168] ss:$16 sps:$4 sm:$0xff]  }
 0x745   : > { %12124 = vmatprep.subr.bf16.mxu1 %v20866_v1  ;;  %v20888_v32 = vld [vmem:[%s22876_s14 + $0x368] ss:$16 sps:$4 sm:$0xff]   ;;  %v20893_v1 = vld [vmem:[%s22876_s14 + $0x14c] ss:$16 sps:$4 sm:$0xff]  }
 0x747   : > { %12082 = vmatpush2.bf16.msra.mxu0 %v20861_v57  ;;  %v20896_v57 = vld [vmem:[%s22876_s14 + $0x34c] ss:$16 sps:$4 sm:$0xff]  }
 0x748   : > { %12125 = vmatpush2.bf16.msra.mxu1 %v20864_v58  ;;  %12083 = vmatprep.subr.bf16.mxu0 %v20869_v42  ;;  %v20891_v58 = vld [vmem:[%s22876_s14 + $0x148] ss:$16 sps:$4 sm:$0xff]  }
 0x749   : > { %12126 = vmatprep.subr.bf16.mxu1 %v20872_v9  ;;  %v20894_v42 = vld [vmem:[%s22876_s14 + $0x348] ss:$16 sps:$4 sm:$0xff]   ;;  %v20899_v9 = vld [vmem:[%s22876_s14 + $0x12c] ss:$16 sps:$4 sm:$0xff]  }
 0x74b   : > { %12084 = vmatpush2.bf16.msra.mxu0 %v20867_v21  ;;  %v20902_v21 = vld [vmem:[%s22876_s14 + $0x32c] ss:$16 sps:$4 sm:$0xff]  }
 0x74c   : > { %12127 = vmatpush2.bf16.msra.mxu1 %v20870_v43  ;;  %12085 = vmatprep.subr.bf16.mxu0 %v20875_v62  ;;  %v20897_v43 = vld [vmem:[%s22876_s14 + $0x128] ss:$16 sps:$4 sm:$0xff]  }
 0x74d   : > { %12128 = vmatprep.subr.bf16.mxu1 %v20878_v30  ;;  %v20900_v62 = vld [vmem:[%s22876_s14 + $0x328] ss:$16 sps:$4 sm:$0xff]   ;;  %v20905_v30 = vld [vmem:[%s22876_s14 + $0x10c] ss:$16 sps:$4 sm:$0xff]  }
 0x74f   : > { %12086 = vmatpush2.bf16.msra.mxu0 %v20873_v60  ;;  %v20908_v60 = vld [vmem:[%s22876_s14 + $0x30c] ss:$16 sps:$4 sm:$0xff]  }
 0x750   : > { %12129 = vmatpush2.bf16.msra.mxu1 %v20876_v27  ;;  %12087 = vmatprep.subr.bf16.mxu0 %v20881_v20  ;;  %v20903_v27 = vld [vmem:[%s22876_s14 + $0x108] ss:$16 sps:$4 sm:$0xff]  }
 0x751   : > { %12130 = vmatprep.subr.bf16.mxu1 %v20884_v48  ;;  %v20906_v20 = vld [vmem:[%s22876_s14 + $0x308] ss:$16 sps:$4 sm:$0xff]   ;;  %v20911_v48 = vld [vmem:[%s22876_s14 + $0x4ec] ss:$16 sps:$4 sm:$0xff]  }
 0x753   : > { %12088 = vmatpush2.bf16.msra.mxu0 %v20879_v15  ;;  %v20914_v15 = vld [vmem:[%s22876_s14 + $0x6ec] ss:$16 sps:$4 sm:$0xff]  }
 0x754   : > { %12131 = vmatpush2.bf16.msra.mxu1 %v20882_v49  ;;  %12089 = vmatprep.subr.bf16.mxu0 %v20887_v6  ;;  %v20909_v49 = vld [vmem:[%s22876_s14 + $0x4e8] ss:$16 sps:$4 sm:$0xff]  }
 0x755   : > { %12132 = vmatprep.subr.bf16.mxu1 %v20890_v59  ;;  %v20912_v6 = vld [vmem:[%s22876_s14 + $0x6e8] ss:$16 sps:$4 sm:$0xff]   ;;  %v20917_v59 = vld [vmem:[%s22876_s14 + $0x4cc] ss:$16 sps:$4 sm:$0xff]  }
 0x757   : > { %12090 = vmatpush2.bf16.msra.mxu0 %v20885_v36  ;;  %v20920_v36 = vld [vmem:[%s22876_s14 + $0x6cc] ss:$16 sps:$4 sm:$0xff]  }
 0x758   : > { %12133 = vmatpush2.bf16.msra.mxu1 %v20888_v32  ;;  %12091 = vmatprep.subr.bf16.mxu0 %v20893_v1  ;;  %v20915_v32 = vld [vmem:[%s22876_s14 + $0x4c8] ss:$16 sps:$4 sm:$0xff]  }
 0x759   : > { %12134 = vmatprep.subr.bf16.mxu1 %v20896_v57  ;;  %v20918_v1 = vld [vmem:[%s22876_s14 + $0x6c8] ss:$16 sps:$4 sm:$0xff]   ;;  %v20923_v57 = vld [vmem:[%s22876_s14 + $0x4ac] ss:$16 sps:$4 sm:$0xff]  }
 0x75b   : > { %12092 = vmatpush2.bf16.msra.mxu0 %v20891_v58  ;;  %v20926_v58 = vld [vmem:[%s22876_s14 + $0x6ac] ss:$16 sps:$4 sm:$0xff]  }
 0x75c   : > { %12135 = vmatpush2.bf16.msra.mxu1 %v20894_v42  ;;  %12093 = vmatprep.subr.bf16.mxu0 %v20899_v9  ;;  %v20929_v42 = vld [vmem:[%s22876_s14 + $0x48c] ss:$16 sps:$4 sm:$0xff]  }
 0x75d   : > { %12136 = vmatprep.subr.bf16.mxu1 %v20902_v21  ;;  %v20932_v9 = vld [vmem:[%s22876_s14 + $0x68c] ss:$16 sps:$4 sm:$0xff]   ;;  %v20927_v21 = vld [vmem:[%s22876_s14 + $0x488] ss:$16 sps:$4 sm:$0xff]  }
 0x75f   : > { %12094 = vmatpush2.bf16.msra.mxu0 %v20897_v43  ;;  %v20938_v43 = vld [vmem:[%s22876_s14 + $0x66c] ss:$16 sps:$4 sm:$0xff]  }
 0x760   : > { %12137 = vmatpush2.bf16.msra.mxu1 %v20900_v62  ;;  %12095 = vmatprep.subr.bf16.mxu0 %v20905_v30  ;;  %v20933_v62 = vld [vmem:[%s22876_s14 + $0x468] ss:$16 sps:$4 sm:$0xff]  }
 0x761   : > { %12138 = vmatprep.subr.bf16.mxu1 %v20908_v60  ;;  %v20936_v30 = vld [vmem:[%s22876_s14 + $0x668] ss:$16 sps:$4 sm:$0xff]   ;;  %v20941_v60 = vld [vmem:[%s22876_s14 + $0x44c] ss:$16 sps:$4 sm:$0xff]  }
 0x763   : > { %12096 = vmatpush2.bf16.msra.mxu0 %v20903_v27  ;;  %v20944_v27 = vld [vmem:[%s22876_s14 + $0x64c] ss:$16 sps:$4 sm:$0xff]  }
 0x764   : > { %12139 = vmatpush2.bf16.msra.mxu1 %v20906_v20  ;;  %12151 = vmatprep.subr.bf16.mxu0 %v20911_v48  ;;  %v20939_v20 = vld [vmem:[%s22876_s14 + $0x448] ss:$16 sps:$4 sm:$0xff]  }
 0x765   : > { %12194 = vmatprep.subr.bf16.mxu1 %v20914_v15  ;;  %v20942_v48 = vld [vmem:[%s22876_s14 + $0x648] ss:$16 sps:$4 sm:$0xff]   ;;  %v20947_v15 = vld [vmem:[%s22876_s14 + $0x42c] ss:$16 sps:$4 sm:$0xff]  }
 0x766   : > { %12098 = vmatmul.mubr.bf16.vlgmr.msra.gmra.mxu0 %v24440_v51  ;;  %v20921_v51 = vld [vmem:[%s22876_s14 + $0x4a8] ss:$16 sps:$4 sm:$0xff]  }
 0x767   : > { %12141 = vmatmul.mubr.bf16.vlgmr.msra.gmra.mxu1 %v24444_v2  ;;  %12152 = vmatpush1.bf16.msra.mxu0 %v20909_v49  ;;  %v20924_v2 = vld [vmem:[%s22876_s14 + $0x6a8] ss:$16 sps:$4 sm:$0xff]   ;;  %v20950_v49 = vld [vmem:[%s22876_s14 + $0x62c] ss:$16 sps:$4 sm:$0xff]  }
 0x768   : > { %12195 = vmatpush1.bf16.msra.mxu1 %v20912_v6  ;;  %12153 = vmatprep.subr.bf16.mxu0 %v20917_v59  ;;  %v20945_v6 = vld [vmem:[%s22876_s14 + $0x428] ss:$16 sps:$4 sm:$0xff]  }
 0x769   : > { %12196 = vmatprep.subr.bf16.mxu1 %v20920_v36  ;;  %12183 = vmatprep.mubr.bf16.mxu0 %v24459_v35  ;;  %v20930_v35 = vld [vmem:[%s22876_s14 + $0x688] ss:$16 sps:$4 sm:$0xff]   ;;  %v20953_v36 = vld [vmem:[%s22876_s14 + $0x40c] ss:$16 sps:$4 sm:$0xff]  }
 0x76a   : > { %12226 = vmatprep.mubr.bf16.mxu1 %v24463_v39  ;;  %v20935_v39 = vld [vmem:[%s22876_s14 + $0x46c] ss:$16 sps:$4 sm:$0xff]   ;;  %v20948_v59 = vld [vmem:[%s22876_s14 + $0x628] ss:$16 sps:$4 sm:$0xff]  }
 0x76b   : > { %12154 = vmatpush1.bf16.msra.mxu0 %v20915_v32  ;;  %v20956_v32 = vld [vmem:[%s22876_s14 + $0x60c] ss:$16 sps:$4 sm:$0xff]  }
 0x76c   : > { %12197 = vmatpush1.bf16.msra.mxu1 %v20918_v1  ;;  %12155 = vmatprep.subr.bf16.mxu0 %v20923_v57  ;;  %v20951_v1 = vld [vmem:[%s22876_s14 + $0x408] ss:$16 sps:$4 sm:$0xff]  }
 0x76d   : > { %12198 = vmatprep.subr.bf16.mxu1 %v20926_v58  ;;  %v20954_v57 = vld [vmem:[%s22876_s14 + $0x608] ss:$16 sps:$4 sm:$0xff]   ;;  %v20959_v58 = vld [vmem:[%s22876_s14 + $0x5ec] ss:$16 sps:$4 sm:$0xff]  }
 0x76f   : > { %12156 = vmatpush1.bf16.msra.mxu0 %v20921_v51  ;;  %v20962_v51 = vld [vmem:[%s22876_s14 + $0x7ec] ss:$16 sps:$4 sm:$0xff]  }
 0x770   : > { %12199 = vmatpush1.bf16.msra.mxu1 %v20924_v2  ;;  %12157 = vmatprep.subr.bf16.mxu0 %v20929_v42  ;;  %v20957_v2 = vld [vmem:[%s22876_s14 + $0x5e8] ss:$16 sps:$4 sm:$0xff]  }
 0x771   : > { %12200 = vmatprep.subr.bf16.mxu1 %v20932_v9  ;;  %v20960_v42 = vld [vmem:[%s22876_s14 + $0x7e8] ss:$16 sps:$4 sm:$0xff]   ;;  %v20965_v9 = vld [vmem:[%s22876_s14 + $0x5cc] ss:$16 sps:$4 sm:$0xff]  }
 0x773   : > { %12158 = vmatpush1.bf16.msra.mxu0 %v20927_v21  ;;  %v20968_v21 = vld [vmem:[%s22876_s14 + $0x7cc] ss:$16 sps:$4 sm:$0xff]  }
 0x774   : > { %12201 = vmatpush1.bf16.msra.mxu1 %v20930_v35  ;;  %12159 = vmatprep.subr.bf16.mxu0 %v20935_v39  ;;  %v20963_v35 = vld [vmem:[%s22876_s14 + $0x5c8] ss:$16 sps:$4 sm:$0xff]  }
 0x775   : > { %12202 = vmatprep.subr.bf16.mxu1 %v20938_v43  ;;  %v20966_v39 = vld [vmem:[%s22876_s14 + $0x7c8] ss:$16 sps:$4 sm:$0xff]   ;;  %v20971_v43 = vld [vmem:[%s22876_s14 + $0x5ac] ss:$16 sps:$4 sm:$0xff]  }
 0x777   : > { %12160 = vmatpush1.bf16.msra.mxu0 %v20933_v62  ;;  %v20974_v62 = vld [vmem:[%s22876_s14 + $0x7ac] ss:$16 sps:$4 sm:$0xff]  }
 0x778   : > { %12203 = vmatpush1.bf16.msra.mxu1 %v20936_v30  ;;  %12161 = vmatprep.subr.bf16.mxu0 %v20941_v60  ;;  %v20969_v30 = vld [vmem:[%s22876_s14 + $0x5a8] ss:$16 sps:$4 sm:$0xff]  }
 0x779   : > { %12204 = vmatprep.subr.bf16.mxu1 %v20944_v27  ;;  %v20972_v60 = vld [vmem:[%s22876_s14 + $0x7a8] ss:$16 sps:$4 sm:$0xff]   ;;  %v20977_v27 = vld [vmem:[%s22876_s14 + $0x58c] ss:$16 sps:$4 sm:$0xff]  }
 0x77b   : > { %12162 = vmatpush1.bf16.msra.mxu0 %v20939_v20  ;;  %v20980_v20 = vld [vmem:[%s22876_s14 + $0x78c] ss:$16 sps:$4 sm:$0xff]  }
 0x77c   : > { %12205 = vmatpush1.bf16.msra.mxu1 %v20942_v48  ;;  %12163 = vmatprep.subr.bf16.mxu0 %v20947_v15  ;;  %v20975_v48 = vld [vmem:[%s22876_s14 + $0x588] ss:$16 sps:$4 sm:$0xff]  }
 0x77d   : > { %12206 = vmatprep.subr.bf16.mxu1 %v20950_v49  ;;  %v20978_v15 = vld [vmem:[%s22876_s14 + $0x788] ss:$16 sps:$4 sm:$0xff]   ;;  %v20983_v49 = vld [vmem:[%s22876_s14 + $0x56c] ss:$16 sps:$4 sm:$0xff]  }
 0x77f   : > { %12164 = vmatpush1.bf16.msra.mxu0 %v20945_v6  ;;  %v20986_v6 = vld [vmem:[%s22876_s14 + $0x76c] ss:$16 sps:$4 sm:$0xff]  }
 0x780   : > { %12207 = vmatpush1.bf16.msra.mxu1 %v20948_v59  ;;  %12165 = vmatprep.subr.bf16.mxu0 %v20953_v36  ;;  %v20981_v59 = vld [vmem:[%s22876_s14 + $0x568] ss:$16 sps:$4 sm:$0xff]  }
 0x781   : > { %12208 = vmatprep.subr.bf16.mxu1 %v20956_v32  ;;  %v20984_v36 = vld [vmem:[%s22876_s14 + $0x768] ss:$16 sps:$4 sm:$0xff]   ;;  %v20989_v32 = vld [vmem:[%s22876_s14 + $0x54c] ss:$16 sps:$4 sm:$0xff]  }
 0x783   : > { %12166 = vmatpush1.bf16.msra.mxu0 %v20951_v1  ;;  %v20992_v1 = vld [vmem:[%s22876_s14 + $0x74c] ss:$16 sps:$4 sm:$0xff]  }
 0x784   : > { %12209 = vmatpush1.bf16.msra.mxu1 %v20954_v57  ;;  %12167 = vmatprep.subr.bf16.mxu0 %v20959_v58  ;;  %v20987_v57 = vld [vmem:[%s22876_s14 + $0x548] ss:$16 sps:$4 sm:$0xff]  }
 0x785   : > { %12210 = vmatprep.subr.bf16.mxu1 %v20962_v51  ;;  %v20990_v58 = vld [vmem:[%s22876_s14 + $0x748] ss:$16 sps:$4 sm:$0xff]   ;;  %v20995_v51 = vld [vmem:[%s22876_s14 + $0x52c] ss:$16 sps:$4 sm:$0xff]  }
 0x787   : > { %12168 = vmatpush2.bf16.msra.mxu0 %v20957_v2  ;;  %v20998_v2 = vld [vmem:[%s22876_s14 + $0x72c] ss:$16 sps:$4 sm:$0xff]  }
 0x788   : > { %12211 = vmatpush2.bf16.msra.mxu1 %v20960_v42  ;;  %12169 = vmatprep.subr.bf16.mxu0 %v20965_v9  ;;  %v20993_v42 = vld [vmem:[%s22876_s14 + $0x528] ss:$16 sps:$4 sm:$0xff]  }
 0x789   : > { %12212 = vmatprep.subr.bf16.mxu1 %v20968_v21  ;;  %v20996_v9 = vld [vmem:[%s22876_s14 + $0x728] ss:$16 sps:$4 sm:$0xff]   ;;  %v21001_v21 = vld [vmem:[%s22876_s14 + $0x50c] ss:$16 sps:$4 sm:$0xff]  }
 0x78b   : > { %12170 = vmatpush2.bf16.msra.mxu0 %v20963_v35  ;;  %v21004_v35 = vld [vmem:[%s22876_s14 + $0x70c] ss:$16 sps:$4 sm:$0xff]  }
 0x78c   : > { %12213 = vmatpush2.bf16.msra.mxu1 %v20966_v39  ;;  %12171 = vmatprep.subr.bf16.mxu0 %v20971_v43  ;;  %v20999_v39 = vld [vmem:[%s22876_s14 + $0x508] ss:$16 sps:$4 sm:$0xff]  }
 0x78d   : > { %12214 = vmatprep.subr.bf16.mxu1 %v20974_v62  ;;  %v21002_v43 = vld [vmem:[%s22876_s14 + $0x708] ss:$16 sps:$4 sm:$0xff]   ;;  %v21007_v62 = vld [vmem:[%s22876_s14 + $0x8ec] ss:$16 sps:$4 sm:$0xff]  }
 0x78f   : > { %12172 = vmatpush2.bf16.msra.mxu0 %v20969_v30  ;;  %v21010_v30 = vld [vmem:[%s22876_s14 + $0xaec] ss:$16 sps:$4 sm:$0xff]  }
 0x790   : > { %12215 = vmatpush2.bf16.msra.mxu1 %v20972_v60  ;;  %12173 = vmatprep.subr.bf16.mxu0 %v20977_v27  ;;  %v21005_v60 = vld [vmem:[%s22876_s14 + $0x8e8] ss:$16 sps:$4 sm:$0xff]  }
 0x791   : > { %12216 = vmatprep.subr.bf16.mxu1 %v20980_v20  ;;  %v21008_v27 = vld [vmem:[%s22876_s14 + $0xae8] ss:$16 sps:$4 sm:$0xff]   ;;  %v21013_v20 = vld [vmem:[%s22876_s14 + $0x8cc] ss:$16 sps:$4 sm:$0xff]  }
 0x793   : > { %12174 = vmatpush2.bf16.msra.mxu0 %v20975_v48  ;;  %v21016_v48 = vld [vmem:[%s22876_s14 + $0xacc] ss:$16 sps:$4 sm:$0xff]  }
 0x794   : > { %12217 = vmatpush2.bf16.msra.mxu1 %v20978_v15  ;;  %12175 = vmatprep.subr.bf16.mxu0 %v20983_v49  ;;  %v21011_v15 = vld [vmem:[%s22876_s14 + $0x8c8] ss:$16 sps:$4 sm:$0xff]  }
 0x795   : > { %12218 = vmatprep.subr.bf16.mxu1 %v20986_v6  ;;  %v21014_v49 = vld [vmem:[%s22876_s14 + $0xac8] ss:$16 sps:$4 sm:$0xff]   ;;  %v21019_v6 = vld [vmem:[%s22876_s14 + $0x8ac] ss:$16 sps:$4 sm:$0xff]  }
 0x797   : > { %12176 = vmatpush2.bf16.msra.mxu0 %v20981_v59  ;;  %v21022_v59 = vld [vmem:[%s22876_s14 + $0xaac] ss:$16 sps:$4 sm:$0xff]  }
 0x798   : > { %12219 = vmatpush2.bf16.msra.mxu1 %v20984_v36  ;;  %12177 = vmatprep.subr.bf16.mxu0 %v20989_v32  ;;  %v21025_v36 = vld [vmem:[%s22876_s14 + $0x88c] ss:$16 sps:$4 sm:$0xff]  }
 0x799   : > { %12220 = vmatprep.subr.bf16.mxu1 %v20992_v1  ;;  %v21028_v32 = vld [vmem:[%s22876_s14 + $0xa8c] ss:$16 sps:$4 sm:$0xff]   ;;  %v21023_v1 = vld [vmem:[%s22876_s14 + $0x888] ss:$16 sps:$4 sm:$0xff]  }
 0x79b   : > { %12178 = vmatpush2.bf16.msra.mxu0 %v20987_v57  ;;  %v21034_v57 = vld [vmem:[%s22876_s14 + $0xa6c] ss:$16 sps:$4 sm:$0xff]  }
 0x79c   : > { %12221 = vmatpush2.bf16.msra.mxu1 %v20990_v58  ;;  %12179 = vmatprep.subr.bf16.mxu0 %v20995_v51  ;;  %v21029_v58 = vld [vmem:[%s22876_s14 + $0x868] ss:$16 sps:$4 sm:$0xff]  }
 0x79d   : > { %12222 = vmatprep.subr.bf16.mxu1 %v20998_v2  ;;  %v21032_v51 = vld [vmem:[%s22876_s14 + $0xa68] ss:$16 sps:$4 sm:$0xff]   ;;  %v21037_v2 = vld [vmem:[%s22876_s14 + $0x84c] ss:$16 sps:$4 sm:$0xff]  }
 0x79f   : > { %12180 = vmatpush2.bf16.msra.mxu0 %v20993_v42  ;;  %v21040_v42 = vld [vmem:[%s22876_s14 + $0xa4c] ss:$16 sps:$4 sm:$0xff]  }
 0x7a0   : > { %12223 = vmatpush2.bf16.msra.mxu1 %v20996_v9  ;;  %12181 = vmatprep.subr.bf16.mxu0 %v21001_v21  ;;  %v21035_v9 = vld [vmem:[%s22876_s14 + $0x848] ss:$16 sps:$4 sm:$0xff]  }
 0x7a1   : > { %12224 = vmatprep.subr.bf16.mxu1 %v21004_v35  ;;  %v21038_v21 = vld [vmem:[%s22876_s14 + $0xa48] ss:$16 sps:$4 sm:$0xff]   ;;  %v21043_v35 = vld [vmem:[%s22876_s14 + $0x82c] ss:$16 sps:$4 sm:$0xff]  }
 0x7a3   : > { %12182 = vmatpush2.bf16.msra.mxu0 %v20999_v39  ;;  %v21046_v39 = vld [vmem:[%s22876_s14 + $0xa2c] ss:$16 sps:$4 sm:$0xff]  }
 0x7a4   : > { %12225 = vmatpush2.bf16.msra.mxu1 %v21002_v43  ;;  %12237 = vmatprep.subr.bf16.mxu0 %v21007_v62  ;;  %v21041_v43 = vld [vmem:[%s22876_s14 + $0x828] ss:$16 sps:$4 sm:$0xff]  }
 0x7a5   : > { %12280 = vmatprep.subr.bf16.mxu1 %v21010_v30  ;;  %v21044_v62 = vld [vmem:[%s22876_s14 + $0xa28] ss:$16 sps:$4 sm:$0xff]   ;;  %v24921_v30 = vpop.f32.mrf.mxu0 }
 0x7a6   : > { %12184 = vmatmul.mubr.bf16.vlgmr.msra.gmra.mxu0 %v24543_v4  ;;  %v21017_v4 = vld [vmem:[%s22876_s14 + $0x8a8] ss:$16 sps:$4 sm:$0xff]  }
 0x7a7   : > { %12227 = vmatmul.mubr.bf16.vlgmr.msra.gmra.mxu1 %v24547_v55  ;;  %12238 = vmatpush1.bf16.msra.mxu0 %v21005_v60  ;;  %v21020_v55 = vld [vmem:[%s22876_s14 + $0xaa8] ss:$16 sps:$4 sm:$0xff]   ;;  %v24923_v60 = vpop.f32.mrf.mxu1 }
 0x7a8   : > { %12281 = vmatpush1.bf16.msra.mxu1 %v21008_v27  ;;  %12239 = vmatprep.subr.bf16.mxu0 %v21013_v20  ;;  %v21049_v27 = vld [vmem:[%s22876_s14 + $0x80c] ss:$16 sps:$4 sm:$0xff]  }
 0x7a9   : > { %12282 = vmatprep.subr.bf16.mxu1 %v21016_v48  ;;  %12269 = vmatprep.mubr.bf16.mxu0 %v24561_v46  ;;  %v21026_v46 = vld [vmem:[%s22876_s14 + $0xa88] ss:$16 sps:$4 sm:$0xff]   ;;  %v21052_v20 = vld [vmem:[%s22876_s14 + $0xa0c] ss:$16 sps:$4 sm:$0xff]  }
 0x7aa   : > { %12312 = vmatprep.mubr.bf16.mxu1 %v24565_v52  ;;  %v21031_v52 = vld [vmem:[%s22876_s14 + $0x86c] ss:$16 sps:$4 sm:$0xff]   ;;  %v21047_v48 = vld [vmem:[%s22876_s14 + $0x808] ss:$16 sps:$4 sm:$0xff]  }
 0x7ab   : > { %12240 = vmatpush1.bf16.msra.mxu0 %v21011_v15  ;;  %v21050_v15 = vld [vmem:[%s22876_s14 + $0xa08] ss:$16 sps:$4 sm:$0xff]  }
 0x7ac   : > { %12283 = vmatpush1.bf16.msra.mxu1 %v21014_v49  ;;  %12241 = vmatprep.subr.bf16.mxu0 %v21019_v6  ;;  %v24929_v49 = vpop.f32.mrf.mxu0  ;;  %v24931_v6 = vpop.f32.mrf.mxu1 }
 0x7ad   : > { %12284 = vmatprep.subr.bf16.mxu1 %v21022_v59  ;;  %v21055_v59 = vld [vmem:[%s22876_s14 + $0x9ec] ss:$16 sps:$4 sm:$0xff]  }
 0x7af   : > { %12242 = vmatpush1.bf16.msra.mxu0 %v21017_v4  ;;  %v21058_v4 = vld [vmem:[%s22876_s14 + $0xbec] ss:$16 sps:$4 sm:$0xff]  }
 0x7b0   : > { %12285 = vmatpush1.bf16.msra.mxu1 %v21020_v55  ;;  %12243 = vmatprep.subr.bf16.mxu0 %v21025_v36  ;;  %v8471_v55 = vadd.f32 %v24229_v17, %v24227_v63  ;;  %v8473_v36 = vadd.f32 %v24237_v14, %v24235_v47  ;;  %v21064_v63 = vld [vmem:[%s22876_s14 + $0xbcc] ss:$16 sps:$4 sm:$0xff]   ;;  %v8475_v17 = vadd.f32 %v24245_v45, %v24243_v37 }
 0x7b1   : > { %12286 = vmatprep.subr.bf16.mxu1 %v21028_v32  ;;  %v21067_v37 = vld [vmem:[%s22876_s14 + $0x9ac] ss:$16 sps:$4 sm:$0xff]  }
 0x7b2   : > { %v8514_v32 = vadd.f32 %v24257_v31, %v8471_v55  ;;  %v8516_v47 = vadd.f32 %v24265_v34, %v8473_v36  ;;  %v8518_v31 = vadd.f32 %v24273_v11, %v8475_v17  ;;  %v21070_v45 = vld [vmem:[%s22876_s14 + $0xbac] ss:$16 sps:$4 sm:$0xff]  }
 0x7b3   : > { %12244 = vmatpush1.bf16.msra.mxu0 %v21023_v1  ;;  %v21053_v1 = vld [vmem:[%s22876_s14 + $0x9e8] ss:$16 sps:$4 sm:$0xff]  }
 0x7b4   : > { %12287 = vmatpush1.bf16.msra.mxu1 %v21026_v46  ;;  %12245 = vmatprep.subr.bf16.mxu0 %v21031_v52  ;;  %v21056_v46 = vld [vmem:[%s22876_s14 + $0xbe8] ss:$16 sps:$4 sm:$0xff]   ;;  %v24942_v52 = vpop.f32.mrf.mxu0  ;;  %v8557_v14 = vadd.f32 %v24259_v33, %v8514_v32  ;;  %v8559_v33 = vadd.f32 %v24267_v3, %v8516_v47  ;;  %v21073_v3 = vld [vmem:[%s22876_s14 + $0x98c] ss:$16 sps:$4 sm:$0xff]  }
 0x7b5   : > { %12288 = vmatprep.subr.bf16.mxu1 %v21034_v57  ;;  %v24944_v57 = vpop.f32.mrf.mxu1  ;;  %v26025_v47 = vld [vmem:[#allocation36_spill] sm:$0xff] }
 0x7b6   : > { %v8600_v34 = vadd.f32 %v24287_v29, %v8557_v14  ;;  %v21076_v29 = vld [vmem:[%s22876_s14 + $0xb8c] ss:$16 sps:$4 sm:$0xff]  }
 0x7b7   : > { %12246 = vmatpush1.bf16.msra.mxu0 %v21029_v58  ;;  %v21061_v58 = vld [vmem:[%s22876_s14 + $0x9cc] ss:$16 sps:$4 sm:$0xff]  }
 0x7b8   : > { %12289 = vmatpush1.bf16.msra.mxu1 %v21032_v51  ;;  %12247 = vmatprep.subr.bf16.mxu0 %v21037_v2  ;;  %v21059_v51 = vld [vmem:[%s22876_s14 + $0x9c8] ss:$16 sps:$4 sm:$0xff]  }
 0x7b9   : > { %12290 = vmatprep.subr.bf16.mxu1 %v21040_v42  ;;  %v21062_v2 = vld [vmem:[%s22876_s14 + $0xbc8] ss:$16 sps:$4 sm:$0xff]   ;;  %v8477_v42 = vadd.f32 %v24253_v25, %v24251_v18  ;;  %v8561_v25 = vadd.f32 %v24275_v19, %v8518_v31 }
 0x7bb   : > { %12248 = vmatpush1.bf16.msra.mxu0 %v21035_v9  ;;  %v24957_v9 = vpop.f32.mrf.mxu0  ;;  %v8520_v11 = vadd.f32 %v24281_v41, %v8477_v42  ;;  %v8643_v41 = vadd.f32 %v24289_v50, %v8600_v34  ;;  %v21094_v34 = vld [vmem:[%s22876_s14 + $0xb2c] ss:$16 sps:$4 sm:$0xff]  }
 0x7bc   : > { %12291 = vmatpush1.bf16.msra.mxu1 %v21038_v21  ;;  %12249 = vmatprep.subr.bf16.mxu0 %v21043_v35  ;;  %v24959_v21 = vpop.f32.mrf.mxu1 }
 0x7bd   : > { %12292 = vmatprep.subr.bf16.mxu1 %v21046_v39  ;;  %v24966_v35 = vpop.f32.mrf.mxu0  ;;  %v8602_v39 = vadd.f32 %v24295_v53, %v8559_v33  ;;  %v8563_v19 = vadd.f32 %v24283_v22, %v8520_v11  ;;  %v21079_v22 = vld [vmem:[%s22876_s14 + $0x96c] ss:$16 sps:$4 sm:$0xff]  }
 0x7be   : > { %v24968_v18 = vpop.f32.mrf.mxu1 }
 0x7bf   : > { %12250 = vmatpush1.bf16.msra.mxu0 %v21041_v43  ;;  %v21065_v43 = vld [vmem:[%s22876_s14 + $0x9a8] ss:$16 sps:$4 sm:$0xff]   ;;  %v8606_v50 = vadd.f32 %v24311_v44, %v8563_v19 }
 0x7c0   : > { %12293 = vmatpush1.bf16.msra.mxu1 %v21044_v62  ;;  %12251 = vmatprep.subr.bf16.mxu0 %v21049_v27  ;;  %v21068_v62 = vld [vmem:[%s22876_s14 + $0xba8] ss:$16 sps:$4 sm:$0xff]   ;;  %v8604_v27 = vadd.f32 %v24303_v28, %v8561_v25  ;;  %v24981_v53 = vpop.f32.mrf.mxu1  ;;  %v21082_v28 = vld [vmem:[%s22876_s14 + $0xb6c] ss:$16 sps:$4 sm:$0xff]  }
 0x7c1   : > { %12294 = vmatprep.subr.bf16.mxu1 %v21052_v20  ;;  %v24979_v20 = vpop.f32.mrf.mxu0  ;;  %v21077_v44 = vld [vmem:[%s22876_s14 + $0x968] ss:$16 sps:$4 sm:$0xff]  }
 0x7c2   : > { %v8647_v55 = vadd.f32 %v24305_v61, %v8604_v27  ;;  %v21085_v61 = vld [vmem:[%s22876_s14 + $0x94c] ss:$16 sps:$4 sm:$0xff]  }
 0x7c3   : > { %12252 = vmatpush1.bf16.msra.mxu0 %v21047_v48  ;;  %v8645_v48 = vadd.f32 %v24297_v54, %v8602_v39  ;;  %v11845_v36 = vpop.f32.mrf.mxu0  ;;  %v26027_v39 = vld [vmem:[#allocation37_spill] sm:$0xff] }
 0x7c4   : > { %12295 = vmatpush1.bf16.msra.mxu1 %v21050_v15  ;;  %12253 = vmatprep.subr.bf16.mxu0 %v21055_v59  ;;  %v8686_v15 = vadd.f32 %v24317_v26, %v8643_v41  ;;  %v21071_v59 = vld [vmem:[%s22876_s14 + $0x988] ss:$16 sps:$4 sm:$0xff]   ;;  %v24992_v26 = vpop.f32.mrf.mxu1  ;;  %v12411_v41 = vlaneseq }
 0x7c5   : > { %12296 = vmatprep.subr.bf16.mxu1 %v21058_v4  ;;  %v21074_v4 = vld [vmem:[%s22876_s14 + $0xb88] ss:$16 sps:$4 sm:$0xff]   ;;  %v8688_v54 = vadd.f32 %v24325_v13, %v8645_v48  ;;  %v11847_v14 = vpop.f32.mrf.mxu0  ;;  %v21100_v48 = vld [vmem:[%s22876_s14 + $0xb0c] ss:$16 sps:$4 sm:$0xff]  }
 0x7c6   : > { %v8729_v32 = vadd.f32 %v24319_v5, %v8686_v15  ;;  %v26024_v13 = vld [vmem:[#allocation34_spill] sm:$0xff]  ;;  %v25004_v31 = vpop.f32.mrf.mxu1 }
 0x7c7   : > { %12254 = vmatpush2.bf16.msra.mxu0 %v21053_v1  ;;  %v8690_v1 = vadd.f32 %v24334_v7, %v8647_v55  ;;  %v8731_v17 = vadd.f32 %v26024_v13, %v8688_v54  ;;  %v21109_v13 = vld [vmem:[%s22876_s14 + $0xccc] ss:$16 sps:$4 sm:$0xff]  }
 0x7c8   : > { %12297 = vmatpush2.bf16.msra.mxu1 %v21056_v46  ;;  %12255 = vmatprep.subr.bf16.mxu0 %v21061_v58  ;;  %v21080_v46 = vld [vmem:[%s22876_s14 + $0xb68] ss:$16 sps:$4 sm:$0xff]   ;;  %v8649_v58 = vadd.f32 %v24313_v10, %v8606_v50  ;;  %v11756_v5 = vadd.f32 %v24921_v30, %v8729_v32  ;;  %v11970_v33 = vpop.f32.mrf.mxu1  ;;  %v21091_v30 = vld [vmem:[%s22876_s14 + $0x92c] ss:$16 sps:$4 sm:$0xff]   ;;  %v25027_v50 = vshrl.u32 %v12411_v41, 7 }
 0x7c9   : > { %12298 = vmatprep.subr.bf16.mxu1 %v21064_v63  ;;  %v21088_v63 = vld [vmem:[%s22876_s14 + $0xb4c] ss:$16 sps:$4 sm:$0xff]   ;;  %v11758_v42 = vadd.f32 %v24929_v49, %v8731_v17  ;;  %v21083_v10 = vld [vmem:[%s22876_s14 + $0x948] ss:$16 sps:$4 sm:$0xff]  }
 0x7ca   : > { %v8692_v7 = vadd.f32 %v26025_v47, %v8649_v58  ;;  %v11799_v11 = vadd.f32 %v24923_v60, %v11756_v5  ;;  %v11972_v60 = vpop.f32.mrf.mxu1  ;;  %v21101_v32 = vld [vmem:[%s22876_s14 + $0xce8] ss:$16 sps:$4 sm:$0xff]   ;;  %v21112_v17 = vld [vmem:[%s22876_s14 + $0xecc] ss:$16 sps:$4 sm:$0xff]  }
 0x7cb   : > { %12256 = vmatpush2.bf16.msra.mxu0 %v21059_v51  ;;  %v26026_v51 = vld [vmem:[#allocation35_spill] sm:$0xff] }
 0x7cc   : > { %12299 = vmatpush2.bf16.msra.mxu1 %v21062_v2  ;;  %12257 = vmatprep.subr.bf16.mxu0 %v21067_v37  ;;  %v8733_v2 = vadd.f32 %v26026_v51, %v8690_v1  ;;  %v21086_v37 = vld [vmem:[%s22876_s14 + $0xb48] ss:$16 sps:$4 sm:$0xff]   ;;  %v8735_v49 = vadd.f32 %v26027_v39, %v8692_v7  ;;  %v11974_v55 = vpop.f32.mrf.mxu1 }
 0x7cd   : > { %12300 = vmatprep.subr.bf16.mxu1 %v21070_v45  ;;  %v11927_v45 = vpop.f32.mrf.mxu0  ;;  %v21104_v58 = vld [vmem:[%s22876_s14 + $0xee8] ss:$16 sps:$4 sm:$0xff]  }
 0x7ce   : > { %v11760_v25 = vadd.f32 %v24942_v52, %v8733_v2  ;;  %v11762_v27 = vadd.f32 %v24957_v9, %v8735_v49  ;;  %v21097_v52 = vld [vmem:[%s22876_s14 + $0x90c] ss:$16 sps:$4 sm:$0xff]   ;;  %v21098_v9 = vld [vmem:[%s22876_s14 + $0xb08] ss:$16 sps:$4 sm:$0xff]  }
 0x7cf   : > { %12258 = vmatpush2.bf16.msra.mxu0 %v21065_v43  ;;  %v11801_v43 = vadd.f32 %v24931_v6, %v11758_v42  ;;  %v11929_v19 = vpop.f32.mrf.mxu0  ;;  %v26028_v51 = vld [vmem:[#allocation38_spill] sm:$0xff] }
 0x7d0   : > { %12301 = vmatpush2.bf16.msra.mxu1 %v21068_v62  ;;  %12259 = vmatprep.subr.bf16.mxu0 %v21073_v3  ;;  %v11842_v62 = vadd.f32 %v24966_v35, %v11799_v11  ;;  %v21089_v3 = vld [vmem:[%s22876_s14 + $0x928] ss:$16 sps:$4 sm:$0xff]   ;;  %v11803_v6 = vadd.f32 %v24944_v57, %v11760_v25  ;;  %v21103_v57 = vld [vmem:[%s22876_s14 + $0xcec] ss:$16 sps:$4 sm:$0xff]  }
 0x7d1   : > { %12302 = vmatprep.subr.bf16.mxu1 %v21076_v29  ;;  %v21092_v29 = vld [vmem:[%s22876_s14 + $0xb28] ss:$16 sps:$4 sm:$0xff]   ;;  %v11844_v35 = vadd.f32 %v24979_v20, %v11801_v43  ;;  %v21106_v20 = vld [vmem:[%s22876_s14 + $0xeec] ss:$16 sps:$4 sm:$0xff]  }
 0x7d2   : > { %v11885_v15 = vadd.f32 %v24968_v18, %v11842_v62  ;;  %v21118_v11 = vld [vmem:[%s22876_s14 + $0xeac] ss:$16 sps:$4 sm:$0xff]  }
 0x7d3   : > { %12260 = vmatpush2.bf16.msra.mxu0 %v21071_v59  ;;  %v11846_v59 = vadd.f32 %v11845_v36, %v11803_v6  ;;  %v11887_v18 = vadd.f32 %v24981_v53, %v11844_v35  ;;  %v12417_v53 = vsub.s32 1, %v25027_v50 }
 0x7d4   : > { %12303 = vmatpush2.bf16.msra.mxu1 %v21074_v4  ;;  %12261 = vmatprep.subr.bf16.mxu0 %v21079_v22  ;;  %v21095_v4 = vld [vmem:[%s22876_s14 + $0x908] ss:$16 sps:$4 sm:$0xff]   ;;  %v11805_v22 = vadd.f32 %v24959_v21, %v11762_v27  ;;  %v11928_v54 = vadd.f32 %v11927_v45, %v11885_v15  ;;  %v25037_v21 = vld [vmem:[%s572_s26] sm:$0xf] }
 0x7d5   : > { %12304 = vmatprep.subr.bf16.mxu1 %v21082_v28  ;;  %v11931_v28 = vpop.f32.mrf.mxu0  ;;  %v11889_v1 = vadd.f32 %v24992_v26, %v11846_v59  ;;  %v21110_v45 = vld [vmem:[%s22876_s14 + $0xec8] ss:$16 sps:$4 sm:$0xff]  }
 0x7d6   : > { %v11848_v36 = vadd.f32 %v11847_v14, %v11805_v22  ;;  %v11971_v26 = vadd.f32 %v11970_v33, %v11928_v54  ;;  %v21113_v27 = vld [vmem:[%s22876_s14 + $0xca8] ss:$16 sps:$4 sm:$0xff]  }
 0x7d7   : > { %12262 = vmatpush2.bf16.msra.mxu0 %v21077_v44  ;;  %v11930_v44 = vadd.f32 %v11929_v19, %v11887_v18  ;;  %v11932_v5 = vadd.f32 %v11931_v28, %v11889_v1  ;;  %v21116_v19 = vld [vmem:[%s22876_s14 + $0xea8] ss:$16 sps:$4 sm:$0xff]   ;;  %v21130_v18 = vld [vmem:[%s22876_s14 + $0xe6c] ss:$16 sps:$4 sm:$0xff]  }
 0x7d8   : > { %12305 = vmatpush2.bf16.msra.mxu1 %v21080_v46  ;;  %12263 = vmatprep.subr.bf16.mxu0 %v21085_v61  ;;  %v12413_v46 = vsub.s32 0, %v25027_v50  ;;  %v11933_v61 = vpop.f32.mrf.mxu0  ;;  %v11891_v47 = vadd.f32 %v25004_v31, %v11848_v36  ;;  %v12418_v31 = vrot.slane %v25037_v21, %v12417_v53  ;;  %v21119_v59 = vld [vmem:[%s22876_s14 + $0xc88] ss:$16 sps:$4 sm:$0xff]  }
 0x7d9   : > { %12306 = vmatprep.subr.bf16.mxu1 %v21088_v63  ;;  %v11976_v63 = vpop.f32.mrf.mxu1  ;;  %v11973_v2 = vadd.f32 %v11972_v60, %v11930_v44  ;;  %v11975_v25 = vadd.f32 %v11974_v55, %v11932_v5  ;;  %v21122_v55 = vld [vmem:[%s22876_s14 + $0xe88] ss:$16 sps:$4 sm:$0xff]   ;;  %v21142_v5 = vld [vmem:[%s22876_s14 + $0xe2c] ss:$16 sps:$4 sm:$0xff]  }
 0x7da   : > { %v11934_v33 = vadd.f32 %v11933_v61, %v11891_v47  ;;  %v21125_v44 = vld [vmem:[%s22876_s14 + $0xc68] ss:$16 sps:$4 sm:$0xff]   ;;  %v21133_v61 = vld [vmem:[%s22876_s14 + $0xc4c] ss:$16 sps:$4 sm:$0xff]  }
 0x7db   : > { %12264 = vmatpush2.bf16.msra.mxu0 %v21083_v10  ;;  %v12414_v10 = vrot.slane %v25037_v21, %v12413_v46  ;;  %v21128_v46 = vld [vmem:[%s22876_s14 + $0xe68] ss:$16 sps:$4 sm:$0xff]  }
 0x7dc   : > { %12307 = vmatpush2.bf16.msra.mxu1 %v21086_v37  ;;  %12265 = vmatprep.subr.bf16.mxu0 %v21091_v30  ;;  %v21107_v37 = vld [vmem:[%s22876_s14 + $0xcc8] ss:$16 sps:$4 sm:$0xff]   ;;  %v11977_v60 = vadd.f32 %v11976_v63, %v11934_v33  ;;  %v21136_v63 = vld [vmem:[%s22876_s14 + $0xe4c] ss:$16 sps:$4 sm:$0xff]  }
 0x7dd   : > { %12308 = vmatprep.subr.bf16.mxu1 %v21094_v34  ;;  %v21137_v47 = vld [vmem:[%s22876_s14 + $0xc28] ss:$16 sps:$4 sm:$0xff]   ;;  %v21151_v33 = vld [vmem:[%s22876_s14 + $0xdec] ss:$16 sps:$4 sm:$0xff]  }
 0x7df   : > { %12266 = vmatpush2.bf16.msra.mxu0 %v21089_v3 }
 0x7e0   : > { %12309 = vmatpush2.bf16.msra.mxu1 %v21092_v29  ;;  %12267 = vmatprep.subr.bf16.mxu0 %v21097_v52 }
 0x7e1   : > { %12310 = vmatprep.subr.bf16.mxu1 %v21100_v48  ;;  %v21124_v48 = vld [vmem:[%s22876_s14 + $0xe8c] ss:$16 sps:$4 sm:$0xff]  }
 0x7e3   : > { %12268 = vmatpush2.bf16.msra.mxu0 %v21095_v4 }
 0x7e4   : > { %12311 = vmatpush2.bf16.msra.mxu1 %v21098_v9  ;;  %12323 = vmatprep.subr.bf16.mxu0 %v21103_v57 }
 0x7e5   : > { %12366 = vmatprep.subr.bf16.mxu1 %v21106_v20  ;;  %v21127_v20 = vld [vmem:[%s22876_s14 + $0xc6c] ss:$16 sps:$4 sm:$0xff]  }
 0x7e6   : > { %v12013_v7 = vpop.f32.mrf.mxu0  ;;  %12270 = vmatmul.mubr.bf16.vlgmr.msra.gmra.mxu0 %v24647_v38  ;;  %v21115_v38 = vld [vmem:[%s22876_s14 + $0xcac] ss:$16 sps:$4 sm:$0xff]  }
 0x7e7   : > { %v12056_v14 = vpop.f32.mrf.mxu1  ;;  %12313 = vmatmul.mubr.bf16.vlgmr.msra.gmra.mxu1 %v26028_v51  ;;  %v12014_v42 = vadd.f32 %v12013_v7, %v11971_v26  ;;  %12324 = vmatpush1.bf16.msra.mxu0 %v21101_v32  ;;  %v21139_v26 = vld [vmem:[%s22876_s14 + $0xc2c] ss:$16 sps:$4 sm:$0xff]   ;;  %v21140_v7 = vld [vmem:[%s22876_s14 + $0xe28] ss:$16 sps:$4 sm:$0xff]  }
 0x7e8   : > { %12367 = vmatpush1.bf16.msra.mxu1 %v21104_v58  ;;  %v12015_v30 = vpop.f32.mrf.mxu0  ;;  %12325 = vmatprep.subr.bf16.mxu0 %v21109_v13  ;;  %v21131_v13 = vld [vmem:[%s22876_s14 + $0xc48] ss:$16 sps:$4 sm:$0xff]   ;;  %v21148_v51 = vld [vmem:[%s22876_s14 + $0xe0c] ss:$16 sps:$4 sm:$0xff]  }
 0x7e9   : > { %v12058_v34 = vpop.f32.mrf.mxu1  ;;  %12368 = vmatprep.subr.bf16.mxu1 %v21112_v17  ;;  %v12057_v39 = vadd.f32 %v12056_v14, %v12014_v42  ;;  %v12016_v49 = vadd.f32 %v12015_v30, %v11973_v2  ;;  %12355 = vmatprep.mubr.bf16.mxu0 %v24665_v16  ;;  %v21121_v16 = vld [vmem:[%s22876_s14 + $0xc8c] ss:$16 sps:$4 sm:$0xff]   ;;  %v21134_v17 = vld [vmem:[%s22876_s14 + $0xe48] ss:$16 sps:$4 sm:$0xff]  }
 0x7ea   : > { %12398 = vmatprep.mubr.bf16.mxu1 %v24669_v8  ;;  %v12017_v43 = vpop.f32.mrf.mxu0  ;;  %v21145_v14 = vld [vmem:[%s22876_s14 + $0xc0c] ss:$16 sps:$4 sm:$0xff]  }
 0x7eb   : > { %v25055_v62 = vadd.f32 %v12414_v10, %v12057_v39  ;;  %v12059_v3 = vadd.f32 %v12058_v34, %v12016_v49  ;;  %v12018_v29 = vadd.f32 %v12017_v43, %v11975_v25  ;;  %v12060_v41 = vpop.f32.mrf.mxu1  ;;  %12326 = vmatpush1.bf16.msra.mxu0 %v21107_v37  ;;  %v21146_v37 = vld [vmem:[%s22876_s14 + $0xe08] ss:$16 sps:$4 sm:$0xff]   ;;  %v21154_v30 = vld [vmem:[%s22876_s14 + $0xfec] ss:$16 sps:$4 sm:$0xff]  }
 0x7ec   : > { %12369 = vmatpush1.bf16.msra.mxu1 %v21110_v45  ;;  %v12019_v52 = vpop.f32.mrf.mxu0  ;;  %12327 = vmatprep.subr.bf16.mxu0 %v21115_v38  ;;  %v21149_v25 = vld [vmem:[%s22876_s14 + $0xde8] ss:$16 sps:$4 sm:$0xff]  }
 0x7ed   : > { %12370 = vmatprep.subr.bf16.mxu1 %v21118_v11  ;;  %v12447_v8 = vmin.f32 %v25055_v62, 0.0  ;;  %v25062_v6 = vadd.f32 %v12418_v31, %v12059_v3  ;;  %v12061_v35 = vadd.f32 %v12060_v41, %v12018_v29  ;;  %v12020_v15 = vadd.f32 %v12019_v52, %v11977_v60  ;;  %v12062_v28 = vpop.f32.mrf.mxu1  ;;  %v21152_v39 = vld [vmem:[%s22876_s14 + $0xfe8] ss:$16 sps:$4 sm:$0xff]   ;;  %v21157_v3 = vld [vmem:[%s22876_s14 + $0xdcc] ss:$16 sps:$4 sm:$0xff]  }
 0x7ee   : > { %vm12439_vm1 = vcmp.gt.f32.partialorder %v25055_v62, 0.0  ;;  %v21160_v29 = vld [vmem:[%s22876_s14 + $0xfcc] ss:$16 sps:$4 sm:$0xff]  }
 0x7ef   : > { %v12455_v4 = vmul.f32 1.442695, %v12447_v8  ;;  %v12448_v9 = vmin.f32 %v25062_v6, 0.0  ;;  %v25066_v22 = vadd.f32 %v12414_v10, %v12061_v35  ;;  %12328 = vmatpush1.bf16.msra.mxu0 %v21113_v27  ;;  %v12063_v57 = vadd.f32 %v12062_v28, %v12020_v15  ;;  %v21143_v10 = vld [vmem:[%s22876_s14 + $0xc08] ss:$16 sps:$4 sm:$0xff]  }
 0x7f0   : > { %12371 = vmatpush1.bf16.msra.mxu1 %v21116_v19  ;;  %12329 = vmatprep.subr.bf16.mxu0 %v21121_v16  ;;  %vm12440_vm2 = vcmp.gt.f32.partialorder %v25062_v6, 0.0  ;;  %v21155_v27 = vld [vmem:[%s22876_s14 + $0xdc8] ss:$16 sps:$4 sm:$0xff]   ;;  %v21163_v16 = vld [vmem:[%s22876_s14 + $0xdac] ss:$16 sps:$4 sm:$0xff]  }
 0x7f1   : > { %12372 = vmatprep.subr.bf16.mxu1 %v21124_v48  ;;  %21197 = vpow2.f32 %v12455_v4  ;;  %v12457_v54 = vmul.f32 1.442695, %v12448_v9  ;;  %v12451_v36 = vmin.f32 %v25066_v22, 0.0  ;;  %v25072_v32 = vadd.f32 %v12418_v31, %v12063_v57  ;;  %v21158_v19 = vld [vmem:[%s22876_s14 + $0xfc8] ss:$16 sps:$4 sm:$0xff]  }
 0x7f2   : > { %vm12443_vm3 = vcmp.gt.f32.partialorder %v25066_v22, 0.0  ;;  %v21166_v48 = vld [vmem:[%s22876_s14 + $0xfac] ss:$16 sps:$4 sm:$0xff]   ;;  %v21164_v35 = vld [vmem:[%s22876_s14 + $0xfa8] ss:$16 sps:$4 sm:$0xff]  }
 0x7f3   : > { %21199 = vpow2.f32 %v12457_v54  ;;  %v12463_v1 = vmul.f32 1.442695, %v12451_v36  ;;  %12330 = vmatpush1.bf16.msra.mxu0 %v21119_v59  ;;  %v12452_v58 = vmin.f32 %v25072_v32, 0.0  ;;  %vm12444_vm4 = vcmp.gt.f32.partialorder %v25072_v32, 0.0  ;;  %v21169_v15 = vld [vmem:[%s22876_s14 + $0xd8c] ss:$16 sps:$4 sm:$0xff]  }
 0x7f4   : > { %12373 = vmatpush1.bf16.msra.mxu1 %v21122_v55  ;;  %12331 = vmatprep.subr.bf16.mxu0 %v21127_v20  ;;  %v21172_v59 = vld [vmem:[%s22876_s14 + $0xf8c] ss:$16 sps:$4 sm:$0xff]   ;;  %v21167_v4 = vld [vmem:[%s22876_s14 + $0xd88] ss:$16 sps:$4 sm:$0xff]  }
 0x7f5   : > { %12374 = vmatprep.subr.bf16.mxu1 %v21130_v18  ;;  %21201 = vpow2.f32 %v12463_v1  ;;  %v12465_v53 = vmul.f32 1.442695, %v12452_v58  ;;  %v21170_v9 = vld [vmem:[%s22876_s14 + $0xf88] ss:$16 sps:$4 sm:$0xff]   ;;  %v21178_v28 = vld [vmem:[%s22876_s14 + $0xf6c] ss:$16 sps:$4 sm:$0xff]  }
 0x7f6   : > { %v21173_v55 = vld [vmem:[%s22876_s14 + $0xd68] ss:$16 sps:$4 sm:$0xff]   ;;  %v21181_v20 = vld [vmem:[%s22876_s14 + $0xd4c] ss:$16 sps:$4 sm:$0xff]  }
 0x7f7   : > { %12332 = vmatpush1.bf16.msra.mxu0 %v21125_v44  ;;  %21203 = vpow2.f32 %v12465_v53  ;;  %v21176_v57 = vld [vmem:[%s22876_s14 + $0xf68] ss:$16 sps:$4 sm:$0xff]   ;;  %v21184_v18 = vld [vmem:[%s22876_s14 + $0xf4c] ss:$16 sps:$4 sm:$0xff]  }
 0x7f8   : > { %12375 = vmatpush1.bf16.msra.mxu1 %v21128_v46  ;;  %12333 = vmatprep.subr.bf16.mxu0 %v21133_v61  ;;  %v21179_v54 = vld [vmem:[%s22876_s14 + $0xd48] ss:$16 sps:$4 sm:$0xff]   ;;  %v21190_v1 = vld [vmem:[%s22876_s14 + $0xf2c] ss:$16 sps:$4 sm:$0xff]  }
 0x7f9   : > { %12376 = vmatprep.subr.bf16.mxu1 %v21136_v63  ;;  %v21182_v36 = vld [vmem:[%s22876_s14 + $0xf48] ss:$16 sps:$4 sm:$0xff]   ;;  %v21193_v58 = vld [vmem:[%s22876_s14 + $0xd0c] ss:$16 sps:$4 sm:$0xff]  }
 0x7fa   : > { %v21185_v44 = vld [vmem:[%s22876_s14 + $0xd28] ss:$16 sps:$4 sm:$0xff]   ;;  %v21196_v61 = vld [vmem:[%s22876_s14 + $0xf0c] ss:$16 sps:$4 sm:$0xff]  }
 0x7fb   : > { %12334 = vmatpush1.bf16.msra.mxu0 %v21131_v13  ;;  %v21188_v46 = vld [vmem:[%s22876_s14 + $0xf28] ss:$16 sps:$4 sm:$0xff]  }
 0x7fc   : > { %12377 = vmatpush1.bf16.msra.mxu1 %v21134_v17  ;;  %12335 = vmatprep.subr.bf16.mxu0 %v21139_v26  ;;  %v21191_v63 = vld [vmem:[%s22876_s14 + $0xd08] ss:$16 sps:$4 sm:$0xff]  }
 0x7fd   : > { %12378 = vmatprep.subr.bf16.mxu1 %v21142_v5  ;;  %v21194_v53 = vld [vmem:[%s22876_s14 + $0xf08] ss:$16 sps:$4 sm:$0xff]  }
 0x7fe   : > { %v21198_v2 = vpop.eup %21197 }
 0x7ff   : > { %v18751_v42 = vadd.f32 -1.0, %v21198_v2  ;;  %12336 = vmatpush1.bf16.msra.mxu0 %v21137_v47 }
 0x800   : > { %12379 = vmatpush1.bf16.msra.mxu1 %v21140_v7  ;;  %v21200_v45 = vpop.eup %21199  ;;  %12337 = vmatprep.subr.bf16.mxu0 %v21145_v14 }
 0x801   : > { %12380 = vmatprep.subr.bf16.mxu1 %v21148_v51  ;;  %v18752_v34 = vadd.f32 -1.0, %v21200_v45  ;;  %v12479_v38 = vsel %vm12439_vm1, %v25055_v62, %v18751_v42 }
 0x802   : > { %v21202_v31 = vpop.eup %21201 }
 0x803   : > { %v12480_v11 = vsel %vm12440_vm2, %v25062_v6, %v18752_v34  ;;  %12338 = vmatpush1.bf16.msra.mxu0 %v21143_v10  ;;  %v18755_v43 = vadd.f32 -1.0, %v21202_v31  ;;  %v21161_v6 = vld [vmem:[%s22876_s14 + $0xda8] ss:$16 sps:$4 sm:$0xff]  }
 0x804   : > { %12381 = vmatpush1.bf16.msra.mxu1 %v21146_v37  ;;  %v19395_v49 = vpack.c.bf16 %v12480_v11, %v12479_v38  ;;  %12339 = vmatprep.subr.bf16.mxu0 %v21151_v33  ;;  %v21204_v41 = vpop.eup %21203 }
 0x805   : > { %12382 = vmatprep.subr.bf16.mxu1 %v21154_v30  ;;  %v18756_v62 = vadd.f32 -1.0, %v21204_v41  ;;  %v12483_v60 = vsel %vm12443_vm3, %v25066_v22, %v18755_v43  ;;  %v21175_v22 = vld [vmem:[%s22876_s14 + $0xd6c] ss:$16 sps:$4 sm:$0xff]  }
 0x806   : > { %12515 = vst [vmem:[%s25100_s21] sm:$0xff] %v19395_v49 }
 0x807   : > { %12340 = vmatpush2.bf16.msra.mxu0 %v21149_v25  ;;  %v12484_v52 = vsel %vm12444_vm4, %v25072_v32, %v18756_v62  ;;  %v21187_v32 = vld [vmem:[%s22876_s14 + $0xd2c] ss:$16 sps:$4 sm:$0xff]  }
 0x808   : > { %12383 = vmatpush2.bf16.msra.mxu1 %v21152_v39  ;;  %12341 = vmatprep.subr.bf16.mxu0 %v21157_v3  ;;  %v19397_v8 = vpack.c.bf16 %v12484_v52, %v12483_v60 }
 0x809   : > { %12384 = vmatprep.subr.bf16.mxu1 %v21160_v29 }
 0x80a   : > { %12517 = vst [vmem:[%s25100_s21 + $0x10] sm:$0xff] %v19397_v8 }
 0x80b   : > { %12342 = vmatpush2.bf16.msra.mxu0 %v21155_v27 }
 0x80c   : > { %12385 = vmatpush2.bf16.msra.mxu1 %v21158_v19  ;;  %12343 = vmatprep.subr.bf16.mxu0 %v21163_v16 }
 0x80d   : > { %12386 = vmatprep.subr.bf16.mxu1 %v21166_v48 }
 0x80f   : > { %12344 = vmatpush2.bf16.msra.mxu0 %v21161_v6 }
 0x810   : > { %12387 = vmatpush2.bf16.msra.mxu1 %v21164_v35  ;;  %12345 = vmatprep.subr.bf16.mxu0 %v21169_v15 }
 0x811   : > { %12388 = vmatprep.subr.bf16.mxu1 %v21172_v59 }
 0x813   : > { %12346 = vmatpush2.bf16.msra.mxu0 %v21167_v4  ;;  %v12425_v4 = vsub.s32 3, %v25027_v50 }
 0x814   : > { %12389 = vmatpush2.bf16.msra.mxu1 %v21170_v9  ;;  %12347 = vmatprep.subr.bf16.mxu0 %v21175_v22 }
 0x815   : > { %12390 = vmatprep.subr.bf16.mxu1 %v21178_v28 }
 0x817   : > { %12348 = vmatpush2.bf16.msra.mxu0 %v21173_v55 }
 0x818   : > { %12391 = vmatpush2.bf16.msra.mxu1 %v21176_v57  ;;  %12349 = vmatprep.subr.bf16.mxu0 %v21181_v20 }
 0x819   : > { %12392 = vmatprep.subr.bf16.mxu1 %v21184_v18 }
 0x81b   : > { %12350 = vmatpush2.bf16.msra.mxu0 %v21179_v54 }
 0x81c   : > { %12393 = vmatpush2.bf16.msra.mxu1 %v21182_v36  ;;  %12351 = vmatprep.subr.bf16.mxu0 %v21187_v32 }
 0x81d   : > { %12394 = vmatprep.subr.bf16.mxu1 %v21190_v1 }
 0x81f   : > { %12352 = vmatpush2.bf16.msra.mxu0 %v21185_v44 }
 0x820   : > { %12395 = vmatpush2.bf16.msra.mxu1 %v21188_v46  ;;  %12353 = vmatprep.subr.bf16.mxu0 %v21193_v58  ;;  %v12426_v46 = vrot.slane %v25037_v21, %v12425_v4 }
 0x821   : > { %12396 = vmatprep.subr.bf16.mxu1 %v21196_v61 }
 0x823   : > { %12354 = vmatpush2.bf16.msra.mxu0 %v21191_v63 }
 0x824   : > { %12397 = vmatpush2.bf16.msra.mxu1 %v21194_v53 }
 0x826   : > { %12356 = vmatmul.mubr.bf16.vlgmr.msra.gmra.mxu0 %v24749_v0  ;;  %v12099_v13 = vpop.f32.mrf.mxu0 }
 0x827   : > { %12399 = vmatmul.mubr.bf16.vlgmr.msra.gmra.mxu1 %v24753_v56  ;;  %v12142_v17 = vpop.f32.mrf.mxu1  ;;  %v12100_v30 = vadd.f32 %v12099_v13, %v24678_v24 }
 0x828   : > { %v12101_v26 = vpop.f32.mrf.mxu0 }
 0x829   : > { %v12144_v5 = vpop.f32.mrf.mxu1  ;;  %v12102_v56 = vadd.f32 %v12101_v26, %v24683_v23  ;;  %v12143_v11 = vadd.f32 %v12142_v17, %v12100_v30 }
 0x82a   : > { %v12103_v47 = vpop.f32.mrf.mxu0 }
 0x82b   : > { %v12146_v7 = vpop.f32.mrf.mxu1  ;;  %v12104_v25 = vadd.f32 %v12103_v47, %v24690_v40  ;;  %v12145_v39 = vadd.f32 %v12144_v5, %v12102_v56  ;;  %v12421_v40 = vsub.s32 2, %v25027_v50 }
 0x82c   : > { %v12105_v14 = vpop.f32.mrf.mxu0 }
 0x82d   : > { %v12148_v51 = vpop.f32.mrf.mxu1  ;;  %v12106_v43 = vadd.f32 %v12105_v14, %v24693_v12  ;;  %v12147_v41 = vadd.f32 %v12146_v7, %v12104_v25  ;;  %v12422_v20 = vrot.slane %v25037_v21, %v12421_v40 }
 0x82f   : > { %v12149_v24 = vadd.f32 %v12148_v51, %v12106_v43 }
 0x866   : > { %v12185_v2 = vpop.f32.mrf.mxu0 }
 0x867   : > { %v12228_v42 = vpop.f32.mrf.mxu1  ;;  %v12186_v49 = vadd.f32 %v12185_v2, %v12143_v11 }
 0x868   : > { %v12187_v10 = vpop.f32.mrf.mxu0 }
 0x869   : > { %v12230_v37 = vpop.f32.mrf.mxu1  ;;  %v12188_v62 = vadd.f32 %v12187_v10, %v12145_v39  ;;  %v12229_v27 = vadd.f32 %v12228_v42, %v12186_v49 }
 0x86a   : > { %v12189_v45 = vpop.f32.mrf.mxu0 }
 0x86b   : > { %v12232_v33 = vpop.f32.mrf.mxu1  ;;  %v12190_v19 = vadd.f32 %v12189_v45, %v12147_v41  ;;  %v12231_v16 = vadd.f32 %v12230_v37, %v12188_v62 }
 0x86c   : > { %v12191_v34 = vpop.f32.mrf.mxu0 }
 0x86d   : > { %v12234_v0 = vpop.f32.mrf.mxu1  ;;  %v12192_v48 = vadd.f32 %v12191_v34, %v12149_v24  ;;  %v12233_v8 = vadd.f32 %v12232_v33, %v12190_v19 }
 0x86f   : > { %v12235_v9 = vadd.f32 %v12234_v0, %v12192_v48 }
 0x8a6   : > { %v12271_v31 = vpop.f32.mrf.mxu0 }
 0x8a7   : > { %v12314_v38 = vpop.f32.mrf.mxu1  ;;  %v12272_v23 = vadd.f32 %v12271_v31, %v12229_v27 }
 0x8a8   : > { %v12273_v3 = vpop.f32.mrf.mxu0 }
 0x8a9   : > { %v12316_v29 = vpop.f32.mrf.mxu1  ;;  %v12274_v6 = vadd.f32 %v12273_v3, %v12231_v16  ;;  %v12315_v59 = vadd.f32 %v12314_v38, %v12272_v23 }
 0x8aa   : > { %v12275_v60 = vpop.f32.mrf.mxu0 }
 0x8ab   : > { %v12318_v52 = vpop.f32.mrf.mxu1  ;;  %v12276_v12 = vadd.f32 %v12275_v60, %v12233_v8  ;;  %v12317_v55 = vadd.f32 %v12316_v29, %v12274_v6 }
 0x8ac   : > { %v12277_v35 = vpop.f32.mrf.mxu0 }
 0x8ad   : > { %v12320_v15 = vpop.f32.mrf.mxu1  ;;  %v12278_v18 = vadd.f32 %v12277_v35, %v12235_v9  ;;  %v12319_v32 = vadd.f32 %v12318_v52, %v12276_v12 }
 0x8af   : > { %v12321_v13 = vadd.f32 %v12320_v15, %v12278_v18 }
 0x8e6   : > { %v12357_v22 = vpop.f32.mrf.mxu0 }
 0x8e7   : > { %v12400_v28 = vpop.f32.mrf.mxu1  ;;  %v12358_v57 = vadd.f32 %v12357_v22, %v12315_v59 }
 0x8e8   : > { %v12359_v54 = vpop.f32.mrf.mxu0 }
 0x8e9   : > { %v12402_v36 = vpop.f32.mrf.mxu1  ;;  %v12401_v1 = vadd.f32 %v12400_v28, %v12358_v57  ;;  %v12360_v44 = vadd.f32 %v12359_v54, %v12317_v55 }
 0x8ea   : > { %v12361_v58 = vpop.f32.mrf.mxu0 }
 0x8eb   : > { %v12433_v61 = vadd.f32 %v12422_v20, %v12401_v1  ;;  %v12403_v63 = vadd.f32 %v12402_v36, %v12360_v44  ;;  %v12362_v53 = vadd.f32 %v12361_v58, %v12319_v32  ;;  %v12404_v50 = vpop.f32.mrf.mxu1 }
 0x8ec   : > { %v12363_v17 = vpop.f32.mrf.mxu0 }
 0x8ed   : > { %v12449_v26 = vmin.f32 %v12433_v61, 0.0  ;;  %v12434_v5 = vadd.f32 %v12426_v46, %v12403_v63  ;;  %v12405_v47 = vadd.f32 %v12404_v50, %v12362_v53  ;;  %v12364_v7 = vadd.f32 %v12363_v17, %v12321_v13  ;;  %v12406_v42 = vpop.f32.mrf.mxu1 }
 0x8ee   : > { %vm12441_vm5 = vcmp.gt.f32.partialorder %v12433_v61, 0.0 }
 0x8ef   : > { %v12459_v14 = vmul.f32 1.442695, %v12449_v26  ;;  %v12450_v51 = vmin.f32 %v12434_v5, 0.0  ;;  %v12437_v2 = vadd.f32 %v12422_v20, %v12405_v47  ;;  %v12407_v10 = vadd.f32 %v12406_v42, %v12364_v7 }
 0x8f0   : > { %vm12442_vm6 = vcmp.gt.f32.partialorder %v12434_v5, 0.0 }
 0x8f1   : > { %21205 = vpow2.f32 %v12459_v14  ;;  %v12461_v37 = vmul.f32 1.442695, %v12450_v51  ;;  %v12453_v45 = vmin.f32 %v12437_v2, 0.0  ;;  %v12438_v21 = vadd.f32 %v12426_v46, %v12407_v10 }
 0x8f2   : > { %vm12445_vm7 = vcmp.gt.f32.partialorder %v12437_v2, 0.0 }
 0x8f3   : > { %21207 = vpow2.f32 %v12461_v37  ;;  %v12467_v33 = vmul.f32 1.442695, %v12453_v45  ;;  %v12454_v30 = vmin.f32 %v12438_v21, 0.0  ;;  %vm12446_vm8 = vcmp.gt.f32.partialorder %v12438_v21, 0.0 }
 0x8f5   : > { %21209 = vpow2.f32 %v12467_v33  ;;  %v12469_v34 = vmul.f32 1.442695, %v12454_v30 }
 0x8f7   : > { %21211 = vpow2.f32 %v12469_v34 }
 0x8fe   : > { %v21206_v0 = vpop.eup %21205 }
 0x8ff   : > { %v18753_v56 = vadd.f32 -1.0, %v21206_v0 }
 0x900   : > { %v21208_v31 = vpop.eup %21207 }
 0x901   : > { %v18754_v38 = vadd.f32 -1.0, %v21208_v31  ;;  %v12481_v25 = vsel %vm12441_vm5, %v12433_v61, %v18753_v56 }
 0x902   : > { %v21210_v11 = vpop.eup %21209 }
 0x903   : > { %v12482_v39 = vsel %vm12442_vm6, %v12434_v5, %v18754_v38  ;;  %v18757_v43 = vadd.f32 -1.0, %v21210_v11 }
 0x904   : > { %v19396_v49 = vpack.c.bf16 %v12482_v39, %v12481_v25  ;;  %v21212_v3 = vpop.eup %21211 }
 0x905   : > { %v18758_v29 = vadd.f32 -1.0, %v21212_v3  ;;  %v12485_v41 = vsel %vm12445_vm7, %v12437_v2, %v18757_v43 }
 0x906   : > { %12516 = vst [vmem:[%s25100_s21 + $0x8] sm:$0xff] %v19396_v49 }
 0x907   : > { %v12486_v62 = vsel %vm12446_vm8, %v12438_v21, %v18758_v29 }
 0x908   : > { %v19398_v27 = vpack.c.bf16 %v12486_v62, %v12485_v41 }
 0x90a   : > { %12518 = vst [vmem:[%s25100_s21 + $0x18] sm:$0xff] %v19398_v27 }
 0x90b PF: > { %12522 = sbr.rel (%p4691_p7) target bundleno = 3286 (0xcd6), region = 100  ;;  %s18767_s14 = sadd.s32 (!%p4691_p7), 4294967290, %s22676_s2 }
 0x90c   : > { %p18768_p3 = scmp.ne.s32.totalorder (!%p4691_p7), %s18767_s14, 0 }
 0x910   : > { %12527 = sbr.rel (%p18768_p3) target bundleno = 2327 (0x917), region = 104 }
 0x915   : > { %v22398_v19 = vmov 0.0  }
 0x916   : > { %12528 = vst [vmem:[#allocation4] sm:$0xff] %v22398_v19  ;;  %12529 = vst [vmem:[#allocation4 + $0x8] sm:$0xff] %v22398_v19 }
 0x917 PF: > { %v21213_v24 = vld [vmem:[%s22890_s7 + $0x4e4] ss:$16 sps:$4 sm:$0xff]   ;;  %v21217_v52 = vld [vmem:[%s22890_s7 + $0x4e0] ss:$16 sps:$4 sm:$0xff]   ;;  %v21311_v0 = vld [vmem:[#allocation3 + $0x24] ss:$16 sps:$4 sm:$0xff]  }
 0x918   : > { %v21215_v60 = vld [vmem:[%s22890_s7 + $0x6e4] ss:$16 sps:$4 sm:$0xff]   ;;  %13455 = vmatprep.subr.bf16.mxu0 %v21213_v24  ;;  %v21218_v16 = vld [vmem:[%s22890_s7 + $0x6e0] ss:$16 sps:$4 sm:$0xff]   ;;  %13487 = vmatprep.mubr.bf16.mxu0 %v21311_v0  ;;  %p19337_p1 = scmp.ne.s32.totalorder %s22676_s2, 7 }
 0x919   : > { %13498 = vmatprep.subr.bf16.mxu1 %v21215_v60  ;;  %v21219_v23 = vld [vmem:[%s22890_s7 + $0x4c4] ss:$16 sps:$4 sm:$0xff]   ;;  %13456 = vmatpush1.bf16.msra.mxu0 %v21217_v52  ;;  %v21223_v8 = vld [vmem:[%s22890_s7 + $0x4c0] ss:$16 sps:$4 sm:$0xff]   ;;  %v21317_v52 = vld [vmem:[%s22890_s7 + $0x4ec] ss:$16 sps:$4 sm:$0xff]  }
 0x91a   : > { %13499 = vmatpush1.bf16.msra.mxu1 %v21218_v16  ;;  %v21221_v48 = vld [vmem:[%s22890_s7 + $0x6c4] ss:$16 sps:$4 sm:$0xff]   ;;  %13457 = vmatprep.subr.bf16.mxu0 %v21219_v23  ;;  %v21224_v6 = vld [vmem:[%s22890_s7 + $0x6c0] ss:$16 sps:$4 sm:$0xff]   ;;  %v21320_v16 = vld [vmem:[%s22890_s7 + $0x6ec] ss:$16 sps:$4 sm:$0xff]  }
 0x91b   : > { %13500 = vmatprep.subr.bf16.mxu1 %v21221_v48  ;;  %v21225_v40 = vld [vmem:[%s22890_s7 + $0x4a4] ss:$16 sps:$4 sm:$0xff]   ;;  %v21229_v15 = vld [vmem:[%s22890_s7 + $0x4a0] ss:$16 sps:$4 sm:$0xff]   ;;  %v25215_v23 = vld [vmem:[#allocation3 + $0x20] ss:$16 sps:$4 sm:$0xff]  }
 0x91c   : > { %v21227_v35 = vld [vmem:[%s22890_s7 + $0x6a4] ss:$16 sps:$4 sm:$0xff]   ;;  %v21230_v59 = vld [vmem:[%s22890_s7 + $0x6a0] ss:$16 sps:$4 sm:$0xff]  }
 0x91d   : > { %13458 = vmatpush1.bf16.msra.mxu0 %v21223_v8  ;;  %v21231_v12 = vld [vmem:[%s22890_s7 + $0x484] ss:$16 sps:$4 sm:$0xff]   ;;  %v21235_v9 = vld [vmem:[%s22890_s7 + $0x480] ss:$16 sps:$4 sm:$0xff]   ;;  %v21315_v8 = vld [vmem:[%s22890_s7 + $0x4e8] ss:$16 sps:$4 sm:$0xff]  }
 0x91e   : > { %13501 = vmatpush1.bf16.msra.mxu1 %v21224_v6  ;;  %13459 = vmatprep.subr.bf16.mxu0 %v21225_v40  ;;  %v21233_v4 = vld [vmem:[%s22890_s7 + $0x684] ss:$16 sps:$4 sm:$0xff]   ;;  %v21236_v22 = vld [vmem:[%s22890_s7 + $0x680] ss:$16 sps:$4 sm:$0xff]   ;;  %v21318_v6 = vld [vmem:[%s22890_s7 + $0x6e8] ss:$16 sps:$4 sm:$0xff]  }
 0x91f   : > { %13502 = vmatprep.subr.bf16.mxu1 %v21227_v35  ;;  %v21237_v28 = vld [vmem:[%s22890_s7 + $0x464] ss:$16 sps:$4 sm:$0xff]   ;;  %v21241_v57 = vld [vmem:[%s22890_s7 + $0x460] ss:$16 sps:$4 sm:$0xff]   ;;  %v21323_v40 = vld [vmem:[%s22890_s7 + $0x4cc] ss:$16 sps:$4 sm:$0xff]  }
 0x920   : > { %v21239_v55 = vld [vmem:[%s22890_s7 + $0x664] ss:$16 sps:$4 sm:$0xff]   ;;  %v21242_v20 = vld [vmem:[%s22890_s7 + $0x660] ss:$16 sps:$4 sm:$0xff]   ;;  %v21326_v35 = vld [vmem:[%s22890_s7 + $0x6cc] ss:$16 sps:$4 sm:$0xff]  }
 0x921   : > { %13460 = vmatpush1.bf16.msra.mxu0 %v21229_v15  ;;  %v21243_v18 = vld [vmem:[%s22890_s7 + $0x444] ss:$16 sps:$4 sm:$0xff]   ;;  %v21247_v36 = vld [vmem:[%s22890_s7 + $0x440] ss:$16 sps:$4 sm:$0xff]   ;;  %v21321_v15 = vld [vmem:[%s22890_s7 + $0x4c8] ss:$16 sps:$4 sm:$0xff]  }
 0x922   : > { %13503 = vmatpush1.bf16.msra.mxu1 %v21230_v59  ;;  %13461 = vmatprep.subr.bf16.mxu0 %v21231_v12  ;;  %v21245_v54 = vld [vmem:[%s22890_s7 + $0x644] ss:$16 sps:$4 sm:$0xff]   ;;  %v21248_v32 = vld [vmem:[%s22890_s7 + $0x640] ss:$16 sps:$4 sm:$0xff]   ;;  %v21324_v59 = vld [vmem:[%s22890_s7 + $0x6c8] ss:$16 sps:$4 sm:$0xff]  }
 0x923   : > { %13504 = vmatprep.subr.bf16.mxu1 %v21233_v4  ;;  %v21249_v1 = vld [vmem:[%s22890_s7 + $0x424] ss:$16 sps:$4 sm:$0xff]   ;;  %v21253_v46 = vld [vmem:[%s22890_s7 + $0x420] ss:$16 sps:$4 sm:$0xff]   ;;  %v21329_v12 = vld [vmem:[%s22890_s7 + $0x4ac] ss:$16 sps:$4 sm:$0xff]  }
 0x924   : > { %v21251_v44 = vld [vmem:[%s22890_s7 + $0x624] ss:$16 sps:$4 sm:$0xff]   ;;  %v21254_v58 = vld [vmem:[%s22890_s7 + $0x620] ss:$16 sps:$4 sm:$0xff]   ;;  %v21332_v4 = vld [vmem:[%s22890_s7 + $0x6ac] ss:$16 sps:$4 sm:$0xff]  }
 0x925   : > { %13462 = vmatpush1.bf16.msra.mxu0 %v21235_v9  ;;  %v21255_v61 = vld [vmem:[%s22890_s7 + $0x404] ss:$16 sps:$4 sm:$0xff]   ;;  %v21259_v53 = vld [vmem:[%s22890_s7 + $0x400] ss:$16 sps:$4 sm:$0xff]   ;;  %v21327_v9 = vld [vmem:[%s22890_s7 + $0x4a8] ss:$16 sps:$4 sm:$0xff]  }
 0x926   : > { %13505 = vmatpush1.bf16.msra.mxu1 %v21236_v22  ;;  %13463 = vmatprep.subr.bf16.mxu0 %v21237_v28  ;;  %v21257_v63 = vld [vmem:[%s22890_s7 + $0x604] ss:$16 sps:$4 sm:$0xff]   ;;  %v21260_v50 = vld [vmem:[%s22890_s7 + $0x600] ss:$16 sps:$4 sm:$0xff]   ;;  %v21330_v22 = vld [vmem:[%s22890_s7 + $0x6a8] ss:$16 sps:$4 sm:$0xff]  }
 0x927   : > { %13506 = vmatprep.subr.bf16.mxu1 %v21239_v55  ;;  %v21261_v13 = vld [vmem:[%s22890_s7 + $0x5e4] ss:$16 sps:$4 sm:$0xff]   ;;  %v21265_v26 = vld [vmem:[%s22890_s7 + $0x5e0] ss:$16 sps:$4 sm:$0xff]   ;;  %v21335_v28 = vld [vmem:[%s22890_s7 + $0x48c] ss:$16 sps:$4 sm:$0xff]  }
 0x928   : > { %v21263_v17 = vld [vmem:[%s22890_s7 + $0x7e4] ss:$16 sps:$4 sm:$0xff]   ;;  %v21266_v5 = vld [vmem:[%s22890_s7 + $0x7e0] ss:$16 sps:$4 sm:$0xff]   ;;  %v21338_v55 = vld [vmem:[%s22890_s7 + $0x68c] ss:$16 sps:$4 sm:$0xff]  }
 0x929   : > { %13464 = vmatpush1.bf16.msra.mxu0 %v21241_v57  ;;  %v21267_v47 = vld [vmem:[%s22890_s7 + $0x5c4] ss:$16 sps:$4 sm:$0xff]   ;;  %v21271_v14 = vld [vmem:[%s22890_s7 + $0x5c0] ss:$16 sps:$4 sm:$0xff]   ;;  %v21333_v57 = vld [vmem:[%s22890_s7 + $0x488] ss:$16 sps:$4 sm:$0xff]  }
 0x92a   : > { %13507 = vmatpush1.bf16.msra.mxu1 %v21242_v20  ;;  %13465 = vmatprep.subr.bf16.mxu0 %v21243_v18  ;;  %v21269_v7 = vld [vmem:[%s22890_s7 + $0x7c4] ss:$16 sps:$4 sm:$0xff]   ;;  %v21272_v51 = vld [vmem:[%s22890_s7 + $0x7c0] ss:$16 sps:$4 sm:$0xff]   ;;  %v21336_v20 = vld [vmem:[%s22890_s7 + $0x688] ss:$16 sps:$4 sm:$0xff]  }
 0x92b   : > { %13508 = vmatprep.subr.bf16.mxu1 %v21245_v54  ;;  %v21273_v2 = vld [vmem:[%s22890_s7 + $0x5a4] ss:$16 sps:$4 sm:$0xff]   ;;  %v21277_v10 = vld [vmem:[%s22890_s7 + $0x5a0] ss:$16 sps:$4 sm:$0xff]   ;;  %v21341_v18 = vld [vmem:[%s22890_s7 + $0x46c] ss:$16 sps:$4 sm:$0xff]  }
 0x92c   : > { %v21275_v42 = vld [vmem:[%s22890_s7 + $0x7a4] ss:$16 sps:$4 sm:$0xff]   ;;  %v21278_v37 = vld [vmem:[%s22890_s7 + $0x7a0] ss:$16 sps:$4 sm:$0xff]   ;;  %v21344_v54 = vld [vmem:[%s22890_s7 + $0x66c] ss:$16 sps:$4 sm:$0xff]  }
 0x92d   : > { %13466 = vmatpush1.bf16.msra.mxu0 %v21247_v36  ;;  %v21279_v45 = vld [vmem:[%s22890_s7 + $0x584] ss:$16 sps:$4 sm:$0xff]   ;;  %v21283_v33 = vld [vmem:[%s22890_s7 + $0x580] ss:$16 sps:$4 sm:$0xff]   ;;  %v21339_v36 = vld [vmem:[%s22890_s7 + $0x468] ss:$16 sps:$4 sm:$0xff]  }
 0x92e   : > { %13509 = vmatpush1.bf16.msra.mxu1 %v21248_v32  ;;  %13467 = vmatprep.subr.bf16.mxu0 %v21249_v1  ;;  %v21281_v21 = vld [vmem:[%s22890_s7 + $0x784] ss:$16 sps:$4 sm:$0xff]   ;;  %v21284_v30 = vld [vmem:[%s22890_s7 + $0x780] ss:$16 sps:$4 sm:$0xff]   ;;  %v21342_v32 = vld [vmem:[%s22890_s7 + $0x668] ss:$16 sps:$4 sm:$0xff]  }
 0x92f   : > { %13510 = vmatprep.subr.bf16.mxu1 %v21251_v44  ;;  %v21285_v34 = vld [vmem:[%s22890_s7 + $0x564] ss:$16 sps:$4 sm:$0xff]   ;;  %v21289_v38 = vld [vmem:[%s22890_s7 + $0x560] ss:$16 sps:$4 sm:$0xff]   ;;  %v21347_v1 = vld [vmem:[%s22890_s7 + $0x44c] ss:$16 sps:$4 sm:$0xff]  }
 0x930   : > { %v21287_v56 = vld [vmem:[%s22890_s7 + $0x764] ss:$16 sps:$4 sm:$0xff]   ;;  %v21290_v11 = vld [vmem:[%s22890_s7 + $0x760] ss:$16 sps:$4 sm:$0xff]   ;;  %v21350_v44 = vld [vmem:[%s22890_s7 + $0x64c] ss:$16 sps:$4 sm:$0xff]  }
 0x931   : > { %13468 = vmatpush1.bf16.msra.mxu0 %v21253_v46  ;;  %v21314_v31 = vld [vmem:[#allocation3 + $0x2c] ss:$16 sps:$4 sm:$0xff]   ;;  %v21295_v49 = vld [vmem:[%s22890_s7 + $0x540] ss:$16 sps:$4 sm:$0xff]   ;;  %v21345_v46 = vld [vmem:[%s22890_s7 + $0x448] ss:$16 sps:$4 sm:$0xff]  }
 0x932   : > { %13511 = vmatpush1.bf16.msra.mxu1 %v21254_v58  ;;  %13469 = vmatprep.subr.bf16.mxu0 %v21255_v61  ;;  %v21291_v25 = vld [vmem:[%s22890_s7 + $0x544] ss:$16 sps:$4 sm:$0xff]   ;;  %v21296_v43 = vld [vmem:[%s22890_s7 + $0x740] ss:$16 sps:$4 sm:$0xff]   ;;  %v21348_v58 = vld [vmem:[%s22890_s7 + $0x648] ss:$16 sps:$4 sm:$0xff]  }
 0x933   : > { %13512 = vmatprep.subr.bf16.mxu1 %v21257_v63  ;;  %13530 = vmatprep.mubr.bf16.mxu1 %v21314_v31  ;;  %v21293_v39 = vld [vmem:[%s22890_s7 + $0x744] ss:$16 sps:$4 sm:$0xff]   ;;  %v21301_v41 = vld [vmem:[%s22890_s7 + $0x520] ss:$16 sps:$4 sm:$0xff]   ;;  %v21353_v61 = vld [vmem:[%s22890_s7 + $0x42c] ss:$16 sps:$4 sm:$0xff]  }
 0x934   : > { %v21297_v3 = vld [vmem:[%s22890_s7 + $0x524] ss:$16 sps:$4 sm:$0xff]   ;;  %v21302_v62 = vld [vmem:[%s22890_s7 + $0x720] ss:$16 sps:$4 sm:$0xff]   ;;  %v21356_v63 = vld [vmem:[%s22890_s7 + $0x62c] ss:$16 sps:$4 sm:$0xff]  }
 0x935   : > { %13470 = vmatpush1.bf16.msra.mxu0 %v21259_v53  ;;  %v21299_v29 = vld [vmem:[%s22890_s7 + $0x724] ss:$16 sps:$4 sm:$0xff]   ;;  %v21307_v24 = vld [vmem:[%s22890_s7 + $0x500] ss:$16 sps:$4 sm:$0xff]   ;;  %v21351_v53 = vld [vmem:[%s22890_s7 + $0x428] ss:$16 sps:$4 sm:$0xff]  }
 0x936   : > { %13513 = vmatpush1.bf16.msra.mxu1 %v21260_v50  ;;  %13471 = vmatprep.subr.bf16.mxu0 %v21261_v13  ;;  %v21303_v27 = vld [vmem:[%s22890_s7 + $0x504] ss:$16 sps:$4 sm:$0xff]   ;;  %v21308_v60 = vld [vmem:[%s22890_s7 + $0x700] ss:$16 sps:$4 sm:$0xff]   ;;  %v21354_v50 = vld [vmem:[%s22890_s7 + $0x628] ss:$16 sps:$4 sm:$0xff]  }
 0x937   : > { %13514 = vmatprep.subr.bf16.mxu1 %v21263_v17  ;;  %v21305_v19 = vld [vmem:[%s22890_s7 + $0x704] ss:$16 sps:$4 sm:$0xff]   ;;  %v25217_v48 = vld [vmem:[#allocation3 + $0x28] ss:$16 sps:$4 sm:$0xff]   ;;  %v21359_v13 = vld [vmem:[%s22890_s7 + $0x40c] ss:$16 sps:$4 sm:$0xff]  }
 0x938   : > { %v21362_v17 = vld [vmem:[%s22890_s7 + $0x60c] ss:$16 sps:$4 sm:$0xff]  }
 0x939   : > { %13472 = vmatpush2.bf16.msra.mxu0 %v21265_v26  ;;  %v21357_v26 = vld [vmem:[%s22890_s7 + $0x408] ss:$16 sps:$4 sm:$0xff]  }
 0x93a   : > { %13515 = vmatpush2.bf16.msra.mxu1 %v21266_v5  ;;  %13473 = vmatprep.subr.bf16.mxu0 %v21267_v47  ;;  %v21360_v5 = vld [vmem:[%s22890_s7 + $0x608] ss:$16 sps:$4 sm:$0xff]   ;;  %v21365_v47 = vld [vmem:[%s22890_s7 + $0x5ec] ss:$16 sps:$4 sm:$0xff]  }
 0x93b   : > { %13516 = vmatprep.subr.bf16.mxu1 %v21269_v7  ;;  %v21368_v7 = vld [vmem:[%s22890_s7 + $0x7ec] ss:$16 sps:$4 sm:$0xff]  }
 0x93d   : > { %13474 = vmatpush2.bf16.msra.mxu0 %v21271_v14  ;;  %v21363_v14 = vld [vmem:[%s22890_s7 + $0x5e8] ss:$16 sps:$4 sm:$0xff]  }
 0x93e   : > { %13517 = vmatpush2.bf16.msra.mxu1 %v21272_v51  ;;  %13475 = vmatprep.subr.bf16.mxu0 %v21273_v2  ;;  %v21366_v51 = vld [vmem:[%s22890_s7 + $0x7e8] ss:$16 sps:$4 sm:$0xff]   ;;  %v21371_v2 = vld [vmem:[%s22890_s7 + $0x5cc] ss:$16 sps:$4 sm:$0xff]  }
 0x93f   : > { %13518 = vmatprep.subr.bf16.mxu1 %v21275_v42  ;;  %v21374_v42 = vld [vmem:[%s22890_s7 + $0x7cc] ss:$16 sps:$4 sm:$0xff]  }
 0x941   : > { %13476 = vmatpush2.bf16.msra.mxu0 %v21277_v10  ;;  %v21369_v10 = vld [vmem:[%s22890_s7 + $0x5c8] ss:$16 sps:$4 sm:$0xff]  }
 0x942   : > { %13519 = vmatpush2.bf16.msra.mxu1 %v21278_v37  ;;  %13477 = vmatprep.subr.bf16.mxu0 %v21279_v45  ;;  %v21372_v37 = vld [vmem:[%s22890_s7 + $0x7c8] ss:$16 sps:$4 sm:$0xff]   ;;  %v21377_v45 = vld [vmem:[%s22890_s7 + $0x5ac] ss:$16 sps:$4 sm:$0xff]  }
 0x943   : > { %13520 = vmatprep.subr.bf16.mxu1 %v21281_v21  ;;  %v21380_v21 = vld [vmem:[%s22890_s7 + $0x7ac] ss:$16 sps:$4 sm:$0xff]  }
 0x945   : > { %13478 = vmatpush2.bf16.msra.mxu0 %v21283_v33  ;;  %v21375_v33 = vld [vmem:[%s22890_s7 + $0x5a8] ss:$16 sps:$4 sm:$0xff]  }
 0x946   : > { %13521 = vmatpush2.bf16.msra.mxu1 %v21284_v30  ;;  %13479 = vmatprep.subr.bf16.mxu0 %v21285_v34  ;;  %v21378_v30 = vld [vmem:[%s22890_s7 + $0x7a8] ss:$16 sps:$4 sm:$0xff]   ;;  %v21383_v34 = vld [vmem:[%s22890_s7 + $0x58c] ss:$16 sps:$4 sm:$0xff]  }
 0x947   : > { %13522 = vmatprep.subr.bf16.mxu1 %v21287_v56  ;;  %v21381_v56 = vld [vmem:[%s22890_s7 + $0x588] ss:$16 sps:$4 sm:$0xff]  }
 0x949   : > { %13480 = vmatpush2.bf16.msra.mxu0 %v21289_v38  ;;  %v21389_v38 = vld [vmem:[%s22890_s7 + $0x56c] ss:$16 sps:$4 sm:$0xff]  }
 0x94a   : > { %13523 = vmatpush2.bf16.msra.mxu1 %v21290_v11  ;;  %13481 = vmatprep.subr.bf16.mxu0 %v21291_v25  ;;  %v21392_v11 = vld [vmem:[%s22890_s7 + $0x76c] ss:$16 sps:$4 sm:$0xff]   ;;  %v21387_v25 = vld [vmem:[%s22890_s7 + $0x568] ss:$16 sps:$4 sm:$0xff]  }
 0x94b   : > { %13524 = vmatprep.subr.bf16.mxu1 %v21293_v39  ;;  %v21390_v39 = vld [vmem:[%s22890_s7 + $0x768] ss:$16 sps:$4 sm:$0xff]  }
 0x94d   : > { %13482 = vmatpush2.bf16.msra.mxu0 %v21295_v49  ;;  %v21395_v49 = vld [vmem:[%s22890_s7 + $0x54c] ss:$16 sps:$4 sm:$0xff]  }
 0x94e   : > { %13525 = vmatpush2.bf16.msra.mxu1 %v21296_v43  ;;  %13483 = vmatprep.subr.bf16.mxu0 %v21297_v3  ;;  %v21398_v43 = vld [vmem:[%s22890_s7 + $0x74c] ss:$16 sps:$4 sm:$0xff]   ;;  %v21393_v3 = vld [vmem:[%s22890_s7 + $0x548] ss:$16 sps:$4 sm:$0xff]  }
 0x94f   : > { %13526 = vmatprep.subr.bf16.mxu1 %v21299_v29  ;;  %v21396_v29 = vld [vmem:[%s22890_s7 + $0x748] ss:$16 sps:$4 sm:$0xff]  }
 0x951   : > { %13484 = vmatpush2.bf16.msra.mxu0 %v21301_v41  ;;  %v21401_v41 = vld [vmem:[%s22890_s7 + $0x52c] ss:$16 sps:$4 sm:$0xff]  }
 0x952   : > { %13527 = vmatpush2.bf16.msra.mxu1 %v21302_v62  ;;  %13485 = vmatprep.subr.bf16.mxu0 %v21303_v27  ;;  %v21404_v62 = vld [vmem:[%s22890_s7 + $0x72c] ss:$16 sps:$4 sm:$0xff]   ;;  %v21399_v27 = vld [vmem:[%s22890_s7 + $0x528] ss:$16 sps:$4 sm:$0xff]  }
 0x953   : > { %13528 = vmatprep.subr.bf16.mxu1 %v21305_v19  ;;  %v21402_v19 = vld [vmem:[%s22890_s7 + $0x728] ss:$16 sps:$4 sm:$0xff]  }
 0x955   : > { %13486 = vmatpush2.bf16.msra.mxu0 %v21307_v24  ;;  %v21407_v24 = vld [vmem:[%s22890_s7 + $0x50c] ss:$16 sps:$4 sm:$0xff]  }
 0x956   : > { %13529 = vmatpush2.bf16.msra.mxu1 %v21308_v60  ;;  %13541 = vmatprep.subr.bf16.mxu0 %v21317_v52  ;;  %v21410_v60 = vld [vmem:[%s22890_s7 + $0x70c] ss:$16 sps:$4 sm:$0xff]   ;;  %v21405_v52 = vld [vmem:[%s22890_s7 + $0x508] ss:$16 sps:$4 sm:$0xff]  }
 0x957   : > { %13584 = vmatprep.subr.bf16.mxu1 %v21320_v16  ;;  %v21408_v16 = vld [vmem:[%s22890_s7 + $0x708] ss:$16 sps:$4 sm:$0xff]  }
 0x958   : > { %13488 = vmatmul.mubr.bf16.vlgmr.msra.gmra.mxu0 %v25215_v23 }
 0x959   : > { %13531 = vmatmul.mubr.bf16.vlgmr.msra.gmra.mxu1 %v25217_v48  ;;  %13542 = vmatpush1.bf16.msra.mxu0 %v21315_v8  ;;  %v21413_v8 = vld [vmem:[%s22890_s7 + $0xe4] ss:$16 sps:$4 sm:$0xff]  }
 0x95a   : > { %13585 = vmatpush1.bf16.msra.mxu1 %v21318_v6  ;;  %13543 = vmatprep.subr.bf16.mxu0 %v21323_v40  ;;  %v21416_v6 = vld [vmem:[%s22890_s7 + $0x2e4] ss:$16 sps:$4 sm:$0xff]   ;;  %v21411_v40 = vld [vmem:[%s22890_s7 + $0xe0] ss:$16 sps:$4 sm:$0xff]  }
 0x95b   : > { %13586 = vmatprep.subr.bf16.mxu1 %v21326_v35  ;;  %13573 = vmatprep.mubr.bf16.mxu0 %v21311_v0  ;;  %v21386_v0 = vld [vmem:[%s22890_s7 + $0x78c] ss:$16 sps:$4 sm:$0xff]   ;;  %v21414_v35 = vld [vmem:[%s22890_s7 + $0x2e0] ss:$16 sps:$4 sm:$0xff]  }
 0x95c   : > { %13616 = vmatprep.mubr.bf16.mxu1 %v21314_v31  ;;  %v21384_v31 = vld [vmem:[%s22890_s7 + $0x788] ss:$16 sps:$4 sm:$0xff]  }
 0x95d   : > { %13544 = vmatpush1.bf16.msra.mxu0 %v21321_v15  ;;  %v21419_v15 = vld [vmem:[%s22890_s7 + $0xc4] ss:$16 sps:$4 sm:$0xff]  }
 0x95e   : > { %13587 = vmatpush1.bf16.msra.mxu1 %v21324_v59  ;;  %13545 = vmatprep.subr.bf16.mxu0 %v21329_v12  ;;  %v21422_v59 = vld [vmem:[%s22890_s7 + $0x2c4] ss:$16 sps:$4 sm:$0xff]   ;;  %v21417_v12 = vld [vmem:[%s22890_s7 + $0xc0] ss:$16 sps:$4 sm:$0xff]  }
 0x95f   : > { %13588 = vmatprep.subr.bf16.mxu1 %v21332_v4  ;;  %v21420_v4 = vld [vmem:[%s22890_s7 + $0x2c0] ss:$16 sps:$4 sm:$0xff]  }
 0x961   : > { %13546 = vmatpush1.bf16.msra.mxu0 %v21327_v9  ;;  %v21425_v9 = vld [vmem:[%s22890_s7 + $0xa4] ss:$16 sps:$4 sm:$0xff]  }
 0x962   : > { %13589 = vmatpush1.bf16.msra.mxu1 %v21330_v22  ;;  %13547 = vmatprep.subr.bf16.mxu0 %v21335_v28  ;;  %v25294_v22 = vld [vmem:[#allocation3 + $0x4] ss:$16 sps:$4 sm:$0xff]   ;;  %v21428_v28 = vld [vmem:[%s22890_s7 + $0x2a4] ss:$16 sps:$4 sm:$0xff]  }
 0x963   : > { %13590 = vmatprep.subr.bf16.mxu1 %v21338_v55  ;;  %v25297_v55 = vld [vmem:[#allocation3 + $0xc] ss:$16 sps:$4 sm:$0xff]  }
 0x965   : > { %13548 = vmatpush1.bf16.msra.mxu0 %v21333_v57  ;;  %v21426_v57 = vld [vmem:[%s22890_s7 + $0x2a0] ss:$16 sps:$4 sm:$0xff]  }
 0x966   : > { %13591 = vmatpush1.bf16.msra.mxu1 %v21336_v20  ;;  %13549 = vmatprep.subr.bf16.mxu0 %v21341_v18  ;;  %v21434_v20 = vld [vmem:[%s22890_s7 + $0x284] ss:$16 sps:$4 sm:$0xff]   ;;  %v21429_v18 = vld [vmem:[%s22890_s7 + $0x80] ss:$16 sps:$4 sm:$0xff]  }
 0x967   : > { %13592 = vmatprep.subr.bf16.mxu1 %v21344_v54  ;;  %v21432_v54 = vld [vmem:[%s22890_s7 + $0x280] ss:$16 sps:$4 sm:$0xff]  }
 0x969   : > { %13550 = vmatpush1.bf16.msra.mxu0 %v21339_v36  ;;  %v21437_v36 = vld [vmem:[%s22890_s7 + $0x64] ss:$16 sps:$4 sm:$0xff]  }
 0x96a   : > { %13593 = vmatpush1.bf16.msra.mxu1 %v21342_v32  ;;  %13551 = vmatprep.subr.bf16.mxu0 %v21347_v1  ;;  %v21440_v32 = vld [vmem:[%s22890_s7 + $0x264] ss:$16 sps:$4 sm:$0xff]   ;;  %v21435_v1 = vld [vmem:[%s22890_s7 + $0x60] ss:$16 sps:$4 sm:$0xff]  }
 0x96b   : > { %13594 = vmatprep.subr.bf16.mxu1 %v21350_v44  ;;  %v21438_v44 = vld [vmem:[%s22890_s7 + $0x260] ss:$16 sps:$4 sm:$0xff]  }
 0x96d   : > { %13552 = vmatpush1.bf16.msra.mxu0 %v21345_v46  ;;  %v21443_v46 = vld [vmem:[%s22890_s7 + $0x44] ss:$16 sps:$4 sm:$0xff]  }
 0x96e   : > { %13595 = vmatpush1.bf16.msra.mxu1 %v21348_v58  ;;  %13553 = vmatprep.subr.bf16.mxu0 %v21353_v61  ;;  %v21446_v58 = vld [vmem:[%s22890_s7 + $0x244] ss:$16 sps:$4 sm:$0xff]   ;;  %v21441_v61 = vld [vmem:[%s22890_s7 + $0x40] ss:$16 sps:$4 sm:$0xff]  }
 0x96f   : > { %13596 = vmatprep.subr.bf16.mxu1 %v21356_v63  ;;  %v21444_v63 = vld [vmem:[%s22890_s7 + $0x240] ss:$16 sps:$4 sm:$0xff]  }
 0x971   : > { %13554 = vmatpush1.bf16.msra.mxu0 %v21351_v53  ;;  %v21449_v53 = vld [vmem:[%s22890_s7 + $0x24] ss:$16 sps:$4 sm:$0xff]  }
 0x972   : > { %13597 = vmatpush1.bf16.msra.mxu1 %v21354_v50  ;;  %13555 = vmatprep.subr.bf16.mxu0 %v21359_v13  ;;  %v21452_v50 = vld [vmem:[%s22890_s7 + $0x224] ss:$16 sps:$4 sm:$0xff]   ;;  %v21447_v13 = vld [vmem:[%s22890_s7 + $0x20] ss:$16 sps:$4 sm:$0xff]  }
 0x973   : > { %13598 = vmatprep.subr.bf16.mxu1 %v21362_v17  ;;  %v21450_v17 = vld [vmem:[%s22890_s7 + $0x220] ss:$16 sps:$4 sm:$0xff]  }
 0x975   : > { %13556 = vmatpush1.bf16.msra.mxu0 %v21357_v26  ;;  %v21455_v26 = vld [vmem:[%s22890_s7 + $0x4] ss:$16 sps:$4 sm:$0xff]  }
 0x976   : > { %13599 = vmatpush1.bf16.msra.mxu1 %v21360_v5  ;;  %13557 = vmatprep.subr.bf16.mxu0 %v21365_v47  ;;  %v21458_v5 = vld [vmem:[%s22890_s7 + $0x204] ss:$16 sps:$4 sm:$0xff]   ;;  %v21453_v47 = vld [vmem:[%s22890_s7] ss:$16 sps:$4 sm:$0xff]  }
 0x977   : > { %13600 = vmatprep.subr.bf16.mxu1 %v21368_v7  ;;  %v21456_v7 = vld [vmem:[%s22890_s7 + $0x200] ss:$16 sps:$4 sm:$0xff]  }
 0x979   : > { %13558 = vmatpush2.bf16.msra.mxu0 %v21363_v14  ;;  %v21461_v14 = vld [vmem:[%s22890_s7 + $0x1e4] ss:$16 sps:$4 sm:$0xff]  }
 0x97a   : > { %13601 = vmatpush2.bf16.msra.mxu1 %v21366_v51  ;;  %13559 = vmatprep.subr.bf16.mxu0 %v21371_v2  ;;  %v21464_v51 = vld [vmem:[%s22890_s7 + $0x3e4] ss:$16 sps:$4 sm:$0xff]   ;;  %v21459_v2 = vld [vmem:[%s22890_s7 + $0x1e0] ss:$16 sps:$4 sm:$0xff]  }
 0x97b   : > { %13602 = vmatprep.subr.bf16.mxu1 %v21374_v42  ;;  %v21462_v42 = vld [vmem:[%s22890_s7 + $0x3e0] ss:$16 sps:$4 sm:$0xff]  }
 0x97d   : > { %13560 = vmatpush2.bf16.msra.mxu0 %v21369_v10  ;;  %v21467_v10 = vld [vmem:[%s22890_s7 + $0x1c4] ss:$16 sps:$4 sm:$0xff]  }
 0x97e   : > { %13603 = vmatpush2.bf16.msra.mxu1 %v21372_v37  ;;  %13561 = vmatprep.subr.bf16.mxu0 %v21377_v45  ;;  %v21470_v37 = vld [vmem:[%s22890_s7 + $0x3c4] ss:$16 sps:$4 sm:$0xff]   ;;  %v21465_v45 = vld [vmem:[%s22890_s7 + $0x1c0] ss:$16 sps:$4 sm:$0xff]  }
 0x97f   : > { %13604 = vmatprep.subr.bf16.mxu1 %v21380_v21  ;;  %v21468_v21 = vld [vmem:[%s22890_s7 + $0x3c0] ss:$16 sps:$4 sm:$0xff]  }
 0x981   : > { %13562 = vmatpush2.bf16.msra.mxu0 %v21375_v33  ;;  %v21473_v33 = vld [vmem:[%s22890_s7 + $0x1a4] ss:$16 sps:$4 sm:$0xff]  }
 0x982   : > { %13605 = vmatpush2.bf16.msra.mxu1 %v21378_v30  ;;  %13563 = vmatprep.subr.bf16.mxu0 %v21383_v34  ;;  %v21476_v30 = vld [vmem:[%s22890_s7 + $0x3a4] ss:$16 sps:$4 sm:$0xff]   ;;  %v21471_v34 = vld [vmem:[%s22890_s7 + $0x1a0] ss:$16 sps:$4 sm:$0xff]  }
 0x983   : > { %13606 = vmatprep.subr.bf16.mxu1 %v21386_v0  ;;  %v21474_v0 = vld [vmem:[%s22890_s7 + $0x3a0] ss:$16 sps:$4 sm:$0xff]  }
 0x985   : > { %13564 = vmatpush2.bf16.msra.mxu0 %v21381_v56  ;;  %v21479_v56 = vld [vmem:[%s22890_s7 + $0x184] ss:$16 sps:$4 sm:$0xff]  }
 0x986   : > { %13607 = vmatpush2.bf16.msra.mxu1 %v21384_v31  ;;  %13565 = vmatprep.subr.bf16.mxu0 %v21389_v38  ;;  %v21482_v31 = vld [vmem:[%s22890_s7 + $0x384] ss:$16 sps:$4 sm:$0xff]   ;;  %v21477_v38 = vld [vmem:[%s22890_s7 + $0x180] ss:$16 sps:$4 sm:$0xff]  }
 0x987   : > { %13608 = vmatprep.subr.bf16.mxu1 %v21392_v11  ;;  %v21480_v11 = vld [vmem:[%s22890_s7 + $0x380] ss:$16 sps:$4 sm:$0xff]  }
 0x989   : > { %13566 = vmatpush2.bf16.msra.mxu0 %v21387_v25  ;;  %v21485_v25 = vld [vmem:[%s22890_s7 + $0x164] ss:$16 sps:$4 sm:$0xff]  }
 0x98a   : > { %13609 = vmatpush2.bf16.msra.mxu1 %v21390_v39  ;;  %13567 = vmatprep.subr.bf16.mxu0 %v21395_v49  ;;  %v21488_v39 = vld [vmem:[%s22890_s7 + $0x364] ss:$16 sps:$4 sm:$0xff]   ;;  %v21483_v49 = vld [vmem:[%s22890_s7 + $0x160] ss:$16 sps:$4 sm:$0xff]  }
 0x98b   : > { %13610 = vmatprep.subr.bf16.mxu1 %v21398_v43  ;;  %v21486_v43 = vld [vmem:[%s22890_s7 + $0x360] ss:$16 sps:$4 sm:$0xff]  }
 0x98d   : > { %13568 = vmatpush2.bf16.msra.mxu0 %v21393_v3  ;;  %v21491_v3 = vld [vmem:[%s22890_s7 + $0x144] ss:$16 sps:$4 sm:$0xff]  }
 0x98e   : > { %13611 = vmatpush2.bf16.msra.mxu1 %v21396_v29  ;;  %13569 = vmatprep.subr.bf16.mxu0 %v21401_v41  ;;  %v21494_v29 = vld [vmem:[%s22890_s7 + $0x344] ss:$16 sps:$4 sm:$0xff]   ;;  %v21489_v41 = vld [vmem:[%s22890_s7 + $0x140] ss:$16 sps:$4 sm:$0xff]  }
 0x98f   : > { %13612 = vmatprep.subr.bf16.mxu1 %v21404_v62  ;;  %v21492_v62 = vld [vmem:[%s22890_s7 + $0x340] ss:$16 sps:$4 sm:$0xff]  }
 0x991   : > { %13570 = vmatpush2.bf16.msra.mxu0 %v21399_v27  ;;  %v21497_v27 = vld [vmem:[%s22890_s7 + $0x124] ss:$16 sps:$4 sm:$0xff]  }
 0x992   : > { %13613 = vmatpush2.bf16.msra.mxu1 %v21402_v19  ;;  %13571 = vmatprep.subr.bf16.mxu0 %v21407_v24  ;;  %v21500_v19 = vld [vmem:[%s22890_s7 + $0x324] ss:$16 sps:$4 sm:$0xff]   ;;  %v21495_v24 = vld [vmem:[%s22890_s7 + $0x120] ss:$16 sps:$4 sm:$0xff]  }
 0x993   : > { %13614 = vmatprep.subr.bf16.mxu1 %v21410_v60  ;;  %v21498_v60 = vld [vmem:[%s22890_s7 + $0x320] ss:$16 sps:$4 sm:$0xff]  }
 0x995   : > { %13572 = vmatpush2.bf16.msra.mxu0 %v21405_v52  ;;  %v21503_v52 = vld [vmem:[%s22890_s7 + $0x104] ss:$16 sps:$4 sm:$0xff]  }
 0x996   : > { %13615 = vmatpush2.bf16.msra.mxu1 %v21408_v16  ;;  %14287 = vmatprep.subr.bf16.mxu0 %v21413_v8  ;;  %v21506_v16 = vld [vmem:[%s22890_s7 + $0x304] ss:$16 sps:$4 sm:$0xff]   ;;  %v21501_v8 = vld [vmem:[%s22890_s7 + $0x100] ss:$16 sps:$4 sm:$0xff]  }
 0x997   : > { %14330 = vmatprep.subr.bf16.mxu1 %v21416_v6  ;;  %v21504_v6 = vld [vmem:[%s22890_s7 + $0x300] ss:$16 sps:$4 sm:$0xff]  }
 0x998   : > { %13574 = vmatmul.mubr.bf16.vlgmr.msra.gmra.mxu0 %v25215_v23  ;;  %v21423_v23 = vld [vmem:[%s22890_s7 + $0xa0] ss:$16 sps:$4 sm:$0xff]  }
 0x999   : > { %13617 = vmatmul.mubr.bf16.vlgmr.msra.gmra.mxu1 %v25217_v48  ;;  %14288 = vmatpush1.bf16.msra.mxu0 %v21411_v40  ;;  %v21431_v48 = vld [vmem:[%s22890_s7 + $0x84] ss:$16 sps:$4 sm:$0xff]   ;;  %v21515_v40 = vld [vmem:[%s22890_s7 + $0xec] ss:$16 sps:$4 sm:$0xff]  }
 0x99a   : > { %14331 = vmatpush1.bf16.msra.mxu1 %v21414_v35  ;;  %14289 = vmatprep.subr.bf16.mxu0 %v21419_v15  ;;  %v21518_v35 = vld [vmem:[%s22890_s7 + $0x2ec] ss:$16 sps:$4 sm:$0xff]   ;;  %v25357_v15 = vld [vmem:[#allocation3] ss:$16 sps:$4 sm:$0xff]  }
 0x99b   : > { %14332 = vmatprep.subr.bf16.mxu1 %v21422_v59  ;;  %14319 = vmatprep.mubr.bf16.mxu0 %v25294_v22  ;;  %v25359_v59 = vld [vmem:[#allocation3 + $0x8] ss:$16 sps:$4 sm:$0xff]  }
 0x99c   : > { %14362 = vmatprep.mubr.bf16.mxu1 %v25297_v55 }
 0x99d   : > { %14290 = vmatpush1.bf16.msra.mxu0 %v21417_v12  ;;  %v21513_v12 = vld [vmem:[%s22890_s7 + $0xe8] ss:$16 sps:$4 sm:$0xff]  }
 0x99e   : > { %14333 = vmatpush1.bf16.msra.mxu1 %v21420_v4  ;;  %14291 = vmatprep.subr.bf16.mxu0 %v21425_v9  ;;  %v21516_v4 = vld [vmem:[%s22890_s7 + $0x2e8] ss:$16 sps:$4 sm:$0xff]   ;;  %v21521_v9 = vld [vmem:[%s22890_s7 + $0xcc] ss:$16 sps:$4 sm:$0xff]  }
 0x99f   : > { %14334 = vmatprep.subr.bf16.mxu1 %v21428_v28  ;;  %v21524_v28 = vld [vmem:[%s22890_s7 + $0x2cc] ss:$16 sps:$4 sm:$0xff]  }
 0x9a1   : > { %14292 = vmatpush1.bf16.msra.mxu0 %v21423_v23  ;;  %v21519_v23 = vld [vmem:[%s22890_s7 + $0xc8] ss:$16 sps:$4 sm:$0xff]  }
 0x9a2   : > { %14335 = vmatpush1.bf16.msra.mxu1 %v21426_v57  ;;  %14293 = vmatprep.subr.bf16.mxu0 %v21431_v48  ;;  %v21522_v57 = vld [vmem:[%s22890_s7 + $0x2c8] ss:$16 sps:$4 sm:$0xff]   ;;  %v21527_v48 = vld [vmem:[%s22890_s7 + $0xac] ss:$16 sps:$4 sm:$0xff]  }
 0x9a3   : > { %14336 = vmatprep.subr.bf16.mxu1 %v21434_v20  ;;  %v21530_v20 = vld [vmem:[%s22890_s7 + $0x2ac] ss:$16 sps:$4 sm:$0xff]  }
 0x9a5   : > { %14294 = vmatpush1.bf16.msra.mxu0 %v21429_v18  ;;  %v21525_v18 = vld [vmem:[%s22890_s7 + $0xa8] ss:$16 sps:$4 sm:$0xff]  }
 0x9a6   : > { %14337 = vmatpush1.bf16.msra.mxu1 %v21432_v54  ;;  %14295 = vmatprep.subr.bf16.mxu0 %v21437_v36  ;;  %v21528_v54 = vld [vmem:[%s22890_s7 + $0x2a8] ss:$16 sps:$4 sm:$0xff]   ;;  %v21533_v36 = vld [vmem:[%s22890_s7 + $0x8c] ss:$16 sps:$4 sm:$0xff]  }
 0x9a7   : > { %14338 = vmatprep.subr.bf16.mxu1 %v21440_v32  ;;  %v21536_v32 = vld [vmem:[%s22890_s7 + $0x28c] ss:$16 sps:$4 sm:$0xff]  }
 0x9a9   : > { %14296 = vmatpush1.bf16.msra.mxu0 %v21435_v1  ;;  %v21531_v1 = vld [vmem:[%s22890_s7 + $0x88] ss:$16 sps:$4 sm:$0xff]  }
 0x9aa   : > { %14339 = vmatpush1.bf16.msra.mxu1 %v21438_v44  ;;  %14297 = vmatprep.subr.bf16.mxu0 %v21443_v46  ;;  %v21534_v44 = vld [vmem:[%s22890_s7 + $0x288] ss:$16 sps:$4 sm:$0xff]  }
 0x9ab   : > { %14340 = vmatprep.subr.bf16.mxu1 %v21446_v58  ;;  %v21537_v46 = vld [vmem:[%s22890_s7 + $0x68] ss:$16 sps:$4 sm:$0xff]  }
 0x9ac   : > { %v21540_v58 = vld [vmem:[%s22890_s7 + $0x268] ss:$16 sps:$4 sm:$0xff]  }
 0x9ad   : > { %14298 = vmatpush1.bf16.msra.mxu0 %v21441_v61  ;;  %v21545_v61 = vld [vmem:[%s22890_s7 + $0x4c] ss:$16 sps:$4 sm:$0xff]  }
 0x9ae   : > { %14341 = vmatpush1.bf16.msra.mxu1 %v21444_v63  ;;  %14299 = vmatprep.subr.bf16.mxu0 %v21449_v53  ;;  %v21548_v63 = vld [vmem:[%s22890_s7 + $0x24c] ss:$16 sps:$4 sm:$0xff]   ;;  %v21543_v53 = vld [vmem:[%s22890_s7 + $0x48] ss:$16 sps:$4 sm:$0xff]  }
 0x9af   : > { %14342 = vmatprep.subr.bf16.mxu1 %v21452_v50  ;;  %v21546_v50 = vld [vmem:[%s22890_s7 + $0x248] ss:$16 sps:$4 sm:$0xff]  }
 0x9b1   : > { %14300 = vmatpush1.bf16.msra.mxu0 %v21447_v13  ;;  %v21551_v13 = vld [vmem:[%s22890_s7 + $0x2c] ss:$16 sps:$4 sm:$0xff]  }
 0x9b2   : > { %14343 = vmatpush1.bf16.msra.mxu1 %v21450_v17  ;;  %14301 = vmatprep.subr.bf16.mxu0 %v21455_v26  ;;  %v21554_v17 = vld [vmem:[%s22890_s7 + $0x22c] ss:$16 sps:$4 sm:$0xff]   ;;  %v21549_v26 = vld [vmem:[%s22890_s7 + $0x28] ss:$16 sps:$4 sm:$0xff]  }
 0x9b3   : > { %14344 = vmatprep.subr.bf16.mxu1 %v21458_v5  ;;  %v21552_v5 = vld [vmem:[%s22890_s7 + $0x228] ss:$16 sps:$4 sm:$0xff]  }
 0x9b5   : > { %14302 = vmatpush1.bf16.msra.mxu0 %v21453_v47  ;;  %v21557_v47 = vld [vmem:[%s22890_s7 + $0xc] ss:$16 sps:$4 sm:$0xff]  }
 0x9b6   : > { %14345 = vmatpush1.bf16.msra.mxu1 %v21456_v7  ;;  %14303 = vmatprep.subr.bf16.mxu0 %v21461_v14  ;;  %v21560_v7 = vld [vmem:[%s22890_s7 + $0x20c] ss:$16 sps:$4 sm:$0xff]   ;;  %v21555_v14 = vld [vmem:[%s22890_s7 + $0x8] ss:$16 sps:$4 sm:$0xff]  }
 0x9b7   : > { %14346 = vmatprep.subr.bf16.mxu1 %v21464_v51  ;;  %v21558_v51 = vld [vmem:[%s22890_s7 + $0x208] ss:$16 sps:$4 sm:$0xff]  }
 0x9b9   : > { %14304 = vmatpush2.bf16.msra.mxu0 %v21459_v2  ;;  %v21563_v2 = vld [vmem:[%s22890_s7 + $0x1ec] ss:$16 sps:$4 sm:$0xff]  }
 0x9ba   : > { %14347 = vmatpush2.bf16.msra.mxu1 %v21462_v42  ;;  %14305 = vmatprep.subr.bf16.mxu0 %v21467_v10  ;;  %v21566_v42 = vld [vmem:[%s22890_s7 + $0x3ec] ss:$16 sps:$4 sm:$0xff]   ;;  %v21561_v10 = vld [vmem:[%s22890_s7 + $0x1e8] ss:$16 sps:$4 sm:$0xff]  }
 0x9bb   : > { %14348 = vmatprep.subr.bf16.mxu1 %v21470_v37  ;;  %v21564_v37 = vld [vmem:[%s22890_s7 + $0x3e8] ss:$16 sps:$4 sm:$0xff]  }
 0x9bd   : > { %14306 = vmatpush2.bf16.msra.mxu0 %v21465_v45  ;;  %v21569_v45 = vld [vmem:[%s22890_s7 + $0x1cc] ss:$16 sps:$4 sm:$0xff]  }
 0x9be   : > { %14349 = vmatpush2.bf16.msra.mxu1 %v21468_v21  ;;  %14307 = vmatprep.subr.bf16.mxu0 %v21473_v33  ;;  %v21572_v21 = vld [vmem:[%s22890_s7 + $0x3cc] ss:$16 sps:$4 sm:$0xff]   ;;  %v21567_v33 = vld [vmem:[%s22890_s7 + $0x1c8] ss:$16 sps:$4 sm:$0xff]  }
 0x9bf   : > { %14350 = vmatprep.subr.bf16.mxu1 %v21476_v30  ;;  %v21570_v30 = vld [vmem:[%s22890_s7 + $0x3c8] ss:$16 sps:$4 sm:$0xff]  }
 0x9c1   : > { %14308 = vmatpush2.bf16.msra.mxu0 %v21471_v34  ;;  %v21575_v34 = vld [vmem:[%s22890_s7 + $0x1ac] ss:$16 sps:$4 sm:$0xff]  }
 0x9c2   : > { %14351 = vmatpush2.bf16.msra.mxu1 %v21474_v0  ;;  %14309 = vmatprep.subr.bf16.mxu0 %v21479_v56  ;;  %v21578_v0 = vld [vmem:[%s22890_s7 + $0x3ac] ss:$16 sps:$4 sm:$0xff]   ;;  %v21573_v56 = vld [vmem:[%s22890_s7 + $0x1a8] ss:$16 sps:$4 sm:$0xff]  }
 0x9c3   : > { %14352 = vmatprep.subr.bf16.mxu1 %v21482_v31  ;;  %v21576_v31 = vld [vmem:[%s22890_s7 + $0x3a8] ss:$16 sps:$4 sm:$0xff]  }
 0x9c5   : > { %14310 = vmatpush2.bf16.msra.mxu0 %v21477_v38  ;;  %v21581_v38 = vld [vmem:[%s22890_s7 + $0x18c] ss:$16 sps:$4 sm:$0xff]  }
 0x9c6   : > { %14353 = vmatpush2.bf16.msra.mxu1 %v21480_v11  ;;  %14311 = vmatprep.subr.bf16.mxu0 %v21485_v25  ;;  %v21584_v11 = vld [vmem:[%s22890_s7 + $0x38c] ss:$16 sps:$4 sm:$0xff]   ;;  %v21579_v25 = vld [vmem:[%s22890_s7 + $0x188] ss:$16 sps:$4 sm:$0xff]  }
 0x9c7   : > { %14354 = vmatprep.subr.bf16.mxu1 %v21488_v39  ;;  %v21582_v39 = vld [vmem:[%s22890_s7 + $0x388] ss:$16 sps:$4 sm:$0xff]  }
 0x9c9   : > { %14312 = vmatpush2.bf16.msra.mxu0 %v21483_v49  ;;  %v21587_v49 = vld [vmem:[%s22890_s7 + $0x16c] ss:$16 sps:$4 sm:$0xff]  }
 0x9ca   : > { %14355 = vmatpush2.bf16.msra.mxu1 %v21486_v43  ;;  %14313 = vmatprep.subr.bf16.mxu0 %v21491_v3  ;;  %v21590_v43 = vld [vmem:[%s22890_s7 + $0x36c] ss:$16 sps:$4 sm:$0xff]   ;;  %v21585_v3 = vld [vmem:[%s22890_s7 + $0x168] ss:$16 sps:$4 sm:$0xff]  }
 0x9cb   : > { %14356 = vmatprep.subr.bf16.mxu1 %v21494_v29  ;;  %v21588_v29 = vld [vmem:[%s22890_s7 + $0x368] ss:$16 sps:$4 sm:$0xff]  }
 0x9cd   : > { %14314 = vmatpush2.bf16.msra.mxu0 %v21489_v41  ;;  %v21593_v41 = vld [vmem:[%s22890_s7 + $0x14c] ss:$16 sps:$4 sm:$0xff]  }
 0x9ce   : > { %14357 = vmatpush2.bf16.msra.mxu1 %v21492_v62  ;;  %14315 = vmatprep.subr.bf16.mxu0 %v21497_v27  ;;  %v21596_v62 = vld [vmem:[%s22890_s7 + $0x34c] ss:$16 sps:$4 sm:$0xff]   ;;  %v21591_v27 = vld [vmem:[%s22890_s7 + $0x148] ss:$16 sps:$4 sm:$0xff]  }
 0x9cf   : > { %14358 = vmatprep.subr.bf16.mxu1 %v21500_v19  ;;  %v21594_v19 = vld [vmem:[%s22890_s7 + $0x348] ss:$16 sps:$4 sm:$0xff]  }
 0x9d1   : > { %14316 = vmatpush2.bf16.msra.mxu0 %v21495_v24  ;;  %v21599_v24 = vld [vmem:[%s22890_s7 + $0x12c] ss:$16 sps:$4 sm:$0xff]  }
 0x9d2   : > { %14359 = vmatpush2.bf16.msra.mxu1 %v21498_v60  ;;  %14317 = vmatprep.subr.bf16.mxu0 %v21503_v52  ;;  %v21602_v60 = vld [vmem:[%s22890_s7 + $0x32c] ss:$16 sps:$4 sm:$0xff]   ;;  %v21597_v52 = vld [vmem:[%s22890_s7 + $0x128] ss:$16 sps:$4 sm:$0xff]  }
 0x9d3   : > { %14360 = vmatprep.subr.bf16.mxu1 %v21506_v16  ;;  %v21600_v16 = vld [vmem:[%s22890_s7 + $0x328] ss:$16 sps:$4 sm:$0xff]  }
 0x9d5   : > { %14318 = vmatpush2.bf16.msra.mxu0 %v21501_v8  ;;  %v21605_v8 = vld [vmem:[%s22890_s7 + $0x10c] ss:$16 sps:$4 sm:$0xff]  }
 0x9d6   : > { %14361 = vmatpush2.bf16.msra.mxu1 %v21504_v6  ;;  %14373 = vmatprep.subr.bf16.mxu0 %v21515_v40  ;;  %v21608_v6 = vld [vmem:[%s22890_s7 + $0x30c] ss:$16 sps:$4 sm:$0xff]   ;;  %v21603_v40 = vld [vmem:[%s22890_s7 + $0x108] ss:$16 sps:$4 sm:$0xff]  }
 0x9d7   : > { %14416 = vmatprep.subr.bf16.mxu1 %v21518_v35  ;;  %v21606_v35 = vld [vmem:[%s22890_s7 + $0x308] ss:$16 sps:$4 sm:$0xff]  }
 0x9d8   : > { %14320 = vmatmul.mubr.bf16.vlgmr.msra.gmra.mxu0 %v25357_v15 }
 0x9d9   : > { %14363 = vmatmul.mubr.bf16.vlgmr.msra.gmra.mxu1 %v25359_v59  ;;  %14374 = vmatpush1.bf16.msra.mxu0 %v21513_v12  ;;  %v21611_v12 = vld [vmem:[%s22890_s7 + $0x8e4] ss:$16 sps:$4 sm:$0xff]  }
 0x9da   : > { %14417 = vmatpush1.bf16.msra.mxu1 %v21516_v4  ;;  %14375 = vmatprep.subr.bf16.mxu0 %v21521_v9  ;;  %v21614_v4 = vld [vmem:[%s22890_s7 + $0xae4] ss:$16 sps:$4 sm:$0xff]   ;;  %v21609_v9 = vld [vmem:[%s22890_s7 + $0x8e0] ss:$16 sps:$4 sm:$0xff]  }
 0x9db   : > { %14418 = vmatprep.subr.bf16.mxu1 %v21524_v28  ;;  %14405 = vmatprep.mubr.bf16.mxu0 %v25294_v22  ;;  %v21539_v22 = vld [vmem:[%s22890_s7 + $0x6c] ss:$16 sps:$4 sm:$0xff]   ;;  %v21612_v28 = vld [vmem:[%s22890_s7 + $0xae0] ss:$16 sps:$4 sm:$0xff]  }
 0x9dc   : > { %14448 = vmatprep.mubr.bf16.mxu1 %v25297_v55  ;;  %v21542_v55 = vld [vmem:[%s22890_s7 + $0x26c] ss:$16 sps:$4 sm:$0xff]  }
 0x9dd   : > { %14376 = vmatpush1.bf16.msra.mxu0 %v21519_v23  ;;  %v21617_v23 = vld [vmem:[%s22890_s7 + $0x8c4] ss:$16 sps:$4 sm:$0xff]  }
 0x9de   : > { %14419 = vmatpush1.bf16.msra.mxu1 %v21522_v57  ;;  %14377 = vmatprep.subr.bf16.mxu0 %v21527_v48  ;;  %v21620_v57 = vld [vmem:[%s22890_s7 + $0xac4] ss:$16 sps:$4 sm:$0xff]   ;;  %v25433_v48 = vld [vmem:[#allocation3 + $0x44] ss:$16 sps:$4 sm:$0xff]  }
 0x9df   : > { %14420 = vmatprep.subr.bf16.mxu1 %v21530_v20  ;;  %v25435_v20 = vld [vmem:[#allocation3 + $0x4c] ss:$16 sps:$4 sm:$0xff]  }
 0x9e1   : > { %14378 = vmatpush1.bf16.msra.mxu0 %v21525_v18  ;;  %v21615_v18 = vld [vmem:[%s22890_s7 + $0x8c0] ss:$16 sps:$4 sm:$0xff]  }
 0x9e2   : > { %14421 = vmatpush1.bf16.msra.mxu1 %v21528_v54  ;;  %14379 = vmatprep.subr.bf16.mxu0 %v21533_v36  ;;  %v21618_v54 = vld [vmem:[%s22890_s7 + $0xac0] ss:$16 sps:$4 sm:$0xff]   ;;  %v21623_v36 = vld [vmem:[%s22890_s7 + $0x8a4] ss:$16 sps:$4 sm:$0xff]  }
 0x9e3   : > { %14422 = vmatprep.subr.bf16.mxu1 %v21536_v32  ;;  %v21626_v32 = vld [vmem:[%s22890_s7 + $0xaa4] ss:$16 sps:$4 sm:$0xff]  }
 0x9e5   : > { %14380 = vmatpush1.bf16.msra.mxu0 %v21531_v1  ;;  %v21629_v1 = vld [vmem:[%s22890_s7 + $0x884] ss:$16 sps:$4 sm:$0xff]  }
 0x9e6   : > { %14423 = vmatpush1.bf16.msra.mxu1 %v21534_v44  ;;  %14381 = vmatprep.subr.bf16.mxu0 %v21539_v22  ;;  %v21632_v44 = vld [vmem:[%s22890_s7 + $0xa84] ss:$16 sps:$4 sm:$0xff]   ;;  %v21627_v22 = vld [vmem:[%s22890_s7 + $0x880] ss:$16 sps:$4 sm:$0xff]  }
 0x9e7   : > { %14424 = vmatprep.subr.bf16.mxu1 %v21542_v55  ;;  %v21630_v55 = vld [vmem:[%s22890_s7 + $0xa80] ss:$16 sps:$4 sm:$0xff]  }
 0x9e9   : > { %14382 = vmatpush1.bf16.msra.mxu0 %v21537_v46  ;;  %v21635_v46 = vld [vmem:[%s22890_s7 + $0x864] ss:$16 sps:$4 sm:$0xff]  }
 0x9ea   : > { %14425 = vmatpush1.bf16.msra.mxu1 %v21540_v58  ;;  %14383 = vmatprep.subr.bf16.mxu0 %v21545_v61  ;;  %v21638_v58 = vld [vmem:[%s22890_s7 + $0xa64] ss:$16 sps:$4 sm:$0xff]   ;;  %v21633_v61 = vld [vmem:[%s22890_s7 + $0x860] ss:$16 sps:$4 sm:$0xff]  }
 0x9eb   : > { %14426 = vmatprep.subr.bf16.mxu1 %v21548_v63  ;;  %v21636_v63 = vld [vmem:[%s22890_s7 + $0xa60] ss:$16 sps:$4 sm:$0xff]  }
 0x9ed   : > { %14384 = vmatpush1.bf16.msra.mxu0 %v21543_v53  ;;  %v21641_v53 = vld [vmem:[%s22890_s7 + $0x844] ss:$16 sps:$4 sm:$0xff]  }
 0x9ee   : > { %14427 = vmatpush1.bf16.msra.mxu1 %v21546_v50  ;;  %14385 = vmatprep.subr.bf16.mxu0 %v21551_v13  ;;  %v21644_v50 = vld [vmem:[%s22890_s7 + $0xa44] ss:$16 sps:$4 sm:$0xff]   ;;  %v21639_v13 = vld [vmem:[%s22890_s7 + $0x840] ss:$16 sps:$4 sm:$0xff]  }
 0x9ef   : > { %14428 = vmatprep.subr.bf16.mxu1 %v21554_v17  ;;  %v21642_v17 = vld [vmem:[%s22890_s7 + $0xa40] ss:$16 sps:$4 sm:$0xff]  }
 0x9f1   : > { %14386 = vmatpush1.bf16.msra.mxu0 %v21549_v26  ;;  %v21647_v26 = vld [vmem:[%s22890_s7 + $0x824] ss:$16 sps:$4 sm:$0xff]  }
 0x9f2   : > { %14429 = vmatpush1.bf16.msra.mxu1 %v21552_v5  ;;  %14387 = vmatprep.subr.bf16.mxu0 %v21557_v47  ;;  %v21650_v5 = vld [vmem:[%s22890_s7 + $0xa24] ss:$16 sps:$4 sm:$0xff]   ;;  %v21645_v47 = vld [vmem:[%s22890_s7 + $0x820] ss:$16 sps:$4 sm:$0xff]  }
 0x9f3   : > { %14430 = vmatprep.subr.bf16.mxu1 %v21560_v7  ;;  %v21648_v7 = vld [vmem:[%s22890_s7 + $0xa20] ss:$16 sps:$4 sm:$0xff]  }
 0x9f5   : > { %14388 = vmatpush1.bf16.msra.mxu0 %v21555_v14  ;;  %v21653_v14 = vld [vmem:[%s22890_s7 + $0x804] ss:$16 sps:$4 sm:$0xff]  }
 0x9f6   : > { %14431 = vmatpush1.bf16.msra.mxu1 %v21558_v51  ;;  %14389 = vmatprep.subr.bf16.mxu0 %v21563_v2  ;;  %v21656_v51 = vld [vmem:[%s22890_s7 + $0xa04] ss:$16 sps:$4 sm:$0xff]   ;;  %v21651_v2 = vld [vmem:[%s22890_s7 + $0x800] ss:$16 sps:$4 sm:$0xff]  }
 0x9f7   : > { %14432 = vmatprep.subr.bf16.mxu1 %v21566_v42  ;;  %v21654_v42 = vld [vmem:[%s22890_s7 + $0xa00] ss:$16 sps:$4 sm:$0xff]  }
 0x9f9   : > { %14390 = vmatpush2.bf16.msra.mxu0 %v21561_v10  ;;  %v21659_v10 = vld [vmem:[%s22890_s7 + $0x9e4] ss:$16 sps:$4 sm:$0xff]  }
 0x9fa   : > { %14433 = vmatpush2.bf16.msra.mxu1 %v21564_v37  ;;  %14391 = vmatprep.subr.bf16.mxu0 %v21569_v45  ;;  %v21662_v37 = vld [vmem:[%s22890_s7 + $0xbe4] ss:$16 sps:$4 sm:$0xff]   ;;  %v21657_v45 = vld [vmem:[%s22890_s7 + $0x9e0] ss:$16 sps:$4 sm:$0xff]  }
 0x9fb   : > { %14434 = vmatprep.subr.bf16.mxu1 %v21572_v21  ;;  %v21660_v21 = vld [vmem:[%s22890_s7 + $0xbe0] ss:$16 sps:$4 sm:$0xff]  }
 0x9fd   : > { %14392 = vmatpush2.bf16.msra.mxu0 %v21567_v33  ;;  %v21665_v33 = vld [vmem:[%s22890_s7 + $0x9c4] ss:$16 sps:$4 sm:$0xff]  }
 0x9fe   : > { %14435 = vmatpush2.bf16.msra.mxu1 %v21570_v30  ;;  %14393 = vmatprep.subr.bf16.mxu0 %v21575_v34  ;;  %v21668_v30 = vld [vmem:[%s22890_s7 + $0xbc4] ss:$16 sps:$4 sm:$0xff]   ;;  %v21663_v34 = vld [vmem:[%s22890_s7 + $0x9c0] ss:$16 sps:$4 sm:$0xff]  }
 0x9ff   : > { %14436 = vmatprep.subr.bf16.mxu1 %v21578_v0  ;;  %v21666_v0 = vld [vmem:[%s22890_s7 + $0xbc0] ss:$16 sps:$4 sm:$0xff]  }
 0xa01   : > { %14394 = vmatpush2.bf16.msra.mxu0 %v21573_v56  ;;  %v21671_v56 = vld [vmem:[%s22890_s7 + $0x9a4] ss:$16 sps:$4 sm:$0xff]  }
 0xa02   : > { %14437 = vmatpush2.bf16.msra.mxu1 %v21576_v31  ;;  %14395 = vmatprep.subr.bf16.mxu0 %v21581_v38  ;;  %v21674_v31 = vld [vmem:[%s22890_s7 + $0xba4] ss:$16 sps:$4 sm:$0xff]   ;;  %v21669_v38 = vld [vmem:[%s22890_s7 + $0x9a0] ss:$16 sps:$4 sm:$0xff]  }
 0xa03   : > { %14438 = vmatprep.subr.bf16.mxu1 %v21584_v11  ;;  %v21672_v11 = vld [vmem:[%s22890_s7 + $0xba0] ss:$16 sps:$4 sm:$0xff]  }
 0xa05   : > { %14396 = vmatpush2.bf16.msra.mxu0 %v21579_v25  ;;  %v21677_v25 = vld [vmem:[%s22890_s7 + $0x984] ss:$16 sps:$4 sm:$0xff]  }
 0xa06   : > { %14439 = vmatpush2.bf16.msra.mxu1 %v21582_v39  ;;  %14397 = vmatprep.subr.bf16.mxu0 %v21587_v49  ;;  %v21680_v39 = vld [vmem:[%s22890_s7 + $0xb84] ss:$16 sps:$4 sm:$0xff]   ;;  %v21675_v49 = vld [vmem:[%s22890_s7 + $0x980] ss:$16 sps:$4 sm:$0xff]  }
 0xa07   : > { %14440 = vmatprep.subr.bf16.mxu1 %v21590_v43  ;;  %v21678_v43 = vld [vmem:[%s22890_s7 + $0xb80] ss:$16 sps:$4 sm:$0xff]  }
 0xa09   : > { %14398 = vmatpush2.bf16.msra.mxu0 %v21585_v3  ;;  %v21683_v3 = vld [vmem:[%s22890_s7 + $0x964] ss:$16 sps:$4 sm:$0xff]  }
 0xa0a   : > { %14441 = vmatpush2.bf16.msra.mxu1 %v21588_v29  ;;  %14399 = vmatprep.subr.bf16.mxu0 %v21593_v41  ;;  %v21686_v29 = vld [vmem:[%s22890_s7 + $0xb64] ss:$16 sps:$4 sm:$0xff]   ;;  %v21681_v41 = vld [vmem:[%s22890_s7 + $0x960] ss:$16 sps:$4 sm:$0xff]  }
 0xa0b   : > { %14442 = vmatprep.subr.bf16.mxu1 %v21596_v62  ;;  %v21684_v62 = vld [vmem:[%s22890_s7 + $0xb60] ss:$16 sps:$4 sm:$0xff]  }
 0xa0d   : > { %14400 = vmatpush2.bf16.msra.mxu0 %v21591_v27  ;;  %v21689_v27 = vld [vmem:[%s22890_s7 + $0x944] ss:$16 sps:$4 sm:$0xff]  }
 0xa0e   : > { %14443 = vmatpush2.bf16.msra.mxu1 %v21594_v19  ;;  %14401 = vmatprep.subr.bf16.mxu0 %v21599_v24  ;;  %v21692_v19 = vld [vmem:[%s22890_s7 + $0xb44] ss:$16 sps:$4 sm:$0xff]   ;;  %v21687_v24 = vld [vmem:[%s22890_s7 + $0x940] ss:$16 sps:$4 sm:$0xff]  }
 0xa0f   : > { %14444 = vmatprep.subr.bf16.mxu1 %v21602_v60  ;;  %v21690_v60 = vld [vmem:[%s22890_s7 + $0xb40] ss:$16 sps:$4 sm:$0xff]  }
 0xa11   : > { %14402 = vmatpush2.bf16.msra.mxu0 %v21597_v52 }
 0xa12   : > { %14445 = vmatpush2.bf16.msra.mxu1 %v21600_v16  ;;  %14403 = vmatprep.subr.bf16.mxu0 %v21605_v8  ;;  %v21695_v8 = vld [vmem:[%s22890_s7 + $0x924] ss:$16 sps:$4 sm:$0xff]  }
 0xa13   : > { %14446 = vmatprep.subr.bf16.mxu1 %v21608_v6  ;;  %v21698_v6 = vld [vmem:[%s22890_s7 + $0xb24] ss:$16 sps:$4 sm:$0xff]  }
 0xa15   : > { %14404 = vmatpush2.bf16.msra.mxu0 %v21603_v40  ;;  %v21693_v40 = vld [vmem:[%s22890_s7 + $0x920] ss:$16 sps:$4 sm:$0xff]  }
 0xa16   : > { %14447 = vmatpush2.bf16.msra.mxu1 %v21606_v35  ;;  %15252 = vmatprep.subr.bf16.mxu0 %v21611_v12  ;;  %v21696_v35 = vld [vmem:[%s22890_s7 + $0xb20] ss:$16 sps:$4 sm:$0xff]  }
 0xa17   : > { %15295 = vmatprep.subr.bf16.mxu1 %v21614_v4 }
 0xa18   : > { %14406 = vmatmul.mubr.bf16.vlgmr.msra.gmra.mxu0 %v25357_v15  ;;  %v21621_v15 = vld [vmem:[%s22890_s7 + $0x8a0] ss:$16 sps:$4 sm:$0xff]   ;;  %v25491_v52 = vpop.f32.mrf.mxu0 }
 0xa19   : > { %14449 = vmatmul.mubr.bf16.vlgmr.msra.gmra.mxu1 %v25359_v59  ;;  %15253 = vmatpush1.bf16.msra.mxu0 %v21609_v9  ;;  %v21624_v59 = vld [vmem:[%s22890_s7 + $0xaa0] ss:$16 sps:$4 sm:$0xff]   ;;  %v25493_v16 = vpop.f32.mrf.mxu1  ;;  %v21701_v9 = vld [vmem:[%s22890_s7 + $0x904] ss:$16 sps:$4 sm:$0xff]  }
 0xa1a   : > { %15296 = vmatpush1.bf16.msra.mxu1 %v21612_v28  ;;  %15254 = vmatprep.subr.bf16.mxu0 %v21617_v23  ;;  %v25499_v12 = vpop.f32.mrf.mxu0  ;;  %v21704_v28 = vld [vmem:[%s22890_s7 + $0xb04] ss:$16 sps:$4 sm:$0xff]   ;;  %v21699_v23 = vld [vmem:[%s22890_s7 + $0x900] ss:$16 sps:$4 sm:$0xff]  }
 0xa1b   : > { %15297 = vmatprep.subr.bf16.mxu1 %v21620_v57  ;;  %15284 = vmatprep.mubr.bf16.mxu0 %v25433_v48  ;;  %v25501_v4 = vpop.f32.mrf.mxu1  ;;  %v21702_v57 = vld [vmem:[%s22890_s7 + $0xb00] ss:$16 sps:$4 sm:$0xff]  }
 0xa1c   : > { %15327 = vmatprep.mubr.bf16.mxu1 %v25435_v20 }
 0xa1d   : > { %15255 = vmatpush1.bf16.msra.mxu0 %v21615_v18  ;;  %v25507_v18 = vpop.f32.mrf.mxu0 }
 0xa1e   : > { %15298 = vmatpush1.bf16.msra.mxu1 %v21618_v54  ;;  %15256 = vmatprep.subr.bf16.mxu0 %v21623_v36  ;;  %v25509_v54 = vpop.f32.mrf.mxu1  ;;  %v25511_v36 = vld [vmem:[#allocation3 + $0x40] ss:$16 sps:$4 sm:$0xff]  }
 0xa1f   : > { %15299 = vmatprep.subr.bf16.mxu1 %v21626_v32  ;;  %v25513_v32 = vld [vmem:[#allocation3 + $0x48] ss:$16 sps:$4 sm:$0xff]  }
 0xa21   : > { %15257 = vmatpush1.bf16.msra.mxu0 %v21621_v15  ;;  %v21713_v15 = vld [vmem:[%s22890_s7 + $0x8ec] ss:$16 sps:$4 sm:$0xff]  }
 0xa22   : > { %15300 = vmatpush1.bf16.msra.mxu1 %v21624_v59  ;;  %15258 = vmatprep.subr.bf16.mxu0 %v21629_v1  ;;  %v21716_v59 = vld [vmem:[%s22890_s7 + $0xaec] ss:$16 sps:$4 sm:$0xff]   ;;  %v21711_v1 = vld [vmem:[%s22890_s7 + $0x8e8] ss:$16 sps:$4 sm:$0xff]  }
 0xa23   : > { %15301 = vmatprep.subr.bf16.mxu1 %v21632_v44  ;;  %v21714_v44 = vld [vmem:[%s22890_s7 + $0xae8] ss:$16 sps:$4 sm:$0xff]  }
 0xa25   : > { %15259 = vmatpush1.bf16.msra.mxu0 %v21627_v22  ;;  %v25519_v22 = vpop.f32.mrf.mxu0 }
 0xa26   : > { %15302 = vmatpush1.bf16.msra.mxu1 %v21630_v55  ;;  %15260 = vmatprep.subr.bf16.mxu0 %v21635_v46  ;;  %v25521_v55 = vpop.f32.mrf.mxu1  ;;  %v21719_v46 = vld [vmem:[%s22890_s7 + $0x8cc] ss:$16 sps:$4 sm:$0xff]  }
 0xa27   : > { %15303 = vmatprep.subr.bf16.mxu1 %v21638_v58  ;;  %v21722_v58 = vld [vmem:[%s22890_s7 + $0xacc] ss:$16 sps:$4 sm:$0xff]  }
 0xa29   : > { %15261 = vmatpush1.bf16.msra.mxu0 %v21633_v61  ;;  %v21717_v61 = vld [vmem:[%s22890_s7 + $0x8c8] ss:$16 sps:$4 sm:$0xff]  }
 0xa2a   : > { %15304 = vmatpush1.bf16.msra.mxu1 %v21636_v63  ;;  %15262 = vmatprep.subr.bf16.mxu0 %v21641_v53  ;;  %v21720_v63 = vld [vmem:[%s22890_s7 + $0xac8] ss:$16 sps:$4 sm:$0xff]  }
 0xa2b   : > { %15305 = vmatprep.subr.bf16.mxu1 %v21644_v50 }
 0xa2d   : > { %15263 = vmatpush1.bf16.msra.mxu0 %v21639_v13 }
 0xa2e   : > { %15306 = vmatpush1.bf16.msra.mxu1 %v21642_v17  ;;  %15264 = vmatprep.subr.bf16.mxu0 %v21647_v26 }
 0xa2f   : > { %15307 = vmatprep.subr.bf16.mxu1 %v21650_v5  ;;  %v21725_v5 = vld [vmem:[%s22890_s7 + $0x8ac] ss:$16 sps:$4 sm:$0xff]  }
 0xa31   : > { %15265 = vmatpush1.bf16.msra.mxu0 %v21645_v47  ;;  %v21728_v47 = vld [vmem:[%s22890_s7 + $0xaac] ss:$16 sps:$4 sm:$0xff]  }
 0xa32   : > { %15308 = vmatpush1.bf16.msra.mxu1 %v21648_v7  ;;  %15266 = vmatprep.subr.bf16.mxu0 %v21653_v14  ;;  %v21723_v14 = vld [vmem:[%s22890_s7 + $0x8a8] ss:$16 sps:$4 sm:$0xff]  }
 0xa33   : > { %15309 = vmatprep.subr.bf16.mxu1 %v21656_v51  ;;  %v21726_v51 = vld [vmem:[%s22890_s7 + $0xaa8] ss:$16 sps:$4 sm:$0xff]  }
 0xa35   : > { %15267 = vmatpush1.bf16.msra.mxu0 %v21651_v2 }
 0xa36   : > { %15310 = vmatpush1.bf16.msra.mxu1 %v21654_v42  ;;  %15268 = vmatprep.subr.bf16.mxu0 %v21659_v10 }
 0xa37   : > { %15311 = vmatprep.subr.bf16.mxu1 %v21662_v37 }
 0xa39   : > { %15269 = vmatpush2.bf16.msra.mxu0 %v21657_v45 }
 0xa3a   : > { %15312 = vmatpush2.bf16.msra.mxu1 %v21660_v21  ;;  %15270 = vmatprep.subr.bf16.mxu0 %v21665_v33  ;;  %v21731_v21 = vld [vmem:[%s22890_s7 + $0x88c] ss:$16 sps:$4 sm:$0xff]  }
 0xa3b   : > { %15313 = vmatprep.subr.bf16.mxu1 %v21668_v30  ;;  %v21732_v30 = vld [vmem:[%s22890_s7 + $0xa88] ss:$16 sps:$4 sm:$0xff]  }
 0xa3d   : > { %15271 = vmatpush2.bf16.msra.mxu0 %v21663_v34  ;;  %v21737_v34 = vld [vmem:[%s22890_s7 + $0x86c] ss:$16 sps:$4 sm:$0xff]  }
 0xa3e   : > { %15314 = vmatpush2.bf16.msra.mxu1 %v21666_v0  ;;  %15272 = vmatprep.subr.bf16.mxu0 %v21671_v56  ;;  %v21740_v0 = vld [vmem:[%s22890_s7 + $0xa6c] ss:$16 sps:$4 sm:$0xff]   ;;  %v21735_v56 = vld [vmem:[%s22890_s7 + $0x868] ss:$16 sps:$4 sm:$0xff]  }
 0xa3f   : > { %15315 = vmatprep.subr.bf16.mxu1 %v21674_v31  ;;  %v21738_v31 = vld [vmem:[%s22890_s7 + $0xa68] ss:$16 sps:$4 sm:$0xff]  }
 0xa41   : > { %15273 = vmatpush2.bf16.msra.mxu0 %v21669_v38  ;;  %v21743_v38 = vld [vmem:[%s22890_s7 + $0x84c] ss:$16 sps:$4 sm:$0xff]  }
 0xa42   : > { %15316 = vmatpush2.bf16.msra.mxu1 %v21672_v11  ;;  %15274 = vmatprep.subr.bf16.mxu0 %v21677_v25  ;;  %v21746_v11 = vld [vmem:[%s22890_s7 + $0xa4c] ss:$16 sps:$4 sm:$0xff]   ;;  %v21741_v25 = vld [vmem:[%s22890_s7 + $0x848] ss:$16 sps:$4 sm:$0xff]  }
 0xa43   : > { %15317 = vmatprep.subr.bf16.mxu1 %v21680_v39  ;;  %v21744_v39 = vld [vmem:[%s22890_s7 + $0xa48] ss:$16 sps:$4 sm:$0xff]  }
 0xa45   : > { %15275 = vmatpush2.bf16.msra.mxu0 %v21675_v49  ;;  %v21749_v49 = vld [vmem:[%s22890_s7 + $0x82c] ss:$16 sps:$4 sm:$0xff]  }
 0xa46   : > { %15318 = vmatpush2.bf16.msra.mxu1 %v21678_v43  ;;  %15276 = vmatprep.subr.bf16.mxu0 %v21683_v3  ;;  %v21752_v43 = vld [vmem:[%s22890_s7 + $0xa2c] ss:$16 sps:$4 sm:$0xff]   ;;  %v21747_v3 = vld [vmem:[%s22890_s7 + $0x828] ss:$16 sps:$4 sm:$0xff]  }
 0xa47   : > { %15319 = vmatprep.subr.bf16.mxu1 %v21686_v29  ;;  %v21750_v29 = vld [vmem:[%s22890_s7 + $0xa28] ss:$16 sps:$4 sm:$0xff]  }
 0xa49   : > { %15277 = vmatpush2.bf16.msra.mxu0 %v21681_v41  ;;  %v21755_v41 = vld [vmem:[%s22890_s7 + $0x80c] ss:$16 sps:$4 sm:$0xff]  }
 0xa4a   : > { %15320 = vmatpush2.bf16.msra.mxu1 %v21684_v62  ;;  %15278 = vmatprep.subr.bf16.mxu0 %v21689_v27  ;;  %v21758_v62 = vld [vmem:[%s22890_s7 + $0xa0c] ss:$16 sps:$4 sm:$0xff]   ;;  %v21753_v27 = vld [vmem:[%s22890_s7 + $0x808] ss:$16 sps:$4 sm:$0xff]  }
 0xa4b   : > { %15321 = vmatprep.subr.bf16.mxu1 %v21692_v19  ;;  %v21756_v19 = vld [vmem:[%s22890_s7 + $0xa08] ss:$16 sps:$4 sm:$0xff]  }
 0xa4d   : > { %15279 = vmatpush2.bf16.msra.mxu0 %v21687_v24  ;;  %v21761_v24 = vld [vmem:[%s22890_s7 + $0x9ec] ss:$16 sps:$4 sm:$0xff]  }
 0xa4e   : > { %15322 = vmatpush2.bf16.msra.mxu1 %v21690_v60  ;;  %15280 = vmatprep.subr.bf16.mxu0 %v21695_v8  ;;  %v21764_v60 = vld [vmem:[%s22890_s7 + $0xbec] ss:$16 sps:$4 sm:$0xff]   ;;  %v21759_v8 = vld [vmem:[%s22890_s7 + $0x9e8] ss:$16 sps:$4 sm:$0xff]  }
 0xa4f   : > { %15323 = vmatprep.subr.bf16.mxu1 %v21698_v6  ;;  %v21762_v6 = vld [vmem:[%s22890_s7 + $0xbe8] ss:$16 sps:$4 sm:$0xff]  }
 0xa51   : > { %15281 = vmatpush2.bf16.msra.mxu0 %v21693_v40  ;;  %v21767_v40 = vld [vmem:[%s22890_s7 + $0x9cc] ss:$16 sps:$4 sm:$0xff]  }
 0xa52   : > { %15324 = vmatpush2.bf16.msra.mxu1 %v21696_v35  ;;  %15282 = vmatprep.subr.bf16.mxu0 %v21701_v9  ;;  %v21770_v35 = vld [vmem:[%s22890_s7 + $0xbcc] ss:$16 sps:$4 sm:$0xff]   ;;  %v21765_v9 = vld [vmem:[%s22890_s7 + $0x9c8] ss:$16 sps:$4 sm:$0xff]  }
 0xa53   : > { %15325 = vmatprep.subr.bf16.mxu1 %v21704_v28  ;;  %v21768_v28 = vld [vmem:[%s22890_s7 + $0xbc8] ss:$16 sps:$4 sm:$0xff]  }
 0xa55   : > { %15283 = vmatpush2.bf16.msra.mxu0 %v21699_v23  ;;  %v21773_v23 = vld [vmem:[%s22890_s7 + $0x9ac] ss:$16 sps:$4 sm:$0xff]  }
 0xa56   : > { %15326 = vmatpush2.bf16.msra.mxu1 %v21702_v57  ;;  %15338 = vmatprep.subr.bf16.mxu0 %v21713_v15  ;;  %v21776_v57 = vld [vmem:[%s22890_s7 + $0xbac] ss:$16 sps:$4 sm:$0xff]   ;;  %v21771_v15 = vld [vmem:[%s22890_s7 + $0x9a8] ss:$16 sps:$4 sm:$0xff]  }
 0xa57   : > { %15381 = vmatprep.subr.bf16.mxu1 %v21716_v59  ;;  %v21774_v59 = vld [vmem:[%s22890_s7 + $0xba8] ss:$16 sps:$4 sm:$0xff]  }
 0xa58   : > { %v13575_v53 = vpop.f32.mrf.mxu0  ;;  %15285 = vmatmul.mubr.bf16.vlgmr.msra.gmra.mxu0 %v25511_v36 }
 0xa59   : > { %v13618_v50 = vpop.f32.mrf.mxu1  ;;  %15328 = vmatmul.mubr.bf16.vlgmr.msra.gmra.mxu1 %v25513_v32  ;;  %15339 = vmatpush1.bf16.msra.mxu0 %v21711_v1  ;;  %v21779_v1 = vld [vmem:[%s22890_s7 + $0x98c] ss:$16 sps:$4 sm:$0xff]  }
 0xa5a   : > { %v25529_v13 = vadd.f32 %v13618_v50, %v13575_v53  ;;  %15382 = vmatpush1.bf16.msra.mxu1 %v21714_v44  ;;  %v13577_v17 = vpop.f32.mrf.mxu0  ;;  %15340 = vmatprep.subr.bf16.mxu0 %v21719_v46  ;;  %v21782_v44 = vld [vmem:[%s22890_s7 + $0xb8c] ss:$16 sps:$4 sm:$0xff]   ;;  %v21777_v46 = vld [vmem:[%s22890_s7 + $0x988] ss:$16 sps:$4 sm:$0xff]  }
 0xa5b   : > { %v13620_v26 = vpop.f32.mrf.mxu1  ;;  %15383 = vmatprep.subr.bf16.mxu1 %v21722_v58  ;;  %15370 = vmatprep.mubr.bf16.mxu0 %v25433_v48  ;;  %v21734_v48 = vld [vmem:[%s22890_s7 + $0xa8c] ss:$16 sps:$4 sm:$0xff]   ;;  %v21780_v58 = vld [vmem:[%s22890_s7 + $0xb88] ss:$16 sps:$4 sm:$0xff]  }
 0xa5c   : > { %v25533_v7 = vadd.f32 %v13620_v26, %v13577_v17  ;;  %15413 = vmatprep.mubr.bf16.mxu1 %v25435_v20  ;;  %v13579_v2 = vpop.f32.mrf.mxu0  ;;  %v21729_v20 = vld [vmem:[%s22890_s7 + $0x888] ss:$16 sps:$4 sm:$0xff]   ;;  %v21791_v17 = vld [vmem:[%s22890_s7 + $0x94c] ss:$16 sps:$4 sm:$0xff]  }
 0xa5d   : > { %v13622_v42 = vpop.f32.mrf.mxu1  ;;  %15341 = vmatpush1.bf16.msra.mxu0 %v21717_v61  ;;  %v21785_v61 = vld [vmem:[%s22890_s7 + $0x96c] ss:$16 sps:$4 sm:$0xff]   ;;  %v21783_v53 = vld [vmem:[%s22890_s7 + $0x968] ss:$16 sps:$4 sm:$0xff]  }
 0xa5e   : > { %v25539_v10 = vadd.f32 %v13622_v42, %v13579_v2  ;;  %15384 = vmatpush1.bf16.msra.mxu1 %v21720_v63  ;;  %v13581_v37 = vpop.f32.mrf.mxu0  ;;  %15342 = vmatprep.subr.bf16.mxu0 %v21725_v5  ;;  %v21788_v63 = vld [vmem:[%s22890_s7 + $0xb6c] ss:$16 sps:$4 sm:$0xff]   ;;  %v21786_v50 = vld [vmem:[%s22890_s7 + $0xb68] ss:$16 sps:$4 sm:$0xff]  }
 0xa5f   : > { %v13624_v45 = vpop.f32.mrf.mxu1  ;;  %15385 = vmatprep.subr.bf16.mxu1 %v21728_v47  ;;  %v21794_v26 = vld [vmem:[%s22890_s7 + $0xb4c] ss:$16 sps:$4 sm:$0xff]   ;;  %v21789_v5 = vld [vmem:[%s22890_s7 + $0x948] ss:$16 sps:$4 sm:$0xff]  }
 0xa60   : > { %v25543_v33 = vadd.f32 %v13624_v45, %v13581_v37  ;;  %v21792_v47 = vld [vmem:[%s22890_s7 + $0xb48] ss:$16 sps:$4 sm:$0xff]   ;;  %v21803_v37 = vld [vmem:[%s22890_s7 + $0x90c] ss:$16 sps:$4 sm:$0xff]  }
 0xa61   : > { %15343 = vmatpush1.bf16.msra.mxu0 %v21723_v14  ;;  %v21797_v14 = vld [vmem:[%s22890_s7 + $0x92c] ss:$16 sps:$4 sm:$0xff]   ;;  %v21795_v2 = vld [vmem:[%s22890_s7 + $0x928] ss:$16 sps:$4 sm:$0xff]  }
 0xa62   : > { %15386 = vmatpush1.bf16.msra.mxu1 %v21726_v51  ;;  %15344 = vmatprep.subr.bf16.mxu0 %v21731_v21  ;;  %v21800_v51 = vld [vmem:[%s22890_s7 + $0xb2c] ss:$16 sps:$4 sm:$0xff]   ;;  %v21798_v42 = vld [vmem:[%s22890_s7 + $0xb28] ss:$16 sps:$4 sm:$0xff]  }
 0xa63   : > { %15387 = vmatprep.subr.bf16.mxu1 %v21734_v48  ;;  %v21806_v45 = vld [vmem:[%s22890_s7 + $0xb0c] ss:$16 sps:$4 sm:$0xff]   ;;  %v21801_v21 = vld [vmem:[%s22890_s7 + $0x908] ss:$16 sps:$4 sm:$0xff]  }
 0xa64   : > { %v21804_v48 = vld [vmem:[%s22890_s7 + $0xb08] ss:$16 sps:$4 sm:$0xff]  }
 0xa65   : > { %15345 = vmatpush1.bf16.msra.mxu0 %v21729_v20  ;;  %v21809_v20 = vld [vmem:[%s22890_s7 + $0xce4] ss:$16 sps:$4 sm:$0xff]  }
 0xa66   : > { %15388 = vmatpush1.bf16.msra.mxu1 %v21732_v30  ;;  %15346 = vmatprep.subr.bf16.mxu0 %v21737_v34  ;;  %v21812_v30 = vld [vmem:[%s22890_s7 + $0xee4] ss:$16 sps:$4 sm:$0xff]   ;;  %v21807_v34 = vld [vmem:[%s22890_s7 + $0xce0] ss:$16 sps:$4 sm:$0xff]  }
 0xa67   : > { %15389 = vmatprep.subr.bf16.mxu1 %v21740_v0  ;;  %v21810_v0 = vld [vmem:[%s22890_s7 + $0xee0] ss:$16 sps:$4 sm:$0xff]  }
 0xa69   : > { %15347 = vmatpush1.bf16.msra.mxu0 %v21735_v56  ;;  %v21815_v56 = vld [vmem:[%s22890_s7 + $0xcc4] ss:$16 sps:$4 sm:$0xff]  }
 0xa6a   : > { %15390 = vmatpush1.bf16.msra.mxu1 %v21738_v31  ;;  %15348 = vmatprep.subr.bf16.mxu0 %v21743_v38  ;;  %v21818_v31 = vld [vmem:[%s22890_s7 + $0xec4] ss:$16 sps:$4 sm:$0xff]   ;;  %v25601_v38 = vld [vmem:[#allocation3 + $0x64] ss:$16 sps:$4 sm:$0xff]  }
 0xa6b   : > { %15391 = vmatprep.subr.bf16.mxu1 %v21746_v11  ;;  %v25603_v11 = vld [vmem:[#allocation3 + $0x6c] ss:$16 sps:$4 sm:$0xff]  }
 0xa6d   : > { %15349 = vmatpush1.bf16.msra.mxu0 %v21741_v25  ;;  %v21813_v25 = vld [vmem:[%s22890_s7 + $0xcc0] ss:$16 sps:$4 sm:$0xff]  }
 0xa6e   : > { %15392 = vmatpush1.bf16.msra.mxu1 %v21744_v39  ;;  %15350 = vmatprep.subr.bf16.mxu0 %v21749_v49  ;;  %v21816_v39 = vld [vmem:[%s22890_s7 + $0xec0] ss:$16 sps:$4 sm:$0xff]   ;;  %v21821_v49 = vld [vmem:[%s22890_s7 + $0xca4] ss:$16 sps:$4 sm:$0xff]  }
 0xa6f   : > { %15393 = vmatprep.subr.bf16.mxu1 %v21752_v43  ;;  %v21824_v43 = vld [vmem:[%s22890_s7 + $0xea4] ss:$16 sps:$4 sm:$0xff]  }
 0xa71   : > { %15351 = vmatpush1.bf16.msra.mxu0 %v21747_v3  ;;  %v21827_v3 = vld [vmem:[%s22890_s7 + $0xc84] ss:$16 sps:$4 sm:$0xff]  }
 0xa72   : > { %15394 = vmatpush1.bf16.msra.mxu1 %v21750_v29  ;;  %15352 = vmatprep.subr.bf16.mxu0 %v21755_v41  ;;  %v21830_v29 = vld [vmem:[%s22890_s7 + $0xe84] ss:$16 sps:$4 sm:$0xff]   ;;  %v21825_v41 = vld [vmem:[%s22890_s7 + $0xc80] ss:$16 sps:$4 sm:$0xff]  }
 0xa73   : > { %15395 = vmatprep.subr.bf16.mxu1 %v21758_v62  ;;  %v21828_v62 = vld [vmem:[%s22890_s7 + $0xe80] ss:$16 sps:$4 sm:$0xff]  }
 0xa75   : > { %15353 = vmatpush1.bf16.msra.mxu0 %v21753_v27  ;;  %v21833_v27 = vld [vmem:[%s22890_s7 + $0xc64] ss:$16 sps:$4 sm:$0xff]  }
 0xa76   : > { %15396 = vmatpush1.bf16.msra.mxu1 %v21756_v19  ;;  %15354 = vmatprep.subr.bf16.mxu0 %v21761_v24  ;;  %v21836_v19 = vld [vmem:[%s22890_s7 + $0xe64] ss:$16 sps:$4 sm:$0xff]   ;;  %v21831_v24 = vld [vmem:[%s22890_s7 + $0xc60] ss:$16 sps:$4 sm:$0xff]  }
 0xa77   : > { %15397 = vmatprep.subr.bf16.mxu1 %v21764_v60  ;;  %v21834_v60 = vld [vmem:[%s22890_s7 + $0xe60] ss:$16 sps:$4 sm:$0xff]  }
 0xa79   : > { %15355 = vmatpush2.bf16.msra.mxu0 %v21759_v8  ;;  %v21839_v8 = vld [vmem:[%s22890_s7 + $0xc44] ss:$16 sps:$4 sm:$0xff]  }
 0xa7a   : > { %15398 = vmatpush2.bf16.msra.mxu1 %v21762_v6  ;;  %15356 = vmatprep.subr.bf16.mxu0 %v21767_v40  ;;  %v21842_v6 = vld [vmem:[%s22890_s7 + $0xe44] ss:$16 sps:$4 sm:$0xff]   ;;  %v21837_v40 = vld [vmem:[%s22890_s7 + $0xc40] ss:$16 sps:$4 sm:$0xff]  }
 0xa7b   : > { %15399 = vmatprep.subr.bf16.mxu1 %v21770_v35  ;;  %v21840_v35 = vld [vmem:[%s22890_s7 + $0xe40] ss:$16 sps:$4 sm:$0xff]  }
 0xa7d   : > { %15357 = vmatpush2.bf16.msra.mxu0 %v21765_v9  ;;  %v21845_v9 = vld [vmem:[%s22890_s7 + $0xc24] ss:$16 sps:$4 sm:$0xff]  }
 0xa7e   : > { %15400 = vmatpush2.bf16.msra.mxu1 %v21768_v28  ;;  %15358 = vmatprep.subr.bf16.mxu0 %v21773_v23  ;;  %v21848_v28 = vld [vmem:[%s22890_s7 + $0xe24] ss:$16 sps:$4 sm:$0xff]   ;;  %v21843_v23 = vld [vmem:[%s22890_s7 + $0xc20] ss:$16 sps:$4 sm:$0xff]  }
 0xa7f   : > { %15401 = vmatprep.subr.bf16.mxu1 %v21776_v57  ;;  %v21846_v57 = vld [vmem:[%s22890_s7 + $0xe20] ss:$16 sps:$4 sm:$0xff]  }
 0xa81   : > { %15359 = vmatpush2.bf16.msra.mxu0 %v21771_v15  ;;  %v21851_v15 = vld [vmem:[%s22890_s7 + $0xc04] ss:$16 sps:$4 sm:$0xff]  }
 0xa82   : > { %15402 = vmatpush2.bf16.msra.mxu1 %v21774_v59  ;;  %15360 = vmatprep.subr.bf16.mxu0 %v21779_v1  ;;  %v21854_v59 = vld [vmem:[%s22890_s7 + $0xe04] ss:$16 sps:$4 sm:$0xff]   ;;  %v21849_v1 = vld [vmem:[%s22890_s7 + $0xc00] ss:$16 sps:$4 sm:$0xff]  }
 0xa83   : > { %15403 = vmatprep.subr.bf16.mxu1 %v21782_v44  ;;  %v21852_v44 = vld [vmem:[%s22890_s7 + $0xe00] ss:$16 sps:$4 sm:$0xff]  }
 0xa85   : > { %15361 = vmatpush2.bf16.msra.mxu0 %v21777_v46  ;;  %v21857_v46 = vld [vmem:[%s22890_s7 + $0xde4] ss:$16 sps:$4 sm:$0xff]  }
 0xa86   : > { %15404 = vmatpush2.bf16.msra.mxu1 %v21780_v58  ;;  %15362 = vmatprep.subr.bf16.mxu0 %v21785_v61  ;;  %v21860_v58 = vld [vmem:[%s22890_s7 + $0xfe4] ss:$16 sps:$4 sm:$0xff]   ;;  %v21855_v61 = vld [vmem:[%s22890_s7 + $0xde0] ss:$16 sps:$4 sm:$0xff]  }
 0xa87   : > { %15405 = vmatprep.subr.bf16.mxu1 %v21788_v63  ;;  %v21858_v63 = vld [vmem:[%s22890_s7 + $0xfe0] ss:$16 sps:$4 sm:$0xff]  }
 0xa89   : > { %15363 = vmatpush2.bf16.msra.mxu0 %v21783_v53  ;;  %v21863_v53 = vld [vmem:[%s22890_s7 + $0xdc4] ss:$16 sps:$4 sm:$0xff]  }
 0xa8a   : > { %15406 = vmatpush2.bf16.msra.mxu1 %v21786_v50  ;;  %15364 = vmatprep.subr.bf16.mxu0 %v21791_v17  ;;  %v21866_v50 = vld [vmem:[%s22890_s7 + $0xfc4] ss:$16 sps:$4 sm:$0xff]   ;;  %v21861_v17 = vld [vmem:[%s22890_s7 + $0xdc0] ss:$16 sps:$4 sm:$0xff]  }
 0xa8b   : > { %15407 = vmatprep.subr.bf16.mxu1 %v21794_v26  ;;  %v21864_v26 = vld [vmem:[%s22890_s7 + $0xfc0] ss:$16 sps:$4 sm:$0xff]  }
 0xa8d   : > { %15365 = vmatpush2.bf16.msra.mxu0 %v21789_v5  ;;  %v21869_v5 = vld [vmem:[%s22890_s7 + $0xda4] ss:$16 sps:$4 sm:$0xff]  }
 0xa8e   : > { %15408 = vmatpush2.bf16.msra.mxu1 %v21792_v47  ;;  %15366 = vmatprep.subr.bf16.mxu0 %v21797_v14  ;;  %v21872_v47 = vld [vmem:[%s22890_s7 + $0xfa4] ss:$16 sps:$4 sm:$0xff]   ;;  %v21867_v14 = vld [vmem:[%s22890_s7 + $0xda0] ss:$16 sps:$4 sm:$0xff]  }
 0xa8f   : > { %15409 = vmatprep.subr.bf16.mxu1 %v21800_v51  ;;  %v21870_v51 = vld [vmem:[%s22890_s7 + $0xfa0] ss:$16 sps:$4 sm:$0xff]  }
 0xa91   : > { %15367 = vmatpush2.bf16.msra.mxu0 %v21795_v2  ;;  %v21875_v2 = vld [vmem:[%s22890_s7 + $0xd84] ss:$16 sps:$4 sm:$0xff]  }
 0xa92   : > { %15410 = vmatpush2.bf16.msra.mxu1 %v21798_v42  ;;  %15368 = vmatprep.subr.bf16.mxu0 %v21803_v37  ;;  %v21878_v42 = vld [vmem:[%s22890_s7 + $0xf84] ss:$16 sps:$4 sm:$0xff]   ;;  %v21873_v37 = vld [vmem:[%s22890_s7 + $0xd80] ss:$16 sps:$4 sm:$0xff]  }
 0xa93   : > { %15411 = vmatprep.subr.bf16.mxu1 %v21806_v45  ;;  %v21876_v45 = vld [vmem:[%s22890_s7 + $0xf80] ss:$16 sps:$4 sm:$0xff]  }
 0xa95   : > { %15369 = vmatpush2.bf16.msra.mxu0 %v21801_v21  ;;  %v21881_v21 = vld [vmem:[%s22890_s7 + $0xd64] ss:$16 sps:$4 sm:$0xff]  }
 0xa96   : > { %15412 = vmatpush2.bf16.msra.mxu1 %v21804_v48  ;;  %16225 = vmatprep.subr.bf16.mxu0 %v21809_v20  ;;  %v21884_v48 = vld [vmem:[%s22890_s7 + $0xf64] ss:$16 sps:$4 sm:$0xff]   ;;  %v21879_v20 = vld [vmem:[%s22890_s7 + $0xd60] ss:$16 sps:$4 sm:$0xff]  }
 0xa97   : > { %16268 = vmatprep.subr.bf16.mxu1 %v21812_v30  ;;  %v21882_v30 = vld [vmem:[%s22890_s7 + $0xf60] ss:$16 sps:$4 sm:$0xff]  }
 0xa98   : > { %15371 = vmatmul.mubr.bf16.vlgmr.msra.gmra.mxu0 %v25511_v36  ;;  %v21819_v36 = vld [vmem:[%s22890_s7 + $0xca0] ss:$16 sps:$4 sm:$0xff]  }
 0xa99   : > { %15414 = vmatmul.mubr.bf16.vlgmr.msra.gmra.mxu1 %v25513_v32  ;;  %16226 = vmatpush1.bf16.msra.mxu0 %v21807_v34  ;;  %v21822_v32 = vld [vmem:[%s22890_s7 + $0xea0] ss:$16 sps:$4 sm:$0xff]   ;;  %v21887_v34 = vld [vmem:[%s22890_s7 + $0xd44] ss:$16 sps:$4 sm:$0xff]  }
 0xa9a   : > { %16269 = vmatpush1.bf16.msra.mxu1 %v21810_v0  ;;  %16227 = vmatprep.subr.bf16.mxu0 %v21815_v56  ;;  %v21890_v0 = vld [vmem:[%s22890_s7 + $0xf44] ss:$16 sps:$4 sm:$0xff]   ;;  %v21885_v56 = vld [vmem:[%s22890_s7 + $0xd40] ss:$16 sps:$4 sm:$0xff]  }
 0xa9b   : > { %16270 = vmatprep.subr.bf16.mxu1 %v21818_v31  ;;  %16257 = vmatprep.mubr.bf16.mxu0 %v25601_v38  ;;  %v21888_v31 = vld [vmem:[%s22890_s7 + $0xf40] ss:$16 sps:$4 sm:$0xff]  }
 0xa9c   : > { %16300 = vmatprep.mubr.bf16.mxu1 %v25603_v11 }
 0xa9d   : > { %16228 = vmatpush1.bf16.msra.mxu0 %v21813_v25  ;;  %v25659_v25 = vpop.f32.mrf.mxu0 }
 0xa9e   : > { %16271 = vmatpush1.bf16.msra.mxu1 %v21816_v39  ;;  %16229 = vmatprep.subr.bf16.mxu0 %v21821_v49  ;;  %v25661_v39 = vpop.f32.mrf.mxu1  ;;  %v21893_v49 = vld [vmem:[%s22890_s7 + $0xd24] ss:$16 sps:$4 sm:$0xff]  }
 0xa9f   : > { %16272 = vmatprep.subr.bf16.mxu1 %v21824_v43  ;;  %v21896_v43 = vld [vmem:[%s22890_s7 + $0xf24] ss:$16 sps:$4 sm:$0xff]  }
 0xaa1   : > { %16230 = vmatpush1.bf16.msra.mxu0 %v21819_v36  ;;  %v21891_v36 = vld [vmem:[%s22890_s7 + $0xd20] ss:$16 sps:$4 sm:$0xff]  }
 0xaa2   : > { %16273 = vmatpush1.bf16.msra.mxu1 %v21822_v32  ;;  %16231 = vmatprep.subr.bf16.mxu0 %v21827_v3  ;;  %v21894_v32 = vld [vmem:[%s22890_s7 + $0xf20] ss:$16 sps:$4 sm:$0xff]   ;;  %v25667_v3 = vpop.f32.mrf.mxu0 }
 0xaa3   : > { %16274 = vmatprep.subr.bf16.mxu1 %v21830_v29  ;;  %v25669_v29 = vpop.f32.mrf.mxu1 }
 0xaa5   : > { %16232 = vmatpush1.bf16.msra.mxu0 %v21825_v41  ;;  %v21899_v41 = vld [vmem:[%s22890_s7 + $0xd04] ss:$16 sps:$4 sm:$0xff]  }
 0xaa6   : > { %16275 = vmatpush1.bf16.msra.mxu1 %v21828_v62  ;;  %16233 = vmatprep.subr.bf16.mxu0 %v21833_v27  ;;  %v21902_v62 = vld [vmem:[%s22890_s7 + $0xf04] ss:$16 sps:$4 sm:$0xff]   ;;  %v21897_v27 = vld [vmem:[%s22890_s7 + $0xd00] ss:$16 sps:$4 sm:$0xff]  }
 0xaa7   : > { %16276 = vmatprep.subr.bf16.mxu1 %v21836_v19  ;;  %v21900_v19 = vld [vmem:[%s22890_s7 + $0xf00] ss:$16 sps:$4 sm:$0xff]  }
 0xaa9   : > { %16234 = vmatpush1.bf16.msra.mxu0 %v21831_v24  ;;  %v25675_v24 = vpop.f32.mrf.mxu0 }
 0xaaa   : > { %16277 = vmatpush1.bf16.msra.mxu1 %v21834_v60  ;;  %16235 = vmatprep.subr.bf16.mxu0 %v21839_v8  ;;  %v25677_v60 = vpop.f32.mrf.mxu1  ;;  %v21911_v8 = vld [vmem:[%s22890_s7 + $0xcec] ss:$16 sps:$4 sm:$0xff]  }
 0xaab   : > { %16278 = vmatprep.subr.bf16.mxu1 %v21842_v6  ;;  %v21914_v6 = vld [vmem:[%s22890_s7 + $0xeec] ss:$16 sps:$4 sm:$0xff]  }
 0xaad   : > { %16236 = vmatpush1.bf16.msra.mxu0 %v21837_v40  ;;  %v25681_v40 = vld [vmem:[#allocation3 + $0x60] ss:$16 sps:$4 sm:$0xff]  }
 0xaae   : > { %16279 = vmatpush1.bf16.msra.mxu1 %v21840_v35  ;;  %16237 = vmatprep.subr.bf16.mxu0 %v21845_v9  ;;  %v25683_v35 = vld [vmem:[#allocation3 + $0x68] ss:$16 sps:$4 sm:$0xff]   ;;  %v21909_v9 = vld [vmem:[%s22890_s7 + $0xce8] ss:$16 sps:$4 sm:$0xff]  }
 0xaaf   : > { %16280 = vmatprep.subr.bf16.mxu1 %v21848_v28  ;;  %v21912_v28 = vld [vmem:[%s22890_s7 + $0xee8] ss:$16 sps:$4 sm:$0xff]  }
 0xab1   : > { %16238 = vmatpush1.bf16.msra.mxu0 %v21843_v23  ;;  %v25687_v23 = vpop.f32.mrf.mxu0 }
 0xab2   : > { %16281 = vmatpush1.bf16.msra.mxu1 %v21846_v57  ;;  %16239 = vmatprep.subr.bf16.mxu0 %v21851_v15  ;;  %v25689_v57 = vpop.f32.mrf.mxu1  ;;  %v21917_v15 = vld [vmem:[%s22890_s7 + $0xccc] ss:$16 sps:$4 sm:$0xff]  }
 0xab3   : > { %16282 = vmatprep.subr.bf16.mxu1 %v21854_v59  ;;  %v21920_v59 = vld [vmem:[%s22890_s7 + $0xecc] ss:$16 sps:$4 sm:$0xff]  }
 0xab5   : > { %16240 = vmatpush1.bf16.msra.mxu0 %v21849_v1 }
 0xab6   : > { %16283 = vmatpush1.bf16.msra.mxu1 %v21852_v44  ;;  %16241 = vmatprep.subr.bf16.mxu0 %v21857_v46 }
 0xab7   : > { %16284 = vmatprep.subr.bf16.mxu1 %v21860_v58  ;;  %v21915_v58 = vld [vmem:[%s22890_s7 + $0xcc8] ss:$16 sps:$4 sm:$0xff]  }
 0xab9   : > { %16242 = vmatpush2.bf16.msra.mxu0 %v21855_v61  ;;  %v21918_v61 = vld [vmem:[%s22890_s7 + $0xec8] ss:$16 sps:$4 sm:$0xff]  }
 0xaba   : > { %16285 = vmatpush2.bf16.msra.mxu1 %v21858_v63  ;;  %16243 = vmatprep.subr.bf16.mxu0 %v21863_v53 }
 0xabb   : > { %16286 = vmatprep.subr.bf16.mxu1 %v21866_v50  ;;  %v21923_v50 = vld [vmem:[%s22890_s7 + $0xcac] ss:$16 sps:$4 sm:$0xff]  }
 0xabd   : > { %16244 = vmatpush2.bf16.msra.mxu0 %v21861_v17  ;;  %v21926_v17 = vld [vmem:[%s22890_s7 + $0xeac] ss:$16 sps:$4 sm:$0xff]  }
 0xabe   : > { %16287 = vmatpush2.bf16.msra.mxu1 %v21864_v26  ;;  %16245 = vmatprep.subr.bf16.mxu0 %v21869_v5 }
 0xabf   : > { %16288 = vmatprep.subr.bf16.mxu1 %v21872_v47 }
 0xac1   : > { %16246 = vmatpush2.bf16.msra.mxu0 %v21867_v14 }
 0xac2   : > { %16289 = vmatpush2.bf16.msra.mxu1 %v21870_v51  ;;  %16247 = vmatprep.subr.bf16.mxu0 %v21875_v2  ;;  %v21921_v2 = vld [vmem:[%s22890_s7 + $0xca8] ss:$16 sps:$4 sm:$0xff]  }
 0xac3   : > { %16290 = vmatprep.subr.bf16.mxu1 %v21878_v42  ;;  %v21924_v42 = vld [vmem:[%s22890_s7 + $0xea8] ss:$16 sps:$4 sm:$0xff]  }
 0xac5   : > { %16248 = vmatpush2.bf16.msra.mxu0 %v21873_v37 }
 0xac6   : > { %16291 = vmatpush2.bf16.msra.mxu1 %v21876_v45  ;;  %16249 = vmatprep.subr.bf16.mxu0 %v21881_v21 }
 0xac7   : > { %16292 = vmatprep.subr.bf16.mxu1 %v21884_v48  ;;  %v21927_v48 = vld [vmem:[%s22890_s7 + $0xc88] ss:$16 sps:$4 sm:$0xff]  }
 0xac9   : > { %16250 = vmatpush2.bf16.msra.mxu0 %v21879_v20  ;;  %v21930_v20 = vld [vmem:[%s22890_s7 + $0xe88] ss:$16 sps:$4 sm:$0xff]  }
 0xaca   : > { %16293 = vmatpush2.bf16.msra.mxu1 %v21882_v30  ;;  %16251 = vmatprep.subr.bf16.mxu0 %v21887_v34  ;;  %v21935_v30 = vld [vmem:[%s22890_s7 + $0xc6c] ss:$16 sps:$4 sm:$0xff]  }
 0xacb   : > { %16294 = vmatprep.subr.bf16.mxu1 %v21890_v0  ;;  %v21938_v34 = vld [vmem:[%s22890_s7 + $0xe6c] ss:$16 sps:$4 sm:$0xff]   ;;  %v21936_v0 = vld [vmem:[%s22890_s7 + $0xe68] ss:$16 sps:$4 sm:$0xff]  }
 0xacd   : > { %16252 = vmatpush2.bf16.msra.mxu0 %v21885_v56  ;;  %v21941_v56 = vld [vmem:[%s22890_s7 + $0xc4c] ss:$16 sps:$4 sm:$0xff]  }
 0xace   : > { %16295 = vmatpush2.bf16.msra.mxu1 %v21888_v31  ;;  %16253 = vmatprep.subr.bf16.mxu0 %v21893_v49  ;;  %v21944_v31 = vld [vmem:[%s22890_s7 + $0xe4c] ss:$16 sps:$4 sm:$0xff]   ;;  %v21939_v49 = vld [vmem:[%s22890_s7 + $0xc48] ss:$16 sps:$4 sm:$0xff]  }
 0xacf   : > { %16296 = vmatprep.subr.bf16.mxu1 %v21896_v43  ;;  %v21942_v43 = vld [vmem:[%s22890_s7 + $0xe48] ss:$16 sps:$4 sm:$0xff]  }
 0xad1   : > { %16254 = vmatpush2.bf16.msra.mxu0 %v21891_v36  ;;  %v21947_v36 = vld [vmem:[%s22890_s7 + $0xc2c] ss:$16 sps:$4 sm:$0xff]  }
 0xad2   : > { %16297 = vmatpush2.bf16.msra.mxu1 %v21894_v32  ;;  %16255 = vmatprep.subr.bf16.mxu0 %v21899_v41  ;;  %v21950_v32 = vld [vmem:[%s22890_s7 + $0xe2c] ss:$16 sps:$4 sm:$0xff]   ;;  %v21945_v41 = vld [vmem:[%s22890_s7 + $0xc28] ss:$16 sps:$4 sm:$0xff]  }
 0xad3   : > { %16298 = vmatprep.subr.bf16.mxu1 %v21902_v62  ;;  %v21948_v62 = vld [vmem:[%s22890_s7 + $0xe28] ss:$16 sps:$4 sm:$0xff]  }
 0xad5   : > { %16256 = vmatpush2.bf16.msra.mxu0 %v21897_v27  ;;  %v21953_v27 = vld [vmem:[%s22890_s7 + $0xc0c] ss:$16 sps:$4 sm:$0xff]  }
 0xad6   : > { %16299 = vmatpush2.bf16.msra.mxu1 %v21900_v19  ;;  %16311 = vmatprep.subr.bf16.mxu0 %v21911_v8  ;;  %v21956_v19 = vld [vmem:[%s22890_s7 + $0xe0c] ss:$16 sps:$4 sm:$0xff]   ;;  %v21951_v8 = vld [vmem:[%s22890_s7 + $0xc08] ss:$16 sps:$4 sm:$0xff]  }
 0xad7   : > { %16354 = vmatprep.subr.bf16.mxu1 %v21914_v6  ;;  %v21954_v6 = vld [vmem:[%s22890_s7 + $0xe08] ss:$16 sps:$4 sm:$0xff]  }
 0xad8   : > { %v14407_v1 = vpop.f32.mrf.mxu0  ;;  %16258 = vmatmul.mubr.bf16.vlgmr.msra.gmra.mxu0 %v25681_v40 }
 0xad9   : > { %v14450_v44 = vpop.f32.mrf.mxu1  ;;  %16301 = vmatmul.mubr.bf16.vlgmr.msra.gmra.mxu1 %v25683_v35  ;;  %v14408_v46 = vadd.f32 %v14407_v1, %v25529_v13  ;;  %16312 = vmatpush1.bf16.msra.mxu0 %v21909_v9  ;;  %v21959_v9 = vld [vmem:[%s22890_s7 + $0xdec] ss:$16 sps:$4 sm:$0xff]  }
 0xada   : > { %16355 = vmatpush1.bf16.msra.mxu1 %v21912_v28  ;;  %v14409_v63 = vpop.f32.mrf.mxu0  ;;  %16313 = vmatprep.subr.bf16.mxu0 %v21917_v15  ;;  %v21962_v28 = vld [vmem:[%s22890_s7 + $0xfec] ss:$16 sps:$4 sm:$0xff]   ;;  %v21957_v15 = vld [vmem:[%s22890_s7 + $0xde8] ss:$16 sps:$4 sm:$0xff]  }
 0xadb   : > { %v14452_v53 = vpop.f32.mrf.mxu1  ;;  %16356 = vmatprep.subr.bf16.mxu1 %v21920_v59  ;;  %v25700_v26 = vadd.f32 %v14450_v44, %v14408_v46  ;;  %v14410_v5 = vadd.f32 %v14409_v63, %v25533_v7  ;;  %16343 = vmatprep.mubr.bf16.mxu0 %v25601_v38  ;;  %v21929_v7 = vld [vmem:[%s22890_s7 + $0xc8c] ss:$16 sps:$4 sm:$0xff]   ;;  %v21960_v59 = vld [vmem:[%s22890_s7 + $0xfe8] ss:$16 sps:$4 sm:$0xff]  }
 0xadc   : > { %16386 = vmatprep.mubr.bf16.mxu1 %v25603_v11  ;;  %v14411_v13 = vpop.f32.mrf.mxu0  ;;  %v21932_v38 = vld [vmem:[%s22890_s7 + $0xe8c] ss:$16 sps:$4 sm:$0xff]   ;;  %v21963_v46 = vld [vmem:[%s22890_s7 + $0xdc8] ss:$16 sps:$4 sm:$0xff]  }
 0xadd   : > { %v14454_v47 = vpop.f32.mrf.mxu1  ;;  %v25705_v14 = vadd.f32 %v14452_v53, %v14410_v5  ;;  %v14412_v51 = vadd.f32 %v14411_v13, %v25539_v10  ;;  %16314 = vmatpush1.bf16.msra.mxu0 %v21915_v58  ;;  %v21965_v1 = vld [vmem:[%s22890_s7 + $0xdcc] ss:$16 sps:$4 sm:$0xff]   ;;  %v21966_v58 = vld [vmem:[%s22890_s7 + $0xfc8] ss:$16 sps:$4 sm:$0xff]  }
 0xade   : > { %16357 = vmatpush1.bf16.msra.mxu1 %v21918_v61  ;;  %v14413_v37 = vpop.f32.mrf.mxu0  ;;  %16315 = vmatprep.subr.bf16.mxu0 %v21923_v50  ;;  %v21968_v44 = vld [vmem:[%s22890_s7 + $0xfcc] ss:$16 sps:$4 sm:$0xff]   ;;  %v21969_v53 = vld [vmem:[%s22890_s7 + $0xda8] ss:$16 sps:$4 sm:$0xff]  }
 0xadf   : > { %16358 = vmatprep.subr.bf16.mxu1 %v21926_v17  ;;  %v25712_v11 = vadd.f32 %v14454_v47, %v14412_v51  ;;  %v14414_v45 = vadd.f32 %v14413_v37, %v25543_v33  ;;  %v14456_v10 = vpop.f32.mrf.mxu1  ;;  %v21933_v33 = vld [vmem:[%s22890_s7 + $0xc68] ss:$16 sps:$4 sm:$0xff]   ;;  %v21971_v61 = vld [vmem:[%s22890_s7 + $0xdac] ss:$16 sps:$4 sm:$0xff]  }
 0xae0   : > { %v21974_v63 = vld [vmem:[%s22890_s7 + $0xfac] ss:$16 sps:$4 sm:$0xff]   ;;  %v21972_v50 = vld [vmem:[%s22890_s7 + $0xfa8] ss:$16 sps:$4 sm:$0xff]  }
 0xae1   : > { %v25715_v21 = vadd.f32 %v14456_v10, %v14414_v45  ;;  %16316 = vmatpush1.bf16.msra.mxu0 %v21921_v2  ;;  %v21977_v17 = vld [vmem:[%s22890_s7 + $0xd8c] ss:$16 sps:$4 sm:$0xff]   ;;  %v21975_v13 = vld [vmem:[%s22890_s7 + $0xd88] ss:$16 sps:$4 sm:$0xff]  }
 0xae2   : > { %16359 = vmatpush1.bf16.msra.mxu1 %v21924_v42  ;;  %16317 = vmatprep.subr.bf16.mxu0 %v21929_v7  ;;  %v21980_v5 = vld [vmem:[%s22890_s7 + $0xf8c] ss:$16 sps:$4 sm:$0xff]   ;;  %v21978_v47 = vld [vmem:[%s22890_s7 + $0xf88] ss:$16 sps:$4 sm:$0xff]  }
 0xae3   : > { %16360 = vmatprep.subr.bf16.mxu1 %v21932_v38  ;;  %v21983_v51 = vld [vmem:[%s22890_s7 + $0xd6c] ss:$16 sps:$4 sm:$0xff]   ;;  %v21981_v42 = vld [vmem:[%s22890_s7 + $0xd68] ss:$16 sps:$4 sm:$0xff]  }
 0xae4   : > { %v21986_v2 = vld [vmem:[%s22890_s7 + $0xf6c] ss:$16 sps:$4 sm:$0xff]   ;;  %v21984_v37 = vld [vmem:[%s22890_s7 + $0xf68] ss:$16 sps:$4 sm:$0xff]  }
 0xae5   : > { %16318 = vmatpush1.bf16.msra.mxu0 %v21927_v48  ;;  %v21989_v7 = vld [vmem:[%s22890_s7 + $0xd4c] ss:$16 sps:$4 sm:$0xff]   ;;  %v21987_v45 = vld [vmem:[%s22890_s7 + $0xd48] ss:$16 sps:$4 sm:$0xff]  }
 0xae6   : > { %16361 = vmatpush1.bf16.msra.mxu1 %v21930_v20  ;;  %16319 = vmatprep.subr.bf16.mxu0 %v21935_v30  ;;  %v21992_v38 = vld [vmem:[%s22890_s7 + $0xf4c] ss:$16 sps:$4 sm:$0xff]   ;;  %v21990_v10 = vld [vmem:[%s22890_s7 + $0xf48] ss:$16 sps:$4 sm:$0xff]  }
 0xae7   : > { %16362 = vmatprep.subr.bf16.mxu1 %v21938_v34  ;;  %v21995_v48 = vld [vmem:[%s22890_s7 + $0xd2c] ss:$16 sps:$4 sm:$0xff]   ;;  %v21993_v30 = vld [vmem:[%s22890_s7 + $0xd28] ss:$16 sps:$4 sm:$0xff]  }
 0xae8   : > { %v21998_v20 = vld [vmem:[%s22890_s7 + $0xf2c] ss:$16 sps:$4 sm:$0xff]   ;;  %v21996_v34 = vld [vmem:[%s22890_s7 + $0xf28] ss:$16 sps:$4 sm:$0xff]  }
 0xae9   : > { %16320 = vmatpush1.bf16.msra.mxu0 %v21933_v33  ;;  %v22001_v33 = vld [vmem:[%s22890_s7 + $0xd0c] ss:$16 sps:$4 sm:$0xff]  }
 0xaea   : > { %16363 = vmatpush1.bf16.msra.mxu1 %v21936_v0  ;;  %16321 = vmatprep.subr.bf16.mxu0 %v21941_v56  ;;  %v22004_v0 = vld [vmem:[%s22890_s7 + $0xf0c] ss:$16 sps:$4 sm:$0xff]   ;;  %v21999_v56 = vld [vmem:[%s22890_s7 + $0xd08] ss:$16 sps:$4 sm:$0xff]  }
 0xaeb   : > { %16364 = vmatprep.subr.bf16.mxu1 %v21944_v31  ;;  %v22002_v31 = vld [vmem:[%s22890_s7 + $0xf08] ss:$16 sps:$4 sm:$0xff]  }
 0xaed   : > { %16322 = vmatpush1.bf16.msra.mxu0 %v21939_v49  ;;  %v22005_v49 = vld [vmem:[%s22902_s20 + $0x78] sm:$0xff]  }
 0xaee   : > { %16365 = vmatpush1.bf16.msra.mxu1 %v21942_v43  ;;  %16323 = vmatprep.subr.bf16.mxu0 %v21947_v36  ;;  %v22006_v43 = vld [vmem:[%s22902_s20 + $0x38] sm:$0xff]   ;;  %v22007_v36 = vld [vmem:[%s22902_s20 + $0x70] sm:$0xff]  }
 0xaef   : > { %16366 = vmatprep.subr.bf16.mxu1 %v21950_v32  ;;  %v22008_v32 = vld [vmem:[%s22902_s20 + $0x30] sm:$0xff]  }
 0xaf1   : > { %16324 = vmatpush1.bf16.msra.mxu0 %v21945_v41  ;;  %v22009_v41 = vld [vmem:[%s22902_s20 + $0x68] sm:$0xff]  }
 0xaf2   : > { %16367 = vmatpush1.bf16.msra.mxu1 %v21948_v62  ;;  %16325 = vmatprep.subr.bf16.mxu0 %v21953_v27  ;;  %v22010_v62 = vld [vmem:[%s22902_s20 + $0x28] sm:$0xff]   ;;  %v22013_v27 = vld [vmem:[%s22902_s20 + $0x58] sm:$0xff]  }
 0xaf3   : > { %16368 = vmatprep.subr.bf16.mxu1 %v21956_v19  ;;  %v22014_v19 = vld [vmem:[%s22902_s20 + $0x18] sm:$0xff]  }
 0xaf5   : > { %16326 = vmatpush1.bf16.msra.mxu0 %v21951_v8  ;;  %v22015_v8 = vld [vmem:[%s22902_s20 + $0x50] sm:$0xff]  }
 0xaf6   : > { %16369 = vmatpush1.bf16.msra.mxu1 %v21954_v6  ;;  %16327 = vmatprep.subr.bf16.mxu0 %v21959_v9  ;;  %v22016_v6 = vld [vmem:[%s22902_s20 + $0x10] sm:$0xff]   ;;  %v22017_v9 = vld [vmem:[%s22902_s20 + $0x48] sm:$0xff]  }
 0xaf7   : > { %16370 = vmatprep.subr.bf16.mxu1 %v21962_v28  ;;  %v22018_v28 = vld [vmem:[%s22902_s20 + $0x8] sm:$0xff]  }
 0xaf9   : > { %16328 = vmatpush2.bf16.msra.mxu0 %v21957_v15  ;;  %v22019_v15 = vld [vmem:[%s22902_s20 + $0x40] sm:$0xff]  }
 0xafa   : > { %16371 = vmatpush2.bf16.msra.mxu1 %v21960_v59  ;;  %16329 = vmatprep.subr.bf16.mxu0 %v21965_v1  ;;  %v22020_v59 = vld [vmem:[%s22902_s20] sm:$0xff]  }
 0xafb   : > { %16372 = vmatprep.subr.bf16.mxu1 %v21968_v44 }
 0xafd   : > { %16330 = vmatpush2.bf16.msra.mxu0 %v21963_v46 }
 0xafe   : > { %16373 = vmatpush2.bf16.msra.mxu1 %v21966_v58  ;;  %16331 = vmatprep.subr.bf16.mxu0 %v21971_v61 }
 0xaff   : > { %16374 = vmatprep.subr.bf16.mxu1 %v21974_v63 }
 0xb01   : > { %16332 = vmatpush2.bf16.msra.mxu0 %v21969_v53 }
 0xb02   : > { %16375 = vmatpush2.bf16.msra.mxu1 %v21972_v50  ;;  %16333 = vmatprep.subr.bf16.mxu0 %v21977_v17 }
 0xb03   : > { %16376 = vmatprep.subr.bf16.mxu1 %v21980_v5 }
 0xb05   : > { %16334 = vmatpush2.bf16.msra.mxu0 %v21975_v13 }
 0xb06   : > { %16377 = vmatpush2.bf16.msra.mxu1 %v21978_v47  ;;  %16335 = vmatprep.subr.bf16.mxu0 %v21983_v51 }
 0xb07   : > { %16378 = vmatprep.subr.bf16.mxu1 %v21986_v2 }
 0xb09   : > { %16336 = vmatpush2.bf16.msra.mxu0 %v21981_v42 }
 0xb0a   : > { %16379 = vmatpush2.bf16.msra.mxu1 %v21984_v37  ;;  %16337 = vmatprep.subr.bf16.mxu0 %v21989_v7 }
 0xb0b   : > { %16380 = vmatprep.subr.bf16.mxu1 %v21992_v38  ;;  %v22021_v38 = vld [vmem:[%s22902_s20 + $0xf8] sm:$0xff]  }
 0xb0d   : > { %16338 = vmatpush2.bf16.msra.mxu0 %v21987_v45 }
 0xb0e   : > { %16381 = vmatpush2.bf16.msra.mxu1 %v21990_v10  ;;  %16339 = vmatprep.subr.bf16.mxu0 %v21995_v48  ;;  %v22022_v48 = vld [vmem:[%s22902_s20 + $0xb8] sm:$0xff]  }
 0xb0f   : > { %16382 = vmatprep.subr.bf16.mxu1 %v21998_v20 }
 0xb11   : > { %16340 = vmatpush2.bf16.msra.mxu0 %v21993_v30 }
 0xb12   : > { %16383 = vmatpush2.bf16.msra.mxu1 %v21996_v34  ;;  %16341 = vmatprep.subr.bf16.mxu0 %v22001_v33  ;;  %v22023_v33 = vld [vmem:[%s22902_s20 + $0xf0] sm:$0xff]  }
 0xb13   : > { %16384 = vmatprep.subr.bf16.mxu1 %v22004_v0 }
 0xb15   : > { %16342 = vmatpush2.bf16.msra.mxu0 %v21999_v56  ;;  %v22025_v56 = vld [vmem:[%s22902_s20 + $0xe8] sm:$0xff]  }
 0xb16   : > { %16385 = vmatpush2.bf16.msra.mxu1 %v22002_v31  ;;  %19400 = vmatprep.subr.bf16.mxu0 %v22005_v49  ;;  %v22026_v31 = vld [vmem:[%s22902_s20 + $0xa8] sm:$0xff]   ;;  %v22028_v49 = vld [vmem:[%s22902_s20 + $0xa0] sm:$0xff]  }
 0xb17   : > { %19422 = vmatprep.subr.bf16.mxu1 %v22021_v38 }
 0xb18   : > { %16344 = vmatmul.mubr.bf16.vlgmr.msra.gmra.mxu0 %v25681_v40  ;;  %v22011_v40 = vld [vmem:[%s22902_s20 + $0x60] sm:$0xff]   ;;  %v25785_v1 = vpop.f32.mrf.mxu0 }
 0xb19   : > { %16387 = vmatmul.mubr.bf16.vlgmr.msra.gmra.mxu1 %v25683_v35  ;;  %19401 = vmatpush3.bf16.msra.mxu0 %v22006_v43  ;;  %v22012_v35 = vld [vmem:[%s22902_s20 + $0x20] sm:$0xff]   ;;  %v15329_v44 = vpop.f32.mrf.mxu1  ;;  %v22029_v43 = vld [vmem:[%s22902_s20 + $0xd8] sm:$0xff]  }
 0xb1a   : > { %19402 = vmatprep.subr.bf16.mxu0 %v22007_v36  ;;  %v25787_v46 = vpop.f32.mrf.mxu0  ;;  %19423 = vmatpush3.bf16.msra.mxu1 %v22022_v48  ;;  %v22030_v36 = vld [vmem:[%s22902_s20 + $0x98] sm:$0xff]  }
 0xb1b   : > { %v25789_v58 = vpop.f32.mrf.mxu1  ;;  %19424 = vmatprep.subr.bf16.mxu1 %v22023_v33 }
 0xb1c   : > { %v25791_v61 = vpop.f32.mrf.mxu0 }
 0xb1d   : > { %19403 = vmatpush3.bf16.msra.mxu0 %v22008_v32  ;;  %v25793_v63 = vpop.f32.mrf.mxu1  ;;  %v22032_v32 = vld [vmem:[%s22902_s20 + $0x90] sm:$0xff]  }
 0xb1e   : > { %19404 = vmatprep.subr.bf16.mxu0 %v22009_v41  ;;  %v25795_v53 = vpop.f32.mrf.mxu0  ;;  %v22033_v41 = vld [vmem:[%s22902_s20 + $0xc8] sm:$0xff]  }
 0xb1f   : > { %v25797_v50 = vpop.f32.mrf.mxu1 }
 0xb21   : > { %19405 = vmatpush3.bf16.msra.mxu0 %v22010_v62  ;;  %v22034_v62 = vld [vmem:[%s22902_s20 + $0x88] sm:$0xff]  }
 0xb22   : > { %19406 = vmatprep.subr.bf16.mxu0 %v22011_v40  ;;  %v22035_v40 = vld [vmem:[%s22902_s20 + $0xc0] sm:$0xff]  }
 0xb25   : > { %19407 = vmatpush3.bf16.msra.mxu0 %v22012_v35  ;;  %v22036_v35 = vld [vmem:[%s22902_s20 + $0x80] sm:$0xff]  }
 0xb26   : > { %19408 = vmatprep.subr.bf16.mxu0 %v22013_v27  ;;  %v16407_v27 = vlaneseq }
 0xb29   : > { %19409 = vmatpush3.bf16.msra.mxu0 %v22014_v19  ;;  %v13533_v19 = vadd.f32 %v25493_v16, %v25491_v52  ;;  %v15332_v16 = vadd.f32 %v25789_v58, %v25787_v46 }
 0xb2a   : > { %19410 = vmatprep.subr.bf16.mxu0 %v22015_v8  ;;  %v25829_v8 = vshrl.u32 %v16407_v27, 7 }
 0xb2d   : > { %19411 = vmatpush3.bf16.msra.mxu0 %v22016_v6  ;;  %v13535_v6 = vadd.f32 %v25501_v4, %v25499_v12  ;;  %v16413_v12 = vsub.s32 1, %v25829_v8  ;;  %v13539_v4 = vadd.f32 %v25521_v55, %v25519_v22 }
 0xb2e   : > { %19412 = vmatprep.subr.bf16.mxu0 %v22017_v9  ;;  %v14322_v9 = vadd.f32 %v25659_v25, %v13533_v19 }
 0xb2f   : > { %v14328_v46 = vadd.f32 %v25687_v23, %v13539_v4 }
 0xb30   : > { %v14365_v52 = vadd.f32 %v25661_v39, %v14322_v9 }
 0xb31   : > { %19413 = vmatpush3.bf16.msra.mxu0 %v22018_v28  ;;  %v13537_v28 = vadd.f32 %v25509_v54, %v25507_v18 }
 0xb32   : > { %19414 = vmatprep.subr.bf16.mxu0 %v22019_v15  ;;  %v14324_v15 = vadd.f32 %v25667_v3, %v13535_v6 }
 0xb34   : > { %v14367_v18 = vadd.f32 %v25669_v29, %v14324_v15  ;;  %v15336_v29 = vadd.f32 %v25797_v50, %v25795_v53 }
 0xb35   : > { %19415 = vmatpush3.bf16.msra.mxu0 %v22020_v59  ;;  %v15330_v59 = vadd.f32 %v15329_v44, %v25785_v1 }
 0xb37   : > { %v15424_v3 = vadd.f32 %v15330_v59, %v14365_v52  ;;  %v16417_v52 = vsub.s32 2, %v25829_v8 }
 0xb58   : > { %v15372_v17 = vpop.f32.mrf.mxu0 }
 0xb59   : > { %v15415_v5 = vpop.f32.mrf.mxu1 }
 0xb5a   : > { %v15416_v13 = vadd.f32 %v15415_v5, %v15372_v17  ;;  %v15374_v47 = vpop.f32.mrf.mxu0  ;;  %v16409_v17 = vsub.s32 0, %v25829_v8  ;;  %v14326_v5 = vadd.f32 %v25675_v24, %v13537_v28  ;;  %v15334_v24 = vadd.f32 %v25793_v63, %v25791_v61 }
 0xb5b   : > { %v15417_v51 = vpop.f32.mrf.mxu1 }
 0xb5c   : > { %v25800_v2 = vadd.f32 %v15416_v13, %v25700_v26  ;;  %v15418_v42 = vadd.f32 %v15417_v51, %v15374_v47  ;;  %v15376_v37 = vpop.f32.mrf.mxu0  ;;  %v25841_v13 = vld [vmem:[%s22896_s15] sm:$0xf]  ;;  %v14369_v39 = vadd.f32 %v25677_v60, %v14326_v5  ;;  %v15425_v51 = vadd.f32 %v15332_v16, %v14367_v18  ;;  %s26029_s15 = sld [smem:[#allocation48_spill]] (!%p19337_p1) }
 0xb5d   : > { %v15419_v7 = vpop.f32.mrf.mxu1  ;;  %v16410_v44 = vrot.slane %v25841_v13, %v16409_v17  ;;  %v16414_v55 = vrot.slane %v25841_v13, %v16413_v12  ;;  %v14371_v60 = vadd.f32 %v25689_v57, %v14328_v46  ;;  %v16421_v16 = vsub.s32 3, %v25829_v8 }
 0xb5e   : > { %v25804_v45 = vadd.f32 %v15418_v42, %v25705_v14  ;;  %v15420_v10 = vadd.f32 %v15419_v7, %v15376_v37  ;;  %v15378_v20 = vpop.f32.mrf.mxu0  ;;  %v22024_v14 = vld [vmem:[%s22902_s20 + $0xb0] sm:$0xff]   ;;  %v15428_v61 = vadd.f32 %v15334_v24, %v14369_v39 }
 0xb5f   : > { %v15421_v30 = vpop.f32.mrf.mxu1  ;;  %19425 = vmatpush3.bf16.msra.mxu1 %v22024_v14  ;;  %v15429_v33 = vadd.f32 %v15336_v29, %v14371_v60 }
 0xb60   : > { %v25808_v26 = vadd.f32 %v15420_v10, %v25712_v11  ;;  %v15422_v34 = vadd.f32 %v15421_v30, %v15378_v20  ;;  %19426 = vmatprep.subr.bf16.mxu1 %v22025_v56  ;;  %v22027_v11 = vld [vmem:[%s22902_s20 + $0xe0] sm:$0xff]  }
 0xb62   : > { %v25812_v0 = vadd.f32 %v15422_v34, %v25715_v21  ;;  %v22031_v21 = vld [vmem:[%s22902_s20 + $0xd0] sm:$0xff]   ;;  %s26030_s20 = smov (!%p19337_p1), %s26029_s15 }
 0xb63   : > { %19427 = vmatpush3.bf16.msra.mxu1 %v22026_v31 }
 0xb64   : > { %19428 = vmatprep.subr.bf16.mxu1 %v22027_v11 }
 0xb67   : > { %19429 = vmatpush3.bf16.msra.mxu1 %v22028_v49 }
 0xb68   : > { %19430 = vmatprep.subr.bf16.mxu1 %v22029_v43 }
 0xb6b   : > { %19431 = vmatpush3.bf16.msra.mxu1 %v22030_v36 }
 0xb6c   : > { %19432 = vmatprep.subr.bf16.mxu1 %v22031_v21 }
 0xb6f   : > { %19433 = vmatpush3.bf16.msra.mxu1 %v22032_v32 }
 0xb70   : > { %19434 = vmatprep.subr.bf16.mxu1 %v22033_v41 }
 0xb73   : > { %19435 = vmatpush3.bf16.msra.mxu1 %v22034_v62 }
 0xb74   : > { %19436 = vmatprep.subr.bf16.mxu1 %v22035_v40 }
 0xb77   : > { %19437 = vmatpush3.bf16.msra.mxu1 %v22036_v35 }
 0xb98   : > { %v16259_v54 = vpop.f32.mrf.mxu0 }
 0xb99   : > { %v16302_v25 = vpop.f32.mrf.mxu1 }
 0xb9a   : > { %v16303_v1 = vadd.f32 %v16302_v25, %v16259_v54  ;;  %v16261_v58 = vpop.f32.mrf.mxu0  ;;  %v16418_v54 = vrot.slane %v25841_v13, %v16417_v52 }
 0xb9b   : > { %v16304_v47 = vpop.f32.mrf.mxu1 }
 0xb9c   : > { %v16397_v42 = vadd.f32 %v16303_v1, %v15424_v3  ;;  %v16305_v22 = vadd.f32 %v16304_v47, %v16261_v58  ;;  %v16263_v37 = vpop.f32.mrf.mxu0 }
 0xb9d   : > { %v16306_v7 = vpop.f32.mrf.mxu1 }
 0xb9e   : > { %v16427_v63 = vadd.f32 %v16410_v44, %v16397_v42  ;;  %v16398_v38 = vadd.f32 %v16305_v22, %v15425_v51  ;;  %v16307_v10 = vadd.f32 %v16306_v7, %v16263_v37  ;;  %v16265_v48 = vpop.f32.mrf.mxu0 }
 0xb9f   : > { %v16308_v23 = vpop.f32.mrf.mxu1 }
 0xba0   : > { %v16443_v20 = vmin.f32 %v16427_v63, 0.0  ;;  %v16428_v30 = vadd.f32 %v16414_v55, %v16398_v38  ;;  %v16401_v34 = vadd.f32 %v16307_v10, %v15428_v61  ;;  %v16309_v14 = vadd.f32 %v16308_v23, %v16265_v48 }
 0xba1   : > { %vm16435_vm12 = vcmp.gt.f32.partialorder %v16427_v63, 0.0 }
 0xba2   : > { %v16451_v56 = vmul.f32 1.442695, %v16443_v20  ;;  %v16444_v31 = vmin.f32 %v16428_v30, 0.0  ;;  %v16431_v11 = vadd.f32 %v16410_v44, %v16401_v34  ;;  %v16402_v49 = vadd.f32 %v16309_v14, %v15429_v33 }
 0xba3   : > { %vm16436_vm10 = vcmp.gt.f32.partialorder %v16428_v30, 0.0  ;;  %v16422_v44 = vrot.slane %v25841_v13, %v16421_v16 }
 0xba4   : > { %v16453_v53 = vmul.f32 1.442695, %v16444_v31  ;;  %v16447_v50 = vmin.f32 %v16431_v11, 0.0  ;;  %v16432_v43 = vadd.f32 %v16414_v55, %v16402_v49  ;;  %22037 = vpow2.f32 %v16451_v56 }
 0xba5   : > { %vm16439_vm9 = vcmp.gt.f32.partialorder %v16431_v11, 0.0 }
 0xba6   : > { %v16459_v36 = vmul.f32 1.442695, %v16447_v50  ;;  %22039 = vpow2.f32 %v16453_v53  ;;  %v16448_v21 = vmin.f32 %v16432_v43, 0.0  ;;  %vm16440_vm11 = vcmp.gt.f32.partialorder %v16432_v43, 0.0 }
 0xba8   : > { %22041 = vpow2.f32 %v16459_v36  ;;  %v16461_v57 = vmul.f32 1.442695, %v16448_v21 }
 0xbaa   : > { %22043 = vpow2.f32 %v16461_v57 }
 0xbb1   : > { %v22038_v32 = vpop.eup %22037 }
 0xbb2   : > { %v19297_v19 = vadd.f32 -1.0, %v22038_v32 }
 0xbb3   : > { %v22040_v41 = vpop.eup %22039 }
 0xbb4   : > { %v19298_v35 = vadd.f32 -1.0, %v22040_v41  ;;  %v16475_v17 = vsel %vm16435_vm12, %v16427_v63, %v19297_v19 }
 0xbb5   : > { %v22042_v62 = vpop.eup %22041 }
 0xbb6   : > { %v19301_v40 = vadd.f32 -1.0, %v22042_v62  ;;  %v16476_v28 = vsel %vm16436_vm10, %v16428_v30, %v19298_v35  ;;  %v16483_v35 = vld [vmem:[#allocation4] sm:$0xff] }
 0xbb7   : > { %v22044_v27 = vpop.eup %22043 }
 0xbb8   : > { %v19302_v6 = vadd.f32 -1.0, %v22044_v27  ;;  %v16479_v9 = vsel %vm16439_vm9, %v16431_v11, %v19301_v40 }
 0xbb9   : > { %v16485_v5 = vpack.c.bf16 %v16479_v9, %v16475_v17 }
 0xbba   : > { %v16480_v15 = vsel %vm16440_vm11, %v16432_v43, %v19302_v6 }
 0xbbb   : > { %v16486_v59 = vpack.c.bf16 %v16480_v15, %v16476_v28 }
 0xbbd   : > { %16777 = vmatprep.mubr.bf16.mxu0 %v16486_v59  ;;  %v16484_v59 = vld [vmem:[#allocation4 + $0x8] sm:$0xff] }
 0xbbe   : > { %16778 = vmatmul.mubr.bf16.vlgmr.msra.gmra.mxu0 %v16485_v5 }
 0xbd8   : > { %v16345_v12 = vpop.f32.mrf.mxu0 }
 0xbd9   : > { %v16388_v4 = vpop.f32.mrf.mxu1 }
 0xbda   : > { %v16389_v18 = vadd.f32 %v16388_v4, %v16345_v12  ;;  %v16347_v25 = vpop.f32.mrf.mxu0 }
 0xbdb   : > { %v16390_v3 = vpop.f32.mrf.mxu1 }
 0xbdc   : > { %v16399_v24 = vadd.f32 %v16389_v18, %v25800_v2  ;;  %v16391_v1 = vadd.f32 %v16390_v3, %v16347_v25  ;;  %v16349_v39 = vpop.f32.mrf.mxu0 }
 0xbdd   : > { %v16392_v46 = vpop.f32.mrf.mxu1 }
 0xbde   : > { %v16429_v58 = vadd.f32 %v16418_v54, %v16399_v24  ;;  %v16400_v47 = vadd.f32 %v16391_v1, %v25804_v45  ;;  %v16393_v51 = vadd.f32 %v16392_v46, %v16349_v39  ;;  %v16351_v42 = vpop.f32.mrf.mxu0 }
 0xbdf   : > { %v16394_v8 = vpop.f32.mrf.mxu1 }
 0xbe0   : > { %v16445_v22 = vmin.f32 %v16429_v58, 0.0  ;;  %v16430_v55 = vadd.f32 %v16422_v44, %v16400_v47  ;;  %v16403_v29 = vadd.f32 %v16393_v51, %v25808_v26  ;;  %v16395_v37 = vadd.f32 %v16394_v8, %v16351_v42 }
 0xbe1   : > { %vm16437_vm13 = vcmp.gt.f32.partialorder %v16429_v58, 0.0 }
 0xbe2   : > { %v16455_v7 = vmul.f32 1.442695, %v16445_v22  ;;  %v16446_v61 = vmin.f32 %v16430_v55, 0.0  ;;  %v16433_v63 = vadd.f32 %v16418_v54, %v16403_v29  ;;  %v16404_v2 = vadd.f32 %v16395_v37, %v25812_v0 }
 0xbe3   : > { %vm16438_vm15 = vcmp.gt.f32.partialorder %v16430_v55, 0.0 }
 0xbe4   : > { %22045 = vpow2.f32 %v16455_v7  ;;  %v16457_v13 = vmul.f32 1.442695, %v16446_v61  ;;  %v16449_v38 = vmin.f32 %v16433_v63, 0.0  ;;  %v16434_v10 = vadd.f32 %v16422_v44, %v16404_v2 }
 0xbe5   : > { %vm16441_vm14 = vcmp.gt.f32.partialorder %v16433_v63, 0.0 }
 0xbe6   : > { %v16463_v60 = vmul.f32 1.442695, %v16449_v38  ;;  %22047 = vpow2.f32 %v16457_v13  ;;  %v16450_v45 = vmin.f32 %v16434_v10, 0.0  ;;  %vm16442_vm0 = vcmp.gt.f32.partialorder %v16434_v10, 0.0 }
 0xbe8   : > { %22049 = vpow2.f32 %v16463_v60  ;;  %v16465_v48 = vmul.f32 1.442695, %v16450_v45 }
 0xbea   : > { %22051 = vpow2.f32 %v16465_v48 }
 0xbf1   : > { %v22046_v23 = vpop.eup %22045 }
 0xbf2   : > { %v19299_v30 = vadd.f32 -1.0, %v22046_v23 }
 0xbf3   : > { %v22048_v20 = vpop.eup %22047 }
 0xbf4   : > { %v19300_v33 = vadd.f32 -1.0, %v22048_v20  ;;  %v16477_v0 = vsel %vm16437_vm13, %v16429_v58, %v19299_v30 }
 0xbf5   : > { %v22050_v26 = vpop.eup %22049 }
 0xbf6   : > { %v19303_v34 = vadd.f32 -1.0, %v22050_v26  ;;  %v16478_v49 = vsel %vm16438_vm15, %v16430_v55, %v19300_v33 }
 0xbf7   : > { %v22052_v14 = vpop.eup %22051 }
 0xbf8   : > { %v16481_v56 = vsel %vm16441_vm14, %v16433_v63, %v19303_v34  ;;  %v19304_v31 = vadd.f32 -1.0, %v22052_v14 }
 0xbf9   : > { %v16487_v11 = vpack.c.bf16 %v16481_v56, %v16477_v0 }
 0xbfa   : > { %v16482_v53 = vsel %vm16442_vm0, %v16434_v10, %v19304_v31 }
 0xbfb   : > { %v16488_v50 = vpack.c.bf16 %v16482_v53, %v16478_v49 }
 0xbfd   : > { %16818 = vmatprep.mubr.bf16.mxu1 %v16488_v50 }
 0xbfe   : > { %16819 = vmatmul.mubr.bf16.vlgmr.msra.gmra.mxu1 %v16487_v11 }
 0xc7e   : > { %v19416_v43 = vpop.f32.mrf.mxu0 }
 0xc80   : > { %v19417_v36 = vpop.f32.mrf.mxu0 }
 0xc81   : > { %v19418_v41 = vadd.f32 %v19417_v36, %v19416_v43 }
 0xc82   : > { %v19419_v21 = vpop.f32.mrf.mxu0 }
 0xc84   : > { %v19420_v40 = vpop.f32.mrf.mxu0 }
 0xc85   : > { %v19421_v9 = vadd.f32 %v19420_v40, %v19419_v21 }
 0xcbe   : > { %v19438_v57 = vpop.f32.mrf.mxu1 }
 0xcc0   : > { %v19439_v32 = vpop.f32.mrf.mxu1 }
 0xcc1   : > { %v19440_v62 = vadd.f32 %v19439_v32, %v19438_v57 }
 0xcc2   : > { %v19441_v27 = vpop.f32.mrf.mxu1 }
 0xcc3   : > { %v16821_v19 = vadd.f32 %v19440_v62, %v19418_v41 }
 0xcc4   : > { %v19442_v6 = vpop.f32.mrf.mxu1 }
 0xcc5   : > { %v16827_v28 = vadd.f32 %v16821_v19, %v16483_v35  ;;  %v19443_v15 = vadd.f32 %v19442_v6, %v19441_v27 }
 0xcc7   : > { %16829 = vst [vmem:[#allocation4] sm:$0xff] %v16827_v28  ;;  %v16824_v17 = vadd.f32 %v19443_v15, %v19421_v9  ;;  %16834 = sbr.rel (%p19337_p1) target bundleno = 3286 (0xcd6), region = 108 }
 0xcc9   : > { %v16828_v5 = vadd.f32 %v16824_v17, %v16484_v59 }
 0xccb   : > { %16830 = vst [vmem:[#allocation4 + $0x8] sm:$0xff] %v16828_v5 }
 0xccc   : > { %v19338_v16 = vld [vmem:[#allocation16] ss:$0 sm:$0xff] }
 0xcce   : > { %v16835_v52 = vld [vmem:[#allocation4] sm:$0xff] }
 0xccf   : > { %v16844_v4 = vadd.f32 %v19338_v16, %v16835_v52 }
 0xcd1   : > { %16846 = vst [vmem:[%s26029_s15] sm:$0xff] %v16844_v4 }
 0xcd2   : > { %v16836_v12 = vld [vmem:[#allocation4 + $0x8] sm:$0xff] }
 0xcd3   : > { %v16845_v18 = vadd.f32 %v19338_v16, %v16836_v12 }
 0xcd5   : > { %16847 = vst [vmem:[%s26030_s20 + $0x8] sm:$0xff] %v16845_v18 }
 0xcd6 PF: > { %s26031_s18 = sld [smem:[#allocation28_spill]]  ;;  %s26038_s30 = smov %s22349_s10 }
 0xcd7   : > { %s26032_s2 = sld [smem:[#allocation25_spill]]  ;;  %s26040_s12 = smov %s22361_s13 }
 0xcd8   : > { %s26033_s11 = sld [smem:[#allocation32_spill]]  ;;  %s26042_s15 = smov %s22373_s16 }
 0xcd9   : > { %s26034_s19 = sld [smem:[#allocation26_spill]] }
 0xcda   : > { %s26035_s14 = sld [smem:[#allocation31_spill]] }
 0xcdb   : > { %s26036_s1 = sld [smem:[#allocation27_spill]] }
 0xcdc   : > { %s26037_s17 = sld [smem:[#allocation29_spill]]  ;;  %p29_p8 = scmp.ge.s32.totalorder %s26031_s18, 10  }
 0xcdd   : > { %s26039_s10 = smov %s26032_s2 }
 0xcde   :  { %31 = sbr.rel (!%p29_p8) target bundleno = 24 (0x18), region = 194 }
 0xcdf   : > { %s26041_s13 = smov %s26034_s19 }
 0xce1   : > { %s26043_s16 = smov %s26036_s1 }
 0xce3   :  { %16859 = vsyncpa [#allocation6], 1 }
 0xce4   :  { %16861 = vsyncpa [#allocation6 + $0x1], 1 }
 0xce5   :  { %16862 = vsyncpa [#allocation8], 1 }
 0xce6   :  { %16864 = vsyncpa [#allocation8 + $0x1], 1 }
 0xce7   :  { %16865 = vsyncpa [#allocation11], 1 }
 0xce8   :  { %16867 = vsyncpa [#allocation11 + $0x1], 1 }
 0xce9   :  { %16868 = vsyncpa [#allocation14], 1 }
 0xcea   :  { %16870 = vsyncpa [#allocation14 + $0x1], 1 }
 0xceb   :  { %16871 = vsyncpa [#allocation17], 1 }

</bundles_post_ra>
